<compile_context>
chip_gen: v7x
topology: tpu7x:2x2x1
jax: 0.10.0
libtpu: 0.0.40
codegen_flags: <defaults>
</compile_context>

<pallas_src>
import functools

import jax
import jax.numpy as jnp
from jax.experimental import pallas as pl
from jax.experimental.pallas import tpu as pltpu

BN_EPS = 1e-5
LANE = 128


def _round_up(v, m):
    return ((v + m - 1) // m) * m


# ----------------------------------------------------------------------------
# In-kernel helpers
# ----------------------------------------------------------------------------
def _tap_matrix(ph_ref, ki, kj, *, n, ho, wo, stride):
    """(M, Cin) window of the phase-decomposed padded input for tap (ki, kj)."""
    s = stride
    pidx = (ki % s) * s + (kj % s)
    r0, c0 = ki // s, kj // s
    win = ph_ref[pidx, :, r0:r0 + ho, c0:c0 + wo, :]      # (N, Ho, Wo, Cin) f32
    return win.reshape(n * ho * wo, ph_ref.shape[-1])


def _conv3x3_acc(ph_ref, w_ref, *, n, ho, wo, stride):
    """3x3 conv as 9 shifted bf16 matmuls with f32 accumulation."""
    acc = None
    for ki in range(3):
        for kj in range(3):
            xm = _tap_matrix(ph_ref, ki, kj, n=n, ho=ho, wo=wo,
                             stride=stride).astype(jnp.bfloat16)
            d = jnp.dot(xm, w_ref[ki, kj, :, :],
                        preferred_element_type=jnp.float32)
            acc = d if acc is None else acc + d
    return acc


def _conv2_acc(hpad_ref, w2_ref, *, n, ho, wo):
    """Second 3x3 conv (stride 1, pad 1) reading the VMEM-resident padded h."""
    m = n * ho * wo
    p = w2_ref.shape[-1]
    acc = None
    for ki in range(3):
        for kj in range(3):
            hm = hpad_ref[:, ki:ki + ho, kj:kj + wo, :].reshape(m, p)
            d = jnp.dot(hm, w2_ref[ki, kj, :, :],
                        preferred_element_type=jnp.float32)
            acc = d if acc is None else acc + d
    return acc


def _batchnorm(y, g, b):
    """Training-mode BatchNorm folded into a per-channel scale/shift (f32)."""
    mu = jnp.mean(y, axis=0, keepdims=True)
    mean_sq = jnp.mean(y * y, axis=0, keepdims=True)
    var = mean_sq - mu * mu
    scale = g * jax.lax.rsqrt(var + BN_EPS)
    shift = b - mu * scale
    return y * scale + shift


# ----------------------------------------------------------------------------
# Fused BasicBlock kernels
# ----------------------------------------------------------------------------
def _basic_block_kernel(ph_ref, w1_ref, g1_ref, b1_ref, w2_ref, g2_ref, b2_ref,
                        o_ref, hpad_ref, *, n, ho, wo, stride, pad):
    p = w1_ref.shape[-1]

    # conv1 -> bn1 -> relu
    h = jnp.maximum(
        _batchnorm(_conv3x3_acc(ph_ref, w1_ref, n=n, ho=ho, wo=wo, stride=stride),
                   g1_ref[...], b1_ref[...]), 0.0)

    # zero-padded copy of h in VMEM scratch, feeding conv2 (3x3, s1, p1)
    hpad_ref[...] = jnp.zeros(hpad_ref.shape, hpad_ref.dtype)
    hpad_ref[:, 1:1 + ho, 1:1 + wo, :] = h.reshape(n, ho, wo, p).astype(hpad_ref.dtype)

    # conv2 -> bn2
    y = _batchnorm(_conv2_acc(hpad_ref, w2_ref, n=n, ho=ho, wo=wo),
                   g2_ref[...], b2_ref[...])

    # identity (no downsample: stride==1, Cin==planes) == (pad, pad) tap of x
    identity = _tap_matrix(ph_ref, pad, pad, n=n, ho=ho, wo=wo, stride=stride)

    o_ref[...] = jnp.maximum(y + identity, 0.0)


def _basic_block_ds_kernel(ph_ref, w1_ref, g1_ref, b1_ref, w2_ref, g2_ref,
                           b2_ref, wd_ref, gd_ref, bd_ref, o_ref, hpad_ref,
                           *, n, ho, wo, stride, pad):
    p = w1_ref.shape[-1]

    h = jnp.maximum(
        _batchnorm(_conv3x3_acc(ph_ref, w1_ref, n=n, ho=ho, wo=wo, stride=stride),
                   g1_ref[...], b1_ref[...]), 0.0)

    hpad_ref[...] = jnp.zeros(hpad_ref.shape, hpad_ref.dtype)
    hpad_ref[:, 1:1 + ho, 1:1 + wo, :] = h.reshape(n, ho, wo, p).astype(hpad_ref.dtype)

    y = _batchnorm(_conv2_acc(hpad_ref, w2_ref, n=n, ho=ho, wo=wo),
                   g2_ref[...], b2_ref[...])

    # downsample: strided 1x1 conv -> bn, read straight from the phase tensor
    idm = _tap_matrix(ph_ref, pad, pad, n=n, ho=ho, wo=wo,
                      stride=stride).astype(jnp.bfloat16)
    identity = _batchnorm(jnp.dot(idm, wd_ref[...],
                                  preferred_element_type=jnp.float32),
                          gd_ref[...], bd_ref[...])

    o_ref[...] = jnp.maximum(y + identity, 0.0)


# ----------------------------------------------------------------------------
# Host-side preparation (cheap layout plumbing, no 9x im2col)
# ----------------------------------------------------------------------------
def _make_phases(x_nhwc, *, k, pad, stride, ho, wo):
    """Stride-phase decomposition of the zero-padded NHWC input.

    Returns (stride*stride, N, Hph, Wph, C) f32; tap (ki,kj) with stride s is
    phase (ki%s, kj%s) at row/col offset (ki//s, kj//s).  Total bytes ~= 1x the
    padded input (no patch-matrix inflation).
    """
    n, h, w, c = x_nhwc.shape
    xp = jnp.pad(x_nhwc, ((0, 0), (pad, pad), (pad, pad), (0, 0)))
    hp, wp = h + 2 * pad, w + 2 * pad
    lh = (k - 1) // stride + ho
    lw = (k - 1) // stride + wo
    rt = stride * max(lh, -(-hp // stride))
    ct = stride * max(lw, -(-wp // stride))
    xp = jnp.pad(xp, ((0, 0), (0, rt - hp), (0, ct - wp), (0, 0)))
    phases = [xp[:, pi::stride, pj::stride, :]
              for pi in range(stride) for pj in range(stride)]
    return jnp.stack(phases, axis=0)


def _pad_last(a, target):
    extra = target - a.shape[-1]
    if extra == 0:
        return a
    return jnp.pad(a, [(0, 0)] * (a.ndim - 1) + [(0, extra)])


def _prep_w3x3(w_oihw, cin_p, cout_p):
    # (Cout, Cin, 3, 3) -> (3, 3, Cin_p, Cout_p) bf16, zero-padded channels
    w = jnp.transpose(w_oihw, (2, 3, 1, 0))
    w = jnp.pad(w, ((0, 0), (0, 0),
                    (0, cin_p - w.shape[2]), (0, cout_p - w.shape[3])))
    return w.astype(jnp.bfloat16)


def _prep_bn_param(v, cout_p, fill):
    v = jnp.pad(v, (0, cout_p - v.shape[0]), constant_values=fill)
    return v.reshape(1, cout_p).astype(jnp.float32)


def basic_block_forward(x_nchw, params):
    """Forward of one BasicBlock. x_nchw: (N, Cin, H, W). Returns NCHW."""
    stride = int(params["stride"])
    w1 = params["conv1_w"]
    planes, inplanes = int(w1.shape[0]), int(w1.shape[1])
    has_ds = "ds_w" in params
    n, c, h, w = x_nchw.shape
    assert c == inplanes
    if not has_ds:
        assert stride == 1 and inplanes == planes, \
            "BasicBlock without downsample needs stride==1 and inplanes==planes"

    k, pad = 3, 1
    ho = (h + 2 * pad - k) // stride + 1
    wo = (w + 2 * pad - k) // stride + 1
    m = n * ho * wo

    cin_p = _round_up(inplanes, LANE)
    p_p = _round_up(planes, LANE)
    if not has_ds:
        cin_p = p_p = max(cin_p, p_p)

    x = jnp.transpose(x_nchw, (0, 2, 3, 1)).astype(jnp.float32)   # NHWC
    x = _pad_last(x, cin_p)
    phases = _make_phases(x, k=k, pad=pad, stride=stride, ho=ho, wo=wo)

    w1m = _prep_w3x3(w1, cin_p, p_p)
    w2m = _prep_w3x3(params["conv2_w"], p_p, p_p)
    g1 = _prep_bn_param(params["bn1_g"], p_p, 1.0)
    b1 = _prep_bn_param(params["bn1_b"], p_p, 0.0)
    g2 = _prep_bn_param(params["bn2_g"], p_p, 1.0)
    b2 = _prep_bn_param(params["bn2_b"], p_p, 0.0)

    vspec = pl.BlockSpec(memory_space=pltpu.MemorySpace.VMEM)

    if has_ds:
        wd = jnp.transpose(params["ds_w"][:, :, 0, 0], (1, 0))    # (Cin, Cout)
        wd = jnp.pad(wd, ((0, cin_p - inplanes),
                          (0, p_p - planes))).astype(jnp.bfloat16)
        gd = _prep_bn_param(params["ds_g"], p_p, 1.0)
        bd = _prep_bn_param(params["ds_b"], p_p, 0.0)
        kernel = functools.partial(_basic_block_ds_kernel,
                                   n=n, ho=ho, wo=wo, stride=stride, pad=pad)
        args = (phases, w1m, g1, b1, w2m, g2, b2, wd, gd, bd)
    else:
        kernel = functools.partial(_basic_block_kernel,
                                   n=n, ho=ho, wo=wo, stride=stride, pad=pad)
        args = (phases, w1m, g1, b1, w2m, g2, b2)

    out = pl.pallas_call(
        kernel,
        out_shape=jax.ShapeDtypeStruct((m, p_p), jnp.float32),
        in_specs=[vspec] * len(args),
        out_specs=vspec,
        scratch_shapes=[pltpu.VMEM((n, ho + 2, wo + 2, p_p), jnp.bfloat16)],
    )(*args)

    out = out.reshape(n, ho, wo, p_p)[:, :, :, :planes]
    return jnp.transpose(out, (0, 3, 1, 2))                       # back to NCHW


# ----------------------------------------------------------------------------
# Parameter construction (mirrors BasicBlock.__init__ + standard downsample)
# ----------------------------------------------------------------------------
def init_basic_block_params(key, inplanes, planes, stride=1):
    ks = jax.random.split(key, 3)

    def kaiming(k_, shape):
        fan_out = shape[0] * shape[2] * shape[3]
        return ((2.0 / fan_out) ** 0.5) * jax.random.normal(k_, shape, jnp.float32)

    p = {
        "stride": stride,
        "conv1_w": kaiming(ks[0], (planes, inplanes, 3, 3)),
        "bn1_g": jnp.ones((planes,), jnp.float32),
        "bn1_b": jnp.zeros((planes,), jnp.float32),
        "conv2_w": kaiming(ks[1], (planes, planes, 3, 3)),
        "bn2_g": jnp.ones((planes,), jnp.float32),
        "bn2_b": jnp.zeros((planes,), jnp.float32),
    }
    if stride != 1 or inplanes != planes:
        p["ds_w"] = kaiming(ks[2], (planes, inplanes, 1, 1))
        p["ds_g"] = jnp.ones((planes,), jnp.float32)
        p["ds_b"] = jnp.zeros((planes,), jnp.float32)
    return p


# ----------------------------------------------------------------------------
# Pure-JAX reference (training-mode BN), for a sanity check
# ----------------------------------------------------------------------------
def _reference_basic_block(x_nchw, params):
    x = x_nchw.astype(jnp.float32)

    def conv(v, w, stride, pad):
        return jax.lax.conv_general_dilated(
            v, w, window_strides=(stride, stride),
            padding=((pad, pad), (pad, pad)),
            dimension_numbers=("NCHW", "OIHW", "NCHW"))

    def bn(v, g, b):
        mu = jnp.mean(v, axis=(0, 2, 3), keepdims=True)
        var = jnp.mean(jnp.square(v - mu), axis=(0, 2, 3), keepdims=True)
        return ((v - mu) * jax.lax.rsqrt(var + BN_EPS)
                * g.reshape(1, -1, 1, 1) + b.reshape(1, -1, 1, 1))

    s = int(params["stride"])
    out = jax.nn.relu(bn(conv(x, params["conv1_w"], s, 1),
                         params["bn1_g"], params["bn1_b"]))
    out = bn(conv(out, params["conv2_w"], 1, 1),
             params["bn2_g"], params["bn2_b"])
    if "ds_w" in params:
        identity = bn(conv(x, params["ds_w"], s, 0),
                      params["ds_g"], params["ds_b"])
    else:
        identity = x
    return jax.nn.relu(out + identity)


if __name__ == "__main__":
    key = jax.random.PRNGKey(0)
    k_x, k_a, k_b = jax.random.split(key, 3)

    n, cin, h, w = 2, 64, 16, 16
    x = jax.random.normal(k_x, (n, cin, h, w), jnp.float32)   # NCHW like PyTorch

    # BasicBlock(inplanes=64, planes=64, stride=1, downsample=None)
    params_a = init_basic_block_params(k_a, inplanes=64, planes=64, stride=1)
    y_a = basic_block_forward(x, params_a)
    jax.block_until_ready(y_a)
    assert y_a.shape == (n, 64, h, w), y_a.shape
    err_a = float(jnp.max(jnp.abs(y_a - _reference_basic_block(x, params_a))))
    assert err_a < 0.2, f"mismatch vs reference (no downsample): {err_a}"

    # BasicBlock(inplanes=64, planes=128, stride=2) with 1x1-conv+BN downsample
    params_b = init_basic_block_params(k_b, inplanes=64, planes=128, stride=2)
    y_b = basic_block_forward(x, params_b)
    jax.block_until_ready(y_b)
    assert y_b.shape == (n, 128, h // 2, w // 2), y_b.shape
    err_b = float(jnp.max(jnp.abs(y_b - _reference_basic_block(x, params_b))))
    assert err_b < 0.2, f"mismatch vs reference (downsample): {err_b}"

    print("KERNEL_OK")
</pallas_src>

<mosaic_0001>
module attributes {stable_mosaic.version = 11 : i64} {
  func.func @_basic_block_kernel(%arg0: memref<1x2x18x18x128xf32, #tpu.memory_space<vmem>>, %arg1: memref<3x3x128x128xbf16, #tpu.memory_space<vmem>>, %arg2: memref<1x128xf32, #tpu.memory_space<vmem>>, %arg3: memref<1x128xf32, #tpu.memory_space<vmem>>, %arg4: memref<3x3x128x128xbf16, #tpu.memory_space<vmem>>, %arg5: memref<1x128xf32, #tpu.memory_space<vmem>>, %arg6: memref<1x128xf32, #tpu.memory_space<vmem>>, %arg7: memref<512x128xf32, #tpu.memory_space<vmem>>, %arg8: memref<2x18x18x128xbf16, #tpu.memory_space<vmem>>) attributes {dimension_semantics = [], scalar_prefetch = 0 : i64, scratch_operands = 1 : i64, tpu.core_type = #tpu.core_type<tc>} {
    %c0 = arith.constant 0 : index
    %c0_0 = arith.constant 0 : index
    %c0_1 = arith.constant 0 : index
    %c0_2 = arith.constant 0 : index
    %c0_3 = arith.constant 0 : index
    %0 = vector.load %arg0[%c0, %c0_0, %c0_1, %c0_2, %c0_3] : memref<1x2x18x18x128xf32, #tpu.memory_space<vmem>>, vector<1x2x16x16x128xf32>
    %1 = vector.shape_cast %0 : vector<1x2x16x16x128xf32> to vector<2x16x16x128xf32>
    %2 = vector.shape_cast %1 : vector<2x16x16x128xf32> to vector<512x128xf32>
    %3 = arith.truncf %2 : vector<512x128xf32> to vector<512x128xbf16>
    %c0_4 = arith.constant 0 : index
    %c0_5 = arith.constant 0 : index
    %c0_6 = arith.constant 0 : index
    %c0_7 = arith.constant 0 : index
    %4 = vector.load %arg1[%c0_4, %c0_5, %c0_6, %c0_7] : memref<3x3x128x128xbf16, #tpu.memory_space<vmem>>, vector<1x1x128x128xbf16>
    %5 = vector.shape_cast %4 : vector<1x1x128x128xbf16> to vector<128x128xbf16>
    %cst = arith.constant dense<0.000000e+00> : vector<512x128xf32>
    %6 = tpu.matmul %3, %5, %cst {dimension_numbers = #tpu.dot_dimension_numbers<[1], [0], [0], [1], [0, 0, 1, 1], [], []>} : vector<512x128xbf16>, vector<128x128xbf16>, vector<512x128xf32> -> vector<512x128xf32>
    %c0_8 = arith.constant 0 : index
    %c0_9 = arith.constant 0 : index
    %c0_10 = arith.constant 0 : index
    %c1 = arith.constant 1 : index
    %c0_11 = arith.constant 0 : index
    %7 = vector.load %arg0[%c0_8, %c0_9, %c0_10, %c1, %c0_11] : memref<1x2x18x18x128xf32, #tpu.memory_space<vmem>>, vector<1x2x16x16x128xf32>
    %8 = vector.shape_cast %7 : vector<1x2x16x16x128xf32> to vector<2x16x16x128xf32>
    %9 = vector.shape_cast %8 : vector<2x16x16x128xf32> to vector<512x128xf32>
    %10 = arith.truncf %9 : vector<512x128xf32> to vector<512x128xbf16>
    %c0_12 = arith.constant 0 : index
    %c1_13 = arith.constant 1 : index
    %c0_14 = arith.constant 0 : index
    %c0_15 = arith.constant 0 : index
    %11 = vector.load %arg1[%c0_12, %c1_13, %c0_14, %c0_15] : memref<3x3x128x128xbf16, #tpu.memory_space<vmem>>, vector<1x1x128x128xbf16>
    %12 = vector.shape_cast %11 : vector<1x1x128x128xbf16> to vector<128x128xbf16>
    %cst_16 = arith.constant dense<0.000000e+00> : vector<512x128xf32>
    %13 = tpu.matmul %10, %12, %cst_16 {dimension_numbers = #tpu.dot_dimension_numbers<[1], [0], [0], [1], [0, 0, 1, 1], [], []>} : vector<512x128xbf16>, vector<128x128xbf16>, vector<512x128xf32> -> vector<512x128xf32>
    %14 = arith.addf %6, %13 : vector<512x128xf32>
    %c0_17 = arith.constant 0 : index
    %c0_18 = arith.constant 0 : index
    %c0_19 = arith.constant 0 : index
    %c2 = arith.constant 2 : index
    %c0_20 = arith.constant 0 : index
    %15 = vector.load %arg0[%c0_17, %c0_18, %c0_19, %c2, %c0_20] : memref<1x2x18x18x128xf32, #tpu.memory_space<vmem>>, vector<1x2x16x16x128xf32>
    %16 = vector.shape_cast %15 : vector<1x2x16x16x128xf32> to vector<2x16x16x128xf32>
    %17 = vector.shape_cast %16 : vector<2x16x16x128xf32> to vector<512x128xf32>
    %18 = arith.truncf %17 : vector<512x128xf32> to vector<512x128xbf16>
    %c0_21 = arith.constant 0 : index
    %c2_22 = arith.constant 2 : index
    %c0_23 = arith.constant 0 : index
    %c0_24 = arith.constant 0 : index
    %19 = vector.load %arg1[%c0_21, %c2_22, %c0_23, %c0_24] : memref<3x3x128x128xbf16, #tpu.memory_space<vmem>>, vector<1x1x128x128xbf16>
    %20 = vector.shape_cast %19 : vector<1x1x128x128xbf16> to vector<128x128xbf16>
    %cst_25 = arith.constant dense<0.000000e+00> : vector<512x128xf32>
    %21 = tpu.matmul %18, %20, %cst_25 {dimension_numbers = #tpu.dot_dimension_numbers<[1], [0], [0], [1], [0, 0, 1, 1], [], []>} : vector<512x128xbf16>, vector<128x128xbf16>, vector<512x128xf32> -> vector<512x128xf32>
    %22 = arith.addf %14, %21 : vector<512x128xf32>
    %c0_26 = arith.constant 0 : index
    %c0_27 = arith.constant 0 : index
    %c1_28 = arith.constant 1 : index
    %c0_29 = arith.constant 0 : index
    %c0_30 = arith.constant 0 : index
    %23 = vector.load %arg0[%c0_26, %c0_27, %c1_28, %c0_29, %c0_30] : memref<1x2x18x18x128xf32, #tpu.memory_space<vmem>>, vector<1x2x16x16x128xf32>
    %24 = vector.shape_cast %23 : vector<1x2x16x16x128xf32> to vector<2x16x16x128xf32>
    %25 = vector.shape_cast %24 : vector<2x16x16x128xf32> to vector<512x128xf32>
    %26 = arith.truncf %25 : vector<512x128xf32> to vector<512x128xbf16>
    %c1_31 = arith.constant 1 : index
    %c0_32 = arith.constant 0 : index
    %c0_33 = arith.constant 0 : index
    %c0_34 = arith.constant 0 : index
    %27 = vector.load %arg1[%c1_31, %c0_32, %c0_33, %c0_34] : memref<3x3x128x128xbf16, #tpu.memory_space<vmem>>, vector<1x1x128x128xbf16>
    %28 = vector.shape_cast %27 : vector<1x1x128x128xbf16> to vector<128x128xbf16>
    %cst_35 = arith.constant dense<0.000000e+00> : vector<512x128xf32>
    %29 = tpu.matmul %26, %28, %cst_35 {dimension_numbers = #tpu.dot_dimension_numbers<[1], [0], [0], [1], [0, 0, 1, 1], [], []>} : vector<512x128xbf16>, vector<128x128xbf16>, vector<512x128xf32> -> vector<512x128xf32>
    %30 = arith.addf %22, %29 : vector<512x128xf32>
    %c0_36 = arith.constant 0 : index
    %c0_37 = arith.constant 0 : index
    %c1_38 = arith.constant 1 : index
    %c1_39 = arith.constant 1 : index
    %c0_40 = arith.constant 0 : index
    %31 = vector.load %arg0[%c0_36, %c0_37, %c1_38, %c1_39, %c0_40] : memref<1x2x18x18x128xf32, #tpu.memory_space<vmem>>, vector<1x2x16x16x128xf32>
    %32 = vector.shape_cast %31 : vector<1x2x16x16x128xf32> to vector<2x16x16x128xf32>
    %33 = vector.shape_cast %32 : vector<2x16x16x128xf32> to vector<512x128xf32>
    %34 = arith.truncf %33 : vector<512x128xf32> to vector<512x128xbf16>
    %c1_41 = arith.constant 1 : index
    %c1_42 = arith.constant 1 : index
    %c0_43 = arith.constant 0 : index
    %c0_44 = arith.constant 0 : index
    %35 = vector.load %arg1[%c1_41, %c1_42, %c0_43, %c0_44] : memref<3x3x128x128xbf16, #tpu.memory_space<vmem>>, vector<1x1x128x128xbf16>
    %36 = vector.shape_cast %35 : vector<1x1x128x128xbf16> to vector<128x128xbf16>
    %cst_45 = arith.constant dense<0.000000e+00> : vector<512x128xf32>
    %37 = tpu.matmul %34, %36, %cst_45 {dimension_numbers = #tpu.dot_dimension_numbers<[1], [0], [0], [1], [0, 0, 1, 1], [], []>} : vector<512x128xbf16>, vector<128x128xbf16>, vector<512x128xf32> -> vector<512x128xf32>
    %38 = arith.addf %30, %37 : vector<512x128xf32>
    %c0_46 = arith.constant 0 : index
    %c0_47 = arith.constant 0 : index
    %c1_48 = arith.constant 1 : index
    %c2_49 = arith.constant 2 : index
    %c0_50 = arith.constant 0 : index
    %39 = vector.load %arg0[%c0_46, %c0_47, %c1_48, %c2_49, %c0_50] : memref<1x2x18x18x128xf32, #tpu.memory_space<vmem>>, vector<1x2x16x16x128xf32>
    %40 = vector.shape_cast %39 : vector<1x2x16x16x128xf32> to vector<2x16x16x128xf32>
    %41 = vector.shape_cast %40 : vector<2x16x16x128xf32> to vector<512x128xf32>
    %42 = arith.truncf %41 : vector<512x128xf32> to vector<512x128xbf16>
    %c1_51 = arith.constant 1 : index
    %c2_52 = arith.constant 2 : index
    %c0_53 = arith.constant 0 : index
    %c0_54 = arith.constant 0 : index
    %43 = vector.load %arg1[%c1_51, %c2_52, %c0_53, %c0_54] : memref<3x3x128x128xbf16, #tpu.memory_space<vmem>>, vector<1x1x128x128xbf16>
    %44 = vector.shape_cast %43 : vector<1x1x128x128xbf16> to vector<128x128xbf16>
    %cst_55 = arith.constant dense<0.000000e+00> : vector<512x128xf32>
    %45 = tpu.matmul %42, %44, %cst_55 {dimension_numbers = #tpu.dot_dimension_numbers<[1], [0], [0], [1], [0, 0, 1, 1], [], []>} : vector<512x128xbf16>, vector<128x128xbf16>, vector<512x128xf32> -> vector<512x128xf32>
    %46 = arith.addf %38, %45 : vector<512x128xf32>
    %c0_56 = arith.constant 0 : index
    %c0_57 = arith.constant 0 : index
    %c2_58 = arith.constant 2 : index
    %c0_59 = arith.constant 0 : index
    %c0_60 = arith.constant 0 : index
    %47 = vector.load %arg0[%c0_56, %c0_57, %c2_58, %c0_59, %c0_60] : memref<1x2x18x18x128xf32, #tpu.memory_space<vmem>>, vector<1x2x16x16x128xf32>
    %48 = vector.shape_cast %47 : vector<1x2x16x16x128xf32> to vector<2x16x16x128xf32>
    %49 = vector.shape_cast %48 : vector<2x16x16x128xf32> to vector<512x128xf32>
    %50 = arith.truncf %49 : vector<512x128xf32> to vector<512x128xbf16>
    %c2_61 = arith.constant 2 : index
    %c0_62 = arith.constant 0 : index
    %c0_63 = arith.constant 0 : index
    %c0_64 = arith.constant 0 : index
    %51 = vector.load %arg1[%c2_61, %c0_62, %c0_63, %c0_64] : memref<3x3x128x128xbf16, #tpu.memory_space<vmem>>, vector<1x1x128x128xbf16>
    %52 = vector.shape_cast %51 : vector<1x1x128x128xbf16> to vector<128x128xbf16>
    %cst_65 = arith.constant dense<0.000000e+00> : vector<512x128xf32>
    %53 = tpu.matmul %50, %52, %cst_65 {dimension_numbers = #tpu.dot_dimension_numbers<[1], [0], [0], [1], [0, 0, 1, 1], [], []>} : vector<512x128xbf16>, vector<128x128xbf16>, vector<512x128xf32> -> vector<512x128xf32>
    %54 = arith.addf %46, %53 : vector<512x128xf32>
    %c0_66 = arith.constant 0 : index
    %c0_67 = arith.constant 0 : index
    %c2_68 = arith.constant 2 : index
    %c1_69 = arith.constant 1 : index
    %c0_70 = arith.constant 0 : index
    %55 = vector.load %arg0[%c0_66, %c0_67, %c2_68, %c1_69, %c0_70] : memref<1x2x18x18x128xf32, #tpu.memory_space<vmem>>, vector<1x2x16x16x128xf32>
    %56 = vector.shape_cast %55 : vector<1x2x16x16x128xf32> to vector<2x16x16x128xf32>
    %57 = vector.shape_cast %56 : vector<2x16x16x128xf32> to vector<512x128xf32>
    %58 = arith.truncf %57 : vector<512x128xf32> to vector<512x128xbf16>
    %c2_71 = arith.constant 2 : index
    %c1_72 = arith.constant 1 : index
    %c0_73 = arith.constant 0 : index
    %c0_74 = arith.constant 0 : index
    %59 = vector.load %arg1[%c2_71, %c1_72, %c0_73, %c0_74] : memref<3x3x128x128xbf16, #tpu.memory_space<vmem>>, vector<1x1x128x128xbf16>
    %60 = vector.shape_cast %59 : vector<1x1x128x128xbf16> to vector<128x128xbf16>
    %cst_75 = arith.constant dense<0.000000e+00> : vector<512x128xf32>
    %61 = tpu.matmul %58, %60, %cst_75 {dimension_numbers = #tpu.dot_dimension_numbers<[1], [0], [0], [1], [0, 0, 1, 1], [], []>} : vector<512x128xbf16>, vector<128x128xbf16>, vector<512x128xf32> -> vector<512x128xf32>
    %62 = arith.addf %54, %61 : vector<512x128xf32>
    %c0_76 = arith.constant 0 : index
    %c0_77 = arith.constant 0 : index
    %c2_78 = arith.constant 2 : index
    %c2_79 = arith.constant 2 : index
    %c0_80 = arith.constant 0 : index
    %63 = vector.load %arg0[%c0_76, %c0_77, %c2_78, %c2_79, %c0_80] : memref<1x2x18x18x128xf32, #tpu.memory_space<vmem>>, vector<1x2x16x16x128xf32>
    %64 = vector.shape_cast %63 : vector<1x2x16x16x128xf32> to vector<2x16x16x128xf32>
    %65 = vector.shape_cast %64 : vector<2x16x16x128xf32> to vector<512x128xf32>
    %66 = arith.truncf %65 : vector<512x128xf32> to vector<512x128xbf16>
    %c2_81 = arith.constant 2 : index
    %c2_82 = arith.constant 2 : index
    %c0_83 = arith.constant 0 : index
    %c0_84 = arith.constant 0 : index
    %67 = vector.load %arg1[%c2_81, %c2_82, %c0_83, %c0_84] : memref<3x3x128x128xbf16, #tpu.memory_space<vmem>>, vector<1x1x128x128xbf16>
    %68 = vector.shape_cast %67 : vector<1x1x128x128xbf16> to vector<128x128xbf16>
    %cst_85 = arith.constant dense<0.000000e+00> : vector<512x128xf32>
    %69 = tpu.matmul %66, %68, %cst_85 {dimension_numbers = #tpu.dot_dimension_numbers<[1], [0], [0], [1], [0, 0, 1, 1], [], []>} : vector<512x128xbf16>, vector<128x128xbf16>, vector<512x128xf32> -> vector<512x128xf32>
    %70 = arith.addf %62, %69 : vector<512x128xf32>
    %c0_86 = arith.constant 0 : index
    %c0_87 = arith.constant 0 : index
    %71 = vector.load %arg2[%c0_86, %c0_87] : memref<1x128xf32, #tpu.memory_space<vmem>>, vector<1x128xf32>
    %c0_88 = arith.constant 0 : index
    %c0_89 = arith.constant 0 : index
    %72 = vector.load %arg3[%c0_88, %c0_89] : memref<1x128xf32, #tpu.memory_space<vmem>>, vector<1x128xf32>
    %cst_90 = arith.constant dense<0.000000e+00> : vector<128xf32>
    %73 = vector.multi_reduction <add>, %70, %cst_90 [0] : vector<512x128xf32> to vector<128xf32>
    %74 = vector.shape_cast %73 : vector<128xf32> to vector<1x128xf32>
    %cst_91 = arith.constant 5.120000e+02 : f32
    %75 = vector.broadcast %cst_91 : f32 to vector<1x128xf32>
    %76 = arith.divf %74, %75 : vector<1x128xf32>
    %77 = arith.mulf %70, %70 : vector<512x128xf32>
    %cst_92 = arith.constant dense<0.000000e+00> : vector<128xf32>
    %78 = vector.multi_reduction <add>, %77, %cst_92 [0] : vector<512x128xf32> to vector<128xf32>
    %79 = vector.shape_cast %78 : vector<128xf32> to vector<1x128xf32>
    %cst_93 = arith.constant 5.120000e+02 : f32
    %80 = vector.broadcast %cst_93 : f32 to vector<1x128xf32>
    %81 = arith.divf %79, %80 : vector<1x128xf32>
    %82 = arith.mulf %76, %76 : vector<1x128xf32>
    %83 = arith.subf %81, %82 : vector<1x128xf32>
    %cst_94 = arith.constant 9.99999974E-6 : f32
    %84 = vector.broadcast %cst_94 : f32 to vector<1x128xf32>
    %85 = arith.addf %83, %84 : vector<1x128xf32>
    %86 = math.rsqrt %85 : vector<1x128xf32>
    %87 = arith.mulf %71, %86 : vector<1x128xf32>
    %88 = arith.mulf %76, %87 : vector<1x128xf32>
    %89 = arith.subf %72, %88 : vector<1x128xf32>
    %90 = vector.broadcast %87 : vector<1x128xf32> to vector<512x128xf32>
    %91 = arith.mulf %70, %90 : vector<512x128xf32>
    %92 = vector.broadcast %89 : vector<1x128xf32> to vector<512x128xf32>
    %93 = arith.addf %91, %92 : vector<512x128xf32>
    %cst_95 = arith.constant 0.000000e+00 : f32
    %94 = vector.broadcast %cst_95 : f32 to vector<512x128xf32>
    %95 = arith.maximumf %93, %94 : vector<512x128xf32>
    %cst_96 = arith.constant 0.000000e+00 : bf16
    %96 = vector.broadcast %cst_96 : bf16 to vector<2x18x18x128xbf16>
    %c0_97 = arith.constant 0 : index
    %c0_98 = arith.constant 0 : index
    %c0_99 = arith.constant 0 : index
    %c0_100 = arith.constant 0 : index
    %97 = vector.load %arg8[%c0_97, %c0_98, %c0_99, %c0_100] : memref<2x18x18x128xbf16, #tpu.memory_space<vmem>>, vector<2x18x18x128xbf16>
    tpu.vector_store %arg8[%c0_97, %c0_98, %c0_99, %c0_100], %96 {strides = array<i32>} : memref<2x18x18x128xbf16, #tpu.memory_space<vmem>>, vector<2x18x18x128xbf16>,
    %98 = vector.shape_cast %95 : vector<512x128xf32> to vector<2x16x16x128xf32>
    %99 = arith.truncf %98 : vector<2x16x16x128xf32> to vector<2x16x16x128xbf16>
    %c0_101 = arith.constant 0 : index
    %c1_102 = arith.constant 1 : index
    %c1_103 = arith.constant 1 : index
    %c0_104 = arith.constant 0 : index
    %100 = vector.load %arg8[%c0_101, %c1_102, %c1_103, %c0_104] : memref<2x18x18x128xbf16, #tpu.memory_space<vmem>>, vector<2x16x16x128xbf16>
    tpu.vector_store %arg8[%c0_101, %c1_102, %c1_103, %c0_104], %99 {strides = array<i32>} : memref<2x18x18x128xbf16, #tpu.memory_space<vmem>>, vector<2x16x16x128xbf16>,
    %c0_105 = arith.constant 0 : index
    %c0_106 = arith.constant 0 : index
    %c0_107 = arith.constant 0 : index
    %c0_108 = arith.constant 0 : index
    %101 = vector.load %arg8[%c0_105, %c0_106, %c0_107, %c0_108] : memref<2x18x18x128xbf16, #tpu.memory_space<vmem>>, vector<2x16x16x128xbf16>
    %102 = vector.shape_cast %101 : vector<2x16x16x128xbf16> to vector<512x128xbf16>
    %c0_109 = arith.constant 0 : index
    %c0_110 = arith.constant 0 : index
    %c0_111 = arith.constant 0 : index
    %c0_112 = arith.constant 0 : index
    %103 = vector.load %arg4[%c0_109, %c0_110, %c0_111, %c0_112] : memref<3x3x128x128xbf16, #tpu.memory_space<vmem>>, vector<1x1x128x128xbf16>
    %104 = vector.shape_cast %103 : vector<1x1x128x128xbf16> to vector<128x128xbf16>
    %cst_113 = arith.constant dense<0.000000e+00> : vector<512x128xf32>
    %105 = tpu.matmul %102, %104, %cst_113 {dimension_numbers = #tpu.dot_dimension_numbers<[1], [0], [0], [1], [0, 0, 1, 1], [], []>} : vector<512x128xbf16>, vector<128x128xbf16>, vector<512x128xf32> -> vector<512x128xf32>
    %c0_114 = arith.constant 0 : index
    %c0_115 = arith.constant 0 : index
    %c1_116 = arith.constant 1 : index
    %c0_117 = arith.constant 0 : index
    %106 = vector.load %arg8[%c0_114, %c0_115, %c1_116, %c0_117] : memref<2x18x18x128xbf16, #tpu.memory_space<vmem>>, vector<2x16x16x128xbf16>
    %107 = vector.shape_cast %106 : vector<2x16x16x128xbf16> to vector<512x128xbf16>
    %c0_118 = arith.constant 0 : index
    %c1_119 = arith.constant 1 : index
    %c0_120 = arith.constant 0 : index
    %c0_121 = arith.constant 0 : index
    %108 = vector.load %arg4[%c0_118, %c1_119, %c0_120, %c0_121] : memref<3x3x128x128xbf16, #tpu.memory_space<vmem>>, vector<1x1x128x128xbf16>
    %109 = vector.shape_cast %108 : vector<1x1x128x128xbf16> to vector<128x128xbf16>
    %cst_122 = arith.constant dense<0.000000e+00> : vector<512x128xf32>
    %110 = tpu.matmul %107, %109, %cst_122 {dimension_numbers = #tpu.dot_dimension_numbers<[1], [0], [0], [1], [0, 0, 1, 1], [], []>} : vector<512x128xbf16>, vector<128x128xbf16>, vector<512x128xf32> -> vector<512x128xf32>
    %111 = arith.addf %105, %110 : vector<512x128xf32>
    %c0_123 = arith.constant 0 : index
    %c0_124 = arith.constant 0 : index
    %c2_125 = arith.constant 2 : index
    %c0_126 = arith.constant 0 : index
    %112 = vector.load %arg8[%c0_123, %c0_124, %c2_125, %c0_126] : memref<2x18x18x128xbf16, #tpu.memory_space<vmem>>, vector<2x16x16x128xbf16>
    %113 = vector.shape_cast %112 : vector<2x16x16x128xbf16> to vector<512x128xbf16>
    %c0_127 = arith.constant 0 : index
    %c2_128 = arith.constant 2 : index
    %c0_129 = arith.constant 0 : index
    %c0_130 = arith.constant 0 : index
    %114 = vector.load %arg4[%c0_127, %c2_128, %c0_129, %c0_130] : memref<3x3x128x128xbf16, #tpu.memory_space<vmem>>, vector<1x1x128x128xbf16>
    %115 = vector.shape_cast %114 : vector<1x1x128x128xbf16> to vector<128x128xbf16>
    %cst_131 = arith.constant dense<0.000000e+00> : vector<512x128xf32>
    %116 = tpu.matmul %113, %115, %cst_131 {dimension_numbers = #tpu.dot_dimension_numbers<[1], [0], [0], [1], [0, 0, 1, 1], [], []>} : vector<512x128xbf16>, vector<128x128xbf16>, vector<512x128xf32> -> vector<512x128xf32>
    %117 = arith.addf %111, %116 : vector<512x128xf32>
    %c0_132 = arith.constant 0 : index
    %c1_133 = arith.constant 1 : index
    %c0_134 = arith.constant 0 : index
    %c0_135 = arith.constant 0 : index
    %118 = vector.load %arg8[%c0_132, %c1_133, %c0_134, %c0_135] : memref<2x18x18x128xbf16, #tpu.memory_space<vmem>>, vector<2x16x16x128xbf16>
    %119 = vector.shape_cast %118 : vector<2x16x16x128xbf16> to vector<512x128xbf16>
    %c1_136 = arith.constant 1 : index
    %c0_137 = arith.constant 0 : index
    %c0_138 = arith.constant 0 : index
    %c0_139 = arith.constant 0 : index
    %120 = vector.load %arg4[%c1_136, %c0_137, %c0_138, %c0_139] : memref<3x3x128x128xbf16, #tpu.memory_space<vmem>>, vector<1x1x128x128xbf16>
    %121 = vector.shape_cast %120 : vector<1x1x128x128xbf16> to vector<128x128xbf16>
    %cst_140 = arith.constant dense<0.000000e+00> : vector<512x128xf32>
    %122 = tpu.matmul %119, %121, %cst_140 {dimension_numbers = #tpu.dot_dimension_numbers<[1], [0], [0], [1], [0, 0, 1, 1], [], []>} : vector<512x128xbf16>, vector<128x128xbf16>, vector<512x128xf32> -> vector<512x128xf32>
    %123 = arith.addf %117, %122 : vector<512x128xf32>
    %c0_141 = arith.constant 0 : index
    %c1_142 = arith.constant 1 : index
    %c1_143 = arith.constant 1 : index
    %c0_144 = arith.constant 0 : index
    %124 = vector.load %arg8[%c0_141, %c1_142, %c1_143, %c0_144] : memref<2x18x18x128xbf16, #tpu.memory_space<vmem>>, vector<2x16x16x128xbf16>
    %125 = vector.shape_cast %124 : vector<2x16x16x128xbf16> to vector<512x128xbf16>
    %c1_145 = arith.constant 1 : index
    %c1_146 = arith.constant 1 : index
    %c0_147 = arith.constant 0 : index
    %c0_148 = arith.constant 0 : index
    %126 = vector.load %arg4[%c1_145, %c1_146, %c0_147, %c0_148] : memref<3x3x128x128xbf16, #tpu.memory_space<vmem>>, vector<1x1x128x128xbf16>
    %127 = vector.shape_cast %126 : vector<1x1x128x128xbf16> to vector<128x128xbf16>
    %cst_149 = arith.constant dense<0.000000e+00> : vector<512x128xf32>
    %128 = tpu.matmul %125, %127, %cst_149 {dimension_numbers = #tpu.dot_dimension_numbers<[1], [0], [0], [1], [0, 0, 1, 1], [], []>} : vector<512x128xbf16>, vector<128x128xbf16>, vector<512x128xf32> -> vector<512x128xf32>
    %129 = arith.addf %123, %128 : vector<512x128xf32>
    %c0_150 = arith.constant 0 : index
    %c1_151 = arith.constant 1 : index
    %c2_152 = arith.constant 2 : index
    %c0_153 = arith.constant 0 : index
    %130 = vector.load %arg8[%c0_150, %c1_151, %c2_152, %c0_153] : memref<2x18x18x128xbf16, #tpu.memory_space<vmem>>, vector<2x16x16x128xbf16>
    %131 = vector.shape_cast %130 : vector<2x16x16x128xbf16> to vector<512x128xbf16>
    %c1_154 = arith.constant 1 : index
    %c2_155 = arith.constant 2 : index
    %c0_156 = arith.constant 0 : index
    %c0_157 = arith.constant 0 : index
    %132 = vector.load %arg4[%c1_154, %c2_155, %c0_156, %c0_157] : memref<3x3x128x128xbf16, #tpu.memory_space<vmem>>, vector<1x1x128x128xbf16>
    %133 = vector.shape_cast %132 : vector<1x1x128x128xbf16> to vector<128x128xbf16>
    %cst_158 = arith.constant dense<0.000000e+00> : vector<512x128xf32>
    %134 = tpu.matmul %131, %133, %cst_158 {dimension_numbers = #tpu.dot_dimension_numbers<[1], [0], [0], [1], [0, 0, 1, 1], [], []>} : vector<512x128xbf16>, vector<128x128xbf16>, vector<512x128xf32> -> vector<512x128xf32>
    %135 = arith.addf %129, %134 : vector<512x128xf32>
    %c0_159 = arith.constant 0 : index
    %c2_160 = arith.constant 2 : index
    %c0_161 = arith.constant 0 : index
    %c0_162 = arith.constant 0 : index
    %136 = vector.load %arg8[%c0_159, %c2_160, %c0_161, %c0_162] : memref<2x18x18x128xbf16, #tpu.memory_space<vmem>>, vector<2x16x16x128xbf16>
    %137 = vector.shape_cast %136 : vector<2x16x16x128xbf16> to vector<512x128xbf16>
    %c2_163 = arith.constant 2 : index
    %c0_164 = arith.constant 0 : index
    %c0_165 = arith.constant 0 : index
    %c0_166 = arith.constant 0 : index
    %138 = vector.load %arg4[%c2_163, %c0_164, %c0_165, %c0_166] : memref<3x3x128x128xbf16, #tpu.memory_space<vmem>>, vector<1x1x128x128xbf16>
    %139 = vector.shape_cast %138 : vector<1x1x128x128xbf16> to vector<128x128xbf16>
    %cst_167 = arith.constant dense<0.000000e+00> : vector<512x128xf32>
    %140 = tpu.matmul %137, %139, %cst_167 {dimension_numbers = #tpu.dot_dimension_numbers<[1], [0], [0], [1], [0, 0, 1, 1], [], []>} : vector<512x128xbf16>, vector<128x128xbf16>, vector<512x128xf32> -> vector<512x128xf32>
    %141 = arith.addf %135, %140 : vector<512x128xf32>
    %c0_168 = arith.constant 0 : index
    %c2_169 = arith.constant 2 : index
    %c1_170 = arith.constant 1 : index
    %c0_171 = arith.constant 0 : index
    %142 = vector.load %arg8[%c0_168, %c2_169, %c1_170, %c0_171] : memref<2x18x18x128xbf16, #tpu.memory_space<vmem>>, vector<2x16x16x128xbf16>
    %143 = vector.shape_cast %142 : vector<2x16x16x128xbf16> to vector<512x128xbf16>
    %c2_172 = arith.constant 2 : index
    %c1_173 = arith.constant 1 : index
    %c0_174 = arith.constant 0 : index
    %c0_175 = arith.constant 0 : index
    %144 = vector.load %arg4[%c2_172, %c1_173, %c0_174, %c0_175] : memref<3x3x128x128xbf16, #tpu.memory_space<vmem>>, vector<1x1x128x128xbf16>
    %145 = vector.shape_cast %144 : vector<1x1x128x128xbf16> to vector<128x128xbf16>
    %cst_176 = arith.constant dense<0.000000e+00> : vector<512x128xf32>
    %146 = tpu.matmul %143, %145, %cst_176 {dimension_numbers = #tpu.dot_dimension_numbers<[1], [0], [0], [1], [0, 0, 1, 1], [], []>} : vector<512x128xbf16>, vector<128x128xbf16>, vector<512x128xf32> -> vector<512x128xf32>
    %147 = arith.addf %141, %146 : vector<512x128xf32>
    %c0_177 = arith.constant 0 : index
    %c2_178 = arith.constant 2 : index
    %c2_179 = arith.constant 2 : index
    %c0_180 = arith.constant 0 : index
    %148 = vector.load %arg8[%c0_177, %c2_178, %c2_179, %c0_180] : memref<2x18x18x128xbf16, #tpu.memory_space<vmem>>, vector<2x16x16x128xbf16>
    %149 = vector.shape_cast %148 : vector<2x16x16x128xbf16> to vector<512x128xbf16>
    %c2_181 = arith.constant 2 : index
    %c2_182 = arith.constant 2 : index
    %c0_183 = arith.constant 0 : index
    %c0_184 = arith.constant 0 : index
    %150 = vector.load %arg4[%c2_181, %c2_182, %c0_183, %c0_184] : memref<3x3x128x128xbf16, #tpu.memory_space<vmem>>, vector<1x1x128x128xbf16>
    %151 = vector.shape_cast %150 : vector<1x1x128x128xbf16> to vector<128x128xbf16>
    %cst_185 = arith.constant dense<0.000000e+00> : vector<512x128xf32>
    %152 = tpu.matmul %149, %151, %cst_185 {dimension_numbers = #tpu.dot_dimension_numbers<[1], [0], [0], [1], [0, 0, 1, 1], [], []>} : vector<512x128xbf16>, vector<128x128xbf16>, vector<512x128xf32> -> vector<512x128xf32>
    %153 = arith.addf %147, %152 : vector<512x128xf32>
    %c0_186 = arith.constant 0 : index
    %c0_187 = arith.constant 0 : index
    %154 = vector.load %arg5[%c0_186, %c0_187] : memref<1x128xf32, #tpu.memory_space<vmem>>, vector<1x128xf32>
    %c0_188 = arith.constant 0 : index
    %c0_189 = arith.constant 0 : index
    %155 = vector.load %arg6[%c0_188, %c0_189] : memref<1x128xf32, #tpu.memory_space<vmem>>, vector<1x128xf32>
    %cst_190 = arith.constant dense<0.000000e+00> : vector<128xf32>
    %156 = vector.multi_reduction <add>, %153, %cst_190 [0] : vector<512x128xf32> to vector<128xf32>
    %157 = vector.shape_cast %156 : vector<128xf32> to vector<1x128xf32>
    %cst_191 = arith.constant 5.120000e+02 : f32
    %158 = vector.broadcast %cst_191 : f32 to vector<1x128xf32>
    %159 = arith.divf %157, %158 : vector<1x128xf32>
    %160 = arith.mulf %153, %153 : vector<512x128xf32>
    %cst_192 = arith.constant dense<0.000000e+00> : vector<128xf32>
    %161 = vector.multi_reduction <add>, %160, %cst_192 [0] : vector<512x128xf32> to vector<128xf32>
    %162 = vector.shape_cast %161 : vector<128xf32> to vector<1x128xf32>
    %cst_193 = arith.constant 5.120000e+02 : f32
    %163 = vector.broadcast %cst_193 : f32 to vector<1x128xf32>
    %164 = arith.divf %162, %163 : vector<1x128xf32>
    %165 = arith.mulf %159, %159 : vector<1x128xf32>
    %166 = arith.subf %164, %165 : vector<1x128xf32>
    %cst_194 = arith.constant 9.99999974E-6 : f32
    %167 = vector.broadcast %cst_194 : f32 to vector<1x128xf32>
    %168 = arith.addf %166, %167 : vector<1x128xf32>
    %169 = math.rsqrt %168 : vector<1x128xf32>
    %170 = arith.mulf %154, %169 : vector<1x128xf32>
    %171 = arith.mulf %159, %170 : vector<1x128xf32>
    %172 = arith.subf %155, %171 : vector<1x128xf32>
    %173 = vector.broadcast %170 : vector<1x128xf32> to vector<512x128xf32>
    %174 = arith.mulf %153, %173 : vector<512x128xf32>
    %175 = vector.broadcast %172 : vector<1x128xf32> to vector<512x128xf32>
    %176 = arith.addf %174, %175 : vector<512x128xf32>
    %c0_195 = arith.constant 0 : index
    %c0_196 = arith.constant 0 : index
    %c1_197 = arith.constant 1 : index
    %c1_198 = arith.constant 1 : index
    %c0_199 = arith.constant 0 : index
    %177 = vector.load %arg0[%c0_195, %c0_196, %c1_197, %c1_198, %c0_199] : memref<1x2x18x18x128xf32, #tpu.memory_space<vmem>>, vector<1x2x16x16x128xf32>
    %178 = vector.shape_cast %177 : vector<1x2x16x16x128xf32> to vector<2x16x16x128xf32>
    %179 = vector.shape_cast %178 : vector<2x16x16x128xf32> to vector<512x128xf32>
    %180 = arith.addf %176, %179 : vector<512x128xf32>
    %cst_200 = arith.constant 0.000000e+00 : f32
    %181 = vector.broadcast %cst_200 : f32 to vector<512x128xf32>
    %182 = arith.maximumf %180, %181 : vector<512x128xf32>
    %c0_201 = arith.constant 0 : index
    %c0_202 = arith.constant 0 : index
    %183 = vector.load %arg7[%c0_201, %c0_202] : memref<512x128xf32, #tpu.memory_space<vmem>>, vector<512x128xf32>
    tpu.vector_store %arg7[%c0_201, %c0_202], %182 {strides = array<i32>} : memref<512x128xf32, #tpu.memory_space<vmem>>, vector<512x128xf32>,
    return
  }
}

</mosaic_0001>

<bundles_post_ra>
// kernel: tpu_custom_call.1
= control target key start
LH: loop header
LB: loop body
LE: loop exit
PB: predicated region body
PF: predicated region fallthrough
CT: control target
= control target key end

     0   :  { %s27572_s0 = inlined_call_operand.vmem [shape: f32[1,2,18,18,128], index: 0, kind: input, shape index: {}]   ;;  %s27573_s1 = inlined_call_operand.vmem [shape: bf16[3,3,128,128], index: 1, kind: input, shape index: {}]   ;;  %s27574_s2 = inlined_call_operand.vmem [shape: f32[1,128], index: 2, kind: input, shape index: {}]   ;;  %s27575_s3 = inlined_call_operand.vmem [shape: f32[1,128], index: 3, kind: input, shape index: {}]   ;;  %s27576_s4 = inlined_call_operand.vmem [shape: bf16[3,3,128,128], index: 4, kind: input, shape index: {}]   ;;  %s27577_s5 = inlined_call_operand.vmem [shape: f32[1,128], index: 5, kind: input, shape index: {}]   ;;  %s27578_s6 = inlined_call_operand.vmem [shape: f32[1,128], index: 6, kind: input, shape index: {}]   ;;  %s27579_s7 = inlined_call_operand.hbm [shape: f32[512,128], index: 7, kind: output, shape index: {}]  }
   0x1   :  { %v20019_v0 = vld [vmem:[%s27573_s1 + $0x40] sm:$0xff]   ;;  %v20020_v1 = vld [vmem:[%s27573_s1 + $0x48] sm:$0xff]   ;;  %v20021_v2 = vld [vmem:[%s27573_s1 + $0x50] sm:$0xff]  }
   0x2   :  { %17551 = vmatprep.subr.bf16.mxu0 %v20019_v0  ;;  %v20022_v3 = vld [vmem:[%s27573_s1 + $0x58] sm:$0xff]   ;;  %v140_v4 = vld [vmem:[%s27572_s0 + $0x1] sm:$0xff]  ;;  %v141_v5 = vld [vmem:[%s27572_s0 + $0x9] sm:$0xff] }
   0x3   :  { %17552 = vmatpush3.bf16.msra.mxu0 %v20019_v0  ;;  %v204_v6 = vpack.c.bf16 %v141_v5, %v140_v4  ;;  %v20023_v7 = vld [vmem:[%s27573_s1 + $0x60] sm:$0xff]   ;;  %v20024_v8 = vld [vmem:[%s27573_s1 + $0x68] sm:$0xff]   ;;  %v20025_v9 = vld [vmem:[%s27573_s1 + $0x70] sm:$0xff]  }
   0x4   :  { %17553 = vmatprep.subr.bf16.mxu0 %v20020_v1  ;;  %v20026_v10 = vld [vmem:[%s27573_s1 + $0x78] sm:$0xff]   ;;  %v143_v12 = vld [vmem:[%s27572_s0 + $0x21] sm:$0xff]  ;;  %v146_v19 = vld [vmem:[%s27572_s0 + $0x49] sm:$0xff] }
   0x5   :  { %17567 = vmatprep.mubr.bf16.mxu0 %v204_v6  ;;  %v142_v11 = vld [vmem:[%s27572_s0 + $0x19] sm:$0xff]  ;;  %v144_v14 = vld [vmem:[%s27572_s0 + $0x31] sm:$0xff]  ;;  %v20028_v18 = vld [vmem:[%s27573_s1 + $0x8] sm:$0xff]  }
   0x6   :  { %v20027_v13 = vld [vmem:[%s27573_s1] sm:$0xff]   ;;  %v205_v16 = vpack.c.bf16 %v143_v12, %v142_v11  ;;  %v147_v20 = vld [vmem:[%s27572_s0 + $0x51] sm:$0xff]  ;;  %v149_v22 = vld [vmem:[%s27572_s0 + $0x69] sm:$0xff] }
   0x7   :  { %17554 = vmatpush3.bf16.msra.mxu0 %v20020_v1  ;;  %v145_v15 = vld [vmem:[%s27572_s0 + $0x39] sm:$0xff]  ;;  %v148_v21 = vld [vmem:[%s27572_s0 + $0x61] sm:$0xff]  ;;  %v20029_v23 = vld [vmem:[%s27573_s1 + $0x10] sm:$0xff]   ;;  %v207_v24 = vpack.c.bf16 %v147_v20, %v146_v19 }
   0x8   :  { %17555 = vmatprep.subr.bf16.mxu0 %v20021_v2  ;;  %v206_v17 = vpack.c.bf16 %v145_v15, %v144_v14  ;;  %v208_v25 = vpack.c.bf16 %v149_v22, %v148_v21  ;;  %v20030_v26 = vld [vmem:[%s27573_s1 + $0x18] sm:$0xff]   ;;  %v151_v28 = vld [vmem:[%s27572_s0 + $0x81] sm:$0xff]  ;;  %v154_v35 = vld [vmem:[%s27572_s0 + $0xa9] sm:$0xff] }
   0x9   :  { %v150_v27 = vld [vmem:[%s27572_s0 + $0x79] sm:$0xff]  ;;  %v152_v29 = vld [vmem:[%s27572_s0 + $0x91] sm:$0xff]  ;;  %v20032_v33 = vld [vmem:[%s27573_s1 + $0x28] sm:$0xff]  }
   0xa   :  { %v153_v30 = vld [vmem:[%s27572_s0 + $0x99] sm:$0xff]  ;;  %v209_v32 = vpack.c.bf16 %v151_v28, %v150_v27  ;;  %v155_v36 = vld [vmem:[%s27572_s0 + $0xb1] sm:$0xff]  ;;  %v156_v37 = vld [vmem:[%s27572_s0 + $0xc1] sm:$0xff] }
   0xb   :  { %17556 = vmatpush3.bf16.msra.mxu0 %v20021_v2  ;;  %v20031_v31 = vld [vmem:[%s27573_s1 + $0x20] sm:$0xff]   ;;  %v210_v34 = vpack.c.bf16 %v153_v30, %v152_v29  ;;  %v157_v38 = vld [vmem:[%s27572_s0 + $0xc9] sm:$0xff]  ;;  %v211_v40 = vpack.c.bf16 %v155_v36, %v154_v35  ;;  %v20034_v41 = vld [vmem:[%s27573_s1 + $0x38] sm:$0xff]  }
   0xc   :  { %17557 = vmatprep.subr.bf16.mxu0 %v20022_v3  ;;  %v20033_v39 = vld [vmem:[%s27573_s1 + $0x30] sm:$0xff]   ;;  %v212_v42 = vpack.c.bf16 %v157_v38, %v156_v37  ;;  %v158_v43 = vld [vmem:[%s27572_s0 + $0xd9] sm:$0xff]  ;;  %v159_v44 = vld [vmem:[%s27572_s0 + $0xe1] sm:$0xff] }
   0xd   :  { %v160_v45 = vld [vmem:[%s27572_s0 + $0xf1] sm:$0xff]  ;;  %v161_v46 = vld [vmem:[%s27572_s0 + $0xf9] sm:$0xff]  ;;  %v213_v48 = vpack.c.bf16 %v159_v44, %v158_v43  ;;  %v162_v50 = vld [vmem:[%s27572_s0 + $0x109] sm:$0xff] }
   0xe   :  { %v20597_v47 = vld [vmem:[%s27573_s1 + $0x80] sm:$0xff]   ;;  %v214_v49 = vpack.c.bf16 %v161_v46, %v160_v45  ;;  %v163_v51 = vld [vmem:[%s27572_s0 + $0x111] sm:$0xff]  ;;  %v165_v53 = vld [vmem:[%s27572_s0 + $0x129] sm:$0xff] }
   0xf   :  { %17558 = vmatpush3.bf16.msra.mxu0 %v20022_v3  ;;  %v164_v52 = vld [vmem:[%s27572_s0 + $0x121] sm:$0xff]  ;;  %v215_v54 = vpack.c.bf16 %v163_v51, %v162_v50  ;;  %v166_v56 = vld [vmem:[%s27572_s0 + $0x139] sm:$0xff]  ;;  %v168_v58 = vld [vmem:[%s27572_s0 + $0x151] sm:$0xff] }
  0x10   :  { %17559 = vmatprep.subr.bf16.mxu0 %v20023_v7  ;;  %v216_v55 = vpack.c.bf16 %v165_v53, %v164_v52  ;;  %v167_v57 = vld [vmem:[%s27572_s0 + $0x141] sm:$0xff]  ;;  %v169_v59 = vld [vmem:[%s27572_s0 + $0x159] sm:$0xff]  ;;  %v170_v62 = vld [vmem:[%s27572_s0 + $0x169] sm:$0xff] }
  0x11   :  { %v217_v60 = vpack.c.bf16 %v167_v57, %v166_v56  ;;  %v218_v61 = vpack.c.bf16 %v169_v59, %v168_v58  ;;  %v171_v63 = vld [vmem:[%s27572_s0 + $0x171] sm:$0xff]  ;;  %v173_v1 = vld [vmem:[%s27572_s0 + $0x1b9] sm:$0xff]  ;;  %v174_v4 = vld [vmem:[%s27572_s0 + $0x1c9] sm:$0xff] }
  0x12   :  { %v172_v0 = vld [vmem:[%s27572_s0 + $0x1b1] sm:$0xff]  ;;  %v219_v2 = vpack.c.bf16 %v171_v63, %v170_v62  ;;  %v176_v6 = vld [vmem:[%s27572_s0 + $0x1e1] sm:$0xff]  ;;  %v185_v19 = vld [vmem:[%s27572_s0 + $0x249] sm:$0xff] }
  0x13   :  { %17560 = vmatpush3.bf16.msra.mxu0 %v20023_v7  ;;  %v220_v3 = vpack.c.bf16 %v173_v1, %v172_v0  ;;  %v175_v5 = vld [vmem:[%s27572_s0 + $0x1d1] sm:$0xff]  ;;  %v177_v7 = vld [vmem:[%s27572_s0 + $0x1e9] sm:$0xff]  ;;  %v179_v11 = vld [vmem:[%s27572_s0 + $0x201] sm:$0xff] }
  0x14   :  { %17561 = vmatprep.subr.bf16.mxu0 %v20024_v8  ;;  %v180_v12 = vld [vmem:[%s27572_s0 + $0x211] sm:$0xff]  ;;  %v186_v22 = vld [vmem:[%s27572_s0 + $0x259] sm:$0xff]  ;;  %v190_v28 = vld [vmem:[%s27572_s0 + $0x289] sm:$0xff] }
  0x15   :  { %v191_v29 = vld [vmem:[%s27572_s0 + $0x291] sm:$0xff]  ;;  %v192_v30 = vld [vmem:[%s27572_s0 + $0x2a1] sm:$0xff]  ;;  %v197_v37 = vld [vmem:[%s27572_s0 + $0x2d9] sm:$0xff] }
  0x16   :  { %v195_v35 = vld [vmem:[%s27572_s0 + $0x2c1] sm:$0xff]  ;;  %v196_v36 = vld [vmem:[%s27572_s0 + $0x2d1] sm:$0xff]  ;;  %v201_v43 = vld [vmem:[%s27572_s0 + $0x309] sm:$0xff] }
  0x17   :  { %17562 = vmatpush3.bf16.msra.mxu0 %v20024_v8  ;;  %v221_v8 = vpack.c.bf16 %v175_v5, %v174_v4 }
  0x18   :  { %17563 = vmatprep.subr.bf16.mxu0 %v20025_v9 }
  0x1b   :  { %17564 = vmatpush3.bf16.msra.mxu0 %v20025_v9  ;;  %v222_v9 = vpack.c.bf16 %v177_v7, %v176_v6 }
  0x1c   :  { %17565 = vmatprep.subr.bf16.mxu0 %v20026_v10 }
  0x1f   :  { %17566 = vmatpush3.bf16.msra.mxu0 %v20026_v10  ;;  %v178_v10 = vld [vmem:[%s27572_s0 + $0x1f9] sm:$0xff] }
  0x20   :  { %17631 = vmatprep.subr.bf16.mxu0 %v20027_v13  ;;  %v223_v14 = vpack.c.bf16 %v179_v11, %v178_v10 }
  0x22   :  { %17568 = vmatmul.mubr.bf16.vlgmr.msra.gmra.mrb[0].mxu0 %v205_v16  ;;  %v182_v16 = vld [vmem:[%s27572_s0 + $0x229] sm:$0xff] }
  0x23   :  { %17632 = vmatpush3.bf16.msra.mxu0 %v20027_v13  ;;  %17571 = vmatprep.mubr.bf16.mxu0 %v206_v17  ;;  %v181_v13 = vld [vmem:[%s27572_s0 + $0x219] sm:$0xff]  ;;  %v183_v17 = vld [vmem:[%s27572_s0 + $0x231] sm:$0xff] }
  0x24   :  { %17633 = vmatprep.subr.bf16.mxu0 %v20028_v18  ;;  %v224_v15 = vpack.c.bf16 %v181_v13, %v180_v12  ;;  %v225_v20 = vpack.c.bf16 %v183_v17, %v182_v16 }
  0x27   :  { %17634 = vmatpush3.bf16.msra.mxu0 %v20028_v18  ;;  %v184_v18 = vld [vmem:[%s27572_s0 + $0x241] sm:$0xff] }
  0x28   :  { %17635 = vmatprep.subr.bf16.mxu0 %v20029_v23  ;;  %v226_v21 = vpack.c.bf16 %v185_v19, %v184_v18 }
  0x2a   :  { %17572 = vmatmul.mubr.bf16.gmra.mrb[4].mxu0 %v207_v24  ;;  %v188_v24 = vld [vmem:[%s27572_s0 + $0x271] sm:$0xff] }
  0x2b   :  { %17575 = vmatprep.mubr.bf16.mxu0 %v208_v25  ;;  %17636 = vmatpush3.bf16.msra.mxu0 %v20029_v23  ;;  %v187_v23 = vld [vmem:[%s27572_s0 + $0x261] sm:$0xff]  ;;  %v189_v25 = vld [vmem:[%s27572_s0 + $0x279] sm:$0xff] }
  0x2c   :  { %17637 = vmatprep.subr.bf16.mxu0 %v20030_v26  ;;  %v228_v27 = vpack.c.bf16 %v189_v25, %v188_v24 }
  0x2f   :  { %17638 = vmatpush3.bf16.msra.mxu0 %v20030_v26  ;;  %v227_v26 = vpack.c.bf16 %v187_v23, %v186_v22 }
  0x30   :  { %17639 = vmatprep.subr.bf16.mxu0 %v20031_v31 }
  0x32   :  { %17576 = vmatmul.mubr.bf16.gmra.mrb[8].mxu0 %v209_v32  ;;  %v229_v32 = vpack.c.bf16 %v191_v29, %v190_v28 }
  0x33   :  { %17579 = vmatprep.mubr.bf16.mxu0 %v210_v34  ;;  %17640 = vmatpush3.bf16.msra.mxu0 %v20031_v31  ;;  %v193_v31 = vld [vmem:[%s27572_s0 + $0x2a9] sm:$0xff]  ;;  %v194_v34 = vld [vmem:[%s27572_s0 + $0x2b9] sm:$0xff] }
  0x34   :  { %17641 = vmatprep.subr.bf16.mxu0 %v20032_v33  ;;  %v231_v38 = vpack.c.bf16 %v195_v35, %v194_v34 }
  0x37   :  { %17642 = vmatpush3.bf16.msra.mxu0 %v20032_v33  ;;  %v230_v33 = vpack.c.bf16 %v193_v31, %v192_v30 }
  0x38   :  { %17643 = vmatprep.subr.bf16.mxu0 %v20033_v39 }
  0x3a   :  { %17580 = vmatmul.mubr.bf16.gmra.mrb[12].mxu0 %v211_v40  ;;  %v198_v40 = vld [vmem:[%s27572_s0 + $0x2e9] sm:$0xff] }
  0x3b   :  { %17583 = vmatprep.mubr.bf16.mxu0 %v212_v42  ;;  %17644 = vmatpush3.bf16.msra.mxu0 %v20033_v39  ;;  %v232_v39 = vpack.c.bf16 %v197_v37, %v196_v36  ;;  %v200_v42 = vld [vmem:[%s27572_s0 + $0x301] sm:$0xff] }
  0x3c   :  { %17645 = vmatprep.subr.bf16.mxu0 %v20034_v41  ;;  %v234_v45 = vpack.c.bf16 %v201_v43, %v200_v42 }
  0x3f   :  { %17646 = vmatpush3.bf16.msra.mxu0 %v20034_v41  ;;  %v199_v41 = vld [vmem:[%s27572_s0 + $0x2f1] sm:$0xff] }
  0x40   :  { %17711 = vmatprep.subr.bf16.mxu0 %v20597_v47  ;;  %v233_v44 = vpack.c.bf16 %v199_v41, %v198_v40 }
  0x42   :  { %17584 = vmatmul.mubr.bf16.gmra.mrb[16].mxu0 %v213_v48 }
  0x43   :  { %17587 = vmatprep.mubr.bf16.mxu0 %v214_v49 }
  0x4a   :  { %17588 = vmatmul.mubr.bf16.gmra.mrb[20].mxu0 %v215_v54 }
  0x4b   :  { %17591 = vmatprep.mubr.bf16.mxu0 %v216_v55 }
  0x52   :  { %17592 = vmatmul.mubr.bf16.gmra.mrb[24].mxu0 %v217_v60 }
  0x53   :  { %17595 = vmatprep.mubr.bf16.mxu0 %v218_v61 }
  0x5a   :  { %17596 = vmatmul.mubr.bf16.gmra.mrb[28].mxu0 %v219_v2 }
  0x5b   :  { %17599 = vmatprep.mubr.bf16.mxu0 %v220_v3 }
  0x62   :  { %17600 = vmatmul.mubr.bf16.gmra.mrb[32].mxu0 %v221_v8 }
  0x63   :  { %17603 = vmatprep.mubr.bf16.mxu0 %v222_v9 }
  0x6a   :  { %17604 = vmatmul.mubr.bf16.gmra.mrb[36].mxu0 %v223_v14 }
  0x6b   :  { %17607 = vmatprep.mubr.bf16.mxu0 %v224_v15 }
  0x72   :  { %17608 = vmatmul.mubr.bf16.gmra.mrb[40].mxu0 %v225_v20 }
  0x73   :  { %17611 = vmatprep.mubr.bf16.mxu0 %v226_v21 }
  0x7a   :  { %17612 = vmatmul.mubr.bf16.gmra.mrb[44].mxu0 %v227_v26 }
  0x7b   :  { %17615 = vmatprep.mubr.bf16.mxu0 %v228_v27 }
  0x82   :  { %17616 = vmatmul.mubr.bf16.gmra.mrb[48].mxu0 %v229_v32 }
  0x83   :  { %17619 = vmatprep.mubr.bf16.mxu0 %v230_v33 }
  0x8a   :  { %17620 = vmatmul.mubr.bf16.gmra.mrb[52].mxu0 %v231_v38 }
  0x8b   :  { %17623 = vmatprep.mubr.bf16.mxu0 %v232_v39 }
  0x8c   :  { %12 = vsyncpa [#allocation4], 0  ;;  %v202_v46 = vld [vmem:[%s27572_s0 + $0x319] sm:$0xff]  ;;  %v203_v48 = vld [vmem:[%s27572_s0 + $0x321] sm:$0xff]  ;;  %vm5245_vm0 = vsmask.f32 256 }
  0x8d   :  { %v28_v49 = vld [vmem:[%s27572_s0] sm:$0xff]  ;;  %v29_v50 = vld [vmem:[%s27572_s0 + $0x8] sm:$0xff]  ;;  %v235_v51 = vpack.c.bf16 %v203_v48, %v202_v46  ;;  %v30_v53 = vld [vmem:[%s27572_s0 + $0x18] sm:$0xff]  ;;  %vm5246_vm1 = vsmask.f32 4368  ;;  %vm5896_vm2 = vcmask 1040384  }
  0x8e   :  { %v92_v52 = vpack.c.bf16 %v29_v50, %v28_v49  ;;  %v31_v54 = vld [vmem:[%s27572_s0 + $0x20] sm:$0xff]  ;;  %v32_v55 = vld [vmem:[%s27572_s0 + $0x30] sm:$0xff]  ;;  %v33_v56 = vld [vmem:[%s27572_s0 + $0x38] sm:$0xff]  ;;  %vm5889_vm5 = vcmask 1043456   ;;  %vm5890_vm6 = vsmask.f32 7938 }
  0x8f   :  { %v20744_v57 = vpack.c.bf16 %v31_v54, %v30_v53  ;;  %v20746_v58 = vpack.c.bf16 %v33_v56, %v32_v55  ;;  %v20036_v59 = vld [vmem:[%s27573_s1 + $0x88] sm:$0xff]   ;;  %v35_v61 = vld [vmem:[%s27572_s0 + $0x50] sm:$0xff]  ;;  %v36_v62 = vld [vmem:[%s27572_s0 + $0x60] sm:$0xff]  ;;  %vm6230_vm8 = vsmask.f32 3328  ;;  %vm8108_vm11 = vcmask 1042432  }
  0x90   :  { %v34_v60 = vld [vmem:[%s27572_s0 + $0x48] sm:$0xff]  ;;  %v20038_v2 = vld [vmem:[%s27573_s1 + $0x98] sm:$0xff]   ;;  %v39_v4 = vld [vmem:[%s27572_s0 + $0x80] sm:$0xff]  ;;  %vm6231_vm9 = vsmask.f32 7440  ;;  %vm8109_vm12 = vcmask 1046532  }
  0x91   :  { %v37_v63 = vld [vmem:[%s27572_s0 + $0x68] sm:$0xff]  ;;  %v20769_v0 = vpack.c.bf16 %v35_v61, %v34_v60  ;;  %v38_v3 = vld [vmem:[%s27572_s0 + $0x78] sm:$0xff]  ;;  %v40_v5 = vld [vmem:[%s27572_s0 + $0x90] sm:$0xff] }
  0x92   :  { %17624 = vmatmul.mubr.bf16.gmra.mrb[56].mxu0 %v233_v44  ;;  %v20771_v1 = vpack.c.bf16 %v37_v63, %v36_v62  ;;  %v41_v6 = vld [vmem:[%s27572_s0 + $0x98] sm:$0xff]  ;;  %v20039_v7 = vld [vmem:[%s27573_s1 + $0xa0] sm:$0xff]   ;;  %v20793_v8 = vpack.c.bf16 %v39_v4, %v38_v3  ;;  %v20040_v10 = vld [vmem:[%s27573_s1 + $0xa8] sm:$0xff]  }
  0x93   :  { %17627 = vmatprep.mubr.bf16.mxu0 %v234_v45  ;;  %v20795_v9 = vpack.c.bf16 %v41_v6, %v40_v5  ;;  %v42_v11 = vld [vmem:[%s27572_s0 + $0xa8] sm:$0xff]  ;;  %v43_v12 = vld [vmem:[%s27572_s0 + $0xb0] sm:$0xff]  ;;  %v44_v13 = vld [vmem:[%s27572_s0 + $0xc0] sm:$0xff] }
  0x94   :  { %v45_v14 = vld [vmem:[%s27572_s0 + $0xc8] sm:$0xff]  ;;  %v20041_v15 = vld [vmem:[%s27573_s1 + $0xb0] sm:$0xff]   ;;  %v20817_v16 = vpack.c.bf16 %v43_v12, %v42_v11  ;;  %v20042_v18 = vld [vmem:[%s27573_s1 + $0xb8] sm:$0xff]  }
  0x95   :  { %v20819_v17 = vpack.c.bf16 %v45_v14, %v44_v13  ;;  %v46_v19 = vld [vmem:[%s27572_s0 + $0xd8] sm:$0xff]  ;;  %v47_v20 = vld [vmem:[%s27572_s0 + $0xe0] sm:$0xff]  ;;  %v48_v21 = vld [vmem:[%s27572_s0 + $0xf0] sm:$0xff] }
  0x96   :  { %v49_v22 = vld [vmem:[%s27572_s0 + $0xf8] sm:$0xff]  ;;  %v20841_v23 = vld [vmem:[%s27573_s1 + $0xc0] sm:$0xff]   ;;  %v20843_v24 = vpack.c.bf16 %v47_v20, %v46_v19  ;;  %v50_v26 = vld [vmem:[%s27572_s0 + $0x108] sm:$0xff] }
  0x97   :  { %v20845_v25 = vpack.c.bf16 %v49_v22, %v48_v21  ;;  %v51_v27 = vld [vmem:[%s27572_s0 + $0x110] sm:$0xff]  ;;  %v52_v28 = vld [vmem:[%s27572_s0 + $0x120] sm:$0xff]  ;;  %v53_v29 = vld [vmem:[%s27572_s0 + $0x128] sm:$0xff] }
  0x98   :  { %v20862_v30 = vpack.c.bf16 %v51_v27, %v50_v26  ;;  %v20864_v31 = vpack.c.bf16 %v53_v29, %v52_v28  ;;  %v54_v32 = vld [vmem:[%s27572_s0 + $0x138] sm:$0xff]  ;;  %v55_v33 = vld [vmem:[%s27572_s0 + $0x140] sm:$0xff]  ;;  %v56_v34 = vld [vmem:[%s27572_s0 + $0x150] sm:$0xff] }
  0x99   :  { %v57_v35 = vld [vmem:[%s27572_s0 + $0x158] sm:$0xff]  ;;  %v20880_v36 = vpack.c.bf16 %v55_v33, %v54_v32  ;;  %v58_v38 = vld [vmem:[%s27572_s0 + $0x168] sm:$0xff]  ;;  %v59_v39 = vld [vmem:[%s27572_s0 + $0x170] sm:$0xff] }
  0x9a   :  { %17628 = vmatmul.mubr.bf16.gmra.mrb[60].mxu0 %v235_v51  ;;  %v20882_v37 = vpack.c.bf16 %v57_v35, %v56_v34  ;;  %v60_v40 = vld [vmem:[%s27572_s0 + $0x1b0] sm:$0xff]  ;;  %v61_v41 = vld [vmem:[%s27572_s0 + $0x1b8] sm:$0xff]  ;;  %v20898_v42 = vpack.c.bf16 %v59_v39, %v58_v38  ;;  %v62_v44 = vld [vmem:[%s27572_s0 + $0x1c8] sm:$0xff] }
  0x9b   :  { %17647 = vmatprep.mubr.bf16.mxu0 %v92_v52  ;;  %v108_v43 = vpack.c.bf16 %v61_v41, %v60_v40  ;;  %v63_v45 = vld [vmem:[%s27572_s0 + $0x1d0] sm:$0xff]  ;;  %v64_v46 = vld [vmem:[%s27572_s0 + $0x1e0] sm:$0xff]  ;;  %v65_v48 = vld [vmem:[%s27572_s0 + $0x1e8] sm:$0xff] }
  0x9c   :  { %v20913_v49 = vpack.c.bf16 %v63_v45, %v62_v44  ;;  %v20915_v50 = vpack.c.bf16 %v65_v48, %v64_v46  ;;  %v66_v51 = vld [vmem:[%s27572_s0 + $0x1f8] sm:$0xff]  ;;  %v67_v52 = vld [vmem:[%s27572_s0 + $0x200] sm:$0xff]  ;;  %v68_v53 = vld [vmem:[%s27572_s0 + $0x210] sm:$0xff] }
  0x9d   :  { %v69_v54 = vld [vmem:[%s27572_s0 + $0x218] sm:$0xff]  ;;  %v20931_v55 = vpack.c.bf16 %v67_v52, %v66_v51  ;;  %v71_v60 = vld [vmem:[%s27572_s0 + $0x230] sm:$0xff]  ;;  %v72_v61 = vld [vmem:[%s27572_s0 + $0x240] sm:$0xff] }
  0x9e   :  { %v20933_v56 = vpack.c.bf16 %v69_v54, %v68_v53  ;;  %v73_v62 = vld [vmem:[%s27572_s0 + $0x248] sm:$0xff]  ;;  %v75_v3 = vld [vmem:[%s27572_s0 + $0x260] sm:$0xff]  ;;  %v76_v4 = vld [vmem:[%s27572_s0 + $0x270] sm:$0xff] }
  0x9f   :  { %v77_v5 = vld [vmem:[%s27572_s0 + $0x278] sm:$0xff]  ;;  %v79_v11 = vld [vmem:[%s27572_s0 + $0x290] sm:$0xff]  ;;  %v80_v12 = vld [vmem:[%s27572_s0 + $0x2a0] sm:$0xff] }
  0xa0   :  { %v81_v13 = vld [vmem:[%s27572_s0 + $0x2a8] sm:$0xff]  ;;  %v83_v19 = vld [vmem:[%s27572_s0 + $0x2c0] sm:$0xff]  ;;  %v84_v20 = vld [vmem:[%s27572_s0 + $0x2d0] sm:$0xff] }
  0xa1   :  { %v85_v21 = vld [vmem:[%s27572_s0 + $0x2d8] sm:$0xff]  ;;  %v86_v27 = vld [vmem:[%s27572_s0 + $0x2e8] sm:$0xff]  ;;  %v87_v28 = vld [vmem:[%s27572_s0 + $0x2f0] sm:$0xff] }
  0xa2   :  { %17648 = vmatmul.mubr.bf16.vlgmr.msra.gmra.mrb[0].mxu0 %v20744_v57  ;;  %v21005_v26 = vpack.c.bf16 %v85_v21, %v84_v20  ;;  %v88_v29 = vld [vmem:[%s27572_s0 + $0x300] sm:$0xff]  ;;  %v89_v32 = vld [vmem:[%s27572_s0 + $0x308] sm:$0xff]  ;;  %v21021_v33 = vpack.c.bf16 %v87_v28, %v86_v27  ;;  %v90_v35 = vld [vmem:[%s27572_s0 + $0x318] sm:$0xff] }
  0xa3   :  { %17712 = vmatpush3.bf16.msra.mxu0 %v20597_v47  ;;  %17651 = vmatprep.mubr.bf16.mxu0 %v20746_v58  ;;  %v20037_v47 = vld [vmem:[%s27573_s1 + $0x90] sm:$0xff]   ;;  %v21023_v34 = vpack.c.bf16 %v89_v32, %v88_v29  ;;  %v91_v38 = vld [vmem:[%s27572_s0 + $0x320] sm:$0xff]  ;;  %v20044_v53 = vld [vmem:[%s27573_s1 + $0xc8] sm:$0xff]  }
  0xa4   :  { %17713 = vmatprep.subr.bf16.mxu0 %v20036_v59  ;;  %v927_v39 = vld [vmem:[%s27572_s0 + $0x2] sm:$0xff]  ;;  %v928_v40 = vld [vmem:[%s27572_s0 + $0xa] sm:$0xff]  ;;  %v21039_v41 = vpack.c.bf16 %v91_v38, %v90_v35  ;;  %v929_v44 = vld [vmem:[%s27572_s0 + $0x1a] sm:$0xff] }
  0xa5   :  { %v930_v45 = vld [vmem:[%s27572_s0 + $0x22] sm:$0xff]  ;;  %v931_v46 = vld [vmem:[%s27572_s0 + $0x32] sm:$0xff]  ;;  %v932_v48 = vld [vmem:[%s27572_s0 + $0x3a] sm:$0xff] }
  0xa6   :  { %v21054_v51 = vpack.c.bf16 %v930_v45, %v929_v44  ;;  %v21056_v52 = vpack.c.bf16 %v932_v48, %v931_v46  ;;  %v933_v54 = vld [vmem:[%s27572_s0 + $0x4a] sm:$0xff]  ;;  %v942_v21 = vld [vmem:[%s27572_s0 + $0xb2] sm:$0xff]  ;;  %v943_v27 = vld [vmem:[%s27572_s0 + $0xc2] sm:$0xff] }
  0xa7   :  { %17714 = vmatpush3.bf16.msra.mxu0 %v20036_v59  ;;  %v70_v59 = vld [vmem:[%s27572_s0 + $0x228] sm:$0xff]  ;;  %v20049_v29 = vld [vmem:[%s27573_s1 + $0xf0] sm:$0xff]   ;;  %v20050_v38 = vld [vmem:[%s27573_s1 + $0xf8] sm:$0xff]  }
  0xa8   :  { %17715 = vmatprep.subr.bf16.mxu0 %v20037_v47  ;;  %v20949_v63 = vpack.c.bf16 %v71_v60, %v70_v59  ;;  %v934_v59 = vld [vmem:[%s27572_s0 + $0x52] sm:$0xff]  ;;  %v935_v60 = vld [vmem:[%s27572_s0 + $0x62] sm:$0xff]  ;;  %v941_v20 = vld [vmem:[%s27572_s0 + $0xaa] sm:$0xff] }
  0xa9   :  { %v944_v28 = vld [vmem:[%s27572_s0 + $0xca] sm:$0xff]  ;;  %v21127_v32 = vpack.c.bf16 %v942_v21, %v941_v20  ;;  %v948_v44 = vld [vmem:[%s27572_s0 + $0xfa] sm:$0xff]  ;;  %v958_v20 = vld [vmem:[%s27572_s0 + $0x172] sm:$0xff] }
  0xaa   :  { %17652 = vmatmul.mubr.bf16.gmra.mrb[4].mxu0 %v20769_v0  ;;  %v21129_v35 = vpack.c.bf16 %v944_v28, %v943_v27  ;;  %v21151_v45 = vld [vmem:[%s27573_s1 + $0x100] sm:$0xff]   ;;  %v959_v21 = vld [vmem:[%s27572_s0 + $0x1b2] sm:$0xff]  ;;  %vm22855_vm3 = vmor %vm5245_vm0, %vm5246_vm1 }
  0xab   :  { %17655 = vmatprep.mubr.bf16.mxu0 %v20771_v1  ;;  %17716 = vmatpush3.bf16.msra.mxu0 %v20037_v47  ;;  %v20951_v47 = vpack.c.bf16 %v73_v62, %v72_v61  ;;  %v936_v61 = vld [vmem:[%s27572_s0 + $0x6a] sm:$0xff]  ;;  %v21079_v62 = vpack.c.bf16 %v934_v59, %v933_v54  ;;  %v950_v54 = vld [vmem:[%s27572_s0 + $0x112] sm:$0xff]  ;;  %v951_v59 = vld [vmem:[%s27572_s0 + $0x122] sm:$0xff] }
  0xac   :  { %17717 = vmatprep.subr.bf16.mxu0 %v20038_v2  ;;  %v960_v27 = vld [vmem:[%s27572_s0 + $0x1ba] sm:$0xff]  ;;  %vm22871_vm4 = vmand %vm5896_vm2, %vm5245_vm0 }
  0xad   :  { %vm23972_vm7 = vmand %vm5889_vm5, %vm5890_vm6 }
  0xae   :  { %vm24320_vm10 = vmor %vm6230_vm8, %vm6231_vm9 }
  0xaf   :  { %17718 = vmatpush3.bf16.msra.mxu0 %v20038_v2  ;;  %v74_v2 = vld [vmem:[%s27572_s0 + $0x258] sm:$0xff]  ;;  %vm24737_vm13 = vmor %vm8108_vm11, %vm8109_vm12 }
  0xb0   :  { %17719 = vmatprep.subr.bf16.mxu0 %v20039_v7  ;;  %v20967_v6 = vpack.c.bf16 %v75_v3, %v74_v2  ;;  %v21081_v2 = vpack.c.bf16 %v936_v61, %v935_v60  ;;  %v20046_v3 = vld [vmem:[%s27573_s1 + $0xd8] sm:$0xff]   ;;  %v952_v60 = vld [vmem:[%s27572_s0 + $0x12a] sm:$0xff] }
  0xb2   :  { %17656 = vmatmul.mubr.bf16.gmra.mrb[8].mxu0 %v20793_v8 }
  0xb3   :  { %17659 = vmatprep.mubr.bf16.mxu0 %v20795_v9  ;;  %17720 = vmatpush3.bf16.msra.mxu0 %v20039_v7  ;;  %v20969_v7 = vpack.c.bf16 %v77_v5, %v76_v4  ;;  %v937_v4 = vld [vmem:[%s27572_s0 + $0x7a] sm:$0xff]  ;;  %v938_v5 = vld [vmem:[%s27572_s0 + $0x82] sm:$0xff] }
  0xb4   :  { %17721 = vmatprep.subr.bf16.mxu0 %v20040_v10 }
  0xb7   :  { %17722 = vmatpush3.bf16.msra.mxu0 %v20040_v10  ;;  %v78_v10 = vld [vmem:[%s27572_s0 + $0x288] sm:$0xff] }
  0xb8   :  { %17723 = vmatprep.subr.bf16.mxu0 %v20041_v15  ;;  %v20985_v14 = vpack.c.bf16 %v79_v11, %v78_v10  ;;  %v939_v10 = vld [vmem:[%s27572_s0 + $0x92] sm:$0xff]  ;;  %v940_v11 = vld [vmem:[%s27572_s0 + $0x9a] sm:$0xff] }
  0xba   :  { %17660 = vmatmul.mubr.bf16.gmra.mrb[12].mxu0 %v20817_v16 }
  0xbb   :  { %17663 = vmatprep.mubr.bf16.mxu0 %v20819_v17  ;;  %17724 = vmatpush3.bf16.msra.mxu0 %v20041_v15  ;;  %v20987_v15 = vpack.c.bf16 %v81_v13, %v80_v12  ;;  %v20047_v12 = vld [vmem:[%s27573_s1 + $0xe0] sm:$0xff]   ;;  %v21103_v13 = vpack.c.bf16 %v938_v5, %v937_v4  ;;  %v955_v5 = vld [vmem:[%s27572_s0 + $0x152] sm:$0xff] }
  0xbc   :  { %17725 = vmatprep.subr.bf16.mxu0 %v20042_v18  ;;  %v954_v4 = vld [vmem:[%s27572_s0 + $0x142] sm:$0xff] }
  0xbf   :  { %17726 = vmatpush3.bf16.msra.mxu0 %v20042_v18  ;;  %v82_v18 = vld [vmem:[%s27572_s0 + $0x2b8] sm:$0xff] }
  0xc0   :  { %17791 = vmatprep.subr.bf16.mxu0 %v20841_v23  ;;  %v21003_v22 = vpack.c.bf16 %v83_v19, %v82_v18  ;;  %v21105_v18 = vpack.c.bf16 %v940_v11, %v939_v10  ;;  %v20048_v19 = vld [vmem:[%s27573_s1 + $0xe8] sm:$0xff]   ;;  %v956_v10 = vld [vmem:[%s27572_s0 + $0x15a] sm:$0xff] }
  0xc2   :  { %17664 = vmatmul.mubr.bf16.gmra.mrb[16].mxu0 %v20843_v24 }
  0xc3   :  { %17667 = vmatprep.mubr.bf16.mxu0 %v20845_v25 }
  0xca   :  { %17668 = vmatmul.mubr.bf16.gmra.mrb[20].mxu0 %v20862_v30 }
  0xcb   :  { %17671 = vmatprep.mubr.bf16.mxu0 %v20864_v31 }
  0xd2   :  { %17672 = vmatmul.mubr.bf16.gmra.mrb[24].mxu0 %v20880_v36 }
  0xd3   :  { %17675 = vmatprep.mubr.bf16.mxu0 %v20882_v37 }
  0xda   :  { %17676 = vmatmul.mubr.bf16.gmra.mrb[28].mxu0 %v20898_v42 }
  0xdb   :  { %17679 = vmatprep.mubr.bf16.mxu0 %v108_v43  ;;  %v991_v43 = vpack.c.bf16 %v928_v40, %v927_v39  ;;  %v945_v39 = vld [vmem:[%s27572_s0 + $0xda] sm:$0xff]  ;;  %v946_v40 = vld [vmem:[%s27572_s0 + $0xe2] sm:$0xff] }
  0xdc   :  { %v21153_v46 = vpack.c.bf16 %v946_v40, %v945_v39  ;;  %v962_v39 = vld [vmem:[%s27572_s0 + $0x1d2] sm:$0xff]  ;;  %v963_v40 = vld [vmem:[%s27572_s0 + $0x1e2] sm:$0xff] }
  0xe2   :  { %17680 = vmatmul.mubr.bf16.gmra.mrb[32].mxu0 %v20913_v49 }
  0xe3   :  { %17683 = vmatprep.mubr.bf16.mxu0 %v20915_v50 }
  0xea   :  { %17684 = vmatmul.mubr.bf16.gmra.mrb[36].mxu0 %v20931_v55 }
  0xeb   :  { %17687 = vmatprep.mubr.bf16.mxu0 %v20933_v56 }
  0xf2   :  { %17688 = vmatmul.mubr.bf16.gmra.mrb[40].mxu0 %v20949_v63 }
  0xf3   :  { %17691 = vmatprep.mubr.bf16.mxu0 %v20951_v47 }
  0xfa   :  { %17692 = vmatmul.mubr.bf16.gmra.mrb[44].mxu0 %v20967_v6 }
  0xfb   :  { %17695 = vmatprep.mubr.bf16.mxu0 %v20969_v7 }
 0x102   :  { %17696 = vmatmul.mubr.bf16.gmra.mrb[48].mxu0 %v20985_v14 }
 0x103   :  { %17699 = vmatprep.mubr.bf16.mxu0 %v20987_v15 }
 0x10a   :  { %17700 = vmatmul.mubr.bf16.gmra.mrb[52].mxu0 %v21003_v22 }
 0x10b   :  { %17703 = vmatprep.mubr.bf16.mxu0 %v21005_v26 }
 0x112   :  { %17704 = vmatmul.mubr.bf16.gmra.mrb[56].mxu0 %v21021_v33 }
 0x113   :  { %17707 = vmatprep.mubr.bf16.mxu0 %v21023_v34 }
 0x11a   :  { %17708 = vmatmul.mubr.bf16.gmra.mrb[60].mxu0 %v21039_v41 }
 0x11b   :  { %17727 = vmatprep.mubr.bf16.mxu0 %v991_v43  ;;  %v947_v43 = vld [vmem:[%s27572_s0 + $0xf2] sm:$0xff] }
 0x11c   :  { %v21155_v48 = vpack.c.bf16 %v948_v44, %v947_v43  ;;  %v964_v43 = vld [vmem:[%s27572_s0 + $0x1ea] sm:$0xff] }
 0x122   :  { %17728 = vmatmul.mubr.bf16.vlgmr.msra.gmra.mrb[0].mxu0 %v21054_v51 }
 0x123   :  { %17792 = vmatpush3.bf16.msra.mxu0 %v20841_v23  ;;  %17731 = vmatprep.mubr.bf16.mxu0 %v21056_v52  ;;  %v20045_v23 = vld [vmem:[%s27573_s1 + $0xd0] sm:$0xff]  }
 0x124   :  { %17793 = vmatprep.subr.bf16.mxu0 %v20044_v53 }
 0x127   :  { %17794 = vmatpush3.bf16.msra.mxu0 %v20044_v53  ;;  %v949_v53 = vld [vmem:[%s27572_s0 + $0x10a] sm:$0xff] }
 0x128   :  { %17795 = vmatprep.subr.bf16.mxu0 %v20045_v23  ;;  %v21172_v61 = vpack.c.bf16 %v950_v54, %v949_v53  ;;  %v21225_v53 = vpack.c.bf16 %v964_v43, %v963_v40  ;;  %v965_v54 = vld [vmem:[%s27572_s0 + $0x1fa] sm:$0xff]  ;;  %v975_v40 = vld [vmem:[%s27572_s0 + $0x272] sm:$0xff] }
 0x129   :  { %v976_v43 = vld [vmem:[%s27572_s0 + $0x27a] sm:$0xff] }
 0x12a   :  { %17732 = vmatmul.mubr.bf16.gmra.mrb[4].mxu0 %v21079_v62 }
 0x12b   :  { %17735 = vmatprep.mubr.bf16.mxu0 %v21081_v2  ;;  %17796 = vmatpush3.bf16.msra.mxu0 %v20045_v23  ;;  %v21174_v23 = vpack.c.bf16 %v952_v60, %v951_v59  ;;  %v966_v59 = vld [vmem:[%s27572_s0 + $0x202] sm:$0xff]  ;;  %v967_v60 = vld [vmem:[%s27572_s0 + $0x212] sm:$0xff] }
 0x12c   :  { %17797 = vmatprep.subr.bf16.mxu0 %v20046_v3 }
 0x12f   :  { %17798 = vmatpush3.bf16.msra.mxu0 %v20046_v3  ;;  %v953_v3 = vld [vmem:[%s27572_s0 + $0x13a] sm:$0xff] }
 0x130   :  { %17799 = vmatprep.subr.bf16.mxu0 %v20047_v12  ;;  %v21190_v11 = vpack.c.bf16 %v954_v4, %v953_v3  ;;  %v968_v3 = vld [vmem:[%s27572_s0 + $0x21a] sm:$0xff]  ;;  %v21241_v4 = vpack.c.bf16 %v966_v59, %v965_v54  ;;  %v21279_v59 = vpack.c.bf16 %v976_v43, %v975_v40  ;;  %v983_v40 = vld [vmem:[%s27572_s0 + $0x2d2] sm:$0xff] }
 0x131   :  { %v984_v43 = vld [vmem:[%s27572_s0 + $0x2da] sm:$0xff] }
 0x132   :  { %17736 = vmatmul.mubr.bf16.gmra.mrb[8].mxu0 %v21103_v13 }
 0x133   :  { %17739 = vmatprep.mubr.bf16.mxu0 %v21105_v18  ;;  %17800 = vmatpush3.bf16.msra.mxu0 %v20047_v12  ;;  %v21192_v12 = vpack.c.bf16 %v956_v10, %v955_v5  ;;  %v21243_v5 = vpack.c.bf16 %v968_v3, %v967_v60  ;;  %v969_v10 = vld [vmem:[%s27572_s0 + $0x22a] sm:$0xff]  ;;  %v978_v3 = vld [vmem:[%s27572_s0 + $0x292] sm:$0xff] }
 0x134   :  { %17801 = vmatprep.subr.bf16.mxu0 %v20048_v19  ;;  %v977_v60 = vld [vmem:[%s27572_s0 + $0x28a] sm:$0xff] }
 0x137   :  { %17802 = vmatpush3.bf16.msra.mxu0 %v20048_v19  ;;  %v957_v19 = vld [vmem:[%s27572_s0 + $0x16a] sm:$0xff] }
 0x138   :  { %17803 = vmatprep.subr.bf16.mxu0 %v20049_v29  ;;  %v21208_v28 = vpack.c.bf16 %v958_v20, %v957_v19  ;;  %v970_v19 = vld [vmem:[%s27572_s0 + $0x232] sm:$0xff]  ;;  %v971_v20 = vld [vmem:[%s27572_s0 + $0x242] sm:$0xff] }
 0x13a   :  { %17740 = vmatmul.mubr.bf16.gmra.mrb[12].mxu0 %v21127_v32 }
 0x13b   :  { %17743 = vmatprep.mubr.bf16.mxu0 %v21129_v35  ;;  %17804 = vmatpush3.bf16.msra.mxu0 %v20049_v29  ;;  %v1007_v29 = vpack.c.bf16 %v960_v27, %v959_v21  ;;  %v972_v21 = vld [vmem:[%s27572_s0 + $0x24a] sm:$0xff]  ;;  %v21259_v27 = vpack.c.bf16 %v970_v19, %v969_v10  ;;  %v979_v10 = vld [vmem:[%s27572_s0 + $0x2a2] sm:$0xff] }
 0x13c   :  { %17805 = vmatprep.subr.bf16.mxu0 %v20050_v38  ;;  %v980_v19 = vld [vmem:[%s27572_s0 + $0x2aa] sm:$0xff] }
 0x13f   :  { %17806 = vmatpush3.bf16.msra.mxu0 %v20050_v38  ;;  %v961_v38 = vld [vmem:[%s27572_s0 + $0x1ca] sm:$0xff] }
 0x140   :  { %17871 = vmatprep.subr.bf16.mxu0 %v21151_v45  ;;  %v21223_v44 = vpack.c.bf16 %v962_v39, %v961_v38  ;;  %v973_v38 = vld [vmem:[%s27572_s0 + $0x25a] sm:$0xff]  ;;  %v974_v39 = vld [vmem:[%s27572_s0 + $0x262] sm:$0xff] }
 0x141   :  { %v21277_v54 = vpack.c.bf16 %v974_v39, %v973_v38  ;;  %v981_v38 = vld [vmem:[%s27572_s0 + $0x2ba] sm:$0xff]  ;;  %v982_v39 = vld [vmem:[%s27572_s0 + $0x2c2] sm:$0xff] }
 0x142   :  { %17744 = vmatmul.mubr.bf16.gmra.mrb[16].mxu0 %v21153_v46 }
 0x143   :  { %17747 = vmatprep.mubr.bf16.mxu0 %v21155_v48 }
 0x14a   :  { %17748 = vmatmul.mubr.bf16.gmra.mrb[20].mxu0 %v21172_v61 }
 0x14b   :  { %17751 = vmatprep.mubr.bf16.mxu0 %v21174_v23 }
 0x152   :  { %17752 = vmatmul.mubr.bf16.gmra.mrb[24].mxu0 %v21190_v11 }
 0x153   :  { %17755 = vmatprep.mubr.bf16.mxu0 %v21192_v12 }
 0x15a   :  { %17756 = vmatmul.mubr.bf16.gmra.mrb[28].mxu0 %v21208_v28 }
 0x15b   :  { %17759 = vmatprep.mubr.bf16.mxu0 %v1007_v29  ;;  %v21261_v29 = vpack.c.bf16 %v972_v21, %v971_v20  ;;  %v21295_v20 = vpack.c.bf16 %v978_v3, %v977_v60  ;;  %v21297_v21 = vpack.c.bf16 %v980_v19, %v979_v10  ;;  %v21313_v60 = vpack.c.bf16 %v982_v39, %v981_v38  ;;  %v985_v10 = vld [vmem:[%s27572_s0 + $0x2ea] sm:$0xff]  ;;  %v986_v19 = vld [vmem:[%s27572_s0 + $0x2f2] sm:$0xff] }
 0x15c   :  { %v21315_v3 = vpack.c.bf16 %v984_v43, %v983_v40  ;;  %v988_v38 = vld [vmem:[%s27572_s0 + $0x30a] sm:$0xff]  ;;  %v21331_v39 = vpack.c.bf16 %v986_v19, %v985_v10  ;;  %v989_v43 = vld [vmem:[%s27572_s0 + $0x31a] sm:$0xff] }
 0x15d   :  { %27701 = vst [vmem:[#allocation6_spill] sm:$0xff] %v21297_v21  ;;  %27702 = vst [vmem:[#allocation7_spill] sm:$0xff] %v21313_v60  ;;  %v15626_v10 = vld [vmem:[%s27572_s0 + $0x99] sm:$0xff]  ;;  %v15627_v19 = vld [vmem:[%s27572_s0 + $0xa9] sm:$0xff] }
 0x15e   :  { %27703 = vst [vmem:[#allocation8_spill] sm:$0xff] %v21315_v3 }
 0x162   :  { %17760 = vmatmul.mubr.bf16.gmra.mrb[32].mxu0 %v21223_v44 }
 0x163   :  { %17763 = vmatprep.mubr.bf16.mxu0 %v21225_v53 }
 0x16a   :  { %17764 = vmatmul.mubr.bf16.gmra.mrb[36].mxu0 %v21241_v4 }
 0x16b   :  { %17767 = vmatprep.mubr.bf16.mxu0 %v21243_v5 }
 0x172   :  { %17768 = vmatmul.mubr.bf16.gmra.mrb[40].mxu0 %v21259_v27 }
 0x173   :  { %17771 = vmatprep.mubr.bf16.mxu0 %v21261_v29 }
 0x17a   :  { %17772 = vmatmul.mubr.bf16.gmra.mrb[44].mxu0 %v21277_v54 }
 0x17b   :  { %17775 = vmatprep.mubr.bf16.mxu0 %v21279_v59 }
 0x182   :  { %17776 = vmatmul.mubr.bf16.gmra.mrb[48].mxu0 %v21295_v20 }
 0x183   :  { %17779 = vmatprep.mubr.bf16.mxu0 %v21297_v21  ;;  %v987_v21 = vld [vmem:[%s27572_s0 + $0x302] sm:$0xff] }
 0x184   :  { %v21333_v40 = vpack.c.bf16 %v988_v38, %v987_v21  ;;  %v20052_v21 = vld [vmem:[%s27573_s1 + $0x108] sm:$0xff]   ;;  %v15628_v38 = vld [vmem:[%s27572_s0 + $0xb1] sm:$0xff] }
 0x18a   :  { %17780 = vmatmul.mubr.bf16.gmra.mrb[52].mxu0 %v21313_v60 }
 0x18b   :  { %17783 = vmatprep.mubr.bf16.mxu0 %v21315_v3  ;;  %v990_v3 = vld [vmem:[%s27572_s0 + $0x322] sm:$0xff] }
 0x18c   :  { %v21343_v60 = vpack.c.bf16 %v990_v3, %v989_v43  ;;  %v20053_v3 = vld [vmem:[%s27573_s1 + $0x110] sm:$0xff]   ;;  %v20063_v43 = vld [vmem:[%s27573_s1 + $0x160] sm:$0xff]  }
 0x192   :  { %17784 = vmatmul.mubr.bf16.gmra.mrb[56].mxu0 %v21331_v39 }
 0x193   :  { %17787 = vmatprep.mubr.bf16.mxu0 %v21333_v40 }
 0x19a   :  { %17788 = vmatmul.mubr.bf16.gmra.mrb[60].mxu0 %v21343_v60 }
 0x19b   :  { %17807 = vmatprep.mubr.bf16.mxu0 %v20744_v57  ;;  %v20054_v57 = vld [vmem:[%s27573_s1 + $0x118] sm:$0xff]  }
 0x1a2   :  { %17808 = vmatmul.mubr.bf16.vlgmr.msra.gmra.mrb[0].mxu0 %v20746_v58  ;;  %v20055_v58 = vld [vmem:[%s27573_s1 + $0x120] sm:$0xff]  }
 0x1a3   :  { %17872 = vmatpush3.bf16.msra.mxu0 %v21151_v45  ;;  %17811 = vmatprep.mubr.bf16.mxu0 %v20769_v0  ;;  %v20056_v0 = vld [vmem:[%s27573_s1 + $0x128] sm:$0xff]   ;;  %v15625_v45 = vld [vmem:[%s27572_s0 + $0x91] sm:$0xff] }
 0x1a4   :  { %17873 = vmatprep.subr.bf16.mxu0 %v20052_v21 }
 0x1a7   :  { %17874 = vmatpush3.bf16.msra.mxu0 %v20052_v21  ;;  %v21485_v21 = vpack.c.bf16 %v15626_v10, %v15625_v45  ;;  %v15643_v45 = vld [vmem:[%s27572_s0 + $0x169] sm:$0xff]  ;;  %v15644_v10 = vld [vmem:[%s27572_s0 + $0x171] sm:$0xff] }
 0x1a8   :  { %17875 = vmatprep.subr.bf16.mxu0 %v20053_v3 }
 0x1aa   :  { %17812 = vmatmul.mubr.bf16.gmra.mrb[4].mxu0 %v20771_v1  ;;  %v20057_v1 = vld [vmem:[%s27573_s1 + $0x130] sm:$0xff]  }
 0x1ab   :  { %17815 = vmatprep.mubr.bf16.mxu0 %v20793_v8  ;;  %17876 = vmatpush3.bf16.msra.mxu0 %v20053_v3  ;;  %v20058_v8 = vld [vmem:[%s27573_s1 + $0x138] sm:$0xff]   ;;  %v21487_v3 = vpack.c.bf16 %v15628_v38, %v15627_v19  ;;  %v21574_v38 = vpack.c.bf16 %v15644_v10, %v15643_v45  ;;  %v15657_v45 = vld [vmem:[%s27572_s0 + $0x241] sm:$0xff]  ;;  %v15658_v10 = vld [vmem:[%s27572_s0 + $0x249] sm:$0xff] }
 0x1ac   :  { %17877 = vmatprep.subr.bf16.mxu0 %v20054_v57 }
 0x1af   :  { %17878 = vmatpush3.bf16.msra.mxu0 %v20054_v57  ;;  %v20064_v57 = vld [vmem:[%s27573_s1 + $0x168] sm:$0xff]  }
 0x1b0   :  { %17879 = vmatprep.subr.bf16.mxu0 %v20055_v58 }
 0x1b2   :  { %17816 = vmatmul.mubr.bf16.gmra.mrb[8].mxu0 %v20795_v9  ;;  %v20059_v9 = vld [vmem:[%s27573_s1 + $0x140] sm:$0xff]  }
 0x1b3   :  { %17819 = vmatprep.mubr.bf16.mxu0 %v20817_v16  ;;  %17880 = vmatpush3.bf16.msra.mxu0 %v20055_v58  ;;  %v15557_v16 = vld [vmem:[%s27572_s0 + $0x180] sm:$0xff] }
 0x1b4   :  { %17881 = vmatprep.subr.bf16.mxu0 %v20056_v0  ;;  %v15629_v58 = vld [vmem:[%s27572_s0 + $0xc1] sm:$0xff] }
 0x1b7   :  { %17882 = vmatpush3.bf16.msra.mxu0 %v20056_v0  ;;  %v15630_v0 = vld [vmem:[%s27572_s0 + $0xc9] sm:$0xff] }
 0x1b8   :  { %17883 = vmatprep.subr.bf16.mxu0 %v20057_v1 }
 0x1ba   :  { %17820 = vmatmul.mubr.bf16.gmra.mrb[12].mxu0 %v20819_v17  ;;  %v15558_v17 = vld [vmem:[%s27572_s0 + $0x188] sm:$0xff] }
 0x1bb   :  { %17823 = vmatprep.mubr.bf16.mxu0 %v20843_v24  ;;  %17884 = vmatpush3.bf16.msra.mxu0 %v20057_v1  ;;  %v21392_v24 = vpack.c.bf16 %v15558_v17, %v15557_v16  ;;  %v15631_v1 = vld [vmem:[%s27572_s0 + $0xd9] sm:$0xff]  ;;  %v21509_v16 = vpack.c.bf16 %v15630_v0, %v15629_v58  ;;  %v15647_v58 = vld [vmem:[%s27572_s0 + $0x1c9] sm:$0xff]  ;;  %v15648_v0 = vld [vmem:[%s27572_s0 + $0x1d1] sm:$0xff] }
 0x1bc   :  { %17885 = vmatprep.subr.bf16.mxu0 %v20058_v8 }
 0x1bf   :  { %17886 = vmatpush3.bf16.msra.mxu0 %v20058_v8  ;;  %v15632_v8 = vld [vmem:[%s27572_s0 + $0xe1] sm:$0xff] }
 0x1c0   :  { %17951 = vmatprep.subr.bf16.mxu0 %v20059_v9  ;;  %v21511_v17 = vpack.c.bf16 %v15632_v8, %v15631_v1  ;;  %v2036_v8 = vpack.c.bf16 %v15648_v0, %v15647_v58  ;;  %v21641_v58 = vpack.c.bf16 %v15658_v10, %v15657_v45  ;;  %v15668_v45 = vld [vmem:[%s27572_s0 + $0x2c1] sm:$0xff] }
 0x1c2   :  { %17824 = vmatmul.mubr.bf16.gmra.mrb[16].mxu0 %v20845_v25  ;;  %v15589_v25 = vld [vmem:[%s27572_s0 + $0x330] sm:$0xff] }
 0x1c3   :  { %17827 = vmatprep.mubr.bf16.mxu0 %v20862_v30  ;;  %v15590_v30 = vld [vmem:[%s27572_s0 + $0x338] sm:$0xff] }
 0x1ca   :  { %17828 = vmatmul.mubr.bf16.gmra.mrb[20].mxu0 %v20864_v31  ;;  %v15615_v31 = vld [vmem:[%s27572_s0 + $0x19] sm:$0xff] }
 0x1cb   :  { %17831 = vmatprep.mubr.bf16.mxu0 %v20880_v36  ;;  %v15616_v36 = vld [vmem:[%s27572_s0 + $0x21] sm:$0xff] }
 0x1d2   :  { %17832 = vmatmul.mubr.bf16.gmra.mrb[24].mxu0 %v20882_v37  ;;  %v21422_v37 = vpack.c.bf16 %v15590_v30, %v15589_v25  ;;  %v20066_v25 = vld [vmem:[%s27573_s1 + $0x178] sm:$0xff]  }
 0x1d3   :  { %17835 = vmatprep.mubr.bf16.mxu0 %v20898_v42  ;;  %v2020_v42 = vpack.c.bf16 %v15616_v36, %v15615_v31  ;;  %v15633_v30 = vld [vmem:[%s27572_s0 + $0xf1] sm:$0xff]  ;;  %v15634_v31 = vld [vmem:[%s27572_s0 + $0xf9] sm:$0xff]  ;;  %v15635_v36 = vld [vmem:[%s27572_s0 + $0x109] sm:$0xff] }
 0x1da   :  { %17836 = vmatmul.mubr.bf16.gmra.mrb[28].mxu0 %v21392_v24 }
 0x1db   :  { %17839 = vmatprep.mubr.bf16.mxu0 %v20913_v49  ;;  %v15617_v49 = vld [vmem:[%s27572_s0 + $0x31] sm:$0xff] }
 0x1e2   :  { %17840 = vmatmul.mubr.bf16.gmra.mrb[32].mxu0 %v20915_v50  ;;  %v15618_v50 = vld [vmem:[%s27572_s0 + $0x39] sm:$0xff] }
 0x1e3   :  { %17843 = vmatprep.mubr.bf16.mxu0 %v20931_v55  ;;  %v15619_v55 = vld [vmem:[%s27572_s0 + $0x49] sm:$0xff] }
 0x1ea   :  { %17844 = vmatmul.mubr.bf16.gmra.mrb[36].mxu0 %v20933_v56  ;;  %v15620_v56 = vld [vmem:[%s27572_s0 + $0x51] sm:$0xff] }
 0x1eb   :  { %17847 = vmatprep.mubr.bf16.mxu0 %v20949_v63  ;;  %v21437_v63 = vpack.c.bf16 %v15618_v50, %v15617_v49  ;;  %v21533_v49 = vld [vmem:[%s27573_s1 + $0x180] sm:$0xff]   ;;  %v21535_v50 = vpack.c.bf16 %v15634_v31, %v15633_v30 }
 0x1ec   :  { %v15651_v30 = vld [vmem:[%s27572_s0 + $0x1f9] sm:$0xff]  ;;  %v15652_v31 = vld [vmem:[%s27572_s0 + $0x201] sm:$0xff] }
 0x1f2   :  { %17848 = vmatmul.mubr.bf16.gmra.mrb[40].mxu0 %v20951_v47  ;;  %v21439_v47 = vpack.c.bf16 %v15620_v56, %v15619_v55  ;;  %v15637_v56 = vld [vmem:[%s27572_s0 + $0x121] sm:$0xff] }
 0x1f3   :  { %17851 = vmatprep.mubr.bf16.mxu0 %v20967_v6  ;;  %v20060_v6 = vld [vmem:[%s27573_s1 + $0x148] sm:$0xff]  }
 0x1fa   :  { %17852 = vmatmul.mubr.bf16.gmra.mrb[44].mxu0 %v20969_v7  ;;  %v15621_v7 = vld [vmem:[%s27572_s0 + $0x61] sm:$0xff] }
 0x1fb   :  { %17855 = vmatprep.mubr.bf16.mxu0 %v20985_v14  ;;  %v15622_v14 = vld [vmem:[%s27572_s0 + $0x69] sm:$0xff] }
 0x202   :  { %17856 = vmatmul.mubr.bf16.gmra.mrb[48].mxu0 %v20987_v15  ;;  %v15623_v15 = vld [vmem:[%s27572_s0 + $0x79] sm:$0xff] }
 0x203   :  { %17859 = vmatprep.mubr.bf16.mxu0 %v21003_v22  ;;  %v15624_v22 = vld [vmem:[%s27572_s0 + $0x81] sm:$0xff] }
 0x20a   :  { %17860 = vmatmul.mubr.bf16.gmra.mrb[52].mxu0 %v21005_v26  ;;  %v20061_v26 = vld [vmem:[%s27573_s1 + $0x150] sm:$0xff]  }
 0x20b   :  { %17863 = vmatprep.mubr.bf16.mxu0 %v21021_v33  ;;  %v21461_v33 = vpack.c.bf16 %v15622_v14, %v15621_v7  ;;  %v15639_v7 = vld [vmem:[%s27572_s0 + $0x139] sm:$0xff]  ;;  %v15640_v14 = vld [vmem:[%s27572_s0 + $0x141] sm:$0xff] }
 0x212   :  { %17864 = vmatmul.mubr.bf16.gmra.mrb[56].mxu0 %v21023_v34  ;;  %v21463_v34 = vpack.c.bf16 %v15624_v22, %v15623_v15  ;;  %v21556_v22 = vpack.c.bf16 %v15640_v14, %v15639_v7  ;;  %v15655_v7 = vld [vmem:[%s27572_s0 + $0x229] sm:$0xff]  ;;  %v15656_v14 = vld [vmem:[%s27572_s0 + $0x231] sm:$0xff] }
 0x213   :  { %17867 = vmatprep.mubr.bf16.mxu0 %v21039_v41  ;;  %v20062_v41 = vld [vmem:[%s27573_s1 + $0x158] sm:$0xff]  }
 0x21a   :  { %17868 = vmatmul.mubr.bf16.gmra.mrb[60].mxu0 %v21422_v37 }
 0x21b   :  { %17887 = vmatprep.mubr.bf16.mxu0 %v2020_v42  ;;  %v15636_v42 = vld [vmem:[%s27572_s0 + $0x111] sm:$0xff] }
 0x21c   :  { %v21537_v55 = vpack.c.bf16 %v15636_v42, %v15635_v36  ;;  %v21607_v42 = vpack.c.bf16 %v15652_v31, %v15651_v30  ;;  %v15664_v30 = vld [vmem:[%s27572_s0 + $0x291] sm:$0xff] }
 0x222   :  { %17888 = vmatmul.mubr.bf16.vlgmr.msra.gmra.mrb[0].mxu0 %v21437_v63 }
 0x223   :  { %17952 = vmatpush3.bf16.msra.mxu0 %v20059_v9  ;;  %17891 = vmatprep.mubr.bf16.mxu0 %v21439_v47  ;;  %v20065_v9 = vld [vmem:[%s27573_s1 + $0x170] sm:$0xff]  }
 0x224   :  { %17953 = vmatprep.subr.bf16.mxu0 %v20060_v6 }
 0x227   :  { %17954 = vmatpush3.bf16.msra.mxu0 %v20060_v6  ;;  %v15638_v6 = vld [vmem:[%s27572_s0 + $0x129] sm:$0xff] }
 0x228   :  { %17955 = vmatprep.subr.bf16.mxu0 %v20061_v26  ;;  %v21554_v15 = vpack.c.bf16 %v15638_v6, %v15637_v56  ;;  %v15653_v56 = vld [vmem:[%s27572_s0 + $0x211] sm:$0xff]  ;;  %v15654_v6 = vld [vmem:[%s27572_s0 + $0x219] sm:$0xff] }
 0x22a   :  { %17892 = vmatmul.mubr.bf16.gmra.mrb[4].mxu0 %v21461_v33 }
 0x22b   :  { %17895 = vmatprep.mubr.bf16.mxu0 %v21463_v34  ;;  %17956 = vmatpush3.bf16.msra.mxu0 %v20061_v26  ;;  %v15641_v26 = vld [vmem:[%s27572_s0 + $0x151] sm:$0xff] }
 0x22c   :  { %17957 = vmatprep.subr.bf16.mxu0 %v20062_v41 }
 0x22f   :  { %17958 = vmatpush3.bf16.msra.mxu0 %v20062_v41  ;;  %v15642_v41 = vld [vmem:[%s27572_s0 + $0x159] sm:$0xff] }
 0x230   :  { %17959 = vmatprep.subr.bf16.mxu0 %v20063_v43  ;;  %v21572_v19 = vpack.c.bf16 %v15642_v41, %v15641_v26  ;;  %v21623_v26 = vpack.c.bf16 %v15654_v6, %v15653_v56  ;;  %v21625_v41 = vpack.c.bf16 %v15656_v14, %v15655_v7  ;;  %v15665_v6 = vld [vmem:[%s27572_s0 + $0x2a1] sm:$0xff]  ;;  %v15666_v7 = vld [vmem:[%s27572_s0 + $0x2a9] sm:$0xff]  ;;  %v15667_v14 = vld [vmem:[%s27572_s0 + $0x2b9] sm:$0xff] }
 0x231   :  { %v21677_v10 = vpack.c.bf16 %v15666_v7, %v15665_v6  ;;  %v15673_v7 = vld [vmem:[%s27572_s0 + $0x301] sm:$0xff] }
 0x232   :  { %17896 = vmatmul.mubr.bf16.gmra.mrb[8].mxu0 %v21485_v21 }
 0x233   :  { %17899 = vmatprep.mubr.bf16.mxu0 %v21487_v3  ;;  %17960 = vmatpush3.bf16.msra.mxu0 %v20063_v43  ;;  %v15645_v43 = vld [vmem:[%s27572_s0 + $0x181] sm:$0xff] }
 0x234   :  { %17961 = vmatprep.subr.bf16.mxu0 %v20064_v57 }
 0x237   :  { %17962 = vmatpush3.bf16.msra.mxu0 %v20064_v57  ;;  %v15646_v57 = vld [vmem:[%s27572_s0 + $0x189] sm:$0xff] }
 0x238   :  { %17963 = vmatprep.subr.bf16.mxu0 %v20065_v9  ;;  %v21590_v1 = vpack.c.bf16 %v15646_v57, %v15645_v43  ;;  %v15659_v43 = vld [vmem:[%s27572_s0 + $0x259] sm:$0xff]  ;;  %v15660_v57 = vld [vmem:[%s27572_s0 + $0x261] sm:$0xff] }
 0x239   :  { %v21643_v0 = vpack.c.bf16 %v15660_v57, %v15659_v43  ;;  %v21679_v43 = vpack.c.bf16 %v15668_v45, %v15667_v14  ;;  %v15669_v57 = vld [vmem:[%s27572_s0 + $0x2d1] sm:$0xff]  ;;  %v15674_v14 = vld [vmem:[%s27572_s0 + $0x309] sm:$0xff]  ;;  %v15675_v45 = vld [vmem:[%s27572_s0 + $0x319] sm:$0xff] }
 0x23a   :  { %17900 = vmatmul.mubr.bf16.gmra.mrb[12].mxu0 %v21509_v16 }
 0x23b   :  { %17903 = vmatprep.mubr.bf16.mxu0 %v21511_v17  ;;  %17964 = vmatpush3.bf16.msra.mxu0 %v20065_v9  ;;  %v15649_v9 = vld [vmem:[%s27572_s0 + $0x1e1] sm:$0xff] }
 0x23c   :  { %17965 = vmatprep.subr.bf16.mxu0 %v20066_v25 }
 0x23f   :  { %17966 = vmatpush3.bf16.msra.mxu0 %v20066_v25  ;;  %v15650_v25 = vld [vmem:[%s27572_s0 + $0x1e9] sm:$0xff] }
 0x240   :  { %18031 = vmatprep.subr.bf16.mxu0 %v21533_v49  ;;  %v21605_v36 = vpack.c.bf16 %v15650_v25, %v15649_v9  ;;  %v15662_v9 = vld [vmem:[%s27572_s0 + $0x279] sm:$0xff]  ;;  %v15663_v25 = vld [vmem:[%s27572_s0 + $0x289] sm:$0xff] }
 0x241   :  { %v21661_v56 = vpack.c.bf16 %v15664_v30, %v15663_v25  ;;  %v15672_v25 = vld [vmem:[%s27572_s0 + $0x2f1] sm:$0xff] }
 0x242   :  { %17904 = vmatmul.mubr.bf16.gmra.mrb[16].mxu0 %v21535_v50 }
 0x243   :  { %17907 = vmatprep.mubr.bf16.mxu0 %v21537_v55 }
 0x24a   :  { %17908 = vmatmul.mubr.bf16.gmra.mrb[20].mxu0 %v21554_v15 }
 0x24b   :  { %17911 = vmatprep.mubr.bf16.mxu0 %v21556_v22 }
 0x252   :  { %17912 = vmatmul.mubr.bf16.gmra.mrb[24].mxu0 %v21572_v19 }
 0x253   :  { %17915 = vmatprep.mubr.bf16.mxu0 %v21574_v38 }
 0x25a   :  { %17916 = vmatmul.mubr.bf16.gmra.mrb[28].mxu0 %v21590_v1 }
 0x25b   :  { %17919 = vmatprep.mubr.bf16.mxu0 %v2036_v8  ;;  %v15661_v8 = vld [vmem:[%s27572_s0 + $0x271] sm:$0xff] }
 0x25c   :  { %v21659_v31 = vpack.c.bf16 %v15662_v9, %v15661_v8  ;;  %v15670_v8 = vld [vmem:[%s27572_s0 + $0x2d9] sm:$0xff]  ;;  %v15671_v9 = vld [vmem:[%s27572_s0 + $0x2e9] sm:$0xff] }
 0x25d   :  { %v21695_v30 = vpack.c.bf16 %v15670_v8, %v15669_v57  ;;  %v21697_v6 = vpack.c.bf16 %v15672_v25, %v15671_v9  ;;  %v15676_v57 = vld [vmem:[%s27572_s0 + $0x321] sm:$0xff]  ;;  %v21713_v8 = vpack.c.bf16 %v15674_v14, %v15673_v7  ;;  %v15677_v25 = vld [vmem:[%s27572_s0 + $0x331] sm:$0xff] }
 0x25e   :  { %v21715_v9 = vpack.c.bf16 %v15676_v57, %v15675_v45  ;;  %v20068_v7 = vld [vmem:[%s27573_s1 + $0x188] sm:$0xff]   ;;  %v15800_v14 = vld [vmem:[%s27572_s0 + $0x98] sm:$0xff]  ;;  %v20077_v45 = vld [vmem:[%s27573_s1 + $0x1d0] sm:$0xff]  }
 0x25f   :  { %27704 = vst [vmem:[#allocation9_spill] sm:$0xff] %v21695_v30  ;;  %27705 = vst [vmem:[#allocation10_spill] sm:$0xff] %v21697_v6 }
 0x262   :  { %17920 = vmatmul.mubr.bf16.gmra.mrb[32].mxu0 %v21605_v36 }
 0x263   :  { %17923 = vmatprep.mubr.bf16.mxu0 %v21607_v42 }
 0x26a   :  { %17924 = vmatmul.mubr.bf16.gmra.mrb[36].mxu0 %v21623_v26 }
 0x26b   :  { %17927 = vmatprep.mubr.bf16.mxu0 %v21625_v41 }
 0x272   :  { %17928 = vmatmul.mubr.bf16.gmra.mrb[40].mxu0 %v21641_v58 }
 0x273   :  { %17931 = vmatprep.mubr.bf16.mxu0 %v21643_v0 }
 0x27a   :  { %17932 = vmatmul.mubr.bf16.gmra.mrb[44].mxu0 %v21659_v31 }
 0x27b   :  { %17935 = vmatprep.mubr.bf16.mxu0 %v21661_v56 }
 0x282   :  { %17936 = vmatmul.mubr.bf16.gmra.mrb[48].mxu0 %v21677_v10 }
 0x283   :  { %17939 = vmatprep.mubr.bf16.mxu0 %v21679_v43 }
 0x28a   :  { %17940 = vmatmul.mubr.bf16.gmra.mrb[52].mxu0 %v21695_v30 }
 0x28b   :  { %17943 = vmatprep.mubr.bf16.mxu0 %v21697_v6  ;;  %v15678_v6 = vld [vmem:[%s27572_s0 + $0x339] sm:$0xff] }
 0x28c   :  { %v21725_v30 = vpack.c.bf16 %v15678_v6, %v15677_v25  ;;  %v20069_v6 = vld [vmem:[%s27573_s1 + $0x190] sm:$0xff]  }
 0x292   :  { %17944 = vmatmul.mubr.bf16.gmra.mrb[56].mxu0 %v21713_v8 }
 0x293   :  { %17947 = vmatprep.mubr.bf16.mxu0 %v21715_v9 }
 0x29a   :  { %17948 = vmatmul.mubr.bf16.gmra.mrb[60].mxu0 %v21725_v30 }
 0x29b   :  { %17967 = vmatprep.mubr.bf16.mxu0 %v21054_v51  ;;  %v20070_v51 = vld [vmem:[%s27573_s1 + $0x198] sm:$0xff]  }
 0x2a2   :  { %17968 = vmatmul.mubr.bf16.vlgmr.msra.gmra.mrb[0].mxu0 %v21056_v52  ;;  %v20071_v52 = vld [vmem:[%s27573_s1 + $0x1a0] sm:$0xff]  }
 0x2a3   :  { %18032 = vmatpush3.bf16.msra.mxu0 %v21533_v49  ;;  %17971 = vmatprep.mubr.bf16.mxu0 %v21079_v62  ;;  %v20072_v62 = vld [vmem:[%s27573_s1 + $0x1a8] sm:$0xff]   ;;  %v15799_v49 = vld [vmem:[%s27572_s0 + $0x90] sm:$0xff] }
 0x2a4   :  { %18033 = vmatprep.subr.bf16.mxu0 %v20068_v7  ;;  %v3053_v25 = vpack.c.bf16 %v15800_v14, %v15799_v49  ;;  %v15816_v49 = vld [vmem:[%s27572_s0 + $0x158] sm:$0xff] }
 0x2a7   :  { %18034 = vmatpush3.bf16.msra.mxu0 %v20068_v7  ;;  %v20078_v7 = vld [vmem:[%s27573_s1 + $0x1d8] sm:$0xff]  }
 0x2a8   :  { %18035 = vmatprep.subr.bf16.mxu0 %v20069_v6 }
 0x2aa   :  { %17972 = vmatmul.mubr.bf16.gmra.mrb[4].mxu0 %v21081_v2  ;;  %v20073_v2 = vld [vmem:[%s27573_s1 + $0x1b0] sm:$0xff]  }
 0x2ab   :  { %17975 = vmatprep.mubr.bf16.mxu0 %v21103_v13  ;;  %18036 = vmatpush3.bf16.msra.mxu0 %v20069_v6  ;;  %v20074_v13 = vld [vmem:[%s27573_s1 + $0x1b8] sm:$0xff]   ;;  %v15801_v6 = vld [vmem:[%s27572_s0 + $0xa8] sm:$0xff] }
 0x2ac   :  { %18037 = vmatprep.subr.bf16.mxu0 %v20070_v51 }
 0x2af   :  { %18038 = vmatpush3.bf16.msra.mxu0 %v20070_v51  ;;  %v15802_v51 = vld [vmem:[%s27572_s0 + $0xb0] sm:$0xff] }
 0x2b0   :  { %18039 = vmatprep.subr.bf16.mxu0 %v20071_v52 }
 0x2b2   :  { %17976 = vmatmul.mubr.bf16.gmra.mrb[8].mxu0 %v21105_v18  ;;  %v20075_v18 = vld [vmem:[%s27573_s1 + $0x1c0] sm:$0xff]  }
 0x2b3   :  { %17979 = vmatprep.mubr.bf16.mxu0 %v21127_v32  ;;  %18040 = vmatpush3.bf16.msra.mxu0 %v20071_v52  ;;  %v15733_v32 = vld [vmem:[%s27572_s0 + $0x182] sm:$0xff] }
 0x2b4   :  { %18041 = vmatprep.subr.bf16.mxu0 %v20072_v62  ;;  %v15803_v52 = vld [vmem:[%s27572_s0 + $0xc0] sm:$0xff] }
 0x2b7   :  { %18042 = vmatpush3.bf16.msra.mxu0 %v20072_v62  ;;  %v15804_v62 = vld [vmem:[%s27572_s0 + $0xc8] sm:$0xff] }
 0x2b8   :  { %18043 = vmatprep.subr.bf16.mxu0 %v20073_v2 }
 0x2ba   :  { %17980 = vmatmul.mubr.bf16.gmra.mrb[12].mxu0 %v21129_v35  ;;  %v15734_v35 = vld [vmem:[%s27572_s0 + $0x18a] sm:$0xff] }
 0x2bb   :  { %17983 = vmatprep.mubr.bf16.mxu0 %v21153_v46  ;;  %18044 = vmatpush3.bf16.msra.mxu0 %v20073_v2  ;;  %v21774_v46 = vpack.c.bf16 %v15734_v35, %v15733_v32  ;;  %v20079_v2 = vld [vmem:[%s27573_s1 + $0x1e0] sm:$0xff]   ;;  %v20080_v32 = vld [vmem:[%s27573_s1 + $0x1e8] sm:$0xff]   ;;  %v15805_v35 = vld [vmem:[%s27572_s0 + $0xd8] sm:$0xff] }
 0x2bc   :  { %18045 = vmatprep.subr.bf16.mxu0 %v20074_v13 }
 0x2bf   :  { %18046 = vmatpush3.bf16.msra.mxu0 %v20074_v13  ;;  %v3054_v13 = vpack.c.bf16 %v15802_v51, %v15801_v6  ;;  %v15821_v6 = vld [vmem:[%s27572_s0 + $0x198] sm:$0xff]  ;;  %v15822_v51 = vld [vmem:[%s27572_s0 + $0x1a0] sm:$0xff] }
 0x2c0   :  { %18111 = vmatprep.subr.bf16.mxu0 %v20075_v18 }
 0x2c2   :  { %17984 = vmatmul.mubr.bf16.gmra.mrb[16].mxu0 %v21155_v48  ;;  %v27706_v48 = vld [vmem:[#allocation6_spill] sm:$0xff] }
 0x2c3   :  { %17987 = vmatprep.mubr.bf16.mxu0 %v21172_v61  ;;  %v27707_v61 = vld [vmem:[#allocation7_spill] sm:$0xff] }
 0x2ca   :  { %17988 = vmatmul.mubr.bf16.gmra.mrb[20].mxu0 %v21174_v23  ;;  %v27708_v23 = vld [vmem:[#allocation8_spill] sm:$0xff] }
 0x2cb   :  { %17991 = vmatprep.mubr.bf16.mxu0 %v21190_v11  ;;  %v15765_v11 = vld [vmem:[%s27572_s0 + $0x332] sm:$0xff] }
 0x2d2   :  { %17992 = vmatmul.mubr.bf16.gmra.mrb[24].mxu0 %v21192_v12  ;;  %v15766_v12 = vld [vmem:[%s27572_s0 + $0x33a] sm:$0xff] }
 0x2d3   :  { %17995 = vmatprep.mubr.bf16.mxu0 %v21208_v28  ;;  %v15791_v28 = vld [vmem:[%s27572_s0 + $0x30] sm:$0xff] }
 0x2da   :  { %17996 = vmatmul.mubr.bf16.gmra.mrb[28].mxu0 %v21774_v46 }
 0x2db   :  { %17999 = vmatprep.mubr.bf16.mxu0 %v21223_v44  ;;  %v15792_v44 = vld [vmem:[%s27572_s0 + $0x38] sm:$0xff] }
 0x2e2   :  { %18000 = vmatmul.mubr.bf16.gmra.mrb[32].mxu0 %v21225_v53  ;;  %v21804_v53 = vpack.c.bf16 %v15766_v12, %v15765_v11  ;;  %v20081_v11 = vld [vmem:[%s27573_s1 + $0x1f0] sm:$0xff]  }
 0x2e3   :  { %18003 = vmatprep.mubr.bf16.mxu0 %v21241_v4  ;;  %v3049_v4 = vpack.c.bf16 %v15792_v44, %v15791_v28  ;;  %v20082_v44 = vld [vmem:[%s27573_s1 + $0x1f8] sm:$0xff]  }
 0x2ea   :  { %18004 = vmatmul.mubr.bf16.gmra.mrb[36].mxu0 %v21243_v5  ;;  %v15793_v5 = vld [vmem:[%s27572_s0 + $0x48] sm:$0xff] }
 0x2eb   :  { %18007 = vmatprep.mubr.bf16.mxu0 %v21259_v27  ;;  %v15794_v27 = vld [vmem:[%s27572_s0 + $0x50] sm:$0xff] }
 0x2f2   :  { %18008 = vmatmul.mubr.bf16.gmra.mrb[40].mxu0 %v21261_v29  ;;  %v15795_v29 = vld [vmem:[%s27572_s0 + $0x60] sm:$0xff] }
 0x2f3   :  { %18011 = vmatprep.mubr.bf16.mxu0 %v21277_v54  ;;  %v15796_v54 = vld [vmem:[%s27572_s0 + $0x68] sm:$0xff] }
 0x2fa   :  { %18012 = vmatmul.mubr.bf16.gmra.mrb[44].mxu0 %v21279_v59  ;;  %v3050_v59 = vpack.c.bf16 %v15794_v27, %v15793_v5  ;;  %v15810_v5 = vld [vmem:[%s27572_s0 + $0x110] sm:$0xff]  ;;  %v15811_v27 = vld [vmem:[%s27572_s0 + $0x120] sm:$0xff] }
 0x2fb   :  { %18015 = vmatprep.mubr.bf16.mxu0 %v21295_v20  ;;  %v3051_v20 = vpack.c.bf16 %v15796_v54, %v15795_v29  ;;  %v15812_v29 = vld [vmem:[%s27572_s0 + $0x128] sm:$0xff]  ;;  %v21891_v54 = vld [vmem:[%s27573_s1 + $0x200] sm:$0xff]  }
 0x302   :  { %18016 = vmatmul.mubr.bf16.gmra.mrb[48].mxu0 %v27706_v48  ;;  %v15806_v48 = vld [vmem:[%s27572_s0 + $0xe0] sm:$0xff] }
 0x303   :  { %18019 = vmatprep.mubr.bf16.mxu0 %v27707_v61  ;;  %v15807_v61 = vld [vmem:[%s27572_s0 + $0xf0] sm:$0xff]  ;;  %v3056_v12 = vpack.c.bf16 %v15806_v48, %v15805_v35  ;;  %v15828_v35 = vld [vmem:[%s27572_s0 + $0x218] sm:$0xff] }
 0x30a   :  { %18020 = vmatmul.mubr.bf16.gmra.mrb[52].mxu0 %v27708_v23  ;;  %v15808_v23 = vld [vmem:[%s27572_s0 + $0xf8] sm:$0xff] }
 0x30b   :  { %18023 = vmatprep.mubr.bf16.mxu0 %v21331_v39  ;;  %v15797_v39 = vld [vmem:[%s27572_s0 + $0x78] sm:$0xff]  ;;  %v3057_v28 = vpack.c.bf16 %v15808_v23, %v15807_v61  ;;  %v15829_v23 = vld [vmem:[%s27572_s0 + $0x228] sm:$0xff] }
 0x312   :  { %18024 = vmatmul.mubr.bf16.gmra.mrb[56].mxu0 %v21333_v40  ;;  %v15798_v40 = vld [vmem:[%s27572_s0 + $0x80] sm:$0xff] }
 0x313   :  { %18027 = vmatprep.mubr.bf16.mxu0 %v21343_v60  ;;  %v20076_v60 = vld [vmem:[%s27573_s1 + $0x1c8] sm:$0xff]   ;;  %v3052_v57 = vpack.c.bf16 %v15798_v40, %v15797_v39  ;;  %v15814_v39 = vld [vmem:[%s27572_s0 + $0x140] sm:$0xff]  ;;  %v15815_v40 = vld [vmem:[%s27572_s0 + $0x150] sm:$0xff] }
 0x31a   :  { %18028 = vmatmul.mubr.bf16.gmra.mrb[60].mxu0 %v21804_v53 }
 0x31b   :  { %18047 = vmatprep.mubr.bf16.mxu0 %v3049_v4  ;;  %v15809_v4 = vld [vmem:[%s27572_s0 + $0x108] sm:$0xff] }
 0x322   :  { %18048 = vmatmul.mubr.bf16.vlgmr.msra.gmra.mrb[0].mxu0 %v3050_v59  ;;  %v3058_v59 = vpack.c.bf16 %v15810_v5, %v15809_v4  ;;  %v15833_v5 = vld [vmem:[%s27572_s0 + $0x258] sm:$0xff] }
 0x323   :  { %18112 = vmatpush3.bf16.msra.mxu0 %v20075_v18  ;;  %18051 = vmatprep.mubr.bf16.mxu0 %v3051_v20  ;;  %v3055_v18 = vpack.c.bf16 %v15804_v62, %v15803_v52  ;;  %v3059_v20 = vpack.c.bf16 %v15812_v29, %v15811_v27  ;;  %v15823_v52 = vld [vmem:[%s27572_s0 + $0x1e0] sm:$0xff]  ;;  %v15824_v62 = vld [vmem:[%s27572_s0 + $0x1e8] sm:$0xff]  ;;  %v15835_v29 = vld [vmem:[%s27572_s0 + $0x270] sm:$0xff] }
 0x324   :  { %18113 = vmatprep.subr.bf16.mxu0 %v20076_v60  ;;  %v15834_v27 = vld [vmem:[%s27572_s0 + $0x260] sm:$0xff] }
 0x327   :  { %18114 = vmatpush3.bf16.msra.mxu0 %v20076_v60  ;;  %v15813_v60 = vld [vmem:[%s27572_s0 + $0x138] sm:$0xff] }
 0x328   :  { %18115 = vmatprep.subr.bf16.mxu0 %v20077_v45  ;;  %v3060_v14 = vpack.c.bf16 %v15814_v39, %v15813_v60  ;;  %v15837_v39 = vld [vmem:[%s27572_s0 + $0x288] sm:$0xff] }
 0x32a   :  { %18052 = vmatmul.mubr.bf16.gmra.mrb[4].mxu0 %v3052_v57  ;;  %v15817_v57 = vld [vmem:[%s27572_s0 + $0x168] sm:$0xff] }
 0x32b   :  { %18055 = vmatprep.mubr.bf16.mxu0 %v3053_v25  ;;  %18116 = vmatpush3.bf16.msra.mxu0 %v20077_v45  ;;  %v3061_v45 = vpack.c.bf16 %v15816_v49, %v15815_v40  ;;  %v15818_v25 = vld [vmem:[%s27572_s0 + $0x170] sm:$0xff]  ;;  %v15839_v49 = vld [vmem:[%s27572_s0 + $0x2a0] sm:$0xff] }
 0x32c   :  { %18117 = vmatprep.subr.bf16.mxu0 %v20078_v7  ;;  %v15838_v40 = vld [vmem:[%s27572_s0 + $0x290] sm:$0xff] }
 0x32f   :  { %18118 = vmatpush3.bf16.msra.mxu0 %v20078_v7  ;;  %v3062_v7 = vpack.c.bf16 %v15818_v25, %v15817_v57  ;;  %v15841_v25 = vld [vmem:[%s27572_s0 + $0x2b8] sm:$0xff] }
 0x330   :  { %18119 = vmatprep.subr.bf16.mxu0 %v20079_v2 }
 0x332   :  { %18056 = vmatmul.mubr.bf16.gmra.mrb[8].mxu0 %v3054_v13  ;;  %v3065_v13 = vpack.c.bf16 %v15824_v62, %v15823_v52 }
 0x333   :  { %18059 = vmatprep.mubr.bf16.mxu0 %v3055_v18  ;;  %18120 = vmatpush3.bf16.msra.mxu0 %v20079_v2  ;;  %v3064_v2 = vpack.c.bf16 %v15822_v51, %v15821_v6  ;;  %v15826_v18 = vld [vmem:[%s27572_s0 + $0x200] sm:$0xff]  ;;  %v15843_v6 = vld [vmem:[%s27572_s0 + $0x2d0] sm:$0xff]  ;;  %v15844_v51 = vld [vmem:[%s27572_s0 + $0x2d8] sm:$0xff] }
 0x334   :  { %18121 = vmatprep.subr.bf16.mxu0 %v20080_v32  ;;  %v3075_v62 = vpack.c.bf16 %v15844_v51, %v15843_v6 }
 0x337   :  { %18122 = vmatpush3.bf16.msra.mxu0 %v20080_v32  ;;  %v15827_v32 = vld [vmem:[%s27572_s0 + $0x210] sm:$0xff] }
 0x338   :  { %18123 = vmatprep.subr.bf16.mxu0 %v20081_v11  ;;  %v3067_v61 = vpack.c.bf16 %v15828_v35, %v15827_v32 }
 0x33a   :  { %18060 = vmatmul.mubr.bf16.gmra.mrb[12].mxu0 %v3056_v12  ;;  %v15831_v12 = vld [vmem:[%s27572_s0 + $0x240] sm:$0xff] }
 0x33b   :  { %18063 = vmatprep.mubr.bf16.mxu0 %v3057_v28  ;;  %18124 = vmatpush3.bf16.msra.mxu0 %v20081_v11  ;;  %v15830_v11 = vld [vmem:[%s27572_s0 + $0x230] sm:$0xff]  ;;  %v15832_v28 = vld [vmem:[%s27572_s0 + $0x248] sm:$0xff] }
 0x33c   :  { %18125 = vmatprep.subr.bf16.mxu0 %v20082_v44  ;;  %v3069_v4 = vpack.c.bf16 %v15832_v28, %v15831_v12  ;;  %v15854_v12 = vld [vmem:[%s27572_s0 + $0x350] sm:$0xff] }
 0x33f   :  { %18126 = vmatpush3.bf16.msra.mxu0 %v20082_v44  ;;  %v3068_v44 = vpack.c.bf16 %v15830_v11, %v15829_v23  ;;  %v15853_v11 = vld [vmem:[%s27572_s0 + $0x348] sm:$0xff] }
 0x340   :  { %18191 = vmatprep.subr.bf16.mxu0 %v21891_v54  ;;  %v3080_v28 = vpack.c.bf16 %v15854_v12, %v15853_v11  ;;  %v15999_v11 = vld [vmem:[%s27572_s0 + $0x1e2] sm:$0xff]  ;;  %v16000_v12 = vld [vmem:[%s27572_s0 + $0x1ea] sm:$0xff] }
 0x342   :  { %18064 = vmatmul.mubr.bf16.gmra.mrb[16].mxu0 %v3058_v59  ;;  %v15836_v59 = vld [vmem:[%s27572_s0 + $0x278] sm:$0xff] }
 0x343   :  { %18067 = vmatprep.mubr.bf16.mxu0 %v3059_v20  ;;  %v3070_v20 = vpack.c.bf16 %v15834_v27, %v15833_v5  ;;  %v3071_v60 = vpack.c.bf16 %v15836_v59, %v15835_v29  ;;  %v15979_v5 = vld [vmem:[%s27572_s0 + $0xc2] sm:$0xff]  ;;  %v15980_v27 = vld [vmem:[%s27572_s0 + $0xca] sm:$0xff] }
 0x344   :  { %v4083_v59 = vpack.c.bf16 %v15980_v27, %v15979_v5  ;;  %v16022_v5 = vld [vmem:[%s27572_s0 + $0x2f2] sm:$0xff]  ;;  %v16023_v27 = vld [vmem:[%s27572_s0 + $0x302] sm:$0xff] }
 0x34a   :  { %18068 = vmatmul.mubr.bf16.gmra.mrb[20].mxu0 %v3060_v14  ;;  %v15840_v14 = vld [vmem:[%s27572_s0 + $0x2a8] sm:$0xff] }
 0x34b   :  { %18071 = vmatprep.mubr.bf16.mxu0 %v3061_v45  ;;  %v3072_v45 = vpack.c.bf16 %v15838_v40, %v15837_v39  ;;  %v3073_v57 = vpack.c.bf16 %v15840_v14, %v15839_v49  ;;  %v15983_v39 = vld [vmem:[%s27572_s0 + $0xf2] sm:$0xff]  ;;  %v15984_v40 = vld [vmem:[%s27572_s0 + $0xfa] sm:$0xff] }
 0x34c   :  { %v4085_v14 = vpack.c.bf16 %v15984_v40, %v15983_v39  ;;  %v16026_v39 = vld [vmem:[%s27572_s0 + $0x322] sm:$0xff] }
 0x352   :  { %18072 = vmatmul.mubr.bf16.gmra.mrb[24].mxu0 %v3062_v7  ;;  %v15842_v7 = vld [vmem:[%s27572_s0 + $0x2c0] sm:$0xff] }
 0x353   :  { %18075 = vmatprep.mubr.bf16.mxu0 %v21392_v24  ;;  %v15825_v24 = vld [vmem:[%s27572_s0 + $0x1f8] sm:$0xff]  ;;  %v3074_v52 = vpack.c.bf16 %v15842_v7, %v15841_v25  ;;  %v15987_v25 = vld [vmem:[%s27572_s0 + $0x122] sm:$0xff]  ;;  %v15988_v7 = vld [vmem:[%s27572_s0 + $0x12a] sm:$0xff] }
 0x354   :  { %v3066_v48 = vpack.c.bf16 %v15826_v18, %v15825_v24  ;;  %v15847_v24 = vld [vmem:[%s27572_s0 + $0x300] sm:$0xff]  ;;  %v15848_v18 = vld [vmem:[%s27572_s0 + $0x308] sm:$0xff]  ;;  %v4087_v51 = vpack.c.bf16 %v15988_v7, %v15987_v25 }
 0x355   :  { %v3077_v35 = vpack.c.bf16 %v15848_v18, %v15847_v24 }
 0x35a   :  { %18076 = vmatmul.mubr.bf16.gmra.mrb[28].mxu0 %v3064_v2  ;;  %v15845_v2 = vld [vmem:[%s27572_s0 + $0x2e8] sm:$0xff] }
 0x35b   :  { %18079 = vmatprep.mubr.bf16.mxu0 %v3065_v13  ;;  %v15846_v13 = vld [vmem:[%s27572_s0 + $0x2f0] sm:$0xff] }
 0x35c   :  { %v3076_v32 = vpack.c.bf16 %v15846_v13, %v15845_v2  ;;  %v15991_v2 = vld [vmem:[%s27572_s0 + $0x152] sm:$0xff]  ;;  %v15992_v13 = vld [vmem:[%s27572_s0 + $0x15a] sm:$0xff] }
 0x35d   :  { %v4089_v18 = vpack.c.bf16 %v15992_v13, %v15991_v2 }
 0x362   :  { %18080 = vmatmul.mubr.bf16.gmra.mrb[32].mxu0 %v3066_v48  ;;  %v15849_v48 = vld [vmem:[%s27572_s0 + $0x318] sm:$0xff] }
 0x363   :  { %18083 = vmatprep.mubr.bf16.mxu0 %v3067_v61  ;;  %v15850_v61 = vld [vmem:[%s27572_s0 + $0x320] sm:$0xff] }
 0x364   :  { %v3078_v23 = vpack.c.bf16 %v15850_v61, %v15849_v48  ;;  %v15997_v61 = vld [vmem:[%s27572_s0 + $0x19a] sm:$0xff] }
 0x36a   :  { %18084 = vmatmul.mubr.bf16.gmra.mrb[36].mxu0 %v3068_v44  ;;  %v20084_v44 = vld [vmem:[%s27573_s1 + $0x208] sm:$0xff]  }
 0x36b   :  { %18087 = vmatprep.mubr.bf16.mxu0 %v3069_v4  ;;  %v15978_v4 = vld [vmem:[%s27572_s0 + $0xb2] sm:$0xff] }
 0x372   :  { %18088 = vmatmul.mubr.bf16.gmra.mrb[40].mxu0 %v3070_v20  ;;  %v15981_v20 = vld [vmem:[%s27572_s0 + $0xda] sm:$0xff] }
 0x373   :  { %18091 = vmatprep.mubr.bf16.mxu0 %v3071_v60  ;;  %v15982_v60 = vld [vmem:[%s27572_s0 + $0xe2] sm:$0xff] }
 0x374   :  { %v4084_v49 = vpack.c.bf16 %v15982_v60, %v15981_v20  ;;  %v16025_v60 = vld [vmem:[%s27572_s0 + $0x31a] sm:$0xff] }
 0x375   :  { %v4106_v40 = vpack.c.bf16 %v16026_v39, %v16025_v60 }
 0x37a   :  { %18092 = vmatmul.mubr.bf16.gmra.mrb[44].mxu0 %v3072_v45  ;;  %v15985_v45 = vld [vmem:[%s27572_s0 + $0x10a] sm:$0xff] }
 0x37b   :  { %18095 = vmatprep.mubr.bf16.mxu0 %v3073_v57  ;;  %v15986_v57 = vld [vmem:[%s27572_s0 + $0x112] sm:$0xff] }
 0x37c   :  { %v4086_v6 = vpack.c.bf16 %v15986_v57, %v15985_v45 }
 0x382   :  { %18096 = vmatmul.mubr.bf16.gmra.mrb[48].mxu0 %v3074_v52  ;;  %v15989_v52 = vld [vmem:[%s27572_s0 + $0x13a] sm:$0xff] }
 0x383   :  { %18099 = vmatprep.mubr.bf16.mxu0 %v3075_v62  ;;  %v15990_v62 = vld [vmem:[%s27572_s0 + $0x142] sm:$0xff] }
 0x384   :  { %v4088_v24 = vpack.c.bf16 %v15990_v62, %v15989_v52 }
 0x38a   :  { %18100 = vmatmul.mubr.bf16.gmra.mrb[52].mxu0 %v3076_v32  ;;  %v15993_v32 = vld [vmem:[%s27572_s0 + $0x16a] sm:$0xff] }
 0x38b   :  { %18103 = vmatprep.mubr.bf16.mxu0 %v3077_v35  ;;  %v15994_v35 = vld [vmem:[%s27572_s0 + $0x172] sm:$0xff] }
 0x38c   :  { %v4090_v48 = vpack.c.bf16 %v15994_v35, %v15993_v32 }
 0x392   :  { %18104 = vmatmul.mubr.bf16.gmra.mrb[56].mxu0 %v3078_v23  ;;  %v15998_v23 = vld [vmem:[%s27572_s0 + $0x1a2] sm:$0xff] }
 0x393   :  { %18107 = vmatprep.mubr.bf16.mxu0 %v21422_v37  ;;  %v20085_v37 = vld [vmem:[%s27573_s1 + $0x210] sm:$0xff]  }
 0x39a   :  { %18108 = vmatmul.mubr.bf16.gmra.mrb[60].mxu0 %v3080_v28  ;;  %v4092_v28 = vpack.c.bf16 %v15998_v23, %v15997_v61 }
 0x39b   :  { %18127 = vmatprep.mubr.bf16.mxu0 %v21437_v63  ;;  %v20086_v63 = vld [vmem:[%s27573_s1 + $0x218] sm:$0xff]  }
 0x3a2   :  { %18128 = vmatmul.mubr.bf16.vlgmr.msra.gmra.mrb[0].mxu0 %v21439_v47  ;;  %v20087_v47 = vld [vmem:[%s27573_s1 + $0x220] sm:$0xff]  }
 0x3a3   :  { %18192 = vmatpush3.bf16.msra.mxu0 %v21891_v54  ;;  %18131 = vmatprep.mubr.bf16.mxu0 %v21461_v33  ;;  %v20088_v33 = vld [vmem:[%s27573_s1 + $0x228] sm:$0xff]  }
 0x3a4   :  { %18193 = vmatprep.subr.bf16.mxu0 %v20084_v44  ;;  %v15977_v54 = vld [vmem:[%s27572_s0 + $0xaa] sm:$0xff] }
 0x3a5   :  { %v4082_v29 = vpack.c.bf16 %v15978_v4, %v15977_v54  ;;  %v16021_v4 = vld [vmem:[%s27572_s0 + $0x2ea] sm:$0xff] }
 0x3a7   :  { %18194 = vmatpush3.bf16.msra.mxu0 %v20084_v44  ;;  %v4093_v44 = vpack.c.bf16 %v16000_v12, %v15999_v11 }
 0x3a8   :  { %18195 = vmatprep.subr.bf16.mxu0 %v20085_v37 }
 0x3aa   :  { %18132 = vmatmul.mubr.bf16.gmra.mrb[4].mxu0 %v21463_v34  ;;  %v20089_v34 = vld [vmem:[%s27573_s1 + $0x230] sm:$0xff]  }
 0x3ab   :  { %18135 = vmatprep.mubr.bf16.mxu0 %v21485_v21  ;;  %18196 = vmatpush3.bf16.msra.mxu0 %v20085_v37  ;;  %v20090_v21 = vld [vmem:[%s27573_s1 + $0x238] sm:$0xff]   ;;  %v16002_v37 = vld [vmem:[%s27572_s0 + $0x202] sm:$0xff] }
 0x3ac   :  { %18197 = vmatprep.subr.bf16.mxu0 %v20086_v63 }
 0x3af   :  { %18198 = vmatpush3.bf16.msra.mxu0 %v20086_v63  ;;  %v16003_v63 = vld [vmem:[%s27572_s0 + $0x212] sm:$0xff] }
 0x3b0   :  { %18199 = vmatprep.subr.bf16.mxu0 %v20087_v47 }
 0x3b2   :  { %18136 = vmatmul.mubr.bf16.gmra.mrb[8].mxu0 %v21487_v3  ;;  %v15909_v3 = vld [vmem:[%s27572_s0 + $0x199] sm:$0xff] }
 0x3b3   :  { %18139 = vmatprep.mubr.bf16.mxu0 %v21509_v16  ;;  %18200 = vmatpush3.bf16.msra.mxu0 %v20087_v47  ;;  %v15910_v16 = vld [vmem:[%s27572_s0 + $0x1a1] sm:$0xff] }
 0x3b4   :  { %18201 = vmatprep.subr.bf16.mxu0 %v20088_v33  ;;  %v16004_v47 = vld [vmem:[%s27572_s0 + $0x21a] sm:$0xff] }
 0x3b7   :  { %18202 = vmatpush3.bf16.msra.mxu0 %v20088_v33 }
 0x3b8   :  { %18203 = vmatprep.subr.bf16.mxu0 %v20089_v34 }
 0x3ba   :  { %18140 = vmatmul.mubr.bf16.gmra.mrb[12].mxu0 %v21511_v17  ;;  %v3578_v17 = vpack.c.bf16 %v15910_v16, %v15909_v3  ;;  %v16006_v3 = vld [vmem:[%s27572_s0 + $0x232] sm:$0xff]  ;;  %v16007_v16 = vld [vmem:[%s27572_s0 + $0x242] sm:$0xff] }
 0x3bb   :  { %18143 = vmatprep.mubr.bf16.mxu0 %v21535_v50  ;;  %18204 = vmatpush3.bf16.msra.mxu0 %v20089_v34  ;;  %v27709_v50 = vld [vmem:[#allocation9_spill] sm:$0xff]  ;;  %v4095_v34 = vpack.c.bf16 %v16004_v47, %v16003_v63 }
 0x3bc   :  { %18205 = vmatprep.subr.bf16.mxu0 %v20090_v21 }
 0x3bf   :  { %18206 = vmatpush3.bf16.msra.mxu0 %v20090_v21  ;;  %v16005_v21 = vld [vmem:[%s27572_s0 + $0x22a] sm:$0xff] }
 0x3c2   :  { %18144 = vmatmul.mubr.bf16.gmra.mrb[16].mxu0 %v21537_v55  ;;  %v27710_v55 = vld [vmem:[#allocation10_spill] sm:$0xff] }
 0x3c3   :  { %18147 = vmatprep.mubr.bf16.mxu0 %v21554_v15  ;;  %v15941_v15 = vld [vmem:[%s27572_s0 + $0x349] sm:$0xff] }
 0x3ca   :  { %18148 = vmatmul.mubr.bf16.gmra.mrb[20].mxu0 %v21556_v22  ;;  %v15942_v22 = vld [vmem:[%s27572_s0 + $0x351] sm:$0xff] }
 0x3cb   :  { %18151 = vmatprep.mubr.bf16.mxu0 %v21572_v19  ;;  %v15967_v19 = vld [vmem:[%s27572_s0 + $0x32] sm:$0xff] }
 0x3d2   :  { %18152 = vmatmul.mubr.bf16.gmra.mrb[24].mxu0 %v21574_v38  ;;  %v15968_v38 = vld [vmem:[%s27572_s0 + $0x3a] sm:$0xff] }
 0x3d3   :  { %18155 = vmatprep.mubr.bf16.mxu0 %v21590_v1  ;;  %v3594_v1 = vpack.c.bf16 %v15942_v22, %v15941_v15  ;;  %v16009_v15 = vld [vmem:[%s27572_s0 + $0x25a] sm:$0xff]  ;;  %v16010_v22 = vld [vmem:[%s27572_s0 + $0x262] sm:$0xff] }
 0x3da   :  { %18156 = vmatmul.mubr.bf16.gmra.mrb[28].mxu0 %v3578_v17  ;;  %v16008_v17 = vld [vmem:[%s27572_s0 + $0x24a] sm:$0xff] }
 0x3db   :  { %18159 = vmatprep.mubr.bf16.mxu0 %v21605_v36  ;;  %v4077_v36 = vpack.c.bf16 %v15968_v38, %v15967_v19  ;;  %v16011_v19 = vld [vmem:[%s27572_s0 + $0x272] sm:$0xff]  ;;  %v16012_v38 = vld [vmem:[%s27572_s0 + $0x27a] sm:$0xff] }
 0x3e2   :  { %18160 = vmatmul.mubr.bf16.gmra.mrb[32].mxu0 %v21607_v42  ;;  %v15969_v42 = vld [vmem:[%s27572_s0 + $0x4a] sm:$0xff] }
 0x3e3   :  { %18163 = vmatprep.mubr.bf16.mxu0 %v21623_v26  ;;  %v15970_v26 = vld [vmem:[%s27572_s0 + $0x52] sm:$0xff] }
 0x3ea   :  { %18164 = vmatmul.mubr.bf16.gmra.mrb[36].mxu0 %v21625_v41  ;;  %v15971_v41 = vld [vmem:[%s27572_s0 + $0x62] sm:$0xff] }
 0x3eb   :  { %18167 = vmatprep.mubr.bf16.mxu0 %v21641_v58  ;;  %v15972_v58 = vld [vmem:[%s27572_s0 + $0x6a] sm:$0xff] }
 0x3f2   :  { %18168 = vmatmul.mubr.bf16.gmra.mrb[40].mxu0 %v21643_v0  ;;  %v4078_v0 = vpack.c.bf16 %v15970_v26, %v15969_v42  ;;  %v22210_v42 = vld [vmem:[%s27572_s0 + $0x28a] sm:$0xff]  ;;  %v22215_v26 = vld [vmem:[%s27572_s0 + $0x292] sm:$0xff] }
 0x3f3   :  { %18171 = vmatprep.mubr.bf16.mxu0 %v21659_v31  ;;  %v4079_v31 = vpack.c.bf16 %v15972_v58, %v15971_v41  ;;  %v22220_v41 = vld [vmem:[%s27572_s0 + $0x2a2] sm:$0xff]  ;;  %v22225_v58 = vld [vmem:[%s27572_s0 + $0x2aa] sm:$0xff] }
 0x3fa   :  { %18172 = vmatmul.mubr.bf16.gmra.mrb[44].mxu0 %v21661_v56  ;;  %v15973_v56 = vld [vmem:[%s27572_s0 + $0x7a] sm:$0xff] }
 0x3fb   :  { %18175 = vmatprep.mubr.bf16.mxu0 %v21677_v10  ;;  %v15974_v10 = vld [vmem:[%s27572_s0 + $0x82] sm:$0xff] }
 0x402   :  { %18176 = vmatmul.mubr.bf16.gmra.mrb[48].mxu0 %v21679_v43  ;;  %v15975_v43 = vld [vmem:[%s27572_s0 + $0x92] sm:$0xff] }
 0x403   :  { %18179 = vmatprep.mubr.bf16.mxu0 %v27709_v50  ;;  %v4096_v50 = vpack.c.bf16 %v16006_v3, %v16005_v21 }
 0x40a   :  { %18180 = vmatmul.mubr.bf16.gmra.mrb[52].mxu0 %v27710_v55  ;;  %v4097_v55 = vpack.c.bf16 %v16008_v17, %v16007_v16 }
 0x40b   :  { %18183 = vmatprep.mubr.bf16.mxu0 %v21713_v8  ;;  %v4080_v8 = vpack.c.bf16 %v15974_v10, %v15973_v56  ;;  %v20436_v56 = vmov 0   ;;  %v16017_v10 = vld [vmem:[%s27572_s0 + $0x2ba] sm:$0xff] }
 0x40c   :  { %4951 = vst [vmem:[#allocation2 + $0x18] sm:$0xf] %v20436_v56  ;;  %4945 = vst [vmem:[#allocation2] sm:$0xf] %v20436_v56 }
 0x40d   :  { %4946 = vst [vmem:[#allocation2 + $0x4] sm:$0xf] %v20436_v56  ;;  %4947 = vst [vmem:[#allocation2 + $0x8] sm:$0x1] %v20436_v56 }
 0x40e   :  { %4948 = vst [vmem:[#allocation2 + $0xc] sm:$0xf] %v20436_v56  ;;  %4949 = vst [vmem:[#allocation2 + $0x10] sm:$0xf] %v20436_v56 }
 0x40f   :  { %4950 = vst [vmem:[#allocation2 + $0x14] sm:$0x1] %v20436_v56  ;;  %4952 = vst [vmem:[#allocation2 + $0x1c] sm:$0xf] %v20436_v56 }
 0x410   :  { %4953 = vst [vmem:[#allocation2 + $0x20] sm:$0x1] %v20436_v56  ;;  %4954 = vst [vmem:[#allocation2 + $0x24] sm:$0xf] %v20436_v56 }
 0x411   :  { %4955 = vst [vmem:[#allocation2 + $0x28] sm:$0xf] %v20436_v56  ;;  %4956 = vst [vmem:[#allocation2 + $0x2c] sm:$0x1] %v20436_v56 }
 0x412   :  { %18184 = vmatmul.mubr.bf16.gmra.mrb[56].mxu0 %v21715_v9  ;;  %4957 = vst [vmem:[#allocation2 + $0x30] sm:$0xf] %v20436_v56  ;;  %4958 = vst [vmem:[#allocation2 + $0x34] sm:$0xf] %v20436_v56 }
 0x413   :  { %18187 = vmatprep.mubr.bf16.mxu0 %v21725_v30  ;;  %v15976_v30 = vld [vmem:[%s27572_s0 + $0x9a] sm:$0xff]  ;;  %4959 = vst [vmem:[#allocation2 + $0x38] sm:$0x1] %v20436_v56  ;;  %4960 = vst [vmem:[#allocation2 + $0x3c] sm:$0xf] %v20436_v56 }
 0x414   :  { %v4081_v9 = vpack.c.bf16 %v15976_v30, %v15975_v43  ;;  %4961 = vst [vmem:[#allocation2 + $0x40] sm:$0xf] %v20436_v56  ;;  %4962 = vst [vmem:[#allocation2 + $0x44] sm:$0x1] %v20436_v56  ;;  %v16018_v43 = vld [vmem:[%s27572_s0 + $0x2c2] sm:$0xff]  ;;  %v16019_v30 = vld [vmem:[%s27572_s0 + $0x2d2] sm:$0xff] }
 0x415   :  { %4963 = vst [vmem:[#allocation2 + $0x48] sm:$0xf] %v20436_v56  ;;  %4964 = vst [vmem:[#allocation2 + $0x4c] sm:$0xf] %v20436_v56 }
 0x416   :  { %4965 = vst [vmem:[#allocation2 + $0x50] sm:$0x1] %v20436_v56  ;;  %4966 = vst [vmem:[#allocation2 + $0x54] sm:$0xf] %v20436_v56 }
 0x417   :  { %4967 = vst [vmem:[#allocation2 + $0x58] sm:$0xf] %v20436_v56  ;;  %4968 = vst [vmem:[#allocation2 + $0x5c] sm:$0x1] %v20436_v56 }
 0x418   :  { %4969 = vst [vmem:[#allocation2 + $0x60] sm:$0xf] %v20436_v56  ;;  %4970 = vst [vmem:[#allocation2 + $0x64] sm:$0xf] %v20436_v56 }
 0x419   :  { %4971 = vst [vmem:[#allocation2 + $0x68] sm:$0x1] %v20436_v56  ;;  %4972 = vst [vmem:[#allocation2 + $0x6c] sm:$0xf] %v20436_v56 }
 0x41a   :  { %18188 = vmatmul.mubr.bf16.gmra.mrb[60].mxu0 %v3594_v1  ;;  %v4098_v1 = vpack.c.bf16 %v16010_v22, %v16009_v15  ;;  %4973 = vst [vmem:[#allocation2 + $0x70] sm:$0xf] %v20436_v56  ;;  %4974 = vst [vmem:[#allocation2 + $0x74] sm:$0x1] %v20436_v56 }
 0x41b   :  { %18207 = vmatprep.mubr.bf16.mxu0 %v4077_v36  ;;  %v4099_v36 = vpack.c.bf16 %v16012_v38, %v16011_v19  ;;  %4975 = vst [vmem:[#allocation2 + $0x78] sm:$0xf] %v20436_v56  ;;  %4976 = vst [vmem:[#allocation2 + $0x7c] sm:$0xf] %v20436_v56 }
 0x41c   :  { %4977 = vst [vmem:[#allocation2 + $0x80] sm:$0x1] %v20436_v56  ;;  %4978 = vst [vmem:[#allocation2 + $0x84] sm:$0xf] %v20436_v56 }
 0x41d   :  { %4979 = vst [vmem:[#allocation2 + $0x88] sm:$0xf] %v20436_v56  ;;  %4980 = vst [vmem:[#allocation2 + $0x8c] sm:$0x1] %v20436_v56 }
 0x41e   :  { %4981 = vst [vmem:[#allocation2 + $0x90] sm:$0xf] %v20436_v56  ;;  %4982 = vst [vmem:[#allocation2 + $0x94] sm:$0xf] %v20436_v56 }
 0x41f   :  { %4983 = vst [vmem:[#allocation2 + $0x98] sm:$0x1] %v20436_v56  ;;  %4984 = vst [vmem:[#allocation2 + $0x9c] sm:$0xf] %v20436_v56 }
 0x420   :  { %4985 = vst [vmem:[#allocation2 + $0xa0] sm:$0xf] %v20436_v56  ;;  %4986 = vst [vmem:[#allocation2 + $0xa4] sm:$0x1] %v20436_v56 }
 0x421   :  { %4987 = vst [vmem:[#allocation2 + $0xa8] sm:$0xf] %v20436_v56  ;;  %4988 = vst [vmem:[#allocation2 + $0xac] sm:$0xf] %v20436_v56 }
 0x422   :  { %18208 = vmatmul.mubr.bf16.vlgmr.msra.gmra.mrb[0].mxu0 %v4078_v0  ;;  %v4100_v0 = vpack.c.bf16 %v22215_v26, %v22210_v42  ;;  %4989 = vst [vmem:[#allocation2 + $0xb0] sm:$0x1] %v20436_v56  ;;  %4990 = vst [vmem:[#allocation2 + $0xb4] sm:$0xf] %v20436_v56 }
 0x423   :  { %18211 = vmatprep.mubr.bf16.mxu0 %v4079_v31  ;;  %v4101_v31 = vpack.c.bf16 %v22225_v58, %v22220_v41  ;;  %4991 = vst [vmem:[#allocation2 + $0xb8] sm:$0xf] %v20436_v56  ;;  %4992 = vst [vmem:[#allocation2 + $0xbc] sm:$0x1] %v20436_v56 }
 0x424   :  { %4993 = vst [vmem:[#allocation2 + $0xc0] sm:$0xf] %v20436_v56  ;;  %4994 = vst [vmem:[#allocation2 + $0xc4] sm:$0xf] %v20436_v56 }
 0x425   :  { %4995 = vst [vmem:[#allocation2 + $0xc8] sm:$0x1] %v20436_v56  ;;  %4996 = vst [vmem:[#allocation2 + $0xcc] sm:$0xf] %v20436_v56 }
 0x426   :  { %4997 = vst [vmem:[#allocation2 + $0xd0] sm:$0xf] %v20436_v56  ;;  %4998 = vst [vmem:[#allocation2 + $0xd4] sm:$0x1] %v20436_v56 }
 0x427   :  { %4999 = vst [vmem:[#allocation2 + $0xd8] sm:$0xf] %v20436_v56  ;;  %5000 = vst [vmem:[#allocation2 + $0xdc] sm:$0xf] %v20436_v56 }
 0x428   :  { %5001 = vst [vmem:[#allocation2 + $0xe0] sm:$0x1] %v20436_v56  ;;  %5002 = vst [vmem:[#allocation2 + $0xe4] sm:$0xf] %v20436_v56 }
 0x429   :  { %5003 = vst [vmem:[#allocation2 + $0xe8] sm:$0xf] %v20436_v56  ;;  %5004 = vst [vmem:[#allocation2 + $0xec] sm:$0x1] %v20436_v56 }
 0x42a   :  { %18212 = vmatmul.mubr.bf16.gmra.mrb[4].mxu0 %v4080_v8  ;;  %5005 = vst [vmem:[#allocation2 + $0xf0] sm:$0xf] %v20436_v56  ;;  %5006 = vst [vmem:[#allocation2 + $0xf4] sm:$0xf] %v20436_v56  ;;  %v16020_v8 = vld [vmem:[%s27572_s0 + $0x2da] sm:$0xff] }
 0x42b   :  { %18215 = vmatprep.mubr.bf16.mxu0 %v4081_v9  ;;  %5007 = vst [vmem:[#allocation2 + $0xf8] sm:$0x1] %v20436_v56  ;;  %5008 = vst [vmem:[#allocation2 + $0xfc] sm:$0xf] %v20436_v56  ;;  %v4102_v9 = vpack.c.bf16 %v16018_v43, %v16017_v10  ;;  %v4103_v54 = vpack.c.bf16 %v16020_v8, %v16019_v30 }
 0x42c   :  { %5009 = vst [vmem:[#allocation2 + $0x100] sm:$0xf] %v20436_v56  ;;  %5010 = vst [vmem:[#allocation2 + $0x104] sm:$0x1] %v20436_v56 }
 0x42d   :  { %5011 = vst [vmem:[#allocation2 + $0x108] sm:$0xf] %v20436_v56  ;;  %5012 = vst [vmem:[#allocation2 + $0x10c] sm:$0xf] %v20436_v56 }
 0x42e   :  { %5013 = vst [vmem:[#allocation2 + $0x110] sm:$0x1] %v20436_v56  ;;  %5014 = vst [vmem:[#allocation2 + $0x114] sm:$0xf] %v20436_v56 }
 0x42f   :  { %5015 = vst [vmem:[#allocation2 + $0x118] sm:$0xf] %v20436_v56  ;;  %5016 = vst [vmem:[#allocation2 + $0x11c] sm:$0x1] %v20436_v56 }
 0x430   :  { %5017 = vst [vmem:[#allocation2 + $0x120] sm:$0xf] %v20436_v56  ;;  %5018 = vst [vmem:[#allocation2 + $0x124] sm:$0xf] %v20436_v56 }
 0x431   :  { %5019 = vst [vmem:[#allocation2 + $0x128] sm:$0x1] %v20436_v56  ;;  %5020 = vst [vmem:[#allocation2 + $0x12c] sm:$0xf] %v20436_v56 }
 0x432   :  { %18216 = vmatmul.mubr.bf16.gmra.mrb[8].mxu0 %v4082_v29  ;;  %5021 = vst [vmem:[#allocation2 + $0x130] sm:$0xf] %v20436_v56  ;;  %5022 = vst [vmem:[#allocation2 + $0x134] sm:$0x1] %v20436_v56  ;;  %v16024_v29 = vld [vmem:[%s27572_s0 + $0x30a] sm:$0xff] }
 0x433   :  { %18219 = vmatprep.mubr.bf16.mxu0 %v4083_v59  ;;  %5023 = vst [vmem:[#allocation2 + $0x138] sm:$0xf] %v20436_v56  ;;  %5024 = vst [vmem:[#allocation2 + $0x13c] sm:$0xf] %v20436_v56  ;;  %v4104_v59 = vpack.c.bf16 %v16022_v5, %v16021_v4  ;;  %v4105_v20 = vpack.c.bf16 %v16024_v29, %v16023_v27 }
 0x434   :  { %5025 = vst [vmem:[#allocation2 + $0x140] sm:$0x1] %v20436_v56  ;;  %5026 = vst [vmem:[#allocation2 + $0x144] sm:$0xf] %v20436_v56 }
 0x435   :  { %5027 = vst [vmem:[#allocation2 + $0x148] sm:$0xf] %v20436_v56  ;;  %5028 = vst [vmem:[#allocation2 + $0x14c] sm:$0x1] %v20436_v56 }
 0x436   :  { %5029 = vst [vmem:[#allocation2 + $0x150] sm:$0xf] %v20436_v56  ;;  %5030 = vst [vmem:[#allocation2 + $0x154] sm:$0xf] %v20436_v56 }
 0x437   :  { %5031 = vst [vmem:[#allocation2 + $0x158] sm:$0x1] %v20436_v56  ;;  %5032 = vst [vmem:[#allocation2 + $0x15c] sm:$0xf] %v20436_v56 }
 0x438   :  { %5033 = vst [vmem:[#allocation2 + $0x160] sm:$0xf] %v20436_v56  ;;  %5034 = vst [vmem:[#allocation2 + $0x164] sm:$0x1] %v20436_v56 }
 0x439   :  { %5035 = vst [vmem:[#allocation2 + $0x168] sm:$0xf] %v20436_v56  ;;  %5036 = vst [vmem:[#allocation2 + $0x16c] sm:$0xf] %v20436_v56 }
 0x43a   :  { %18220 = vmatmul.mubr.bf16.gmra.mrb[12].mxu0 %v4084_v49  ;;  %5037 = vst [vmem:[#allocation2 + $0x170] sm:$0x1] %v20436_v56  ;;  %5038 = vst [vmem:[#allocation2 + $0x174] sm:$0xf] %v20436_v56  ;;  %v16029_v49 = vld [vmem:[%s27572_s0 + $0x34a] sm:$0xff] }
 0x43b   :  { %18223 = vmatprep.mubr.bf16.mxu0 %v4085_v14  ;;  %5039 = vst [vmem:[#allocation2 + $0x178] sm:$0xf] %v20436_v56  ;;  %5040 = vst [vmem:[#allocation2 + $0x17c] sm:$0x1] %v20436_v56  ;;  %v16030_v14 = vld [vmem:[%s27572_s0 + $0x352] sm:$0xff] }
 0x43c   :  { %5041 = vst [vmem:[#allocation2 + $0x180] sm:$0xf] %v20436_v56  ;;  %5042 = vst [vmem:[#allocation2 + $0x184] sm:$0xf] %v20436_v56  ;;  %v4108_v45 = vpack.c.bf16 %v16030_v14, %v16029_v49 }
 0x43d   :  { %5043 = vst [vmem:[#allocation2 + $0x188] sm:$0x1] %v20436_v56  ;;  %5044 = vst [vmem:[#allocation2 + $0x18c] sm:$0xf] %v20436_v56 }
 0x43e   :  { %5045 = vst [vmem:[#allocation2 + $0x190] sm:$0xf] %v20436_v56  ;;  %5046 = vst [vmem:[#allocation2 + $0x194] sm:$0x1] %v20436_v56 }
 0x43f   :  { %5047 = vst [vmem:[#allocation2 + $0x198] sm:$0xf] %v20436_v56  ;;  %5048 = vst [vmem:[#allocation2 + $0x19c] sm:$0xf] %v20436_v56 }
 0x440   :  { %5049 = vst [vmem:[#allocation2 + $0x1a0] sm:$0x1] %v20436_v56  ;;  %5050 = vst [vmem:[#allocation2 + $0x1a4] sm:$0xf] %v20436_v56 }
 0x441   :  { %5051 = vst [vmem:[#allocation2 + $0x1a8] sm:$0xf] %v20436_v56  ;;  %5052 = vst [vmem:[#allocation2 + $0x1ac] sm:$0x1] %v20436_v56 }
 0x442   :  { %18224 = vmatmul.mubr.bf16.gmra.mrb[16].mxu0 %v4086_v6 }
 0x443   :  { %18227 = vmatprep.mubr.bf16.mxu0 %v4087_v51 }
 0x44a   :  { %18228 = vmatmul.mubr.bf16.gmra.mrb[20].mxu0 %v4088_v24 }
 0x44b   :  { %18231 = vmatprep.mubr.bf16.mxu0 %v4089_v18 }
 0x452   :  { %18232 = vmatmul.mubr.bf16.gmra.mrb[24].mxu0 %v4090_v48 }
 0x453   :  { %18235 = vmatprep.mubr.bf16.mxu0 %v21774_v46  ;;  %v16001_v46 = vld [vmem:[%s27572_s0 + $0x1fa] sm:$0xff] }
 0x454   :  { %v4094_v33 = vpack.c.bf16 %v16002_v37, %v16001_v46 }
 0x45a   :  { %18236 = vmatmul.mubr.bf16.gmra.mrb[28].mxu0 %v4092_v28 }
 0x45b   :  { %18239 = vmatprep.mubr.bf16.mxu0 %v4093_v44 }
 0x462   :  { %18240 = vmatmul.mubr.bf16.gmra.mrb[32].mxu0 %v4094_v33 }
 0x463   :  { %18243 = vmatprep.mubr.bf16.mxu0 %v4095_v34 }
 0x46a   :  { %18244 = vmatmul.mubr.bf16.gmra.mrb[36].mxu0 %v4096_v50 }
 0x46b   :  { %18247 = vmatprep.mubr.bf16.mxu0 %v4097_v55 }
 0x472   :  { %18248 = vmatmul.mubr.bf16.gmra.mrb[40].mxu0 %v4098_v1 }
 0x473   :  { %18251 = vmatprep.mubr.bf16.mxu0 %v4099_v36 }
 0x47a   :  { %18252 = vmatmul.mubr.bf16.gmra.mrb[44].mxu0 %v4100_v0 }
 0x47b   :  { %18255 = vmatprep.mubr.bf16.mxu0 %v4101_v31 }
 0x482   :  { %18256 = vmatmul.mubr.bf16.gmra.mrb[48].mxu0 %v4102_v9 }
 0x483   :  { %18259 = vmatprep.mubr.bf16.mxu0 %v4103_v54 }
 0x48a   :  { %18260 = vmatmul.mubr.bf16.gmra.mrb[52].mxu0 %v4104_v59 }
 0x48b   :  { %18263 = vmatprep.mubr.bf16.mxu0 %v4105_v20 }
 0x492   :  { %18264 = vmatmul.mubr.bf16.gmra.mrb[56].mxu0 %v4106_v40 }
 0x493   :  { %18267 = vmatprep.mubr.bf16.mxu0 %v21804_v53 }
 0x49a   :  { %18268 = vmatmul.mubr.bf16.gmra.mrb[60].mxu0 %v4108_v45 }
 0x4f5   :  { %v22382_v57 = vpop.f32.mrb[0].mxu0 }
 0x4f6   :  { %v22384_v25 = vpop.f32.mrb[1].mxu0  ;;  %v4602_v62 = vmul.f32 %v22382_v57, %v22382_v57 }
 0x4f7   :  { %v22386_v7 = vpop.f32.mrb[2].mxu0  ;;  %v4600_v53 = vmul.f32 %v22384_v25, %v22384_v25 }
 0x4f8   :  { %v22388_v6 = vpop.f32.mrb[3].mxu0  ;;  %v4603_v24 = vmul.f32 %v22386_v7, %v22386_v7 }
 0x4f9   :  { %v4529_v51 = vadd.f32 %v22388_v6, %v22384_v25  ;;  %v4601_v52 = vmul.f32 %v22388_v6, %v22388_v6 }
 0x4fb   :  { %v4530_v2 = vadd.f32 %v22382_v57, %v4529_v51  ;;  %v4664_v13 = vadd.f32 %v4601_v52, %v4600_v53 }
 0x4fd   :  { %v4665_v18 = vadd.f32 %v4664_v13, %v4602_v62  ;;  %v22401_v32 = vpop.f32.mrb[4].mxu0  ;;  %v4531_v35 = vadd.f32 %v22386_v7, %v4530_v2 }
 0x4fe   :  { %v22404_v48 = vpop.f32.mrb[5].mxu0  ;;  %v4606_v63 = vmul.f32 %v22401_v32, %v22401_v32 }
 0x4ff   :  { %v4532_v61 = vadd.f32 %v4531_v35, %v22404_v48  ;;  %v4604_v23 = vmul.f32 %v22404_v48, %v22404_v48  ;;  %v4666_v11 = vadd.f32 %v4665_v18, %v4603_v24  ;;  %v22409_v12 = vpop.f32.mrb[6].mxu0 }
 0x500   :  { %v22411_v28 = vpop.f32.mrb[7].mxu0  ;;  %v4607_v34 = vmul.f32 %v22409_v12, %v22409_v12 }
 0x501   :  { %v4667_v44 = vadd.f32 %v4666_v11, %v4604_v23  ;;  %v4533_v46 = vadd.f32 %v4532_v61, %v22411_v28  ;;  %v4605_v37 = vmul.f32 %v22411_v28, %v22411_v28 }
 0x503   :  { %v4534_v47 = vadd.f32 %v22401_v32, %v4533_v46  ;;  %v4668_v33 = vadd.f32 %v4667_v44, %v4605_v37 }
 0x505   :  { %v4669_v21 = vadd.f32 %v4668_v33, %v4606_v63  ;;  %v22421_v3 = vpop.f32.mrb[8].mxu0  ;;  %v4535_v16 = vadd.f32 %v22409_v12, %v4534_v47 }
 0x506   :  { %v22424_v17 = vpop.f32.mrb[9].mxu0  ;;  %v4610_v42 = vmul.f32 %v22421_v3, %v22421_v3 }
 0x507   :  { %v4536_v50 = vadd.f32 %v4535_v16, %v22424_v17  ;;  %v4608_v55 = vmul.f32 %v22424_v17, %v22424_v17  ;;  %v4670_v15 = vadd.f32 %v4669_v21, %v4607_v34  ;;  %v22429_v22 = vpop.f32.mrb[10].mxu0 }
 0x508   :  { %v22431_v19 = vpop.f32.mrb[11].mxu0  ;;  %v4611_v58 = vmul.f32 %v22429_v22, %v22429_v22 }
 0x509   :  { %v4671_v38 = vadd.f32 %v4670_v15, %v4608_v55  ;;  %v4537_v1 = vadd.f32 %v4536_v50, %v22431_v19  ;;  %v4609_v36 = vmul.f32 %v22431_v19, %v22431_v19 }
 0x50b   :  { %v4538_v26 = vadd.f32 %v22421_v3, %v4537_v1  ;;  %v4672_v41 = vadd.f32 %v4671_v38, %v4609_v36 }
 0x50d   :  { %v4673_v0 = vadd.f32 %v4672_v41, %v4610_v42  ;;  %v22441_v31 = vpop.f32.mrb[12].mxu0  ;;  %v4539_v56 = vadd.f32 %v22429_v22, %v4538_v26 }
 0x50e   :  { %v22444_v10 = vpop.f32.mrb[13].mxu0  ;;  %v4614_v29 = vmul.f32 %v22441_v31, %v22441_v31 }
 0x50f   :  { %v4540_v43 = vadd.f32 %v4539_v56, %v22444_v10  ;;  %v4612_v30 = vmul.f32 %v22444_v10, %v22444_v10  ;;  %v4674_v8 = vadd.f32 %v4673_v0, %v4611_v58  ;;  %v22449_v9 = vpop.f32.mrb[14].mxu0 }
 0x510   :  { %v22451_v54 = vpop.f32.mrb[15].mxu0  ;;  %v4615_v60 = vmul.f32 %v22449_v9, %v22449_v9 }
 0x511   :  { %v4675_v4 = vadd.f32 %v4674_v8, %v4612_v30  ;;  %v4541_v5 = vadd.f32 %v4540_v43, %v22451_v54  ;;  %v4613_v27 = vmul.f32 %v22451_v54, %v22451_v54 }
 0x513   :  { %v4542_v59 = vadd.f32 %v22441_v31, %v4541_v5  ;;  %v4676_v20 = vadd.f32 %v4675_v4, %v4613_v27 }
 0x515   :  { %v4677_v39 = vadd.f32 %v4676_v20, %v4614_v29  ;;  %v22461_v40 = vpop.f32.mrb[16].mxu0  ;;  %v4543_v49 = vadd.f32 %v22449_v9, %v4542_v59 }
 0x516   :  { %v22464_v14 = vpop.f32.mrb[17].mxu0  ;;  %v4618_v18 = vmul.f32 %v22461_v40, %v22461_v40 }
 0x517   :  { %v4544_v45 = vadd.f32 %v4543_v49, %v22464_v14  ;;  %v4616_v53 = vmul.f32 %v22464_v14, %v22464_v14  ;;  %v4678_v51 = vadd.f32 %v4677_v39, %v4615_v60  ;;  %v22469_v52 = vpop.f32.mrb[18].mxu0 }
 0x518   :  { %v22471_v62 = vpop.f32.mrb[19].mxu0  ;;  %v4619_v23 = vmul.f32 %v22469_v52, %v22469_v52 }
 0x519   :  { %v4679_v2 = vadd.f32 %v4678_v51, %v4616_v53  ;;  %v4545_v13 = vadd.f32 %v4544_v45, %v22471_v62  ;;  %v4617_v24 = vmul.f32 %v22471_v62, %v22471_v62 }
 0x51b   :  { %v4546_v35 = vadd.f32 %v22461_v40, %v4545_v13  ;;  %v4680_v61 = vadd.f32 %v4679_v2, %v4617_v24 }
 0x51d   :  { %v4681_v11 = vadd.f32 %v4680_v61, %v4618_v18  ;;  %v22481_v44 = vpop.f32.mrb[20].mxu0  ;;  %v4547_v46 = vadd.f32 %v22469_v52, %v4546_v35 }
 0x51e   :  { %v22484_v37 = vpop.f32.mrb[21].mxu0  ;;  %v4622_v15 = vmul.f32 %v22481_v44, %v22481_v44 }
 0x51f   :  { %v4548_v63 = vadd.f32 %v4547_v46, %v22484_v37  ;;  %v4620_v47 = vmul.f32 %v22484_v37, %v22484_v37  ;;  %v4682_v33 = vadd.f32 %v4681_v11, %v4619_v23  ;;  %v22489_v34 = vpop.f32.mrb[22].mxu0 }
 0x520   :  { %v22491_v21 = vpop.f32.mrb[23].mxu0  ;;  %v4623_v36 = vmul.f32 %v22489_v34, %v22489_v34 }
 0x521   :  { %v4683_v16 = vadd.f32 %v4682_v33, %v4620_v47  ;;  %v4549_v50 = vadd.f32 %v4548_v63, %v22491_v21  ;;  %v4621_v55 = vmul.f32 %v22491_v21, %v22491_v21 }
 0x523   :  { %v4550_v38 = vadd.f32 %v22481_v44, %v4549_v50  ;;  %v4684_v1 = vadd.f32 %v4683_v16, %v4621_v55 }
 0x525   :  { %v4685_v42 = vadd.f32 %v4684_v1, %v4622_v15  ;;  %v22501_v26 = vpop.f32.mrb[24].mxu0  ;;  %v4551_v41 = vadd.f32 %v22489_v34, %v4550_v38 }
 0x526   :  { %v22504_v58 = vpop.f32.mrb[25].mxu0  ;;  %v4626_v29 = vmul.f32 %v22501_v26, %v22501_v26 }
 0x527   :  { %v4552_v0 = vadd.f32 %v4551_v41, %v22504_v58  ;;  %v4624_v56 = vmul.f32 %v22504_v58, %v22504_v58  ;;  %v4686_v43 = vadd.f32 %v4685_v42, %v4623_v36  ;;  %v22509_v30 = vpop.f32.mrb[26].mxu0 }
 0x528   :  { %v22511_v8 = vpop.f32.mrb[27].mxu0  ;;  %v4627_v60 = vmul.f32 %v22509_v30, %v22509_v30 }
 0x529   :  { %v4687_v4 = vadd.f32 %v4686_v43, %v4624_v56  ;;  %v4553_v5 = vadd.f32 %v4552_v0, %v22511_v8  ;;  %v4625_v27 = vmul.f32 %v22511_v8, %v22511_v8 }
 0x52b   :  { %v4554_v59 = vadd.f32 %v22501_v26, %v4553_v5  ;;  %v4688_v20 = vadd.f32 %v4687_v4, %v4625_v27 }
 0x52d   :  { %v4689_v39 = vadd.f32 %v4688_v20, %v4626_v29  ;;  %v22521_v49 = vpop.f32.mrb[28].mxu0  ;;  %v4555_v45 = vadd.f32 %v22509_v30, %v4554_v59 }
 0x52e   :  { %v22524_v53 = vpop.f32.mrb[29].mxu0  ;;  %v4630_v11 = vmul.f32 %v22521_v49, %v22521_v49 }
 0x52f   :  { %v4556_v51 = vadd.f32 %v4555_v45, %v22524_v53  ;;  %v4628_v2 = vmul.f32 %v22524_v53, %v22524_v53  ;;  %v4690_v13 = vadd.f32 %v4689_v39, %v4627_v60  ;;  %v22529_v24 = vpop.f32.mrb[30].mxu0 }
 0x530   :  { %v22531_v18 = vpop.f32.mrb[31].mxu0  ;;  %v4631_v47 = vmul.f32 %v22529_v24, %v22529_v24 }
 0x531   :  { %v4691_v35 = vadd.f32 %v4690_v13, %v4628_v2  ;;  %v4557_v61 = vadd.f32 %v4556_v51, %v22531_v18  ;;  %v4629_v23 = vmul.f32 %v22531_v18, %v22531_v18 }
 0x533   :  { %v4558_v46 = vadd.f32 %v22521_v49, %v4557_v61  ;;  %v4692_v63 = vadd.f32 %v4691_v35, %v4629_v23 }
 0x535   :  { %v4693_v33 = vadd.f32 %v4692_v63, %v4630_v11  ;;  %v22541_v16 = vpop.f32.mrb[32].mxu0  ;;  %v4559_v50 = vadd.f32 %v22529_v24, %v4558_v46 }
 0x536   :  { %v22544_v55 = vpop.f32.mrb[33].mxu0  ;;  %v4634_v43 = vmul.f32 %v22541_v16, %v22541_v16 }
 0x537   :  { %v4560_v15 = vadd.f32 %v4559_v50, %v22544_v55  ;;  %v4632_v38 = vmul.f32 %v22544_v55, %v22544_v55  ;;  %v4694_v1 = vadd.f32 %v4693_v33, %v4631_v47  ;;  %v22549_v36 = vpop.f32.mrb[34].mxu0 }
 0x538   :  { %v22551_v42 = vpop.f32.mrb[35].mxu0  ;;  %v4635_v27 = vmul.f32 %v22549_v36, %v22549_v36 }
 0x539   :  { %v4695_v41 = vadd.f32 %v4694_v1, %v4632_v38  ;;  %v4561_v0 = vadd.f32 %v4560_v15, %v22551_v42  ;;  %v4633_v56 = vmul.f32 %v22551_v42, %v22551_v42 }
 0x53b   :  { %v4562_v4 = vadd.f32 %v22541_v16, %v4561_v0  ;;  %v4696_v5 = vadd.f32 %v4695_v41, %v4633_v56 }
 0x53d   :  { %v4697_v29 = vadd.f32 %v4696_v5, %v4634_v43  ;;  %v22561_v59 = vpop.f32.mrb[36].mxu0  ;;  %v4563_v20 = vadd.f32 %v22549_v36, %v4562_v4 }
 0x53e   :  { %27711 = vst [vmem:[#allocation6_spill] sm:$0xff] %v22561_v59  ;;  %v22564_v60 = vpop.f32.mrb[37].mxu0  ;;  %v4638_v11 = vmul.f32 %v22561_v59, %v22561_v59 }
 0x53f   :  { %v4564_v39 = vadd.f32 %v4563_v20, %v22564_v60  ;;  %v4636_v45 = vmul.f32 %v22564_v60, %v22564_v60  ;;  %v4698_v51 = vadd.f32 %v4697_v29, %v4635_v27  ;;  %v22569_v2 = vpop.f32.mrb[38].mxu0 }
 0x540   :  { %27712 = vst [vmem:[#allocation7_spill] sm:$0xff] %v22569_v2  ;;  %v22571_v13 = vpop.f32.mrb[39].mxu0  ;;  %v4639_v47 = vmul.f32 %v22569_v2, %v22569_v2 }
 0x541   :  { %27713 = vst [vmem:[#allocation8_spill] sm:$0xff] %v22571_v13  ;;  %v4699_v35 = vadd.f32 %v4698_v51, %v4636_v45  ;;  %v4565_v61 = vadd.f32 %v4564_v39, %v22571_v13  ;;  %v4637_v23 = vmul.f32 %v22571_v13, %v22571_v13 }
 0x543   :  { %v4566_v46 = vadd.f32 %v22561_v59, %v4565_v61  ;;  %v4700_v63 = vadd.f32 %v4699_v35, %v4637_v23 }
 0x545   :  { %v4701_v33 = vadd.f32 %v4700_v63, %v4638_v11  ;;  %v22581_v50 = vpop.f32.mrb[40].mxu0  ;;  %v4567_v15 = vadd.f32 %v22569_v2, %v4566_v46 }
 0x546   :  { %27714 = vst [vmem:[#allocation9_spill] sm:$0xff] %v22581_v50  ;;  %v22584_v38 = vpop.f32.mrb[41].mxu0  ;;  %v4642_v29 = vmul.f32 %v22581_v50, %v22581_v50 }
 0x547   :  { %27715 = vst [vmem:[#allocation10_spill] sm:$0xff] %v22584_v38  ;;  %v4568_v1 = vadd.f32 %v4567_v15, %v22584_v38  ;;  %v4640_v41 = vmul.f32 %v22584_v38, %v22584_v38  ;;  %v4702_v0 = vadd.f32 %v4701_v33, %v4639_v47  ;;  %v22589_v56 = vpop.f32.mrb[42].mxu0 }
 0x548   :  { %27716 = vst [vmem:[#allocation11_spill] sm:$0xff] %v22589_v56  ;;  %v22591_v43 = vpop.f32.mrb[43].mxu0  ;;  %v4643_v45 = vmul.f32 %v22589_v56, %v22589_v56 }
 0x549   :  { %27717 = vst [vmem:[#allocation12_spill] sm:$0xff] %v22591_v43  ;;  %v4703_v4 = vadd.f32 %v4702_v0, %v4640_v41  ;;  %v4569_v5 = vadd.f32 %v4568_v1, %v22591_v43  ;;  %v4641_v27 = vmul.f32 %v22591_v43, %v22591_v43 }
 0x54b   :  { %v4570_v20 = vadd.f32 %v22581_v50, %v4569_v5  ;;  %v4704_v39 = vadd.f32 %v4703_v4, %v4641_v27 }
 0x54d   :  { %v4705_v51 = vadd.f32 %v4704_v39, %v4642_v29  ;;  %v22601_v35 = vpop.f32.mrb[44].mxu0  ;;  %v4571_v61 = vadd.f32 %v22589_v56, %v4570_v20 }
 0x54e   :  { %27718 = vst [vmem:[#allocation13_spill] sm:$0xff] %v22601_v35  ;;  %v22604_v23 = vpop.f32.mrb[45].mxu0  ;;  %v4646_v0 = vmul.f32 %v22601_v35, %v22601_v35 }
 0x54f   :  { %27719 = vst [vmem:[#allocation14_spill] sm:$0xff] %v22604_v23  ;;  %v4572_v11 = vadd.f32 %v4571_v61, %v22604_v23  ;;  %v4644_v46 = vmul.f32 %v22604_v23, %v22604_v23  ;;  %v4706_v63 = vadd.f32 %v4705_v51, %v4643_v45  ;;  %v22609_v47 = vpop.f32.mrb[46].mxu0 }
 0x550   :  { %27720 = vst [vmem:[#allocation15_spill] sm:$0xff] %v22609_v47  ;;  %v22611_v33 = vpop.f32.mrb[47].mxu0  ;;  %v4647_v27 = vmul.f32 %v22609_v47, %v22609_v47 }
 0x551   :  { %27721 = vst [vmem:[#allocation16_spill] sm:$0xff] %v22611_v33  ;;  %v4707_v15 = vadd.f32 %v4706_v63, %v4644_v46  ;;  %v4573_v1 = vadd.f32 %v4572_v11, %v22611_v33  ;;  %v4645_v41 = vmul.f32 %v22611_v33, %v22611_v33 }
 0x553   :  { %v4574_v4 = vadd.f32 %v22601_v35, %v4573_v1  ;;  %v4708_v5 = vadd.f32 %v4707_v15, %v4645_v41 }
 0x555   :  { %v4709_v29 = vadd.f32 %v4708_v5, %v4646_v0  ;;  %v22621_v20 = vpop.f32.mrb[48].mxu0  ;;  %v4575_v39 = vadd.f32 %v22609_v47, %v4574_v4 }
 0x556   :  { %27722 = vst [vmem:[#allocation17_spill] sm:$0xff] %v22621_v20  ;;  %v22624_v45 = vpop.f32.mrb[49].mxu0  ;;  %v4650_v0 = vmul.f32 %v22621_v20, %v22621_v20 }
 0x557   :  { %27723 = vst [vmem:[#allocation18_spill] sm:$0xff] %v22624_v45  ;;  %v4576_v51 = vadd.f32 %v4575_v39, %v22624_v45  ;;  %v4648_v61 = vmul.f32 %v22624_v45, %v22624_v45  ;;  %v4710_v11 = vadd.f32 %v4709_v29, %v4647_v27  ;;  %v22629_v46 = vpop.f32.mrb[50].mxu0 }
 0x558   :  { %27724 = vst [vmem:[#allocation19_spill] sm:$0xff] %v22629_v46  ;;  %v22631_v63 = vpop.f32.mrb[51].mxu0  ;;  %v4651_v39 = vmul.f32 %v22629_v46, %v22629_v46 }
 0x559   :  { %27725 = vst [vmem:[#allocation20_spill] sm:$0xff] %v22631_v63  ;;  %v4711_v15 = vadd.f32 %v4710_v11, %v4648_v61  ;;  %v4577_v1 = vadd.f32 %v4576_v51, %v22631_v63  ;;  %v4649_v41 = vmul.f32 %v22631_v63, %v22631_v63 }
 0x55b   :  { %v4578_v4 = vadd.f32 %v22621_v20, %v4577_v1  ;;  %v4712_v5 = vadd.f32 %v4711_v15, %v4649_v41 }
 0x55d   :  { %v4713_v27 = vadd.f32 %v4712_v5, %v4650_v0  ;;  %v22641_v29 = vpop.f32.mrb[52].mxu0  ;;  %v4579_v45 = vadd.f32 %v22629_v46, %v4578_v4 }
 0x55e   :  { %27726 = vst [vmem:[#allocation21_spill] sm:$0xff] %v22641_v29  ;;  %v22644_v61 = vpop.f32.mrb[53].mxu0  ;;  %v4654_v4 = vmul.f32 %v22641_v29, %v22641_v29 }
 0x55f   :  { %27727 = vst [vmem:[#allocation22_spill] sm:$0xff] %v22644_v61  ;;  %v4580_v51 = vadd.f32 %v4579_v45, %v22644_v61  ;;  %v4652_v11 = vmul.f32 %v22644_v61, %v22644_v61  ;;  %v4714_v63 = vadd.f32 %v4713_v27, %v4651_v39  ;;  %v22649_v47 = vpop.f32.mrb[54].mxu0 }
 0x560   :  { %27728 = vst [vmem:[#allocation23_spill] sm:$0xff] %v22649_v47  ;;  %v22651_v1 = vpop.f32.mrb[55].mxu0  ;;  %v4655_v61 = vmul.f32 %v22649_v47, %v22649_v47 }
 0x561   :  { %27729 = vst [vmem:[#allocation24_spill] sm:$0xff] %v22651_v1  ;;  %v4715_v15 = vadd.f32 %v4714_v63, %v4652_v11  ;;  %v4581_v41 = vadd.f32 %v4580_v51, %v22651_v1  ;;  %v4653_v0 = vmul.f32 %v22651_v1, %v22651_v1 }
 0x563   :  { %v4582_v5 = vadd.f32 %v22641_v29, %v4581_v41  ;;  %v4716_v45 = vadd.f32 %v4715_v15, %v4653_v0 }
 0x565   :  { %v4717_v39 = vadd.f32 %v4716_v45, %v4654_v4  ;;  %v22661_v27 = vpop.f32.mrb[56].mxu0  ;;  %v4583_v46 = vadd.f32 %v22649_v47, %v4582_v5 }
 0x566   :  { %27730 = vst [vmem:[#allocation25_spill] sm:$0xff] %v22661_v27  ;;  %v22664_v63 = vpop.f32.mrb[57].mxu0  ;;  %v4658_v5 = vmul.f32 %v22661_v27, %v22661_v27 }
 0x567   :  { %27731 = vst [vmem:[#allocation26_spill] sm:$0xff] %v22664_v63  ;;  %v4584_v51 = vadd.f32 %v4583_v46, %v22664_v63  ;;  %v4656_v11 = vmul.f32 %v22664_v63, %v22664_v63  ;;  %v4718_v1 = vadd.f32 %v4717_v39, %v4655_v61  ;;  %v22669_v20 = vpop.f32.mrb[58].mxu0 }
 0x568   :  { %27732 = vst [vmem:[#allocation27_spill] sm:$0xff] %v22669_v20  ;;  %v22671_v41 = vpop.f32.mrb[59].mxu0  ;;  %v4659_v63 = vmul.f32 %v22669_v20, %v22669_v20 }
 0x569   :  { %27733 = vst [vmem:[#allocation28_spill] sm:$0xff] %v22671_v41  ;;  %v4719_v15 = vadd.f32 %v4718_v1, %v4656_v11  ;;  %v4585_v0 = vadd.f32 %v4584_v51, %v22671_v41  ;;  %v4657_v4 = vmul.f32 %v22671_v41, %v22671_v41 }
 0x56b   :  { %v4586_v45 = vadd.f32 %v22661_v27, %v4585_v0  ;;  %v4720_v46 = vadd.f32 %v4719_v15, %v4657_v4 }
 0x56d   :  { %v4721_v61 = vadd.f32 %v4720_v46, %v4658_v5  ;;  %v22681_v39 = vpop.f32.mrb[60].mxu0  ;;  %v4587_v47 = vadd.f32 %v22669_v20, %v4586_v45 }
 0x56e   :  { %27734 = vst [vmem:[#allocation29_spill] sm:$0xff] %v22681_v39  ;;  %v4448_v1 = vpop.f32.mrb[61].mxu0  ;;  %v4662_v15 = vmul.f32 %v22681_v39, %v22681_v39 }
 0x56f   :  { %v4588_v11 = vadd.f32 %v4587_v47, %v4448_v1  ;;  %v4660_v51 = vmul.f32 %v4448_v1, %v4448_v1  ;;  %v4722_v29 = vadd.f32 %v4721_v61, %v4659_v63  ;;  %v22684_v35 = vpop.f32.mrb[62].mxu0 }
 0x570   :  { %v4451_v41 = vpop.f32.mrb[63].mxu0  ;;  %v4663_v5 = vmul.f32 %v22684_v35, %v22684_v35 }
 0x571   :  { %v4723_v33 = vadd.f32 %v4722_v29, %v4660_v51  ;;  %v4589_v23 = vadd.f32 %v4588_v11, %v4451_v41  ;;  %v4661_v56 = vmul.f32 %v4451_v41, %v4451_v41 }
 0x573   :  { %v4590_v0 = vadd.f32 %v22681_v39, %v4589_v23  ;;  %v4724_v4 = vadd.f32 %v4723_v33, %v4661_v56 }
 0x575   :  { %v4591_v45 = vadd.f32 %v22684_v35, %v4590_v0  ;;  %v4725_v47 = vadd.f32 %v4724_v4, %v4662_v15  ;;  %v4742_v15 = vlaneseq  ;;  %v4527_v4 = vld [vmem:[%s27574_s2] sm:$0x1] }
 0x577   :  { %v4592_v46 = vrot.slane %v4591_v45, 4  ;;  %v4726_v63 = vadd.f32 %v4725_v47, %v4663_v5  ;;  %v4743_v0 = vshrl.u32 %v4742_v15, 7 }
 0x579   :  { %v4593_v61 = vadd.f32 %v4592_v46, %v4591_v45  ;;  %v4727_v20 = vrot.slane %v4726_v63, 4 }
 0x57b   :  { %v4594_v27 = vrot.slane %v4593_v61, 2  ;;  %v4728_v29 = vadd.f32 %v4727_v20, %v4726_v63  ;;  %v22695_v20 = vsub.s32 0, %v4743_v0 }
 0x57d   :  { %v4595_v11 = vadd.f32 %v4594_v27, %v4593_v61  ;;  %v4729_v51 = vrot.slane %v4728_v29, 2  ;;  %27735 = vst [vmem:[#allocation30_spill] sm:$0xff] %v22695_v20 }
 0x57f   :  { %v4596_v50 = vrot.slane %v4595_v11, 1  ;;  %v4730_v43 = vadd.f32 %v4729_v51, %v4728_v29 }
 0x581   :  { %v4597_v38 = vadd.f32 %v4596_v50, %v4595_v11  ;;  %v4731_v2 = vrot.slane %v4730_v43, 1  ;;  %v4528_v50 = vld [vmem:[%s27575_s3] sm:$0x1] }
 0x583   :  { %v4599_v23 = vmul.f32 0.001953125, %v4597_v38  ;;  %v4732_v56 = vadd.f32 %v4731_v2, %v4730_v43 }
 0x585   :  { %v4733_v33 = vmul.f32 0.001953125, %v4732_v56  ;;  %v4734_v39 = vmul.f32 %v4599_v23, %v4599_v23 }
 0x587   :  { %v4735_v59 = vsub.f32 %v4733_v33, %v4734_v39 }
 0x589   :  { %v4736_v13 = vadd.f32 1e-05, %v4735_v59 }
 0x58b   :  { %20259 = vrsqrt.f32 %v4736_v13 }
 0x595   :  { %v20260_v27 = vpop.eup %20259 }
 0x596   :  { %v4738_v5 = vmul.f32 %v20260_v27, %v4527_v4  ;;  %v6108_v4 = vld [vmem:[#allocation2 + $0x194] sm:$0x1]  ;;  %v27744_v27 = vld [vmem:[#allocation8_spill] sm:$0xff] }
 0x598   :  { %v4739_v2 = vmul.f32 %v4738_v5, %v4599_v23  ;;  %v22701_v38 = vrot.slane %v4738_v5, %v22695_v20 }
 0x59a   :  { %v4740_v59 = vsub.f32 %v4528_v50, %v4739_v2  ;;  %v4807_v13 = vmul.f32 %v22701_v38, %v4448_v1  ;;  %v4808_v43 = vmul.f32 %v22701_v38, %v4451_v41  ;;  %v22707_v39 = vmul.f32 %v22701_v38, %v22384_v25  ;;  %v27745_v50 = vld [vmem:[#allocation6_spill] sm:$0xff] }
 0x59b   :  { %v22711_v45 = vmul.f32 %v22701_v38, %v22388_v6  ;;  %v22715_v47 = vmul.f32 %v22382_v57, %v22701_v38  ;;  %v22719_v46 = vmul.f32 %v22386_v7, %v22701_v38  ;;  %v22723_v41 = vmul.f32 %v22701_v38, %v22404_v48 }
 0x59c   :  { %v22726_v25 = vrot.slane %v4740_v59, %v22695_v20  ;;  %v22730_v6 = vmul.f32 %v22701_v38, %v22411_v28  ;;  %v22734_v57 = vmul.f32 %v22401_v32, %v22701_v38  ;;  %v22738_v7 = vmul.f32 %v22409_v12, %v22701_v38 }
 0x59d   :  { %v22742_v48 = vmul.f32 %v22701_v38, %v22424_v17  ;;  %v22746_v1 = vmul.f32 %v22701_v38, %v22431_v19  ;;  %v22750_v28 = vmul.f32 %v22421_v3, %v22701_v38  ;;  %v22754_v32 = vmul.f32 %v22429_v22, %v22701_v38 }
 0x59e   :  { %v4877_v63 = vadd.f32 %v22726_v25, %v4807_v13  ;;  %v4878_v12 = vadd.f32 %v22726_v25, %v4808_v43  ;;  %v22760_v17 = vmul.f32 %v22701_v38, %v22444_v10  ;;  %v22764_v19 = vmul.f32 %v22701_v38, %v22451_v54 }
 0x59f   :  { %v22768_v3 = vmul.f32 %v22441_v31, %v22701_v38  ;;  %v22772_v22 = vmul.f32 %v22449_v9, %v22701_v38  ;;  %v22776_v61 = vmul.f32 %v22701_v38, %v22464_v14  ;;  %v22780_v10 = vmul.f32 %v22701_v38, %v22471_v62 }
 0x5a0   :  { %v4941_v29 = vmax.f32 %v4877_v63, 0.0  ;;  %v4942_v11 = vmax.f32 %v4878_v12, 0.0  ;;  %v22784_v54 = vmul.f32 %v22461_v40, %v22701_v38  ;;  %v22788_v31 = vmul.f32 %v22469_v52, %v22701_v38 }
 0x5a1   :  { %v22792_v9 = vmul.f32 %v22701_v38, %v22484_v37  ;;  %v22796_v14 = vmul.f32 %v22701_v38, %v22491_v21  ;;  %v22800_v62 = vmul.f32 %v22481_v44, %v22701_v38  ;;  %v22804_v40 = vmul.f32 %v22489_v34, %v22701_v38 }
 0x5a2   :  { %v22806_v51 = vpack.c.bf16 %v4941_v29, %v4941_v29  ;;  %v16828_v52 = vpack.c.bf16 %v4942_v11, %v4942_v11  ;;  %v22810_v23 = vmul.f32 %v22701_v38, %v22504_v58  ;;  %v22814_v37 = vmul.f32 %v22701_v38, %v22511_v8  ;;  %v27748_v29 = vld [vmem:[#allocation12_spill] sm:$0xff] }
 0x5a3   :  { %v22818_v21 = vmul.f32 %v22501_v26, %v22701_v38  ;;  %v22822_v44 = vmul.f32 %v22509_v30, %v22701_v38  ;;  %v22826_v34 = vmul.f32 %v22701_v38, %v22524_v53  ;;  %v22830_v58 = vmul.f32 %v22701_v38, %v22531_v18 }
 0x5a4   :  { %27736 = vst [vmem:[#allocation31_spill] sm:$0xff] %v22806_v51  ;;  %v5759_v56 = vshrl.u32 %v22806_v51, 16  ;;  %v5767_v8 = vshrl.u32 %v16828_v52, 16  ;;  %v5770_v33 = vshll.u32 %v16828_v52, 16  ;;  %v22835_v26 = vmul.f32 %v22521_v49, %v22701_v38  ;;  %v27749_v52 = vld [vmem:[#allocation9_spill] sm:$0xff] }
 0x5a5   :  { %v22839_v30 = vmul.f32 %v22529_v24, %v22701_v38  ;;  %v22843_v53 = vmul.f32 %v22701_v38, %v22544_v55  ;;  %v22847_v18 = vmul.f32 %v22701_v38, %v22551_v42  ;;  %v22851_v15 = vmul.f32 %v22541_v16, %v22701_v38 }
 0x5a6   :  { %v27737_v49 = vmov 0  ;;  %v22859_v24 = vrot.slane %v5759_v56, 7  ;;  %v5769_v0 = vrot.slane %v5767_v8, 7  ;;  %v22863_v55 = vmul.f32 %v22549_v36, %v22701_v38  ;;  %v27746_v36 = vld [vmem:[#allocation7_spill] sm:$0xff] }
 0x5a7   :  { %v27738_v49 = vsel %vm22855_vm3, 4294967295, %v27737_v49  ;;  %v22867_v42 = vmul.f32 %v22701_v38, %v22564_v60  ;;  %v27741_v16 = vmov 0  ;;  %v22877_v5 = vmul.f32 %v22701_v38, %v27744_v27  ;;  %v27747_v60 = vld [vmem:[#allocation10_spill] sm:$0xff]  ;;  %v27750_v8 = vld [vmem:[#allocation11_spill] sm:$0xff] }
 0x5a8   :  { %27739 = vst [vmem:[#allocation32_spill] sm:$0xff] %v27738_v49  ;;  %27740 = vst [vmem:[#allocation33_spill] sm:$0xff] %v22859_v24  ;;  %v27742_v16 = vsel %vm22871_vm4, 4294967295, %v27741_v16  ;;  %v22881_v2 = vmul.f32 %v27745_v50, %v22701_v38  ;;  %v22885_v59 = vmul.f32 %v27746_v36, %v22701_v38  ;;  %v22889_v13 = vmul.f32 %v22701_v38, %v27747_v60  ;;  %v27751_v50 = vld [vmem:[#allocation14_spill] sm:$0xff]  ;;  %v27752_v60 = vld [vmem:[#allocation16_spill] sm:$0xff] }
 0x5a9   :  { %27743 = vst [vmem:[#allocation34_spill] sm:$0xff] %v27742_v16  ;;  %v5765_v43 = vrot.slane %v22859_v24, 4  ;;  %v5772_v63 = vor.u32 %v5770_v33, %v5769_v0  ;;  %v5774_v12 = vrot.slane %v5769_v0, 4  ;;  %v22894_v11 = vmul.f32 %v22701_v38, %v27748_v29  ;;  %v27766_v16 = vld [vmem:[#allocation21_spill] sm:$0xff]  ;;  %v27768_v49 = vld [vmem:[#allocation23_spill] sm:$0xff] }
 0x5aa   :  { %v22898_v56 = vmul.f32 %v27749_v52, %v22701_v38  ;;  %v22902_v27 = vmul.f32 %v27750_v8, %v22701_v38  ;;  %v22906_v36 = vmul.f32 %v22701_v38, %v27751_v50  ;;  %v22910_v33 = vmul.f32 %v22701_v38, %v27752_v60  ;;  %v27754_v52 = vld [vmem:[#allocation13_spill] sm:$0xff]  ;;  %v27755_v8 = vld [vmem:[#allocation15_spill] sm:$0xff]  ;;  %v27756_v50 = vld [vmem:[#allocation18_spill] sm:$0xff] }
 0x5ab   :  { %v5773_v0 = vsel %vm22855_vm3, %v5765_v43, %v5772_v63  ;;  %v6109_v29 = vsel %vm22871_vm4, %v5774_v12, %v6108_v4  ;;  %v22918_v20 = vmul.f32 %v27754_v52, %v22701_v38  ;;  %v22922_v24 = vmul.f32 %v27755_v8, %v22701_v38  ;;  %v27758_v4 = vld [vmem:[#allocation17_spill] sm:$0xff]  ;;  %v27760_v12 = vld [vmem:[#allocation19_spill] sm:$0xff]  ;;  %v27762_v8 = vld [vmem:[#allocation22_spill] sm:$0xff] }
 0x5ac   :  { %27753 = vst [vmem:[#allocation8_spill] sm:$0xff] %v22910_v33  ;;  %6107 = vst [vmem:[#allocation2 + $0x190] sm:$0xf] %v5773_v0  ;;  %v22926_v60 = vmul.f32 %v22701_v38, %v27756_v50  ;;  %v27757_v33 = vld [vmem:[#allocation20_spill] sm:$0xff]  ;;  %v22934_v63 = vmul.f32 %v27758_v4, %v22701_v38  ;;  %v22938_v52 = vmul.f32 %v27760_v12, %v22701_v38 }
 0x5ad   :  { %6110 = vst [vmem:[#allocation2 + $0x194] sm:$0x1] %v6109_v29  ;;  %v22930_v43 = vmul.f32 %v22701_v38, %v27757_v33  ;;  %v22942_v0 = vmul.f32 %v22701_v38, %v27762_v8  ;;  %v27764_v29 = vld [vmem:[#allocation24_spill] sm:$0xff]  ;;  %v22950_v33 = vmul.f32 %v27766_v16, %v22701_v38  ;;  %v22954_v4 = vmul.f32 %v27768_v49, %v22701_v38 }
 0x5ae   :  { %27759 = vst [vmem:[#allocation6_spill] sm:$0xff] %v22934_v63  ;;  %27761 = vst [vmem:[#allocation7_spill] sm:$0xff] %v22938_v52  ;;  %v22946_v50 = vmul.f32 %v22701_v38, %v27764_v29  ;;  %v27769_v63 = vld [vmem:[#allocation26_spill] sm:$0xff]  ;;  %v27771_v52 = vld [vmem:[#allocation28_spill] sm:$0xff] }
 0x5af   :  { %27763 = vst [vmem:[#allocation10_spill] sm:$0xff] %v22942_v0  ;;  %27767 = vst [vmem:[#allocation9_spill] sm:$0xff] %v22950_v33  ;;  %v22958_v12 = vmul.f32 %v22701_v38, %v27769_v63  ;;  %v22962_v8 = vmul.f32 %v22701_v38, %v27771_v52  ;;  %v27772_v0 = vld [vmem:[#allocation25_spill] sm:$0xff]  ;;  %v22978_v63 = vmul.f32 %v22684_v35, %v22701_v38 }
 0x5b0   :  { %27765 = vst [vmem:[#allocation12_spill] sm:$0xff] %v22946_v50  ;;  %v22966_v29 = vmul.f32 %v27772_v0, %v22701_v38  ;;  %v27773_v50 = vld [vmem:[#allocation27_spill] sm:$0xff]  ;;  %v27774_v33 = vld [vmem:[#allocation29_spill] sm:$0xff]  ;;  %v22983_v52 = vadd.f32 %v22726_v25, %v22707_v39  ;;  %v22987_v0 = vadd.f32 %v22726_v25, %v22711_v45  ;;  %v22999_v35 = vadd.f32 %v22726_v25, %v22723_v41 }
 0x5b1   :  { %27770 = vst [vmem:[#allocation11_spill] sm:$0xff] %v22958_v12  ;;  %v22970_v16 = vmul.f32 %v27773_v50, %v22701_v38  ;;  %v22974_v49 = vmul.f32 %v27774_v33, %v22701_v38  ;;  %v22991_v50 = vadd.f32 %v22726_v25, %v22715_v47  ;;  %v22995_v33 = vadd.f32 %v22726_v25, %v22719_v46 }
 0x5b2   :  { %v23003_v38 = vadd.f32 %v22726_v25, %v22730_v6  ;;  %v23007_v39 = vadd.f32 %v22726_v25, %v22734_v57  ;;  %v23011_v45 = vadd.f32 %v22726_v25, %v22738_v7  ;;  %v23015_v47 = vadd.f32 %v22726_v25, %v22742_v48 }
 0x5b3   :  { %v23019_v46 = vadd.f32 %v22726_v25, %v22746_v1  ;;  %v23023_v41 = vadd.f32 %v22726_v25, %v22750_v28  ;;  %v23027_v6 = vadd.f32 %v22726_v25, %v22754_v32  ;;  %v23031_v57 = vadd.f32 %v22726_v25, %v22760_v17 }
 0x5b4   :  { %v23035_v7 = vadd.f32 %v22726_v25, %v22764_v19  ;;  %v23039_v48 = vadd.f32 %v22726_v25, %v22768_v3  ;;  %v23043_v1 = vadd.f32 %v22726_v25, %v22772_v22  ;;  %v23047_v28 = vadd.f32 %v22726_v25, %v22776_v61 }
 0x5b5   :  { %v23051_v32 = vadd.f32 %v22726_v25, %v22780_v10  ;;  %v23055_v17 = vadd.f32 %v22726_v25, %v22784_v54  ;;  %v23059_v19 = vadd.f32 %v22726_v25, %v22788_v31  ;;  %v23063_v3 = vadd.f32 %v22726_v25, %v22792_v9  ;;  %v20091_v31 = vld [vmem:[%s27576_s4 + $0x40] sm:$0xff]   ;;  %v27786_v51 = vld [vmem:[#allocation6_spill] sm:$0xff] }
 0x5b6   :  { %v23067_v22 = vadd.f32 %v22726_v25, %v22796_v14  ;;  %v23071_v61 = vadd.f32 %v22726_v25, %v22800_v62  ;;  %v23075_v10 = vadd.f32 %v22726_v25, %v22804_v40  ;;  %v23079_v54 = vadd.f32 %v22726_v25, %v22810_v23  ;;  %18271 = vmatprep.subr.bf16.mxu1 %v20091_v31 }
 0x5b7   :  { %v23086_v9 = vadd.f32 %v22726_v25, %v22814_v37  ;;  %v23090_v14 = vadd.f32 %v22726_v25, %v22818_v21  ;;  %v23094_v62 = vadd.f32 %v22726_v25, %v22822_v44  ;;  %v23098_v40 = vadd.f32 %v22726_v25, %v22826_v34  ;;  %18272 = vmatpush3.bf16.msra.mxu1 %v20091_v31  ;;  %v27781_v31 = vld [vmem:[#allocation8_spill] sm:$0xff] }
 0x5b8   :  { %v23102_v23 = vadd.f32 %v22726_v25, %v22830_v58  ;;  %v23106_v37 = vadd.f32 %v22726_v25, %v22835_v26  ;;  %v23110_v21 = vadd.f32 %v22726_v25, %v22839_v30  ;;  %v23114_v44 = vadd.f32 %v22726_v25, %v22843_v53 }
 0x5b9   :  { %27775 = vst [vmem:[#allocation14_spill] sm:$0xff] %v23090_v14  ;;  %v23118_v34 = vadd.f32 %v22726_v25, %v22847_v18  ;;  %v23122_v58 = vadd.f32 %v22726_v25, %v22851_v15  ;;  %v23126_v26 = vadd.f32 %v22726_v25, %v22863_v55  ;;  %v23130_v30 = vadd.f32 %v22726_v25, %v22867_v42  ;;  %v20092_v42 = vld [vmem:[%s27576_s4 + $0x48] sm:$0xff]  }
 0x5ba   :  { %v23134_v53 = vadd.f32 %v22726_v25, %v22877_v5  ;;  %v23138_v18 = vadd.f32 %v22726_v25, %v22881_v2  ;;  %v23142_v15 = vadd.f32 %v22726_v25, %v22885_v59  ;;  %v23146_v55 = vadd.f32 %v22726_v25, %v22889_v13  ;;  %18273 = vmatprep.subr.bf16.mxu1 %v20092_v42 }
 0x5bb   :  { %v23153_v5 = vadd.f32 %v22726_v25, %v22894_v11  ;;  %v23157_v2 = vadd.f32 %v22726_v25, %v22898_v56  ;;  %v23161_v59 = vadd.f32 %v22726_v25, %v22902_v27  ;;  %v23165_v13 = vadd.f32 %v22726_v25, %v22906_v36  ;;  %18274 = vmatpush3.bf16.msra.mxu1 %v20092_v42  ;;  %v20093_v42 = vld [vmem:[%s27576_s4 + $0x50] sm:$0xff]  }
 0x5bc   :  { %27776 = vst [vmem:[#allocation16_spill] sm:$0xff] %v23138_v18  ;;  %27777 = vst [vmem:[#allocation13_spill] sm:$0xff] %v23142_v15  ;;  %v23169_v12 = vadd.f32 %v22726_v25, %v27781_v31  ;;  %v23173_v11 = vadd.f32 %v22726_v25, %v22918_v20  ;;  %v23177_v56 = vadd.f32 %v22726_v25, %v22922_v24  ;;  %18275 = vmatprep.subr.bf16.mxu1 %v20093_v42 }
 0x5bd   :  { %27778 = vst [vmem:[#allocation15_spill] sm:$0xff] %v23146_v55  ;;  %27779 = vst [vmem:[#allocation18_spill] sm:$0xff] %v23153_v5  ;;  %v23181_v27 = vadd.f32 %v22726_v25, %v22926_v60  ;;  %v23185_v36 = vadd.f32 %v22726_v25, %v22930_v43  ;;  %v23189_v31 = vadd.f32 %v22726_v25, %v27786_v51  ;;  %v27790_v60 = vld [vmem:[#allocation12_spill] sm:$0xff]  ;;  %v20098_v5 = vld [vmem:[%s27576_s4 + $0x78] sm:$0xff]   ;;  %v27810_v18 = vmax.f32 %v22995_v33, 0.0 }
 0x5be   :  { %27780 = vst [vmem:[#allocation20_spill] sm:$0xff] %v23157_v2  ;;  %27782 = vst [vmem:[#allocation17_spill] sm:$0xff] %v23169_v12  ;;  %v27788_v12 = vld [vmem:[#allocation7_spill] sm:$0xff]  ;;  %v23209_v51 = vadd.f32 %v22726_v25, %v22954_v4  ;;  %v23228_v4 = vadd.f32 %v22726_v25, %v22970_v16  ;;  %v27814_v33 = vmax.f32 %v23011_v45, 0.0  ;;  %v27818_v45 = vmax.f32 %v23027_v6, 0.0 }
 0x5bf   :  { %27783 = vst [vmem:[#allocation19_spill] sm:$0xff] %v23173_v11  ;;  %27784 = vst [vmem:[#allocation22_spill] sm:$0xff] %v23177_v56  ;;  %v23193_v20 = vadd.f32 %v22726_v25, %v27788_v12  ;;  %v27789_v11 = vld [vmem:[#allocation10_spill] sm:$0xff]  ;;  %v27791_v56 = vld [vmem:[#allocation9_spill] sm:$0xff]  ;;  %18276 = vmatpush3.bf16.msra.mxu1 %v20093_v42  ;;  %v23333_v14 = vpack.c.bf16 %v27810_v18, %v27810_v18  ;;  %v27822_v6 = vmax.f32 %v23043_v1, 0.0  ;;  %v27826_v1 = vmax.f32 %v23059_v19, 0.0 }
 0x5c0   :  { %27785 = vst [vmem:[#allocation24_spill] sm:$0xff] %v23181_v27  ;;  %27787 = vst [vmem:[#allocation21_spill] sm:$0xff] %v23189_v31  ;;  %v23197_v24 = vadd.f32 %v22726_v25, %v27789_v11  ;;  %v23201_v27 = vadd.f32 %v22726_v25, %v27790_v60  ;;  %v23205_v43 = vadd.f32 %v22726_v25, %v27791_v56  ;;  %v27792_v31 = vld [vmem:[#allocation11_spill] sm:$0xff] }
 0x5c1   :  { %v23213_v12 = vadd.f32 %v22726_v25, %v27792_v31  ;;  %v23220_v11 = vadd.f32 %v22726_v25, %v22962_v8  ;;  %v23224_v56 = vadd.f32 %v22726_v25, %v22966_v29  ;;  %27796 = vst [vmem:[#allocation25_spill] sm:$0xff] %v23228_v4  ;;  %v23232_v31 = vadd.f32 %v22726_v25, %v22974_v49  ;;  %v20097_v4 = vld [vmem:[%s27576_s4 + $0x70] sm:$0xff]  }
 0x5c2   :  { %v23236_v60 = vadd.f32 %v22726_v25, %v22978_v63  ;;  %v27808_v49 = vmax.f32 %v22987_v0, 0.0  ;;  %v27812_v0 = vmax.f32 %v23003_v38, 0.0  ;;  %v23353_v18 = vpack.c.bf16 %v27814_v33, %v27814_v33 }
 0x5c3   :  { %27793 = vst [vmem:[#allocation23_spill] sm:$0xff] %v23213_v12  ;;  %27794 = vst [vmem:[#allocation26_spill] sm:$0xff] %v23220_v11  ;;  %v20094_v11 = vld [vmem:[%s27576_s4 + $0x58] sm:$0xff]   ;;  %v20096_v12 = vld [vmem:[%s27576_s4 + $0x68] sm:$0xff]   ;;  %v27816_v38 = vmax.f32 %v23019_v46, 0.0  ;;  %v23373_v33 = vpack.c.bf16 %v27818_v45, %v27818_v45  ;;  %v27820_v46 = vmax.f32 %v23035_v7, 0.0 }
 0x5c4   :  { %27795 = vst [vmem:[#allocation28_spill] sm:$0xff] %v23224_v56  ;;  %27797 = vst [vmem:[#allocation27_spill] sm:$0xff] %v23232_v31  ;;  %18277 = vmatprep.subr.bf16.mxu1 %v20094_v11  ;;  %v20095_v31 = vld [vmem:[%s27576_s4 + $0x60] sm:$0xff]   ;;  %v23323_v55 = vpack.c.bf16 %v27808_v49, %v27808_v49  ;;  %v23343_v49 = vpack.c.bf16 %v27812_v0, %v27812_v0  ;;  %v27824_v7 = vmax.f32 %v23051_v32, 0.0 }
 0x5c5   :  { %18278 = vmatpush3.bf16.msra.mxu1 %v20094_v11  ;;  %v27798_v42 = vld [vmem:[#allocation17_spill] sm:$0xff]  ;;  %v23363_v0 = vpack.c.bf16 %v27816_v38, %v27816_v38  ;;  %v20099_v32 = vld [vmem:[%s27576_s4] sm:$0xff]  }
 0x5c6   :  { %18279 = vmatprep.subr.bf16.mxu1 %v20095_v31 }
 0x5c7   :  { %v27801_v16 = vld [vmem:[#allocation24_spill] sm:$0xff]  ;;  %v27802_v63 = vld [vmem:[#allocation21_spill] sm:$0xff] }
 0x5c8   :  { %v27805_v2 = vld [vmem:[#allocation25_spill] sm:$0xff] }
 0x5c9   :  { %18280 = vmatpush3.bf16.msra.mxu1 %v20095_v31  ;;  %v27809_v31 = vmax.f32 %v22991_v50, 0.0  ;;  %v27813_v50 = vmax.f32 %v23007_v39, 0.0  ;;  %v27817_v39 = vmax.f32 %v23023_v41, 0.0  ;;  %v27821_v41 = vmax.f32 %v23039_v48, 0.0 }
 0x5ca   :  { %18281 = vmatprep.subr.bf16.mxu1 %v20096_v12  ;;  %v27803_v8 = vld [vmem:[#allocation23_spill] sm:$0xff]  ;;  %v27804_v15 = vld [vmem:[#allocation26_spill] sm:$0xff]  ;;  %v27825_v48 = vmax.f32 %v23055_v17, 0.0 }
 0x5cb   :  { %v27806_v25 = vld [vmem:[#allocation27_spill] sm:$0xff]  ;;  %v23328_v56 = vpack.c.bf16 %v27809_v31, %v27809_v31  ;;  %v23348_v31 = vpack.c.bf16 %v27813_v50, %v27813_v50  ;;  %v23368_v50 = vpack.c.bf16 %v27817_v39, %v27817_v39  ;;  %v23388_v38 = vpack.c.bf16 %v27821_v41, %v27821_v41 }
 0x5cc   :  { %v23393_v39 = vpack.c.bf16 %v27822_v6, %v27822_v6  ;;  %v23413_v41 = vpack.c.bf16 %v27826_v1, %v27826_v1  ;;  %v27831_v1 = vmax.f32 %v23079_v54, 0.0  ;;  %v27836_v54 = vmax.f32 %v23098_v40, 0.0 }
 0x5cd   :  { %18282 = vmatpush3.bf16.msra.mxu1 %v20096_v12  ;;  %v27807_v12 = vmax.f32 %v22983_v52, 0.0  ;;  %v27811_v52 = vmax.f32 %v22999_v35, 0.0  ;;  %v27815_v35 = vmax.f32 %v23015_v47, 0.0  ;;  %v27819_v47 = vmax.f32 %v23031_v57, 0.0 }
 0x5ce   :  { %18283 = vmatprep.subr.bf16.mxu1 %v20097_v4  ;;  %v27823_v57 = vmax.f32 %v23047_v28, 0.0  ;;  %v27827_v28 = vmax.f32 %v23063_v3, 0.0  ;;  %v27840_v40 = vmax.f32 %v23114_v44, 0.0  ;;  %v27845_v44 = vmax.f32 %v23130_v30, 0.0 }
 0x5cf   :  { %v23318_v11 = vpack.c.bf16 %v27807_v12, %v27807_v12  ;;  %v23338_v12 = vpack.c.bf16 %v27811_v52, %v27811_v52  ;;  %v23358_v52 = vpack.c.bf16 %v27815_v35, %v27815_v35  ;;  %v23378_v35 = vpack.c.bf16 %v27819_v47, %v27819_v47 }
 0x5d0   :  { %v23398_v45 = vpack.c.bf16 %v27823_v57, %v27823_v57  ;;  %v23403_v47 = vpack.c.bf16 %v27824_v7, %v27824_v7  ;;  %v23418_v6 = vpack.c.bf16 %v27827_v28, %v27827_v28  ;;  %v27828_v57 = vmax.f32 %v23067_v22, 0.0 }
 0x5d1   :  { %18284 = vmatpush3.bf16.msra.mxu1 %v20097_v4  ;;  %v23383_v4 = vpack.c.bf16 %v27820_v46, %v27820_v46  ;;  %v23408_v46 = vpack.c.bf16 %v27825_v48, %v27825_v48  ;;  %v27829_v7 = vmax.f32 %v23071_v61, 0.0  ;;  %v27830_v48 = vmax.f32 %v23075_v10, 0.0  ;;  %v27833_v61 = vld [vmem:[#allocation14_spill] sm:$0xff] }
 0x5d2   :  { %18285 = vmatprep.subr.bf16.mxu1 %v20098_v5  ;;  %v23426_v17 = vpack.c.bf16 %v27828_v57, %v27828_v57  ;;  %v23441_v28 = vpack.c.bf16 %v27831_v1, %v27831_v1  ;;  %v27832_v22 = vmax.f32 %v23086_v9, 0.0  ;;  %v27834_v29 = vmax.f32 %v27833_v61, 0.0 }
 0x5d3   :  { %v23431_v19 = vpack.c.bf16 %v27829_v7, %v27829_v7  ;;  %v23436_v3 = vpack.c.bf16 %v27830_v48, %v27830_v48  ;;  %v27835_v10 = vmax.f32 %v23094_v62, 0.0  ;;  %v23461_v1 = vpack.c.bf16 %v27836_v54, %v27836_v54 }
 0x5d4   :  { %v23446_v57 = vpack.c.bf16 %v27832_v22, %v27832_v22  ;;  %v23451_v7 = vpack.c.bf16 %v27834_v29, %v27834_v29  ;;  %v27837_v9 = vmax.f32 %v23102_v23, 0.0  ;;  %v27838_v22 = vmax.f32 %v23106_v37, 0.0 }
 0x5d5   :  { %18286 = vmatpush3.bf16.msra.mxu1 %v20098_v5  ;;  %v23456_v48 = vpack.c.bf16 %v27835_v10, %v27835_v10  ;;  %v27839_v62 = vmax.f32 %v23110_v21, 0.0  ;;  %v23481_v10 = vpack.c.bf16 %v27840_v40, %v27840_v40  ;;  %v27841_v23 = vmax.f32 %v23118_v34, 0.0  ;;  %v27849_v40 = vld [vmem:[#allocation16_spill] sm:$0xff] }
 0x5d6   :  { %18351 = vmatprep.subr.bf16.mxu1 %v20099_v32  ;;  %v23466_v5 = vpack.c.bf16 %v27837_v9, %v27837_v9  ;;  %v23471_v29 = vpack.c.bf16 %v27838_v22, %v27838_v22  ;;  %v27842_v37 = vmax.f32 %v23122_v58, 0.0  ;;  %v27843_v21 = vmax.f32 %v23126_v26, 0.0 }
 0x5d7   :  { %v23476_v61 = vpack.c.bf16 %v27839_v62, %v27839_v62  ;;  %v23486_v32 = vpack.c.bf16 %v27841_v23, %v27841_v23  ;;  %v23501_v22 = vpack.c.bf16 %v27845_v44, %v27845_v44  ;;  %v27847_v34 = vmax.f32 %v23134_v53, 0.0 }
 0x5d8   :  { %v23491_v54 = vpack.c.bf16 %v27842_v37, %v27842_v37  ;;  %v23496_v9 = vpack.c.bf16 %v27843_v21, %v27843_v21  ;;  %v27850_v58 = vmax.f32 %v27849_v40, 0.0  ;;  %v27851_v37 = vld [vmem:[#allocation13_spill] sm:$0xff] }
 0x5d9   :  { %27846 = vst [vmem:[#allocation8_spill] sm:$0xff] %v23501_v22  ;;  %v23506_v62 = vpack.c.bf16 %v27847_v34, %v27847_v34  ;;  %v27852_v26 = vmax.f32 %v27851_v37, 0.0  ;;  %v27855_v22 = vld [vmem:[#allocation18_spill] sm:$0xff]  ;;  %v27861_v37 = vmax.f32 %v23161_v59, 0.0 }
 0x5da   :  { %27844 = vst [vmem:[#allocation29_spill] sm:$0xff] %v23496_v9  ;;  %v23511_v23 = vpack.c.bf16 %v27850_v58, %v27850_v58  ;;  %v27853_v9 = vld [vmem:[#allocation15_spill] sm:$0xff]  ;;  %v27856_v53 = vmax.f32 %v27855_v22, 0.0  ;;  %v27863_v22 = vmax.f32 %v27798_v42, 0.0  ;;  %v27869_v42 = vmax.f32 %v23185_v36, 0.0 }
 0x5db   :  { %27848 = vst [vmem:[#allocation6_spill] sm:$0xff] %v23506_v62  ;;  %v23516_v21 = vpack.c.bf16 %v27852_v26, %v27852_v26  ;;  %v27854_v30 = vmax.f32 %v27853_v9, 0.0  ;;  %v27858_v62 = vld [vmem:[#allocation20_spill] sm:$0xff]  ;;  %v23536_v26 = vpack.c.bf16 %v27861_v37, %v27861_v37  ;;  %v27862_v9 = vmax.f32 %v23165_v13, 0.0 }
 0x5dc   :  { %v23526_v34 = vpack.c.bf16 %v27856_v53, %v27856_v53  ;;  %v27859_v40 = vmax.f32 %v27858_v62, 0.0  ;;  %v23546_v53 = vpack.c.bf16 %v27863_v22, %v27863_v22  ;;  %v27868_v13 = vmax.f32 %v27801_v16, 0.0 }
 0x5dd   :  { %v23521_v44 = vpack.c.bf16 %v27854_v30, %v27854_v30  ;;  %v23541_v30 = vpack.c.bf16 %v27862_v9, %v27862_v9  ;;  %v23566_v22 = vpack.c.bf16 %v27869_v42, %v27869_v42  ;;  %v27873_v16 = vmax.f32 %v23197_v24, 0.0 }
 0x5de   :  { %27857 = vst [vmem:[#allocation7_spill] sm:$0xff] %v23526_v34  ;;  %v23531_v58 = vpack.c.bf16 %v27859_v40, %v27859_v40  ;;  %v27864_v34 = vld [vmem:[#allocation19_spill] sm:$0xff]  ;;  %v23561_v9 = vpack.c.bf16 %v27868_v13, %v27868_v13  ;;  %v27875_v36 = vmax.f32 %v23201_v27, 0.0  ;;  %v27881_v24 = vmax.f32 %v27803_v8, 0.0 }
 0x5df   :  { %v27865_v62 = vmax.f32 %v27864_v34, 0.0  ;;  %v27870_v34 = vmax.f32 %v27802_v63, 0.0  ;;  %v23581_v13 = vpack.c.bf16 %v27873_v16, %v27873_v16  ;;  %v27877_v63 = vmax.f32 %v23205_v43, 0.0 }
 0x5e0   :  { %27860 = vst [vmem:[#allocation10_spill] sm:$0xff] %v23531_v58  ;;  %v27866_v58 = vld [vmem:[#allocation22_spill] sm:$0xff]  ;;  %v23586_v42 = vpack.c.bf16 %v27875_v36, %v27875_v36  ;;  %v23601_v16 = vpack.c.bf16 %v27881_v24, %v27881_v24  ;;  %v27883_v27 = vmax.f32 %v27804_v15, 0.0  ;;  %v27890_v8 = vmax.f32 %v27806_v25, 0.0 }
 0x5e1   :  { %v23551_v40 = vpack.c.bf16 %v27865_v62, %v27865_v62  ;;  %v27867_v59 = vmax.f32 %v27866_v58, 0.0  ;;  %v23571_v62 = vpack.c.bf16 %v27870_v34, %v27870_v34  ;;  %v27871_v58 = vmax.f32 %v23193_v20, 0.0  ;;  %27874 = vst [vmem:[#allocation9_spill] sm:$0xff] %v23581_v13 }
 0x5e2   :  { %27876 = vst [vmem:[#allocation11_spill] sm:$0xff] %v23586_v42  ;;  %v23591_v34 = vpack.c.bf16 %v27877_v63, %v27877_v63  ;;  %v27879_v20 = vmax.f32 %v23209_v51, 0.0  ;;  %27882 = vst [vmem:[#allocation21_spill] sm:$0xff] %v23601_v16  ;;  %v23606_v36 = vpack.c.bf16 %v27883_v27, %v27883_v27  ;;  %v27885_v42 = vld [vmem:[#allocation28_spill] sm:$0xff]  ;;  %v27888_v51 = vmax.f32 %v27805_v2, 0.0 }
 0x5e3   :  { %v23556_v37 = vpack.c.bf16 %v27867_v59, %v27867_v59  ;;  %v23576_v59 = vpack.c.bf16 %v27871_v58, %v27871_v58  ;;  %v27886_v43 = vmax.f32 %v27885_v42, 0.0  ;;  %v23621_v24 = vpack.c.bf16 %v27890_v8, %v27890_v8 }
 0x5e4   :  { %27878 = vst [vmem:[#allocation17_spill] sm:$0xff] %v23591_v34  ;;  %v23596_v58 = vpack.c.bf16 %v27879_v20, %v27879_v20  ;;  %27884 = vst [vmem:[#allocation23_spill] sm:$0xff] %v23606_v36  ;;  %v23616_v20 = vpack.c.bf16 %v27888_v51, %v27888_v51  ;;  %v27892_v15 = vmax.f32 %v23236_v60, 0.0  ;;  %v5249_v42 = vshrl.u32 %v23318_v11, 16 }
 0x5e5   :  { %27872 = vst [vmem:[#allocation12_spill] sm:$0xff] %v23576_v59  ;;  %v23611_v63 = vpack.c.bf16 %v27886_v43, %v27886_v43  ;;  %27891 = vst [vmem:[#allocation27_spill] sm:$0xff] %v23621_v24  ;;  %v5252_v43 = vshll.u32 %v23318_v11, 16  ;;  %v5260_v2 = vshll.u32 %v23323_v55, 16  ;;  %v5266_v51 = vshrl.u32 %v23328_v56, 16 }
 0x5e6   :  { %27880 = vst [vmem:[#allocation24_spill] sm:$0xff] %v23596_v58  ;;  %27889 = vst [vmem:[#allocation25_spill] sm:$0xff] %v23616_v20  ;;  %v23626_v27 = vpack.c.bf16 %v27892_v15, %v27892_v15  ;;  %v5269_v25 = vshll.u32 %v23328_v56, 16  ;;  %v5274_v8 = vshrl.u32 %v23333_v14, 16  ;;  %v5251_v24 = vrot.slane %v5249_v42, 7 }
 0x5e7   :  { %27887 = vst [vmem:[#allocation26_spill] sm:$0xff] %v23611_v63  ;;  %v5257_v63 = vshrl.u32 %v23323_v55, 16  ;;  %v5277_v60 = vshll.u32 %v23333_v14, 16  ;;  %v5283_v15 = vshrl.u32 %v23338_v12, 16  ;;  %v5286_v11 = vshll.u32 %v23338_v12, 16 }
 0x5e8   :  { %27893 = vst [vmem:[#allocation14_spill] sm:$0xff] %v23626_v27  ;;  %v5268_v27 = vrot.slane %v5266_v51, 7  ;;  %v23639_v36 = vrot.slane %v5274_v8, 7  ;;  %v5291_v55 = vshrl.u32 %v23343_v49, 16  ;;  %v23643_v16 = vor.u32 %v5252_v43, %v5251_v24 }
 0x5e9   :  { %v23635_v20 = vrot.slane %v5257_v63, 7  ;;  %v5255_v58 = vrot.slane %v5251_v24, 4  ;;  %v5285_v12 = vrot.slane %v5283_v15, 7  ;;  %v5294_v43 = vshll.u32 %v23343_v49, 16 }
 0x5ea   :  { %v23647_v63 = vor.u32 %v5269_v25, %v5268_v27  ;;  %v5272_v34 = vrot.slane %v5268_v27, 4  ;;  %v5279_v14 = vor.u32 %v5277_v60, %v23639_v36  ;;  %v23653_v59 = vrot.slane %v5291_v55, 7 }
 0x5eb   :  { %v5262_v56 = vor.u32 %v5260_v2, %v23635_v20  ;;  %v5300_v2 = vshrl.u32 %v23348_v31, 16  ;;  %v5303_v25 = vshll.u32 %v23348_v31, 16  ;;  %v5308_v27 = vshrl.u32 %v23353_v18, 16 }
 0x5ec   :  { %v5280_v24 = vsel %vm22855_vm3, %v5272_v34, %v5279_v14  ;;  %v23661_v60 = vor.u32 %v5286_v11, %v5285_v12  ;;  %v5289_v51 = vrot.slane %v5285_v12, 4  ;;  %v5311_v34 = vshll.u32 %v23353_v18, 16 }
 0x5ed   :  { %v5263_v13 = vsel %vm22855_vm3, %v5255_v58, %v5262_v56  ;;  %v5296_v58 = vor.u32 %v5294_v43, %v23653_v59  ;;  %5904 = vst [vmem:[#allocation2 + $0x1c] sm:$0xf] %v5280_v24  ;;  %v5302_v55 = vrot.slane %v5300_v2, 7  ;;  %v23665_v49 = vrot.slane %v5308_v27, 7 }
 0x5ee   :  { %5895 = vst [vmem:[#allocation2 + $0x10] sm:$0xf] %v5263_v13  ;;  %v5317_v56 = vshrl.u32 %v23358_v52, 16  ;;  %v5320_v13 = vshll.u32 %v23358_v52, 16  ;;  %v5325_v11 = vshrl.u32 %v23363_v0, 16  ;;  %v5328_v14 = vshll.u32 %v23363_v0, 16 }
 0x5ef   :  { %v5297_v31 = vsel %vm22855_vm3, %v5289_v51, %v5296_v58  ;;  %v23674_v12 = vor.u32 %v5303_v25, %v5302_v55  ;;  %v5306_v43 = vrot.slane %v5302_v55, 4  ;;  %v5313_v24 = vor.u32 %v5311_v34, %v23665_v49 }
 0x5f0   :  { %5911 = vst [vmem:[#allocation2 + $0x28] sm:$0xf] %v5297_v31  ;;  %v5319_v18 = vrot.slane %v5317_v56, 7  ;;  %v23678_v27 = vrot.slane %v5325_v11, 7  ;;  %v5334_v15 = vshrl.u32 %v23368_v50, 16  ;;  %v5337_v51 = vshll.u32 %v23368_v50, 16 }
 0x5f1   :  { %v5314_v52 = vsel %vm22855_vm3, %v5306_v43, %v5313_v24  ;;  %v5342_v0 = vshrl.u32 %v23373_v33, 16  ;;  %v5345_v25 = vshll.u32 %v23373_v33, 16  ;;  %v5351_v58 = vshrl.u32 %v23378_v35, 16 }
 0x5f2   :  { %v23687_v55 = vor.u32 %v5320_v13, %v5319_v18  ;;  %v5323_v34 = vrot.slane %v5319_v18, 4  ;;  %v5330_v56 = vor.u32 %v5328_v14, %v23678_v27  ;;  %5918 = vst [vmem:[#allocation2 + $0x34] sm:$0xf] %v5314_v52  ;;  %v5336_v11 = vrot.slane %v5334_v15, 7 }
 0x5f3   :  { %v23691_v2 = vrot.slane %v5342_v0, 7  ;;  %v5353_v50 = vrot.slane %v5351_v58, 7  ;;  %v5354_v43 = vshll.u32 %v23378_v35, 16  ;;  %v5359_v33 = vshrl.u32 %v23383_v4, 16 }
 0x5f4   :  { %v5331_v24 = vsel %vm22855_vm3, %v5323_v34, %v5330_v56  ;;  %v5362_v13 = vshll.u32 %v23383_v4, 16  ;;  %v5368_v18 = vshrl.u32 %v23388_v38, 16  ;;  %v23699_v42 = vor.u32 %v5337_v51, %v5336_v11 }
 0x5f5   :  { %v5340_v14 = vrot.slane %v5336_v11, 4  ;;  %v5347_v52 = vor.u32 %v5345_v25, %v23691_v2  ;;  %5925 = vst [vmem:[#allocation2 + $0x40] sm:$0xf] %v5331_v24  ;;  %v23703_v0 = vor.u32 %v5354_v43, %v5353_v50  ;;  %v5357_v35 = vrot.slane %v5353_v50, 4 }
 0x5f6   :  { %v23705_v58 = vrot.slane %v5359_v33, 7  ;;  %v5370_v34 = vrot.slane %v5368_v18, 7  ;;  %v5371_v4 = vshll.u32 %v23388_v38, 16  ;;  %v5376_v51 = vshrl.u32 %v23393_v39, 16 }
 0x5f7   :  { %v5348_v56 = vsel %vm22855_vm3, %v5340_v14, %v5347_v52  ;;  %v5379_v11 = vshll.u32 %v23393_v39, 16  ;;  %v5385_v43 = vshrl.u32 %v23398_v45, 16  ;;  %v5388_v18 = vshll.u32 %v23398_v45, 16 }
 0x5f8   :  { %v5364_v25 = vor.u32 %v5362_v13, %v23705_v58  ;;  %v5374_v24 = vrot.slane %v5370_v34, 4  ;;  %5932 = vst [vmem:[#allocation2 + $0x4c] sm:$0xf] %v5348_v56  ;;  %v23715_v50 = vor.u32 %v5371_v4, %v5370_v34  ;;  %v23717_v33 = vrot.slane %v5376_v51, 7 }
 0x5f9   :  { %v5393_v38 = vshrl.u32 %v23403_v47, 16  ;;  %v5387_v39 = vrot.slane %v5385_v43, 7  ;;  %v5396_v13 = vshll.u32 %v23403_v47, 16  ;;  %v5402_v52 = vshrl.u32 %v23408_v46, 16 }
 0x5fa   :  { %v5365_v14 = vsel %vm22855_vm3, %v5357_v35, %v5364_v25  ;;  %v5381_v15 = vor.u32 %v5379_v11, %v23717_v33  ;;  %v5405_v4 = vshll.u32 %v23408_v46, 16  ;;  %v5410_v35 = vshrl.u32 %v23413_v41, 16 }
 0x5fb   :  { %v23727_v34 = vrot.slane %v5393_v38, 7  ;;  %5939 = vst [vmem:[#allocation2 + $0x58] sm:$0xf] %v5365_v14  ;;  %v23730_v45 = vor.u32 %v5388_v18, %v5387_v39  ;;  %v5391_v51 = vrot.slane %v5387_v39, 4  ;;  %v5404_v31 = vrot.slane %v5402_v52, 7 }
 0x5fc   :  { %v5382_v47 = vsel %vm22855_vm3, %v5374_v24, %v5381_v15  ;;  %v5413_v43 = vshll.u32 %v23413_v41, 16  ;;  %v23740_v46 = vrot.slane %v5410_v35, 7  ;;  %v5419_v18 = vshrl.u32 %v23418_v6, 16 }
 0x5fd   :  { %v5398_v25 = vor.u32 %v5396_v13, %v23727_v34  ;;  %v23738_v38 = vor.u32 %v5405_v4, %v5404_v31  ;;  %v5408_v56 = vrot.slane %v5404_v31, 4  ;;  %5946 = vst [vmem:[#allocation2 + $0x64] sm:$0xf] %v5382_v47  ;;  %v5422_v39 = vshll.u32 %v23418_v6, 16 }
 0x5fe   :  { %v5427_v15 = vshrl.u32 %v23426_v17, 16  ;;  %v5430_v24 = vshll.u32 %v23426_v17, 16  ;;  %v5415_v13 = vor.u32 %v5413_v43, %v23740_v46  ;;  %v5421_v52 = vrot.slane %v5419_v18, 7 }
 0x5ff   :  { %v5399_v14 = vsel %vm22855_vm3, %v5391_v51, %v5398_v25  ;;  %v5436_v31 = vshrl.u32 %v23431_v19, 16  ;;  %v5439_v35 = vshll.u32 %v23431_v19, 16  ;;  %v5444_v51 = vshrl.u32 %v23436_v3, 16 }
 0x600   :  { %5953 = vst [vmem:[#allocation2 + $0x70] sm:$0xf] %v5399_v14  ;;  %v23751_v4 = vrot.slane %v5427_v15, 7  ;;  %v5447_v6 = vshll.u32 %v23436_v3, 16  ;;  %v5416_v47 = vsel %vm22855_vm3, %v5408_v56, %v5415_v13  ;;  %v23758_v17 = vor.u32 %v5422_v39, %v5421_v52 }
 0x601   :  { %v5425_v25 = vrot.slane %v5421_v52, 4  ;;  %v5438_v43 = vrot.slane %v5436_v31, 7  ;;  %v23762_v14 = vrot.slane %v5444_v51, 7  ;;  %v5453_v15 = vshrl.u32 %v23441_v28, 16  ;;  %5960 = vst [vmem:[#allocation2 + $0x7c] sm:$0xf] %v5416_v47 }
 0x602   :  { %v5432_v18 = vor.u32 %v5430_v24, %v23751_v4  ;;  %v5456_v3 = vshll.u32 %v23441_v28, 16  ;;  %v5461_v56 = vshrl.u32 %v23446_v57, 16  ;;  %v5464_v51 = vshll.u32 %v23446_v57, 16 }
 0x603   :  { %v23765_v19 = vor.u32 %v5439_v35, %v5438_v43  ;;  %v5442_v11 = vrot.slane %v5438_v43, 4  ;;  %v5449_v13 = vor.u32 %v5447_v6, %v23762_v14  ;;  %v5455_v52 = vrot.slane %v5453_v15, 7 }
 0x604   :  { %v5433_v39 = vsel %vm22855_vm3, %v5425_v25, %v5432_v18  ;;  %v23773_v31 = vrot.slane %v5461_v56, 7  ;;  %v5470_v35 = vshrl.u32 %v23451_v7, 16  ;;  %v5473_v47 = vshll.u32 %v23451_v7, 16 }
 0x605   :  { %5967 = vst [vmem:[#allocation2 + $0x88] sm:$0xf] %v5433_v39  ;;  %v5450_v28 = vsel %vm22855_vm3, %v5442_v11, %v5449_v13  ;;  %v23780_v43 = vor.u32 %v5456_v3, %v5455_v52  ;;  %v5459_v25 = vrot.slane %v5455_v52, 4  ;;  %v5478_v6 = vshrl.u32 %v23456_v48, 16 }
 0x606   :  { %v5466_v18 = vor.u32 %v5464_v51, %v23773_v31  ;;  %v5472_v56 = vrot.slane %v5470_v35, 7  ;;  %v5481_v57 = vshll.u32 %v23456_v48, 16  ;;  %5974 = vst [vmem:[#allocation2 + $0x94] sm:$0xf] %v5450_v28  ;;  %v5487_v7 = vshrl.u32 %v23461_v1, 16 }
 0x607   :  { %v23786_v24 = vrot.slane %v5478_v6, 7  ;;  %v5490_v39 = vshll.u32 %v23461_v1, 16  ;;  %v5495_v11 = vshrl.u32 %v23466_v5, 16  ;;  %v5498_v51 = vshll.u32 %v23466_v5, 16 }
 0x608   :  { %v5467_v3 = vsel %vm22855_vm3, %v5459_v25, %v5466_v18  ;;  %v23793_v13 = vor.u32 %v5473_v47, %v5472_v56  ;;  %v5476_v52 = vrot.slane %v5472_v56, 4  ;;  %v5489_v28 = vrot.slane %v5487_v7, 7 }
 0x609   :  { %v5483_v35 = vor.u32 %v5481_v57, %v23786_v24  ;;  %v23798_v6 = vrot.slane %v5495_v11, 7  ;;  %5981 = vst [vmem:[#allocation2 + $0xa0] sm:$0xf] %v5467_v3  ;;  %v5504_v1 = vshrl.u32 %v23471_v29, 16  ;;  %v5507_v15 = vshll.u32 %v23471_v29, 16 }
 0x60a   :  { %v5512_v41 = vshrl.u32 %v23476_v61, 16  ;;  %v5515_v47 = vshll.u32 %v23476_v61, 16  ;;  %v23806_v5 = vor.u32 %v5490_v39, %v5489_v28  ;;  %v5493_v18 = vrot.slane %v5489_v28, 4 }
 0x60b   :  { %v5484_v25 = vsel %vm22855_vm3, %v5476_v52, %v5483_v35  ;;  %v5500_v56 = vor.u32 %v5498_v51, %v23798_v6  ;;  %v5506_v7 = vrot.slane %v5504_v1, 7  ;;  %v5521_v3 = vshrl.u32 %v23481_v10, 16 }
 0x60c   :  { %v23810_v11 = vrot.slane %v5512_v41, 7  ;;  %5988 = vst [vmem:[#allocation2 + $0xac] sm:$0xf] %v5484_v25  ;;  %v5524_v61 = vshll.u32 %v23481_v10, 16  ;;  %v5529_v52 = vshrl.u32 %v23486_v32, 16  ;;  %v5532_v39 = vshll.u32 %v23486_v32, 16 }
 0x60d   :  { %v5501_v29 = vsel %vm22855_vm3, %v5493_v18, %v5500_v56  ;;  %v23818_v35 = vor.u32 %v5507_v15, %v5506_v7  ;;  %v5510_v51 = vrot.slane %v5506_v7, 4  ;;  %v5523_v1 = vrot.slane %v5521_v3, 7  ;;  %v27898_v56 = vld [vmem:[#allocation29_spill] sm:$0xff]  ;;  %v27899_v7 = vld [vmem:[#allocation8_spill] sm:$0xff] }
 0x60e   :  { %27895 = vst [vmem:[#allocation16_spill] sm:$0xff] %v23810_v11  ;;  %v5517_v28 = vor.u32 %v5515_v47, %v23810_v11  ;;  %5995 = vst [vmem:[#allocation2 + $0xb8] sm:$0xf] %v5501_v29  ;;  %v23822_v57 = vrot.slane %v5529_v52, 7  ;;  %v5538_v25 = vshrl.u32 %v23491_v54, 16  ;;  %v5541_v18 = vshll.u32 %v23491_v54, 16 }
 0x60f   :  { %27896 = vst [vmem:[#allocation13_spill] sm:$0xff] %v23818_v35  ;;  %v5546_v32 = vshrl.u32 %v27898_v56, 16  ;;  %v5549_v15 = vshll.u32 %v27898_v56, 16  ;;  %v5555_v48 = vshrl.u32 %v27899_v7, 16  ;;  %v23831_v47 = vor.u32 %v5524_v61, %v5523_v1  ;;  %v27902_v56 = vld [vmem:[#allocation6_spill] sm:$0xff] }
 0x610   :  { %27897 = vst [vmem:[#allocation15_spill] sm:$0xff] %v23822_v57  ;;  %v5518_v10 = vsel %vm22855_vm3, %v5510_v51, %v5517_v28  ;;  %v5527_v41 = vrot.slane %v5523_v1, 4  ;;  %v5534_v3 = vor.u32 %v5532_v39, %v23822_v57  ;;  %v5540_v52 = vrot.slane %v5538_v25, 7  ;;  %v27909_v29 = vld [vmem:[#allocation10_spill] sm:$0xff] }
 0x611   :  { %27900 = vst [vmem:[#allocation18_spill] sm:$0xff] %v23831_v47  ;;  %6002 = vst [vmem:[#allocation2 + $0xc4] sm:$0xf] %v5518_v10  ;;  %v23835_v11 = vrot.slane %v5546_v32, 7  ;;  %v5557_v54 = vrot.slane %v5555_v48, 7  ;;  %v5558_v51 = vshll.u32 %v27899_v7, 16 }
 0x612   :  { %v5535_v28 = vsel %vm22855_vm3, %v5527_v41, %v5534_v3  ;;  %v5563_v35 = vshrl.u32 %v27902_v56, 16  ;;  %v5566_v61 = vshll.u32 %v27902_v56, 16  ;;  %v5572_v1 = vshrl.u32 %v23511_v23, 16 }
 0x613   :  { %27901 = vst [vmem:[#allocation20_spill] sm:$0xff] %v23835_v11  ;;  %v23843_v47 = vor.u32 %v5541_v18, %v5540_v52  ;;  %v5544_v39 = vrot.slane %v5540_v52, 4  ;;  %v5551_v10 = vor.u32 %v5549_v15, %v23835_v11  ;;  %6009 = vst [vmem:[#allocation2 + $0xe8] sm:$0xf] %v5535_v28  ;;  %v23847_v48 = vor.u32 %v5558_v51, %v5557_v54  ;;  %v5940_v11 = vld [vmem:[#allocation2 + $0x5c] sm:$0x1] }
 0x614   :  { %v5561_v32 = vrot.slane %v5557_v54, 4  ;;  %v23849_v7 = vrot.slane %v5563_v35, 7  ;;  %v5574_v41 = vrot.slane %v5572_v1, 7  ;;  %v5575_v56 = vshll.u32 %v23511_v23, 16 }
 0x615   :  { %27903 = vst [vmem:[#allocation19_spill] sm:$0xff] %v23843_v47  ;;  %27904 = vst [vmem:[#allocation22_spill] sm:$0xff] %v23847_v48  ;;  %v5552_v3 = vsel %vm22855_vm3, %v5544_v39, %v5551_v10  ;;  %v5580_v18 = vshrl.u32 %v23516_v21, 16  ;;  %v5583_v52 = vshll.u32 %v23516_v21, 16  ;;  %v5589_v51 = vshrl.u32 %v23521_v44, 16  ;;  %v27908_v39 = vld [vmem:[#allocation7_spill] sm:$0xff] }
 0x616   :  { %27905 = vst [vmem:[#allocation28_spill] sm:$0xff] %v23849_v7  ;;  %v5568_v15 = vor.u32 %v5566_v61, %v23849_v7  ;;  %v5578_v28 = vrot.slane %v5574_v41, 4  ;;  %6016 = vst [vmem:[#allocation2 + $0xf4] sm:$0xf] %v5552_v3  ;;  %v23859_v35 = vor.u32 %v5575_v56, %v5574_v41  ;;  %v5592_v1 = vshll.u32 %v23521_v44, 16 }
 0x617   :  { %v23861_v54 = vrot.slane %v5580_v18, 7  ;;  %v5597_v23 = vshrl.u32 %v27908_v39, 16  ;;  %v5591_v21 = vrot.slane %v5589_v51, 7  ;;  %v5600_v61 = vshll.u32 %v27908_v39, 16  ;;  %v24010_v47 = vld [vmem:[#allocation2 + $0x6c] sm:$0xf] }
 0x618   :  { %27906 = vst [vmem:[#allocation32_spill] sm:$0xff] %v23859_v35  ;;  %v5569_v10 = vsel %vm22855_vm3, %v5561_v32, %v5568_v15  ;;  %v5606_v25 = vshrl.u32 %v27909_v29, 16  ;;  %v5609_v56 = vshll.u32 %v27909_v29, 16  ;;  %v5614_v32 = vshrl.u32 %v23536_v26, 16 }
 0x619   :  { %27907 = vst [vmem:[#allocation29_spill] sm:$0xff] %v23861_v54  ;;  %v5585_v7 = vor.u32 %v5583_v52, %v23861_v54  ;;  %v23871_v41 = vrot.slane %v5597_v23, 7  ;;  %6023 = vst [vmem:[#allocation2 + $0x100] sm:$0xf] %v5569_v10  ;;  %v23874_v44 = vor.u32 %v5592_v1, %v5591_v21  ;;  %v5595_v18 = vrot.slane %v5591_v21, 4 }
 0x61a   :  { %v5608_v35 = vrot.slane %v5606_v25, 7  ;;  %v5617_v39 = vshll.u32 %v23536_v26, 16  ;;  %v23884_v29 = vrot.slane %v5614_v32, 7  ;;  %v5623_v1 = vshrl.u32 %v23541_v30, 16  ;;  %v5926_v54 = vld [vmem:[#allocation2 + $0x44] sm:$0x1] }
 0x61b   :  { %27910 = vst [vmem:[#allocation8_spill] sm:$0xff] %v23871_v41  ;;  %27911 = vst [vmem:[#allocation6_spill] sm:$0xff] %v23874_v44  ;;  %v5586_v15 = vsel %vm22855_vm3, %v5578_v28, %v5585_v7  ;;  %v5602_v51 = vor.u32 %v5600_v61, %v23871_v41  ;;  %v5626_v10 = vshll.u32 %v23541_v30, 16  ;;  %v5631_v7 = vshrl.u32 %v23546_v53, 16 }
 0x61c   :  { %v23882_v23 = vor.u32 %v5609_v56, %v5608_v35  ;;  %v5612_v3 = vrot.slane %v5608_v35, 4  ;;  %27913 = vst [vmem:[#allocation10_spill] sm:$0xff] %v23884_v29  ;;  %6030 = vst [vmem:[#allocation2 + $0x10c] sm:$0xf] %v5586_v15  ;;  %v5634_v28 = vshll.u32 %v23546_v53, 16  ;;  %v5619_v21 = vor.u32 %v5617_v39, %v23884_v29 }
 0x61d   :  { %v5603_v25 = vsel %vm22855_vm3, %v5595_v18, %v5602_v51  ;;  %v5625_v61 = vrot.slane %v5623_v1, 7  ;;  %v5640_v35 = vshrl.u32 %v23551_v40, 16  ;;  %v23895_v56 = vrot.slane %v5631_v7, 7 }
 0x61e   :  { %27912 = vst [vmem:[#allocation7_spill] sm:$0xff] %v23882_v23  ;;  %6037 = vst [vmem:[#allocation2 + $0x118] sm:$0xf] %v5603_v25  ;;  %v5643_v32 = vshll.u32 %v23551_v40, 16  ;;  %v5648_v18 = vshrl.u32 %v23556_v37, 16  ;;  %v5651_v30 = vshll.u32 %v23556_v37, 16  ;;  %v5620_v15 = vsel %vm22855_vm3, %v5612_v3, %v5619_v21 }
 0x61f   :  { %27914 = vst [vmem:[#allocation35_spill] sm:$0xff] %v23895_v56  ;;  %v23902_v53 = vor.u32 %v5626_v10, %v5625_v61  ;;  %v5629_v51 = vrot.slane %v5625_v61, 4  ;;  %v5642_v39 = vrot.slane %v5640_v35, 7  ;;  %v5636_v1 = vor.u32 %v5634_v28, %v23895_v56  ;;  %6044 = vst [vmem:[#allocation2 + $0x124] sm:$0xf] %v5620_v15 }
 0x620   :  { %v23906_v25 = vrot.slane %v5648_v18, 7  ;;  %v5657_v7 = vshrl.u32 %v23561_v9, 16  ;;  %v5660_v37 = vshll.u32 %v23561_v9, 16  ;;  %v5665_v3 = vshrl.u32 %v23566_v22, 16 }
 0x621   :  { %27915 = vst [vmem:[#allocation36_spill] sm:$0xff] %v23902_v53  ;;  %v23909_v40 = vor.u32 %v5643_v32, %v5642_v39  ;;  %v5646_v52 = vrot.slane %v5642_v39, 4  ;;  %v5637_v10 = vsel %vm22855_vm3, %v5629_v51, %v5636_v1  ;;  %v5668_v18 = vshll.u32 %v23566_v22, 16  ;;  %v27920_v39 = vld [vmem:[#allocation12_spill] sm:$0xff] }
 0x622   :  { %27916 = vst [vmem:[#allocation37_spill] sm:$0xff] %v23906_v25  ;;  %v5653_v21 = vor.u32 %v5651_v30, %v23906_v25  ;;  %v5659_v61 = vrot.slane %v5657_v7, 7  ;;  %v23917_v35 = vrot.slane %v5665_v3, 7  ;;  %v5674_v32 = vshrl.u32 %v23571_v62, 16  ;;  %6051 = vst [vmem:[#allocation2 + $0x130] sm:$0xf] %v5637_v10 }
 0x623   :  { %27917 = vst [vmem:[#allocation38_spill] sm:$0xff] %v23909_v40  ;;  %v5677_v15 = vshll.u32 %v23571_v62, 16  ;;  %v5682_v1 = vshrl.u32 %v27920_v39, 16  ;;  %v5685_v28 = vshll.u32 %v27920_v39, 16  ;;  %v27922_v10 = vld [vmem:[#allocation9_spill] sm:$0xff]  ;;  %v27927_v40 = vld [vmem:[#allocation24_spill] sm:$0xff] }
 0x624   :  { %27918 = vst [vmem:[#allocation39_spill] sm:$0xff] %v23917_v35  ;;  %v5654_v9 = vsel %vm22855_vm3, %v5646_v52, %v5653_v21  ;;  %v23924_v51 = vor.u32 %v5660_v37, %v5659_v61  ;;  %v5663_v30 = vrot.slane %v5659_v61, 4  ;;  %v5670_v7 = vor.u32 %v5668_v18, %v23917_v35  ;;  %v27923_v52 = vld [vmem:[#allocation11_spill] sm:$0xff]  ;;  %v27926_v35 = vld [vmem:[#allocation17_spill] sm:$0xff] }
 0x625   :  { %v5676_v22 = vrot.slane %v5674_v32, 7  ;;  %6058 = vst [vmem:[#allocation2 + $0x13c] sm:$0xf] %v5654_v9  ;;  %v23930_v62 = vrot.slane %v5682_v1, 7  ;;  %v5691_v26 = vshrl.u32 %v27922_v10, 16  ;;  %v5694_v25 = vshll.u32 %v27922_v10, 16 }
 0x626   :  { %27919 = vst [vmem:[#allocation40_spill] sm:$0xff] %v23924_v51  ;;  %v5699_v37 = vshrl.u32 %v27923_v52, 16  ;;  %v5671_v21 = vsel %vm22855_vm3, %v5663_v30, %v5670_v7  ;;  %v5702_v3 = vshll.u32 %v27923_v52, 16  ;;  %v5708_v10 = vshrl.u32 %v27926_v35, 16 }
 0x627   :  { %27921 = vst [vmem:[#allocation12_spill] sm:$0xff] %v23930_v62  ;;  %v23937_v61 = vor.u32 %v5677_v15, %v5676_v22  ;;  %v5680_v18 = vrot.slane %v5676_v22, 4  ;;  %v5687_v32 = vor.u32 %v5685_v28, %v23930_v62  ;;  %v5693_v39 = vrot.slane %v5691_v26, 7  ;;  %6065 = vst [vmem:[#allocation2 + $0x148] sm:$0xf] %v5671_v21  ;;  %v27930_v21 = vld [vmem:[#allocation21_spill] sm:$0xff] }
 0x628   :  { %v23942_v1 = vrot.slane %v5699_v37, 7  ;;  %v5711_v51 = vshll.u32 %v27926_v35, 16  ;;  %v5716_v56 = vshrl.u32 %v27927_v40, 16  ;;  %v5719_v15 = vshll.u32 %v27927_v40, 16  ;;  %v27931_v62 = vld [vmem:[#allocation23_spill] sm:$0xff] }
 0x629   :  { %27924 = vst [vmem:[#allocation9_spill] sm:$0xff] %v23937_v61  ;;  %v5688_v30 = vsel %vm22855_vm3, %v5680_v18, %v5687_v32  ;;  %v23950_v7 = vor.u32 %v5694_v25, %v5693_v39  ;;  %v5697_v28 = vrot.slane %v5693_v39, 4  ;;  %v5710_v52 = vrot.slane %v5708_v10, 7  ;;  %v5892_v10 = vld [vmem:[#allocation2 + $0xc] sm:$0xf] }
 0x62a   :  { %27925 = vst [vmem:[#allocation11_spill] sm:$0xff] %v23942_v1  ;;  %v5704_v22 = vor.u32 %v5702_v3, %v23942_v1  ;;  %v23954_v37 = vrot.slane %v5716_v56, 7  ;;  %v5725_v9 = vshrl.u32 %v27930_v21, 16  ;;  %6072 = vst [vmem:[#allocation2 + $0x154] sm:$0xf] %v5688_v30  ;;  %v5728_v40 = vshll.u32 %v27930_v21, 16 }
 0x62b   :  { %27928 = vst [vmem:[#allocation17_spill] sm:$0xff] %v23950_v7  ;;  %v5733_v18 = vshrl.u32 %v27931_v62, 16  ;;  %v5736_v25 = vshll.u32 %v27931_v62, 16  ;;  %v23962_v32 = vor.u32 %v5711_v51, %v5710_v52  ;;  %v5714_v3 = vrot.slane %v5710_v52, 4  ;;  %v27934_v1 = vld [vmem:[#allocation26_spill] sm:$0xff]  ;;  %v27937_v21 = vld [vmem:[#allocation25_spill] sm:$0xff] }
 0x62c   :  { %27929 = vst [vmem:[#allocation24_spill] sm:$0xff] %v23954_v37  ;;  %v5705_v35 = vsel %vm22855_vm3, %v5697_v28, %v5704_v22  ;;  %v5721_v39 = vor.u32 %v5719_v15, %v23954_v37  ;;  %v5727_v26 = vrot.slane %v5725_v9, 7  ;;  %v5742_v28 = vshrl.u32 %v27934_v1, 16  ;;  %v5901_v51 = vld [vmem:[#allocation2 + $0x18] sm:$0xf] }
 0x62d   :  { %27932 = vst [vmem:[#allocation21_spill] sm:$0xff] %v23962_v32  ;;  %6079 = vst [vmem:[#allocation2 + $0x160] sm:$0xf] %v5705_v35  ;;  %v23966_v30 = vrot.slane %v5733_v18, 7  ;;  %v5745_v22 = vshll.u32 %v27934_v1, 16  ;;  %v5750_v35 = vshrl.u32 %v27937_v21, 16 }
 0x62e   :  { %v5898_v52 = vld [vmem:[#allocation2 + $0x14] sm:$0x1]  ;;  %v5722_v15 = vsel %vm22855_vm3, %v5714_v3, %v5721_v39  ;;  %v5753_v9 = vshll.u32 %v27937_v21, 16  ;;  %v27938_v18 = vld [vmem:[#allocation33_spill] sm:$0xff]  ;;  %v27939_v56 = vld [vmem:[#allocation31_spill] sm:$0xff]  ;;  %v23985_v61 = vor.u32 %v5728_v40, %v5727_v26  ;;  %v5731_v53 = vrot.slane %v5727_v26, 4 }
 0x62f   :  { %27933 = vst [vmem:[#allocation23_spill] sm:$0xff] %v23966_v30  ;;  %v27940_v37 = vshll.u32 %v27939_v56, 16  ;;  %v5905_v1 = vld [vmem:[#allocation2 + $0x20] sm:$0x1]  ;;  %v5908_v7 = vld [vmem:[#allocation2 + $0x24] sm:$0xf]  ;;  %v5738_v29 = vor.u32 %v5736_v25, %v23966_v30 }
 0x630   :  { %27942 = vst [vmem:[#allocation25_spill] sm:$0xff] %v23985_v61  ;;  %6086 = vst [vmem:[#allocation2 + $0x16c] sm:$0xf] %v5722_v15  ;;  %v5912_v3 = vld [vmem:[#allocation2 + $0x2c] sm:$0x1]  ;;  %v5744_v39 = vrot.slane %v5742_v28, 7  ;;  %v5893_v28 = vsel %vm23972_vm7, %v23643_v16, %v5892_v10 }
 0x631   :  { %v23983_v32 = vor.u32 %v27940_v37, %v27938_v18  ;;  %v23989_v41 = vrot.slane %v5750_v35, 7  ;;  %v27944_v21 = vld [vmem:[#allocation27_spill] sm:$0xff]  ;;  %v5915_v37 = vld [vmem:[#allocation2 + $0x30] sm:$0xf]  ;;  %v5739_v26 = vsel %vm22855_vm3, %v5731_v53, %v5738_v29  ;;  %v24000_v15 = vld [vmem:[#allocation2 + $0x48] sm:$0xf] }
 0x632   :  { %v5776_v44 = vshrl.u32 %v27944_v21, 16  ;;  %v5779_v56 = vshll.u32 %v27944_v21, 16  ;;  %v5919_v18 = vld [vmem:[#allocation2 + $0x38] sm:$0x1]  ;;  %v27945_v40 = vld [vmem:[#allocation14_spill] sm:$0xff]  ;;  %v24004_v21 = vor.u32 %v5745_v22, %v5744_v39  ;;  %v5748_v61 = vrot.slane %v5744_v39, 4 }
 0x633   :  { %27941 = vst [vmem:[#allocation26_spill] sm:$0xff] %v23983_v32  ;;  %27943 = vst [vmem:[#allocation33_spill] sm:$0xff] %v23989_v41  ;;  %v5922_v32 = vld [vmem:[#allocation2 + $0x3c] sm:$0xf]  ;;  %v5784_v25 = vshrl.u32 %v27945_v40, 16  ;;  %v5787_v23 = vshll.u32 %v27945_v40, 16  ;;  %v5755_v48 = vor.u32 %v5753_v9, %v23989_v41  ;;  %v5902_v9 = vsel %vm23972_vm7, %v23647_v63, %v5901_v51 }
 0x634   :  { %v5933_v35 = vld [vmem:[#allocation2 + $0x50] sm:$0x1]  ;;  %v24002_v30 = vld [vmem:[#allocation2 + $0x54] sm:$0xf]  ;;  %27946 = vst [vmem:[#allocation31_spill] sm:$0xff] %v24004_v21  ;;  %v5778_v16 = vrot.slane %v5776_v44, 7  ;;  %v5909_v63 = vsel %vm23972_vm7, %v23661_v60, %v5908_v7 }
 0x635   :  { %5894 = vst [vmem:[#allocation2 + $0xc] sm:$0xf] %v5893_v28  ;;  %6093 = vst [vmem:[#allocation2 + $0x178] sm:$0xf] %v5739_v26  ;;  %v24008_v53 = vld [vmem:[#allocation2 + $0x60] sm:$0xf]  ;;  %v5756_v44 = vsel %vm22855_vm3, %v5748_v61, %v5755_v48  ;;  %v5937_v8 = vsel %vm23972_vm7, %v23703_v0, %v24002_v30 }
 0x636   :  { %v5947_v40 = vld [vmem:[#allocation2 + $0x68] sm:$0x1]  ;;  %v24012_v10 = vrot.slane %v5784_v25, 7  ;;  %v27947_v57 = vrot.slane %v23635_v20, 4  ;;  %v24021_v28 = vld [vmem:[#allocation2 + $0x78] sm:$0xf]  ;;  %v5944_v0 = vsel %vm23972_vm7, %v23715_v50, %v24008_v53 }
 0x637   :  { %v24023_v26 = vld [vmem:[#allocation2 + $0x80] sm:$0x1]  ;;  %v5954_v29 = vld [vmem:[#allocation2 + $0x74] sm:$0x1]  ;;  %v24025_v41 = vld [vmem:[#allocation2 + $0x84] sm:$0xf] }
 0x638   :  { %v5899_v39 = vsel %vm22871_vm4, %v27947_v57, %v5898_v52  ;;  %5903 = vst [vmem:[#allocation2 + $0x18] sm:$0xf] %v5902_v9  ;;  %v27949_v20 = vrot.slane %v23639_v36, 4  ;;  %v27950_v51 = vrot.slane %v23653_v59, 4  ;;  %v24040_v25 = vld [vmem:[#allocation2 + $0x90] sm:$0xf]  ;;  %v24048_v36 = vor.u32 %v5779_v56, %v5778_v16 }
 0x639   :  { %5900 = vst [vmem:[#allocation2 + $0x14] sm:$0x1] %v5899_v39  ;;  %v24042_v21 = vld [vmem:[#allocation2 + $0x98] sm:$0x1]  ;;  %v24044_v48 = vld [vmem:[#allocation2 + $0x8c] sm:$0x1]  ;;  %v5789_v39 = vor.u32 %v5787_v23, %v24012_v10  ;;  %v5916_v56 = vsel %vm23972_vm7, %v23674_v12, %v5915_v37 }
 0x63a   :  { %v5906_v57 = vsel %vm22871_vm4, %v27949_v20, %v5905_v1  ;;  %v5913_v52 = vsel %vm22871_vm4, %v27950_v51, %v5912_v3  ;;  %v24046_v61 = vld [vmem:[#allocation2 + $0x9c] sm:$0xf]  ;;  %v5782_v1 = vrot.slane %v5778_v16, 4  ;;  %v5791_v60 = vrot.slane %v24012_v10, 4  ;;  %5910 = vst [vmem:[#allocation2 + $0x24] sm:$0xf] %v5909_v63 }
 0x63b   :  { %5907 = vst [vmem:[#allocation2 + $0x20] sm:$0x1] %v5906_v57  ;;  %5914 = vst [vmem:[#allocation2 + $0x2c] sm:$0x1] %v5913_v52  ;;  %v24052_v59 = vld [vmem:[#allocation2 + $0xa8] sm:$0xf] }
 0x63c   :  { %6100 = vst [vmem:[#allocation2 + $0x184] sm:$0xf] %v5756_v44  ;;  %v24054_v7 = vld [vmem:[#allocation2 + $0xb0] sm:$0x1]  ;;  %v5982_v3 = vld [vmem:[#allocation2 + $0xa4] sm:$0x1]  ;;  %v5923_v44 = vsel %vm23972_vm7, %v23687_v55, %v5922_v32 }
 0x63d   :  { %v24056_v9 = vld [vmem:[#allocation2 + $0xb4] sm:$0xf]  ;;  %v27951_v16 = vrot.slane %v23665_v49, 4  ;;  %v27952_v20 = vrot.slane %v23678_v27, 4  ;;  %v24072_v63 = vld [vmem:[#allocation2 + $0xc0] sm:$0xf]  ;;  %v5790_v49 = vsel %vm22855_vm3, %v5782_v1, %v5789_v39  ;;  %v5930_v27 = vsel %vm23972_vm7, %v23699_v42, %v24000_v15 }
 0x63e   :  { %v24074_v51 = vld [vmem:[#allocation2 + $0xc8] sm:$0x1]  ;;  %v24076_v52 = vld [vmem:[#allocation2 + $0xbc] sm:$0x1]  ;;  %v24078_v12 = vld [vmem:[#allocation2 + $0xe4] sm:$0xf] }
 0x63f   :  { %v5920_v23 = vsel %vm22871_vm4, %v27951_v16, %v5919_v18  ;;  %v5927_v57 = vsel %vm22871_vm4, %v27952_v20, %v5926_v54  ;;  %5917 = vst [vmem:[#allocation2 + $0x30] sm:$0xf] %v5916_v56  ;;  %5924 = vst [vmem:[#allocation2 + $0x3c] sm:$0xf] %v5923_v44  ;;  %v27953_v55 = vrot.slane %v23691_v2, 4  ;;  %v27954_v42 = vrot.slane %v23705_v58, 4 }
 0x640   :  { %5921 = vst [vmem:[#allocation2 + $0x38] sm:$0x1] %v5920_v23  ;;  %5928 = vst [vmem:[#allocation2 + $0x44] sm:$0x1] %v5927_v57  ;;  %v24094_v32 = vld [vmem:[#allocation2 + $0xf0] sm:$0xf] }
 0x641   :  { %v5934_v54 = vsel %vm22871_vm4, %v27953_v55, %v5933_v35  ;;  %v24096_v37 = vld [vmem:[#allocation2 + $0xf8] sm:$0x1]  ;;  %v6010_v18 = vld [vmem:[#allocation2 + $0xec] sm:$0x1]  ;;  %v24098_v1 = vld [vmem:[#allocation2 + $0xfc] sm:$0xf]  ;;  %v5941_v2 = vsel %vm22871_vm4, %v27954_v42, %v5940_v11  ;;  %v5951_v35 = vsel %vm23972_vm7, %v23730_v45, %v24010_v47  ;;  %v5958_v45 = vsel %vm23972_vm7, %v23738_v38, %v24021_v28 }
 0x642   :  { %5931 = vst [vmem:[#allocation2 + $0x48] sm:$0xf] %v5930_v27  ;;  %5935 = vst [vmem:[#allocation2 + $0x50] sm:$0x1] %v5934_v54  ;;  %v27955_v30 = vrot.slane %v23717_v33, 4  ;;  %v27956_v50 = vrot.slane %v23727_v34, 4 }
 0x643   :  { %5938 = vst [vmem:[#allocation2 + $0x54] sm:$0xf] %v5937_v8  ;;  %6114 = vst [vmem:[#allocation2 + $0x19c] sm:$0xf] %v5790_v49  ;;  %v24116_v58 = vld [vmem:[#allocation2 + $0x108] sm:$0xf] }
 0x644   :  { %v5948_v15 = vsel %vm22871_vm4, %v27955_v30, %v5947_v40  ;;  %v24118_v39 = vld [vmem:[#allocation2 + $0x110] sm:$0x1]  ;;  %v6024_v11 = vld [vmem:[#allocation2 + $0x104] sm:$0x1]  ;;  %v24120_v56 = vld [vmem:[#allocation2 + $0x114] sm:$0xf]  ;;  %v5955_v33 = vsel %vm22871_vm4, %v27956_v50, %v5954_v29  ;;  %v5965_v40 = vsel %vm23972_vm7, %v23758_v17, %v24025_v41  ;;  %v5972_v17 = vsel %vm23972_vm7, %v23765_v19, %v24040_v25 }
 0x645   :  { %5942 = vst [vmem:[#allocation2 + $0x5c] sm:$0x1] %v5941_v2  ;;  %5945 = vst [vmem:[#allocation2 + $0x60] sm:$0xf] %v5944_v0  ;;  %v27957_v47 = vrot.slane %v23740_v46, 4  ;;  %v27958_v38 = vrot.slane %v23751_v4, 4 }
 0x646   :  { %5949 = vst [vmem:[#allocation2 + $0x68] sm:$0x1] %v5948_v15  ;;  %5952 = vst [vmem:[#allocation2 + $0x6c] sm:$0xf] %v5951_v35  ;;  %v24139_v34 = vld [vmem:[#allocation2 + $0x120] sm:$0xf] }
 0x647   :  { %v5962_v53 = vsel %vm22871_vm4, %v27957_v47, %v24023_v26  ;;  %v24141_v16 = vld [vmem:[#allocation2 + $0x128] sm:$0x1]  ;;  %v6038_v29 = vld [vmem:[#allocation2 + $0x11c] sm:$0x1]  ;;  %v24143_v23 = vld [vmem:[#allocation2 + $0x12c] sm:$0xf]  ;;  %v5969_v46 = vsel %vm22871_vm4, %v27958_v38, %v24044_v48  ;;  %v5979_v26 = vsel %vm23972_vm7, %v23780_v43, %v24046_v61  ;;  %v5993_v61 = vsel %vm23972_vm7, %v23806_v5, %v24056_v9 }
 0x648   :  { %5956 = vst [vmem:[#allocation2 + $0x74] sm:$0x1] %v5955_v33  ;;  %5959 = vst [vmem:[#allocation2 + $0x78] sm:$0xf] %v5958_v45  ;;  %v27959_v41 = vrot.slane %v23762_v14, 4  ;;  %v27960_v19 = vrot.slane %v23773_v31, 4 }
 0x649   :  { %5963 = vst [vmem:[#allocation2 + $0x80] sm:$0x1] %v5962_v53  ;;  %5966 = vst [vmem:[#allocation2 + $0x84] sm:$0xf] %v5965_v40  ;;  %v24163_v4 = vld [vmem:[#allocation2 + $0x138] sm:$0xf] }
 0x64a   :  { %v5976_v28 = vsel %vm22871_vm4, %v27959_v41, %v24042_v21  ;;  %v6059_v44 = vld [vmem:[#allocation2 + $0x140] sm:$0x1]  ;;  %v6052_v48 = vld [vmem:[#allocation2 + $0x134] sm:$0x1]  ;;  %5970 = vst [vmem:[#allocation2 + $0x8c] sm:$0x1] %v5969_v46  ;;  %v5983_v14 = vsel %vm22871_vm4, %v27960_v19, %v5982_v3  ;;  %v5986_v21 = vsel %vm23972_vm7, %v23793_v13, %v24052_v59 }
 0x64b   :  { %5973 = vst [vmem:[#allocation2 + $0x90] sm:$0xf] %v5972_v17  ;;  %5977 = vst [vmem:[#allocation2 + $0x98] sm:$0x1] %v5976_v28  ;;  %v27961_v43 = vrot.slane %v23786_v24, 4  ;;  %v27962_v13 = vrot.slane %v23798_v6, 4 }
 0x64c   :  { %5980 = vst [vmem:[#allocation2 + $0x9c] sm:$0xf] %v5979_v26  ;;  %v24182_v31 = vld [vmem:[#allocation2 + $0x150] sm:$0xf]  ;;  %v6062_v20 = vld [vmem:[#allocation2 + $0x144] sm:$0xf] }
 0x64d   :  { %v5990_v25 = vsel %vm22871_vm4, %v27961_v43, %v24054_v7  ;;  %v6073_v3 = vld [vmem:[#allocation2 + $0x158] sm:$0x1]  ;;  %5984 = vst [vmem:[#allocation2 + $0xa4] sm:$0x1] %v5983_v14  ;;  %5987 = vst [vmem:[#allocation2 + $0xa8] sm:$0xf] %v5986_v21  ;;  %v5997_v24 = vsel %vm22871_vm4, %v27962_v13, %v24076_v52 }
 0x64e   :  { %5991 = vst [vmem:[#allocation2 + $0xb0] sm:$0x1] %v5990_v25  ;;  %5994 = vst [vmem:[#allocation2 + $0xb4] sm:$0xf] %v5993_v61  ;;  %v27963_v59 = vld [vmem:[#allocation13_spill] sm:$0xff]  ;;  %v27964_v5 = vld [vmem:[#allocation16_spill] sm:$0xff] }
 0x64f   :  { %v6000_v7 = vsel %vm23972_vm7, %v27963_v59, %v24072_v63  ;;  %v27965_v9 = vrot.slane %v27964_v5, 4  ;;  %v27966_v49 = vld [vmem:[#allocation18_spill] sm:$0xff]  ;;  %v6066_v6 = vld [vmem:[#allocation2 + $0x14c] sm:$0x1]  ;;  %5998 = vst [vmem:[#allocation2 + $0xbc] sm:$0x1] %v5997_v24 }
 0x650   :  { %v6007_v27 = vsel %vm23972_vm7, %v27966_v49, %v24078_v12  ;;  %6001 = vst [vmem:[#allocation2 + $0xc0] sm:$0xf] %v6000_v7  ;;  %v27967_v52 = vld [vmem:[#allocation15_spill] sm:$0xff]  ;;  %v27970_v8 = vld [vmem:[#allocation20_spill] sm:$0xff]  ;;  %v27972_v2 = vld [vmem:[#allocation22_spill] sm:$0xff] }
 0x651   :  { %v6004_v57 = vsel %vm22871_vm4, %v27965_v9, %v24074_v51  ;;  %6008 = vst [vmem:[#allocation2 + $0xe4] sm:$0xf] %v6007_v27  ;;  %v27968_v55 = vrot.slane %v27967_v52, 4  ;;  %v27969_v54 = vld [vmem:[#allocation19_spill] sm:$0xff]  ;;  %v27971_v42 = vrot.slane %v27970_v8, 4  ;;  %v6021_v0 = vsel %vm23972_vm7, %v27972_v2, %v24098_v1  ;;  %v27975_v33 = vld [vmem:[#allocation32_spill] sm:$0xff] }
 0x652   :  { %6005 = vst [vmem:[#allocation2 + $0xc8] sm:$0x1] %v6004_v57  ;;  %v6014_v51 = vsel %vm23972_vm7, %v27969_v54, %v24094_v32  ;;  %v6083_v30 = vld [vmem:[#allocation2 + $0x168] sm:$0xf]  ;;  %v6076_v15 = vld [vmem:[#allocation2 + $0x15c] sm:$0xf] }
 0x653   :  { %v6011_v63 = vsel %vm22871_vm4, %v27968_v55, %v6010_v18  ;;  %v6018_v12 = vsel %vm22871_vm4, %v27971_v42, %v24096_v37  ;;  %v6087_v35 = vld [vmem:[#allocation2 + $0x170] sm:$0x1]  ;;  %6015 = vst [vmem:[#allocation2 + $0xf0] sm:$0xf] %v6014_v51  ;;  %6022 = vst [vmem:[#allocation2 + $0xfc] sm:$0xf] %v6021_v0  ;;  %v6028_v37 = vsel %vm23972_vm7, %v27975_v33, %v24116_v58 }
 0x654   :  { %6012 = vst [vmem:[#allocation2 + $0xec] sm:$0x1] %v6011_v63  ;;  %6019 = vst [vmem:[#allocation2 + $0xf8] sm:$0x1] %v6018_v12  ;;  %v27973_v18 = vld [vmem:[#allocation28_spill] sm:$0xff]  ;;  %v27976_v45 = vld [vmem:[#allocation29_spill] sm:$0xff] }
 0x655   :  { %v27974_v32 = vrot.slane %v27973_v18, 4  ;;  %v27977_v1 = vrot.slane %v27976_v45, 4  ;;  %v27978_v53 = vld [vmem:[#allocation6_spill] sm:$0xff]  ;;  %v6080_v38 = vld [vmem:[#allocation2 + $0x164] sm:$0x1]  ;;  %v27981_v28 = vld [vmem:[#allocation7_spill] sm:$0xff] }
 0x656   :  { %v6035_v40 = vsel %vm23972_vm7, %v27978_v53, %v24120_v56  ;;  %v6097_v46 = vld [vmem:[#allocation2 + $0x180] sm:$0xf]  ;;  %v6090_v17 = vld [vmem:[#allocation2 + $0x174] sm:$0xf]  ;;  %6029 = vst [vmem:[#allocation2 + $0x108] sm:$0xf] %v6028_v37 }
 0x657   :  { %v6025_v50 = vsel %vm22871_vm4, %v27974_v32, %v6024_v11  ;;  %v6032_v47 = vsel %vm22871_vm4, %v27977_v1, %v24118_v39  ;;  %6036 = vst [vmem:[#allocation2 + $0x114] sm:$0xf] %v6035_v40  ;;  %v27979_v11 = vld [vmem:[#allocation8_spill] sm:$0xff]  ;;  %v6042_v39 = vsel %vm23972_vm7, %v27981_v28, %v24139_v34  ;;  %v27982_v26 = vld [vmem:[#allocation10_spill] sm:$0xff]  ;;  %v6101_v43 = vld [vmem:[#allocation2 + $0x188] sm:$0x1] }
 0x658   :  { %6026 = vst [vmem:[#allocation2 + $0x104] sm:$0x1] %v6025_v50  ;;  %6033 = vst [vmem:[#allocation2 + $0x110] sm:$0x1] %v6032_v47  ;;  %v27980_v58 = vrot.slane %v27979_v11, 4  ;;  %v27983_v56 = vrot.slane %v27982_v26, 4 }
 0x659   :  { %v27984_v14 = vld [vmem:[#allocation36_spill] sm:$0xff]  ;;  %v6094_v25 = vld [vmem:[#allocation2 + $0x17c] sm:$0x1]  ;;  %v6104_v61 = vld [vmem:[#allocation2 + $0x18c] sm:$0xf] }
 0x65a   :  { %v6039_v41 = vsel %vm22871_vm4, %v27980_v58, %v6038_v29  ;;  %v6046_v19 = vsel %vm22871_vm4, %v27983_v56, %v24141_v16  ;;  %v6049_v21 = vsel %vm23972_vm7, %v27984_v14, %v24143_v23  ;;  %6043 = vst [vmem:[#allocation2 + $0x120] sm:$0xf] %v6042_v39  ;;  %v27985_v29 = vld [vmem:[#allocation35_spill] sm:$0xff]  ;;  %v27987_v24 = vld [vmem:[#allocation38_spill] sm:$0xff]  ;;  %v27988_v59 = vld [vmem:[#allocation37_spill] sm:$0xff] }
 0x65b   :  { %6040 = vst [vmem:[#allocation2 + $0x11c] sm:$0x1] %v6039_v41  ;;  %6047 = vst [vmem:[#allocation2 + $0x128] sm:$0x1] %v6046_v19  ;;  %v27986_v34 = vrot.slane %v27985_v29, 4  ;;  %v6056_v16 = vsel %vm23972_vm7, %v27987_v24, %v24163_v4  ;;  %v27989_v7 = vrot.slane %v27988_v59, 4 }
 0x65c   :  { %6050 = vst [vmem:[#allocation2 + $0x12c] sm:$0xf] %v6049_v21  ;;  %v27990_v5 = vld [vmem:[#allocation40_spill] sm:$0xff]  ;;  %v6111_v57 = vld [vmem:[#allocation2 + $0x198] sm:$0xf]  ;;  %v27993_v52 = vld [vmem:[#allocation9_spill] sm:$0xff] }
 0x65d   :  { %v6053_v13 = vsel %vm22871_vm4, %v27986_v34, %v6052_v48  ;;  %v6060_v23 = vsel %vm22871_vm4, %v27989_v7, %v6059_v44  ;;  %v6063_v9 = vsel %vm23972_vm7, %v27990_v5, %v6062_v20  ;;  %v6115_v49 = vld [vmem:[#allocation2 + $0x1a0] sm:$0x1]  ;;  %6057 = vst [vmem:[#allocation2 + $0x138] sm:$0xf] %v6056_v16  ;;  %v27991_v48 = vld [vmem:[#allocation39_spill] sm:$0xff]  ;;  %v6070_v44 = vsel %vm23972_vm7, %v27993_v52, %v24182_v31  ;;  %v27996_v54 = vld [vmem:[#allocation17_spill] sm:$0xff] }
 0x65e   :  { %6054 = vst [vmem:[#allocation2 + $0x134] sm:$0x1] %v6053_v13  ;;  %6061 = vst [vmem:[#allocation2 + $0x140] sm:$0x1] %v6060_v23  ;;  %v27992_v27 = vrot.slane %v27991_v48, 4  ;;  %v27994_v55 = vld [vmem:[#allocation12_spill] sm:$0xff]  ;;  %v6077_v51 = vsel %vm23972_vm7, %v27996_v54, %v6076_v15  ;;  %v6112_v58 = vsel %vm23972_vm7, %v24048_v36, %v6111_v57 }
 0x65f   :  { %6064 = vst [vmem:[#allocation2 + $0x144] sm:$0xf] %v6063_v9  ;;  %v27995_v63 = vrot.slane %v27994_v55, 4  ;;  %6071 = vst [vmem:[#allocation2 + $0x150] sm:$0xf] %v6070_v44  ;;  %v27997_v8 = vld [vmem:[#allocation11_spill] sm:$0xff] }
 0x660   :  { %v6067_v4 = vsel %vm22871_vm4, %v27992_v27, %v6066_v6  ;;  %6078 = vst [vmem:[#allocation2 + $0x15c] sm:$0xf] %v6077_v51  ;;  %v27998_v6 = vrot.slane %v27997_v8, 4  ;;  %v27999_v12 = vld [vmem:[#allocation21_spill] sm:$0xff]  ;;  %v28000_v2 = vld [vmem:[#allocation24_spill] sm:$0xff]  ;;  %v28003_v33 = vld [vmem:[#allocation23_spill] sm:$0xff] }
 0x661   :  { %v6074_v20 = vsel %vm22871_vm4, %v27995_v63, %v6073_v3  ;;  %6068 = vst [vmem:[#allocation2 + $0x14c] sm:$0x1] %v6067_v4  ;;  %v6084_v31 = vsel %vm23972_vm7, %v27999_v12, %v6083_v30  ;;  %v28001_v0 = vrot.slane %v28000_v2, 4  ;;  %v28002_v18 = vld [vmem:[#allocation25_spill] sm:$0xff]  ;;  %v6118_v32 = vld [vmem:[#allocation2] sm:$0xf] }
 0x662   :  { %6075 = vst [vmem:[#allocation2 + $0x158] sm:$0x1] %v6074_v20  ;;  %v6081_v42 = vsel %vm22871_vm4, %v27998_v6, %v6080_v38  ;;  %v6091_v15 = vsel %vm23972_vm7, %v28002_v18, %v6090_v17  ;;  %v6119_v50 = vld [vmem:[#allocation2 + $0x4] sm:$0xf]  ;;  %6085 = vst [vmem:[#allocation2 + $0x168] sm:$0xf] %v6084_v31 }
 0x663   :  { %v6088_v3 = vsel %vm22871_vm4, %v28001_v0, %v6087_v35  ;;  %6082 = vst [vmem:[#allocation2 + $0x164] sm:$0x1] %v6081_v42  ;;  %6092 = vst [vmem:[#allocation2 + $0x174] sm:$0xf] %v6091_v15  ;;  %v28004_v37 = vrot.slane %v28003_v33, 4  ;;  %v28005_v45 = vld [vmem:[#allocation31_spill] sm:$0xff] }
 0x664   :  { %6089 = vst [vmem:[#allocation2 + $0x170] sm:$0x1] %v6088_v3  ;;  %v6098_v1 = vsel %vm23972_vm7, %v28005_v45, %v6097_v46  ;;  %v28006_v35 = vld [vmem:[#allocation33_spill] sm:$0xff]  ;;  %v28008_v40 = vld [vmem:[#allocation26_spill] sm:$0xff]  ;;  %v6116_v46 = vsel %vm22871_vm4, %v5791_v60, %v6115_v49  ;;  %6113 = vst [vmem:[#allocation2 + $0x198] sm:$0xf] %v6112_v58 }
 0x665   :  { %v6095_v30 = vsel %vm22871_vm4, %v28004_v37, %v6094_v25  ;;  %v28007_v47 = vrot.slane %v28006_v35, 4  ;;  %v6105_v38 = vsel %vm23972_vm7, %v28008_v40, %v6104_v61  ;;  %v6198_v17 = vld [vmem:[#allocation2 + $0x8] sm:$0x1]  ;;  %v6120_v11 = vld [vmem:[#allocation2 + $0xc] sm:$0xf]  ;;  %v6234_v28 = vshrl.u32 %v6118_v32, 16 }
 0x666   :  { %6096 = vst [vmem:[#allocation2 + $0x17c] sm:$0x1] %v6095_v30  ;;  %6099 = vst [vmem:[#allocation2 + $0x180] sm:$0xf] %v6098_v1  ;;  %v6121_v41 = vld [vmem:[#allocation2 + $0x10] sm:$0xf] }
 0x667   :  { %v6102_v53 = vsel %vm22871_vm4, %v28007_v47, %v6101_v43  ;;  %6106 = vst [vmem:[#allocation2 + $0x18c] sm:$0xf] %v6105_v38  ;;  %6117 = vst [vmem:[#allocation2 + $0x1a0] sm:$0x1] %v6116_v46  ;;  %v6237_v39 = vshll.u32 %v6118_v32, 16  ;;  %v6243_v26 = vshll.u32 %v6119_v50, 16 }
 0x668   :  { %6103 = vst [vmem:[#allocation2 + $0x188] sm:$0x1] %v6102_v53  ;;  %v6247_v56 = vshrl.u32 %v6119_v50, 16  ;;  %v6199_v19 = vld [vmem:[#allocation2 + $0x14] sm:$0x1]  ;;  %v6253_v14 = vshll.u32 %v6198_v17, 16 }
 0x669   :  { %v6258_v21 = vshrl.u32 %v6120_v11, 16  ;;  %v6261_v43 = vshll.u32 %v6120_v11, 16  ;;  %v6236_v62 = vrot.slane %v6234_v28, 4  ;;  %v6239_v36 = vrot.slane %v6237_v39, 5  ;;  %v6122_v61 = vld [vmem:[#allocation2 + $0x18] sm:$0xf] }
 0x66a   :  { %v6245_v25 = vrot.slane %v6243_v26, 5  ;;  %v6249_v10 = vrot.slane %v6247_v56, 4  ;;  %v6255_v22 = vrot.slane %v6253_v14, 5  ;;  %v6267_v34 = vshll.u32 %v6121_v41, 16  ;;  %v6123_v7 = vld [vmem:[#allocation2 + $0x1c] sm:$0xf] }
 0x66b   :  { %v6260_v60 = vrot.slane %v6258_v21, 4  ;;  %v6263_v29 = vrot.slane %v6261_v43, 5  ;;  %v6240_v13 = vor.u32 %v6239_v36, %v6236_v62  ;;  %v6271_v16 = vshrl.u32 %v6121_v41, 16  ;;  %v6200_v52 = vld [vmem:[#allocation2 + $0x20] sm:$0x1]  ;;  %v20100_v28 = vld [vmem:[%s27576_s4 + $0x8] sm:$0xff]  }
 0x66c   :  { %v6250_v24 = vor.u32 %v6249_v10, %v6245_v25  ;;  %v6277_v59 = vshll.u32 %v6199_v19, 16  ;;  %v6269_v9 = vrot.slane %v6267_v34, 5  ;;  %v6282_v57 = vshrl.u32 %v6122_v61, 16  ;;  %v6124_v54 = vld [vmem:[#allocation2 + $0x24] sm:$0xf] }
 0x66d   :  { %v6264_v5 = vor.u32 %v6263_v29, %v6260_v60  ;;  %v6241_v49 = vrot.slane %v6240_v13, 4  ;;  %v6273_v27 = vrot.slane %v6271_v16, 4  ;;  %v6285_v63 = vshll.u32 %v6122_v61, 16  ;;  %v6125_v12 = vld [vmem:[#allocation2 + $0x28] sm:$0xf]  ;;  %v20263_v61 = vld [vmem:[%s27576_s4] sm:$0xff]  }
 0x66e   :  { %v6251_v48 = vrot.slane %v6250_v24, 4  ;;  %v6279_v4 = vrot.slane %v6277_v59, 5  ;;  %v6284_v55 = vrot.slane %v6282_v57, 4  ;;  %v6291_v20 = vshll.u32 %v6123_v7, 16  ;;  %v6201_v50 = vld [vmem:[#allocation2 + $0x2c] sm:$0x1] }
 0x66f   :  { %v6265_v44 = vrot.slane %v6264_v5, 4  ;;  %v6246_v51 = vsel %vm24320_vm10, %v6241_v49, %v6245_v25  ;;  %v6274_v6 = vor.u32 %v6273_v27, %v6269_v9  ;;  %v6295_v42 = vshrl.u32 %v6123_v7, 16  ;;  %v6126_v35 = vld [vmem:[#allocation2 + $0x30] sm:$0xf]  ;;  %v6127_v17 = vld [vmem:[#allocation2 + $0x34] sm:$0xf] }
 0x670   :  { %v6256_v8 = vsel %vm24320_vm10, %v6251_v48, %v6255_v22  ;;  %v6287_v0 = vrot.slane %v6285_v63, 5  ;;  %v6293_v3 = vrot.slane %v6291_v20, 5  ;;  %v6301_v32 = vshll.u32 %v6200_v52, 16  ;;  %v6202_v43 = vld [vmem:[#allocation2 + $0x38] sm:$0x1]  ;;  %v20101_v7 = vld [vmem:[%s27576_s4 + $0x10] sm:$0xff]  }
 0x671   :  { %v16135_v31 = vcombine.low %v6246_v51, %v6256_v8  ;;  %v6270_v2 = vsel %vm24320_vm10, %v6265_v44, %v6269_v9  ;;  %v6275_v18 = vrot.slane %v6274_v6, 4  ;;  %v6297_v15 = vrot.slane %v6295_v42, 4  ;;  %v6128_v25 = vld [vmem:[#allocation2 + $0x3c] sm:$0xf]  ;;  %v6129_v34 = vld [vmem:[#allocation2 + $0x40] sm:$0xf] }
 0x672   :  { %v6306_v33 = vshrl.u32 %v6124_v54, 16  ;;  %v6288_v37 = vor.u32 %v6287_v0, %v6284_v55  ;;  %v6309_v30 = vshll.u32 %v6124_v54, 16  ;;  %v6315_v45 = vshll.u32 %v6125_v12, 16  ;;  %v6130_v55 = vld [vmem:[#allocation2 + $0x48] sm:$0xf] }
 0x673   :  { %18287 = vmatprep.mubr.bf16.mxu1 %v16135_v31  ;;  %v6319_v1 = vshrl.u32 %v6125_v12, 16  ;;  %v6280_v47 = vsel %vm24320_vm10, %v6275_v18, %v6279_v4  ;;  %v6298_v53 = vor.u32 %v6297_v15, %v6293_v3  ;;  %v6303_v40 = vrot.slane %v6301_v32, 5  ;;  %v6203_v4 = vld [vmem:[#allocation2 + $0x44] sm:$0x1]  ;;  %v6131_v8 = vld [vmem:[#allocation2 + $0x4c] sm:$0xf] }
 0x674   :  { %v6308_v38 = vrot.slane %v6306_v33, 4  ;;  %v16136_v11 = vcombine.low %v6270_v2, %v6280_v47  ;;  %v6289_v58 = vrot.slane %v6288_v37, 4  ;;  %v6311_v46 = vrot.slane %v6309_v30, 5  ;;  %v20102_v2 = vld [vmem:[%s27576_s4 + $0x18] sm:$0xff]   ;;  %v6204_v33 = vld [vmem:[#allocation2 + $0x50] sm:$0x1] }
 0x675   :  { %v6317_v41 = vrot.slane %v6315_v45, 5  ;;  %v6299_v39 = vrot.slane %v6298_v53, 4  ;;  %v6321_v26 = vrot.slane %v6319_v1, 4  ;;  %v6325_v56 = vshll.u32 %v6201_v50, 16  ;;  %v6132_v45 = vld [vmem:[#allocation2 + $0x54] sm:$0xf] }
 0x676   :  { %v6330_v19 = vshrl.u32 %v6126_v35, 16  ;;  %18288 = vmatmul.mubr.bf16.vlgmr.msra.gmra.mrb[0].mxu1 %v16136_v11  ;;  %v6294_v14 = vsel %vm24320_vm10, %v6289_v58, %v6293_v3  ;;  %v6312_v21 = vor.u32 %v6311_v46, %v6308_v38  ;;  %v6333_v62 = vshll.u32 %v6126_v35, 16  ;;  %v20103_v58 = vld [vmem:[%s27576_s4 + $0x20] sm:$0xff]  }
 0x677   :  { %v6339_v36 = vshll.u32 %v6127_v17, 16  ;;  %v6304_v10 = vsel %vm24320_vm10, %v6299_v39, %v6303_v40  ;;  %18352 = vmatpush3.bf16.msra.mxu1 %v20263_v61  ;;  %v6322_v22 = vor.u32 %v6321_v26, %v6317_v41  ;;  %v6327_v60 = vrot.slane %v6325_v56, 5  ;;  %v6133_v39 = vld [vmem:[#allocation2 + $0x58] sm:$0xf] }
 0x678   :  { %v6332_v29 = vrot.slane %v6330_v19, 4  ;;  %v16137_v13 = vcombine.low %v6294_v14, %v6304_v10  ;;  %v6313_v24 = vrot.slane %v6312_v21, 4  ;;  %v6335_v16 = vrot.slane %v6333_v62, 5  ;;  %18353 = vmatprep.subr.bf16.mxu1 %v20100_v28  ;;  %v6134_v62 = vld [vmem:[#allocation2 + $0x60] sm:$0xf] }
 0x679   :  { %v6341_v59 = vrot.slane %v6339_v36, 5  ;;  %v6323_v5 = vrot.slane %v6322_v22, 4  ;;  %v6343_v9 = vshrl.u32 %v6127_v17, 16  ;;  %v6349_v57 = vshll.u32 %v6202_v43, 16  ;;  %v6205_v43 = vld [vmem:[#allocation2 + $0x5c] sm:$0x1] }
 0x67a   :  { %v6354_v49 = vshrl.u32 %v6128_v25, 16  ;;  %18291 = vmatprep.mubr.bf16.mxu1 %v16137_v13  ;;  %v6318_v48 = vsel %vm24320_vm10, %v6313_v24, %v6317_v41  ;;  %v6336_v27 = vor.u32 %v6335_v16, %v6332_v29  ;;  %v6357_v52 = vshll.u32 %v6128_v25, 16  ;;  %v20104_v13 = vld [vmem:[%s27576_s4 + $0x28] sm:$0xff]  }
 0x67b   :  { %v6363_v44 = vshll.u32 %v6129_v34, 16  ;;  %v6328_v63 = vsel %vm24320_vm10, %v6323_v5, %v6327_v60  ;;  %v6345_v20 = vrot.slane %v6343_v9, 4  ;;  %v6351_v54 = vrot.slane %v6349_v57, 5  ;;  %18354 = vmatpush3.bf16.msra.mxu1 %v20100_v28 }
 0x67c   :  { %v6356_v51 = vrot.slane %v6354_v49, 4  ;;  %v16138_v6 = vcombine.low %v6318_v48, %v6328_v63  ;;  %v6337_v42 = vrot.slane %v6336_v27, 4  ;;  %v6359_v12 = vrot.slane %v6357_v52, 5  ;;  %18355 = vmatprep.subr.bf16.mxu1 %v20101_v7  ;;  %v6206_v27 = vld [vmem:[#allocation2 + $0x68] sm:$0x1] }
 0x67d   :  { %v6365_v31 = vrot.slane %v6363_v44, 5  ;;  %v6346_v0 = vor.u32 %v6345_v20, %v6341_v59  ;;  %v6367_v3 = vshrl.u32 %v6129_v34, 16  ;;  %v6373_v18 = vshll.u32 %v6203_v4, 16  ;;  %v6136_v63 = vld [vmem:[#allocation2 + $0x6c] sm:$0xf] }
 0x67e   :  { %v6378_v15 = vshrl.u32 %v6130_v55, 16  ;;  %18292 = vmatmul.mubr.bf16.gmra.mrb[4].mxu1 %v16138_v6  ;;  %v6342_v32 = vsel %vm24320_vm10, %v6337_v42, %v6341_v59  ;;  %v6360_v50 = vor.u32 %v6359_v12, %v6356_v51  ;;  %v6381_v37 = vshll.u32 %v6130_v55, 16  ;;  %v20105_v6 = vld [vmem:[%s27576_s4 + $0x30] sm:$0xff]  }
 0x67f   :  { %v6387_v30 = vshll.u32 %v6131_v8, 16  ;;  %v6347_v1 = vrot.slane %v6346_v0, 4  ;;  %v6369_v35 = vrot.slane %v6367_v3, 4  ;;  %v6375_v47 = vrot.slane %v6373_v18, 5  ;;  %18356 = vmatpush3.bf16.msra.mxu1 %v20101_v7  ;;  %v6135_v7 = vld [vmem:[#allocation2 + $0x64] sm:$0xf] }
 0x680   :  { %v6380_v53 = vrot.slane %v6378_v15, 4  ;;  %v6361_v40 = vrot.slane %v6360_v50, 4  ;;  %v6383_v38 = vrot.slane %v6381_v37, 5  ;;  %v6391_v11 = vshrl.u32 %v6131_v8, 16  ;;  %18357 = vmatprep.subr.bf16.mxu1 %v20102_v2  ;;  %v6137_v0 = vld [vmem:[#allocation2 + $0x70] sm:$0xf] }
 0x681   :  { %v6389_v17 = vrot.slane %v6387_v30, 5  ;;  %v6352_v46 = vsel %vm24320_vm10, %v6347_v1, %v6351_v54  ;;  %v6370_v41 = vor.u32 %v6369_v35, %v6365_v31  ;;  %v6397_v28 = vshll.u32 %v6204_v33, 16  ;;  %v6139_v1 = vld [vmem:[#allocation2 + $0x7c] sm:$0xf] }
 0x682   :  { %v6402_v26 = vshrl.u32 %v6132_v45, 16  ;;  %v16139_v56 = vcombine.low %v6342_v32, %v6352_v46  ;;  %v6366_v19 = vsel %vm24320_vm10, %v6361_v40, %v6365_v31  ;;  %v6384_v14 = vor.u32 %v6383_v38, %v6380_v53  ;;  %v6207_v32 = vld [vmem:[#allocation2 + $0x74] sm:$0x1]  ;;  %v6138_v38 = vld [vmem:[#allocation2 + $0x78] sm:$0xf] }
 0x683   :  { %v6393_v21 = vrot.slane %v6391_v11, 4  ;;  %v6371_v36 = vrot.slane %v6370_v41, 4  ;;  %v6399_v25 = vrot.slane %v6397_v28, 5  ;;  %v6405_v61 = vshll.u32 %v6132_v45, 16  ;;  %18358 = vmatpush3.bf16.msra.mxu1 %v20102_v2  ;;  %v6208_v28 = vld [vmem:[#allocation2 + $0x80] sm:$0x1] }
 0x684   :  { %v6404_v10 = vrot.slane %v6402_v26, 4  ;;  %18295 = vmatprep.mubr.bf16.mxu1 %v16139_v56  ;;  %v6385_v22 = vrot.slane %v6384_v14, 4  ;;  %v6411_v29 = vshll.u32 %v6133_v39, 16  ;;  %v6415_v34 = vshrl.u32 %v6133_v39, 16  ;;  %18359 = vmatprep.subr.bf16.mxu1 %v20103_v58  ;;  %v6140_v14 = vld [vmem:[#allocation2 + $0x84] sm:$0xf] }
 0x685   :  { %v6394_v60 = vor.u32 %v6393_v21, %v6389_v17  ;;  %v6376_v24 = vsel %vm24320_vm10, %v6371_v36, %v6375_v47  ;;  %v6407_v16 = vrot.slane %v6405_v61, 5  ;;  %v6421_v59 = vshll.u32 %v6205_v43, 16 }
 0x686   :  { %v6426_v5 = vshrl.u32 %v6134_v62, 16  ;;  %v16140_v9 = vcombine.low %v6366_v19, %v6376_v24  ;;  %v6390_v57 = vsel %vm24320_vm10, %v6385_v22, %v6389_v17  ;;  %v6413_v48 = vrot.slane %v6411_v29, 5  ;;  %v20106_v17 = vld [vmem:[%s27576_s4 + $0x38] sm:$0xff]  }
 0x687   :  { %v6395_v49 = vrot.slane %v6394_v60, 4  ;;  %v6408_v4 = vor.u32 %v6407_v16, %v6404_v10  ;;  %v6417_v52 = vrot.slane %v6415_v34, 4  ;;  %v6423_v44 = vrot.slane %v6421_v59, 5  ;;  %18360 = vmatpush3.bf16.msra.mxu1 %v20103_v58  ;;  %v20109_v60 = vld [vmem:[%s27576_s4 + $0x80] sm:$0xff]   ;;  %v6141_v16 = vld [vmem:[#allocation2 + $0x88] sm:$0xf] }
 0x688   :  { %v6428_v55 = vrot.slane %v6426_v5, 4  ;;  %18296 = vmatmul.mubr.bf16.gmra.mrb[8].mxu1 %v16140_v9  ;;  %v6429_v54 = vshll.u32 %v6134_v62, 16  ;;  %v6435_v51 = vshll.u32 %v6135_v7, 16  ;;  %v6439_v8 = vshrl.u32 %v6135_v7, 16  ;;  %18361 = vmatprep.subr.bf16.mxu1 %v20104_v13 }
 0x689   :  { %v6400_v20 = vsel %vm24320_vm10, %v6395_v49, %v6399_v25  ;;  %v6409_v12 = vrot.slane %v6408_v4, 4  ;;  %v6418_v31 = vor.u32 %v6417_v52, %v6413_v48  ;;  %v6445_v2 = vshll.u32 %v6206_v27, 16  ;;  %v6143_v52 = vld [vmem:[#allocation2 + $0x94] sm:$0xf] }
 0x68a   :  { %v16141_v42 = vcombine.low %v6390_v57, %v6400_v20  ;;  %v6431_v3 = vrot.slane %v6429_v54, 5  ;;  %v6437_v18 = vrot.slane %v6435_v51, 5  ;;  %v6441_v15 = vrot.slane %v6439_v8, 4  ;;  %v6142_v54 = vld [vmem:[#allocation2 + $0x90] sm:$0xf] }
 0x68b   :  { %v6450_v50 = vshrl.u32 %v6136_v63, 16  ;;  %v6414_v33 = vsel %vm24320_vm10, %v6409_v12, %v6413_v48  ;;  %v6419_v37 = vrot.slane %v6418_v31, 4  ;;  %v6447_v30 = vrot.slane %v6445_v2, 5  ;;  %18362 = vmatpush3.bf16.msra.mxu1 %v20104_v13  ;;  %v6209_v48 = vld [vmem:[#allocation2 + $0x8c] sm:$0x1] }
 0x68c   :  { %18299 = vmatprep.mubr.bf16.mxu1 %v16141_v42  ;;  %v6453_v45 = vshll.u32 %v6136_v63, 16  ;;  %v6432_v35 = vor.u32 %v6431_v3, %v6428_v55  ;;  %v6442_v47 = vor.u32 %v6441_v15, %v6437_v18  ;;  %v6459_v40 = vshll.u32 %v6137_v0, 16  ;;  %18363 = vmatprep.subr.bf16.mxu1 %v20105_v6 }
 0x68d   :  { %v6452_v53 = vrot.slane %v6450_v50, 4  ;;  %v6424_v11 = vsel %vm24320_vm10, %v6419_v37, %v6423_v44  ;;  %v6463_v46 = vshrl.u32 %v6137_v0, 16  ;;  %v6469_v41 = vshll.u32 %v6207_v32, 16  ;;  %v6210_v32 = vld [vmem:[#allocation2 + $0x98] sm:$0x1] }
 0x68e   :  { %v6455_v58 = vrot.slane %v6453_v45, 5  ;;  %v16142_v39 = vcombine.low %v6414_v33, %v6424_v11  ;;  %v6433_v26 = vrot.slane %v6432_v35, 4  ;;  %v6443_v56 = vrot.slane %v6442_v47, 4  ;;  %v6145_v35 = vld [vmem:[#allocation2 + $0xa0] sm:$0xf] }
 0x68f   :  { %v6461_v19 = vrot.slane %v6459_v40, 5  ;;  %v6465_v43 = vrot.slane %v6463_v46, 4  ;;  %v6471_v62 = vrot.slane %v6469_v41, 5  ;;  %v6474_v36 = vshrl.u32 %v6138_v38, 16  ;;  %18364 = vmatpush3.bf16.msra.mxu1 %v20105_v6  ;;  %v6211_v41 = vld [vmem:[#allocation2 + $0xa4] sm:$0x1] }
 0x690   :  { %v6456_v21 = vor.u32 %v6455_v58, %v6452_v53  ;;  %18300 = vmatmul.mubr.bf16.gmra.mrb[12].mxu1 %v16142_v39  ;;  %v6438_v25 = vsel %vm24320_vm10, %v6433_v26, %v6437_v18  ;;  %v6448_v10 = vsel %vm24320_vm10, %v6443_v56, %v6447_v30  ;;  %v6477_v61 = vshll.u32 %v6138_v38, 16  ;;  %18365 = vmatprep.subr.bf16.mxu1 %v20106_v17 }
 0x691   :  { %v6483_v22 = vshll.u32 %v6139_v1, 16  ;;  %v16143_v29 = vcombine.low %v6438_v25, %v6448_v10  ;;  %v6466_v13 = vor.u32 %v6465_v43, %v6461_v19  ;;  %v6476_v24 = vrot.slane %v6474_v36, 4 }
 0x692   :  { %v6457_v34 = vrot.slane %v6456_v21, 4  ;;  %v6479_v59 = vrot.slane %v6477_v61, 5  ;;  %v6487_v5 = vshrl.u32 %v6139_v1, 16  ;;  %v6493_v9 = vshll.u32 %v6208_v28, 16  ;;  %v6144_v1 = vld [vmem:[#allocation2 + $0x9c] sm:$0xf] }
 0x693   :  { %v6485_v7 = vrot.slane %v6483_v22, 5  ;;  %18303 = vmatprep.mubr.bf16.mxu1 %v16143_v29  ;;  %v6467_v49 = vrot.slane %v6466_v13, 4  ;;  %v6498_v27 = vshrl.u32 %v6140_v14, 16  ;;  %v6501_v4 = vshll.u32 %v6140_v14, 16  ;;  %18366 = vmatpush3.bf16.msra.mxu1 %v20106_v17  ;;  %v24399_v13 = vld [vmem:[#allocation2 + $0xac] sm:$0xf] }
 0x694   :  { %v6462_v57 = vsel %vm24320_vm10, %v6457_v34, %v6461_v19  ;;  %v6480_v44 = vor.u32 %v6479_v59, %v6476_v24  ;;  %v6489_v55 = vrot.slane %v6487_v5, 4  ;;  %v6495_v63 = vrot.slane %v6493_v9, 5  ;;  %18431 = vmatprep.subr.bf16.mxu1 %v20109_v60  ;;  %v6146_v19 = vld [vmem:[#allocation2 + $0xa8] sm:$0xf]  ;;  %v6212_v5 = vld [vmem:[#allocation2 + $0xb0] sm:$0x1] }
 0x695   :  { %v6507_v20 = vshll.u32 %v6141_v16, 16  ;;  %v6472_v51 = vsel %vm24320_vm10, %v6467_v49, %v6471_v62  ;;  %v6500_v8 = vrot.slane %v6498_v27, 4  ;;  %v6503_v6 = vrot.slane %v6501_v4, 5 }
 0x696   :  { %v6511_v42 = vshrl.u32 %v6141_v16, 16  ;;  %v16144_v12 = vcombine.low %v6462_v57, %v6472_v51  ;;  %v6481_v31 = vrot.slane %v6480_v44, 4  ;;  %v6490_v2 = vor.u32 %v6489_v55, %v6485_v7  ;;  %v24404_v55 = vld [vmem:[#allocation2 + $0xb4] sm:$0xf] }
 0x697   :  { %v6509_v0 = vrot.slane %v6507_v20, 5  ;;  %v6504_v3 = vor.u32 %v6503_v6, %v6500_v8  ;;  %v6517_v15 = vshll.u32 %v6209_v48, 16  ;;  %v6522_v50 = vshrl.u32 %v6142_v54, 16  ;;  %v24409_v8 = vld [vmem:[#allocation2 + $0xb8] sm:$0xf] }
 0x698   :  { %v6513_v18 = vrot.slane %v6511_v42, 4  ;;  %18304 = vmatmul.mubr.bf16.gmra.mrb[16].mxu1 %v16144_v12  ;;  %v6486_v33 = vsel %vm24320_vm10, %v6481_v31, %v6485_v7  ;;  %v6491_v37 = vrot.slane %v6490_v2, 4  ;;  %v6525_v30 = vshll.u32 %v6142_v54, 16  ;;  %v24411_v2 = vld [vmem:[#allocation2 + $0xd8] sm:$0xf] }
 0x699   :  { %v6531_v45 = vshll.u32 %v6143_v52, 16  ;;  %v6505_v47 = vrot.slane %v6504_v3, 4  ;;  %v6519_v40 = vrot.slane %v6517_v15, 5  ;;  %v6524_v38 = vrot.slane %v6522_v50, 4 }
 0x69a   :  { %v6514_v53 = vor.u32 %v6513_v18, %v6509_v0  ;;  %v6496_v17 = vsel %vm24320_vm10, %v6491_v37, %v6495_v63  ;;  %v6527_v11 = vrot.slane %v6525_v30, 5  ;;  %v6535_v46 = vshrl.u32 %v6143_v52, 16 }
 0x69b   :  { %v6533_v58 = vrot.slane %v6531_v45, 5  ;;  %v16145_v28 = vcombine.low %v6486_v33, %v6496_v17  ;;  %v6510_v39 = vsel %vm24320_vm10, %v6505_v47, %v6509_v0  ;;  %v6541_v56 = vshll.u32 %v6210_v32, 16  ;;  %v6213_v33 = vld [vmem:[#allocation2 + $0xbc] sm:$0x1] }
 0x69c   :  { %v6515_v26 = vrot.slane %v6514_v53, 4  ;;  %v6528_v14 = vor.u32 %v6527_v11, %v6524_v38  ;;  %v6537_v21 = vrot.slane %v6535_v46, 4  ;;  %v6546_v43 = vshrl.u32 %v6144_v1, 16  ;;  %v24420_v53 = vld [vmem:[#allocation2 + $0xdc] sm:$0xf] }
 0x69d   :  { %v6549_v62 = vshll.u32 %v6144_v1, 16  ;;  %18307 = vmatprep.mubr.bf16.mxu1 %v16145_v28  ;;  %v6543_v25 = vrot.slane %v6541_v56, 5  ;;  %v6555_v10 = vshll.u32 %v6145_v35, 16  ;;  %v6559_v61 = vshrl.u32 %v6145_v35, 16  ;;  %v6214_v28 = vld [vmem:[#allocation2 + $0xe0] sm:$0x1] }
 0x69e   :  { %v6520_v36 = vsel %vm24320_vm10, %v6515_v26, %v6519_v40  ;;  %v6529_v60 = vrot.slane %v6528_v14, 4  ;;  %v6538_v29 = vor.u32 %v6537_v21, %v6533_v58  ;;  %v6548_v34 = vrot.slane %v6546_v43, 4  ;;  %v24428_v21 = vld [vmem:[#allocation2 + $0xe4] sm:$0xf] }
 0x69f   :  { %v16146_v22 = vcombine.low %v6510_v39, %v6520_v36  ;;  %v6551_v24 = vrot.slane %v6549_v62, 5  ;;  %v6557_v16 = vrot.slane %v6555_v10, 5  ;;  %v6561_v59 = vrot.slane %v6559_v61, 4 }
 0x6a0   :  { %v6565_v7 = vshll.u32 %v6211_v41, 16  ;;  %v6534_v9 = vsel %vm24320_vm10, %v6529_v60, %v6533_v58  ;;  %v6539_v57 = vrot.slane %v6538_v29, 4  ;;  %v6570_v49 = vshrl.u32 %v6146_v19, 16  ;;  %v24433_v29 = vld [vmem:[#allocation2 + $0xe8] sm:$0xf] }
 0x6a1   :  { %18308 = vmatmul.mubr.bf16.gmra.mrb[20].mxu1 %v16146_v22  ;;  %v6573_v48 = vshll.u32 %v6146_v19, 16  ;;  %v6552_v27 = vor.u32 %v6551_v24, %v6548_v34  ;;  %v6562_v4 = vor.u32 %v6561_v59, %v6557_v16  ;;  %v6579_v44 = vshll.u32 %v24399_v13, 16 }
 0x6a2   :  { %v6567_v52 = vrot.slane %v6565_v7, 5  ;;  %v6544_v63 = vsel %vm24320_vm10, %v6539_v57, %v6543_v25  ;;  %v6572_v20 = vrot.slane %v6570_v49, 4  ;;  %v6583_v51 = vshrl.u32 %v24399_v13, 16  ;;  %v6215_v57 = vld [vmem:[#allocation2 + $0xec] sm:$0x1] }
 0x6a3   :  { %v6575_v54 = vrot.slane %v6573_v48, 5  ;;  %v16147_v6 = vcombine.low %v6534_v9, %v6544_v63  ;;  %v6553_v42 = vrot.slane %v6552_v27, 4  ;;  %v6563_v12 = vrot.slane %v6562_v4, 4 }
 0x6a4   :  { %v6581_v31 = vrot.slane %v6579_v44, 5  ;;  %v6585_v3 = vrot.slane %v6583_v51, 4  ;;  %v6589_v18 = vshll.u32 %v6212_v5, 16  ;;  %v6594_v15 = vshrl.u32 %v24404_v55, 16  ;;  %v24440_v44 = vld [vmem:[#allocation2 + $0xf0] sm:$0xf] }
 0x6a5   :  { %v6576_v0 = vor.u32 %v6575_v54, %v6572_v20  ;;  %18311 = vmatprep.mubr.bf16.mxu1 %v16147_v6  ;;  %v6558_v32 = vsel %vm24320_vm10, %v6553_v42, %v6557_v16  ;;  %v6568_v50 = vsel %vm24320_vm10, %v6563_v12, %v6567_v52  ;;  %v6597_v37 = vshll.u32 %v24404_v55, 16  ;;  %v24445_v6 = vld [vmem:[#allocation2 + $0xf4] sm:$0xf] }
 0x6a6   :  { %v6603_v30 = vshll.u32 %v24409_v8, 16  ;;  %v16148_v45 = vcombine.low %v6558_v32, %v6568_v50  ;;  %v6586_v35 = vor.u32 %v6585_v3, %v6581_v31  ;;  %v6591_v47 = vrot.slane %v6589_v18, 5  ;;  %v6216_v3 = vld [vmem:[#allocation2 + $0xf8] sm:$0x1] }
 0x6a7   :  { %v6577_v1 = vrot.slane %v6576_v0, 4  ;;  %v6596_v40 = vrot.slane %v6594_v15, 4  ;;  %v6599_v38 = vrot.slane %v6597_v37, 5  ;;  %v6607_v11 = vshrl.u32 %v24409_v8, 16  ;;  %v24452_v37 = vld [vmem:[#allocation2 + $0x100] sm:$0xf] }
 0x6a8   :  { %v6605_v17 = vrot.slane %v6603_v30, 5  ;;  %v6587_v46 = vrot.slane %v6586_v35, 4  ;;  %v6613_v41 = vshll.u32 %v6213_v33, 16  ;;  %v6618_v39 = vshrl.u32 %v24411_v2, 16  ;;  %v24450_v33 = vld [vmem:[#allocation2 + $0xfc] sm:$0xf] }
 0x6a9   :  { %18312 = vmatmul.mubr.bf16.gmra.mrb[24].mxu1 %v16148_v45  ;;  %v6582_v58 = vsel %vm24320_vm10, %v6577_v1, %v6581_v31  ;;  %v6600_v26 = vor.u32 %v6599_v38, %v6596_v40  ;;  %v6609_v56 = vrot.slane %v6607_v11, 4  ;;  %v6621_v19 = vshll.u32 %v24411_v2, 16 }
 0x6aa   :  { %v6627_v14 = vshll.u32 %v24420_v53, 16  ;;  %v6592_v43 = vsel %vm24320_vm10, %v6587_v46, %v6591_v47  ;;  %v6615_v62 = vrot.slane %v6613_v41, 5  ;;  %v6620_v36 = vrot.slane %v6618_v39, 4  ;;  %v24459_v39 = vld [vmem:[#allocation2 + $0x108] sm:$0xf] }
 0x6ab   :  { %v6631_v25 = vshrl.u32 %v24420_v53, 16  ;;  %v16149_v10 = vcombine.low %v6582_v58, %v6592_v43  ;;  %v6601_v61 = vrot.slane %v6600_v26, 4  ;;  %v6610_v22 = vor.u32 %v6609_v56, %v6605_v17  ;;  %v24465_v43 = vld [vmem:[#allocation2 + $0x10c] sm:$0xf] }
 0x6ac   :  { %v6623_v60 = vrot.slane %v6621_v19, 5  ;;  %v6629_v34 = vrot.slane %v6627_v14, 5  ;;  %v6637_v16 = vshll.u32 %v6214_v28, 16  ;;  %v6642_v59 = vshrl.u32 %v24428_v21, 16  ;;  %v6217_v28 = vld [vmem:[#allocation2 + $0x104] sm:$0x1] }
 0x6ad   :  { %v6633_v24 = vrot.slane %v6631_v25, 4  ;;  %18315 = vmatprep.mubr.bf16.mxu1 %v16149_v10  ;;  %v6606_v7 = vsel %vm24320_vm10, %v6601_v61, %v6605_v17  ;;  %v6611_v5 = vrot.slane %v6610_v22, 4  ;;  %v6645_v49 = vshll.u32 %v24428_v21, 16 }
 0x6ae   :  { %v6624_v9 = vor.u32 %v6623_v60, %v6620_v36  ;;  %v6639_v27 = vrot.slane %v6637_v16, 5  ;;  %v6644_v4 = vrot.slane %v6642_v59, 4  ;;  %v6651_v52 = vshll.u32 %v24433_v29, 16 }
 0x6af   :  { %v6634_v48 = vor.u32 %v6633_v24, %v6629_v34  ;;  %v6616_v63 = vsel %vm24320_vm10, %v6611_v5, %v6615_v62  ;;  %v6647_v54 = vrot.slane %v6645_v49, 5  ;;  %v6655_v51 = vshrl.u32 %v24433_v29, 16  ;;  %v6218_v5 = vld [vmem:[#allocation2 + $0x110] sm:$0x1] }
 0x6b0   :  { %v6625_v20 = vrot.slane %v6624_v9, 4  ;;  %v16150_v42 = vcombine.low %v6606_v7, %v6616_v63  ;;  %v6653_v31 = vrot.slane %v6651_v52, 5  ;;  %v6661_v0 = vshll.u32 %v6215_v57, 16 }
 0x6b1   :  { %v6635_v12 = vrot.slane %v6634_v48, 4  ;;  %v6648_v15 = vor.u32 %v6647_v54, %v6644_v4  ;;  %v6657_v32 = vrot.slane %v6655_v51, 4  ;;  %v6666_v50 = vshrl.u32 %v24440_v44, 16 }
 0x6b2   :  { %v6630_v18 = vsel %vm24320_vm10, %v6625_v20, %v6629_v34  ;;  %18316 = vmatmul.mubr.bf16.gmra.mrb[28].mxu1 %v16150_v42  ;;  %v6663_v45 = vrot.slane %v6661_v0, 5  ;;  %v6669_v1 = vshll.u32 %v24440_v44, 16  ;;  %v6675_v35 = vshll.u32 %v24445_v6, 16 }
 0x6b3   :  { %v6640_v30 = vsel %vm24320_vm10, %v6635_v12, %v6639_v27  ;;  %v6649_v40 = vrot.slane %v6648_v15, 4  ;;  %v6658_v38 = vor.u32 %v6657_v32, %v6653_v31  ;;  %v6668_v17 = vrot.slane %v6666_v50, 4  ;;  %v24476_v12 = vld [vmem:[#allocation2 + $0x114] sm:$0xf]  ;;  %v24481_v15 = vld [vmem:[#allocation2 + $0x118] sm:$0xf] }
 0x6b4   :  { %v16151_v47 = vcombine.low %v6630_v18, %v6640_v30  ;;  %v6671_v11 = vrot.slane %v6669_v1, 5  ;;  %v6677_v58 = vrot.slane %v6675_v35, 5  ;;  %v6679_v46 = vshrl.u32 %v24445_v6, 16 }
 0x6b5   :  { %v6685_v41 = vshll.u32 %v6216_v3, 16  ;;  %v6654_v26 = vsel %vm24320_vm10, %v6649_v40, %v6653_v31  ;;  %v6659_v56 = vrot.slane %v6658_v38, 4  ;;  %v6690_v19 = vshrl.u32 %v24450_v33, 16 }
 0x6b6   :  { %18319 = vmatprep.mubr.bf16.mxu1 %v16151_v47  ;;  %v6693_v14 = vshll.u32 %v24450_v33, 16  ;;  %v6672_v62 = vor.u32 %v6671_v11, %v6668_v17  ;;  %v6681_v36 = vrot.slane %v6679_v46, 4  ;;  %v6699_v10 = vshll.u32 %v24452_v37, 16  ;;  %v6219_v47 = vld [vmem:[#allocation2 + $0x11c] sm:$0x1] }
 0x6b7   :  { %v6687_v25 = vrot.slane %v6685_v41, 5  ;;  %v6664_v61 = vsel %vm24320_vm10, %v6659_v56, %v6663_v45  ;;  %v6692_v22 = vrot.slane %v6690_v19, 4  ;;  %v6703_v34 = vshrl.u32 %v24452_v37, 16  ;;  %v24491_v41 = vld [vmem:[#allocation2 + $0x120] sm:$0xf] }
 0x6b8   :  { %v6695_v60 = vrot.slane %v6693_v14, 5  ;;  %v16152_v24 = vcombine.low %v6654_v26, %v6664_v61  ;;  %v6673_v16 = vrot.slane %v6672_v62, 4  ;;  %v6682_v59 = vor.u32 %v6681_v36, %v6677_v58  ;;  %v24493_v14 = vld [vmem:[#allocation2 + $0x124] sm:$0xf] }
 0x6b9   :  { %v6701_v7 = vrot.slane %v6699_v10, 5  ;;  %v6705_v57 = vrot.slane %v6703_v34, 4  ;;  %v6709_v49 = vshll.u32 %v6217_v28, 16  ;;  %v6714_v48 = vshrl.u32 %v24459_v39, 16 }
 0x6ba   :  { %v6696_v9 = vor.u32 %v6695_v60, %v6692_v22  ;;  %18320 = vmatmul.mubr.bf16.gmra.mrb[32].mxu1 %v16152_v24  ;;  %v6678_v27 = vsel %vm24320_vm10, %v6673_v16, %v6677_v58  ;;  %v6683_v4 = vrot.slane %v6682_v59, 4  ;;  %v6717_v52 = vshll.u32 %v24459_v39, 16 }
 0x6bb   :  { %v6723_v63 = vshll.u32 %v24465_v43, 16  ;;  %v6706_v54 = vor.u32 %v6705_v57, %v6701_v7  ;;  %v6711_v51 = vrot.slane %v6709_v49, 5  ;;  %v6716_v42 = vrot.slane %v6714_v48, 4 }
 0x6bc   :  { %v6697_v20 = vrot.slane %v6696_v9, 4  ;;  %v6688_v31 = vsel %vm24320_vm10, %v6683_v4, %v6687_v25  ;;  %v6719_v0 = vrot.slane %v6717_v52, 5  ;;  %v6727_v18 = vshrl.u32 %v24465_v43, 16  ;;  %v24500_v9 = vld [vmem:[#allocation2 + $0x12c] sm:$0xf] }
 0x6bd   :  { %v6725_v3 = vrot.slane %v6723_v63, 5  ;;  %v16153_v32 = vcombine.low %v6678_v27, %v6688_v31  ;;  %v6707_v30 = vrot.slane %v6706_v54, 4  ;;  %v6733_v45 = vshll.u32 %v6218_v5, 16  ;;  %v24505_v4 = vld [vmem:[#allocation2 + $0x130] sm:$0xf] }
 0x6be   :  { %v6702_v50 = vsel %vm24320_vm10, %v6697_v20, %v6701_v7  ;;  %v6720_v1 = vor.u32 %v6719_v0, %v6716_v42  ;;  %v6729_v35 = vrot.slane %v6727_v18, 4  ;;  %v6738_v40 = vshrl.u32 %v24476_v12, 16  ;;  %v6220_v7 = vld [vmem:[#allocation2 + $0x128] sm:$0x1] }
 0x6bf   :  { %v6741_v38 = vshll.u32 %v24476_v12, 16  ;;  %18323 = vmatprep.mubr.bf16.mxu1 %v16153_v32  ;;  %v6712_v17 = vsel %vm24320_vm10, %v6707_v30, %v6711_v51  ;;  %v6735_v11 = vrot.slane %v6733_v45, 5  ;;  %v6747_v58 = vshll.u32 %v24481_v15, 16  ;;  %v6221_v32 = vld [vmem:[#allocation2 + $0x134] sm:$0x1] }
 0x6c0   :  { %v6751_v46 = vshrl.u32 %v24481_v15, 16  ;;  %v16154_v28 = vcombine.low %v6702_v50, %v6712_v17  ;;  %v6721_v26 = vrot.slane %v6720_v1, 4  ;;  %v6730_v56 = vor.u32 %v6729_v35, %v6725_v3  ;;  %v24514_v45 = vld [vmem:[#allocation2 + $0x138] sm:$0xf] }
 0x6c1   :  { %v6740_v19 = vrot.slane %v6738_v40, 4  ;;  %v6743_v62 = vrot.slane %v6741_v38, 5  ;;  %v6749_v36 = vrot.slane %v6747_v58, 5  ;;  %v6757_v10 = vshll.u32 %v6219_v47, 16  ;;  %v24516_v38 = vld [vmem:[#allocation2 + $0x13c] sm:$0xf] }
 0x6c2   :  { %v6753_v25 = vrot.slane %v6751_v46, 4  ;;  %18324 = vmatmul.mubr.bf16.gmra.mrb[36].mxu1 %v16154_v28  ;;  %v6726_v61 = vsel %vm24320_vm10, %v6721_v26, %v6725_v3  ;;  %v6731_v22 = vrot.slane %v6730_v56, 4  ;;  %v6762_v60 = vshrl.u32 %v24491_v41, 16 }
 0x6c3   :  { %v6765_v34 = vshll.u32 %v24491_v41, 16  ;;  %v6744_v24 = vor.u32 %v6743_v62, %v6740_v19  ;;  %v6759_v59 = vrot.slane %v6757_v10, 5  ;;  %v6771_v5 = vshll.u32 %v24493_v14, 16  ;;  %v6222_v19 = vld [vmem:[#allocation2 + $0x140] sm:$0x1] }
 0x6c4   :  { %v6754_v16 = vor.u32 %v6753_v25, %v6749_v36  ;;  %v6736_v57 = vsel %vm24320_vm10, %v6731_v22, %v6735_v11  ;;  %v6764_v49 = vrot.slane %v6762_v60, 4  ;;  %v6775_v27 = vshrl.u32 %v24493_v14, 16  ;;  %v24524_v22 = vld [vmem:[#allocation2 + $0x144] sm:$0xf] }
 0x6c5   :  { %v6767_v48 = vrot.slane %v6765_v34, 5  ;;  %v16155_v52 = vcombine.low %v6726_v61, %v6736_v57  ;;  %v6745_v63 = vrot.slane %v6744_v24, 4  ;;  %v6773_v54 = vrot.slane %v6771_v5, 5 }
 0x6c6   :  { %v6755_v20 = vrot.slane %v6754_v16, 4  ;;  %v6777_v42 = vrot.slane %v6775_v27, 4  ;;  %v6781_v31 = vshll.u32 %v6220_v7, 16  ;;  %v6786_v0 = vshrl.u32 %v24500_v9, 16 }
 0x6c7   :  { %v6768_v51 = vor.u32 %v6767_v48, %v6764_v49  ;;  %18327 = vmatprep.mubr.bf16.mxu1 %v16155_v52  ;;  %v6750_v3 = vsel %vm24320_vm10, %v6745_v63, %v6749_v36  ;;  %v6789_v50 = vshll.u32 %v24500_v9, 16  ;;  %v6795_v30 = vshll.u32 %v24505_v4, 16  ;;  %v24529_v49 = vld [vmem:[#allocation2 + $0x148] sm:$0xf] }
 0x6c8   :  { %v6760_v18 = vsel %vm24320_vm10, %v6755_v20, %v6759_v59  ;;  %v6778_v47 = vor.u32 %v6777_v42, %v6773_v54  ;;  %v6783_v40 = vrot.slane %v6781_v31, 5  ;;  %v6788_v17 = vrot.slane %v6786_v0, 4  ;;  %v6223_v42 = vld [vmem:[#allocation2 + $0x14c] sm:$0x1]  ;;  %v24535_v0 = vld [vmem:[#allocation2 + $0x150] sm:$0xf] }
 0x6c9   :  { %v16156_v1 = vcombine.low %v6750_v3, %v6760_v18  ;;  %v6769_v35 = vrot.slane %v6768_v51, 4  ;;  %v6791_v11 = vrot.slane %v6789_v50, 5  ;;  %v6797_v58 = vrot.slane %v6795_v30, 5 }
 0x6ca   :  { %v6799_v46 = vshrl.u32 %v24505_v4, 16  ;;  %v6779_v26 = vrot.slane %v6778_v47, 4  ;;  %v6805_v56 = vshll.u32 %v6221_v32, 16  ;;  %v6810_v62 = vshrl.u32 %v24514_v45, 16 }
 0x6cb   :  { %18328 = vmatmul.mubr.bf16.gmra.mrb[40].mxu1 %v16156_v1  ;;  %v6774_v28 = vsel %vm24320_vm10, %v6769_v35, %v6773_v54  ;;  %v6792_v36 = vor.u32 %v6791_v11, %v6788_v17  ;;  %v6813_v10 = vshll.u32 %v24514_v45, 16  ;;  %v6819_v61 = vshll.u32 %v24516_v38, 16 }
 0x6cc   :  { %v6801_v25 = vrot.slane %v6799_v46, 4  ;;  %v6784_v60 = vsel %vm24320_vm10, %v6779_v26, %v6783_v40  ;;  %v6807_v34 = vrot.slane %v6805_v56, 5  ;;  %v6812_v24 = vrot.slane %v6810_v62, 4  ;;  %v24541_v40 = vld [vmem:[#allocation2 + $0x154] sm:$0xf] }
 0x6cd   :  { %v6823_v16 = vshrl.u32 %v24516_v38, 16  ;;  %v16157_v59 = vcombine.low %v6774_v28, %v6784_v60  ;;  %v6793_v7 = vrot.slane %v6792_v36, 4  ;;  %v6815_v57 = vrot.slane %v6813_v10, 5  ;;  %v6224_v28 = vld [vmem:[#allocation2 + $0x158] sm:$0x1] }
 0x6ce   :  { %v6802_v5 = vor.u32 %v6801_v25, %v6797_v58  ;;  %v6821_v48 = vrot.slane %v6819_v61, 5  ;;  %v6829_v52 = vshll.u32 %v6222_v19, 16  ;;  %v6834_v63 = vshrl.u32 %v24524_v22, 16  ;;  %v24546_v36 = vld [vmem:[#allocation2 + $0x15c] sm:$0xf] }
 0x6cf   :  { %v6825_v27 = vrot.slane %v6823_v16, 4  ;;  %18331 = vmatprep.mubr.bf16.mxu1 %v16157_v59  ;;  %v6798_v20 = vsel %vm24320_vm10, %v6793_v7, %v6797_v58  ;;  %v6816_v51 = vor.u32 %v6815_v57, %v6812_v24  ;;  %v6837_v31 = vshll.u32 %v24524_v22, 16  ;;  %v24552_v7 = vld [vmem:[#allocation2 + $0x160] sm:$0xf] }
 0x6d0   :  { %v6803_v54 = vrot.slane %v6802_v5, 4  ;;  %v6831_v18 = vrot.slane %v6829_v52, 5  ;;  %v6836_v32 = vrot.slane %v6834_v63, 4  ;;  %v6843_v50 = vshll.u32 %v24529_v49, 16  ;;  %v6225_v52 = vld [vmem:[#allocation2 + $0x164] sm:$0x1] }
 0x6d1   :  { %v6826_v3 = vor.u32 %v6825_v27, %v6821_v48  ;;  %v6817_v1 = vrot.slane %v6816_v51, 4  ;;  %v6839_v35 = vrot.slane %v6837_v31, 5  ;;  %v6847_v47 = vshrl.u32 %v24529_v49, 16  ;;  %v24555_v63 = vld [vmem:[#allocation2 + $0x168] sm:$0xf] }
 0x6d2   :  { %v6808_v30 = vsel %vm24320_vm10, %v6803_v54, %v6807_v34  ;;  %v6845_v58 = vrot.slane %v6843_v50, 5  ;;  %v6853_v46 = vshll.u32 %v6223_v42, 16  ;;  %v6858_v62 = vshrl.u32 %v24535_v0, 16 }
 0x6d3   :  { %v16158_v17 = vcombine.low %v6798_v20, %v6808_v30  ;;  %v6827_v11 = vrot.slane %v6826_v3, 4  ;;  %v6822_v26 = vsel %vm24320_vm10, %v6817_v1, %v6821_v48  ;;  %v6840_v56 = vor.u32 %v6839_v35, %v6836_v32 }
 0x6d4   :  { %v6849_v19 = vrot.slane %v6847_v47, 4  ;;  %v6855_v10 = vrot.slane %v6853_v46, 5  ;;  %v6861_v61 = vshll.u32 %v24535_v0, 16  ;;  %v6867_v60 = vshll.u32 %v24541_v40, 16  ;;  %v24565_v47 = vld [vmem:[#allocation2 + $0x16c] sm:$0xf] }
 0x6d5   :  { %18332 = vmatmul.mubr.bf16.gmra.mrb[44].mxu1 %v16158_v17  ;;  %v6832_v25 = vsel %vm24320_vm10, %v6827_v11, %v6831_v18  ;;  %v6841_v24 = vrot.slane %v6840_v56, 4  ;;  %v6860_v59 = vrot.slane %v6858_v62, 4  ;;  %v6871_v48 = vshrl.u32 %v24541_v40, 16 }
 0x6d6   :  { %v16159_v34 = vcombine.low %v6822_v26, %v6832_v25  ;;  %v6850_v16 = vor.u32 %v6849_v19, %v6845_v58  ;;  %v6863_v5 = vrot.slane %v6861_v61, 5  ;;  %v6869_v57 = vrot.slane %v6867_v60, 5 }
 0x6d7   :  { %v6877_v27 = vshll.u32 %v6224_v28, 16  ;;  %v6846_v20 = vsel %vm24320_vm10, %v6841_v24, %v6845_v58  ;;  %v6882_v51 = vshrl.u32 %v24546_v36, 16  ;;  %v6885_v42 = vshll.u32 %v24546_v36, 16  ;;  %v24567_v28 = vld [vmem:[#allocation2 + $0x170] sm:$0x1] }
 0x6d8   :  { %18335 = vmatprep.mubr.bf16.mxu1 %v16159_v34  ;;  %v6851_v54 = vrot.slane %v6850_v16, 4  ;;  %v6864_v31 = vor.u32 %v6863_v5, %v6860_v59  ;;  %v6873_v3 = vrot.slane %v6871_v48, 4  ;;  %v6891_v32 = vshll.u32 %v24552_v7, 16  ;;  %v24574_v5 = vld [vmem:[#allocation2 + $0x174] sm:$0xf] }
 0x6d9   :  { %v6879_v18 = vrot.slane %v6877_v27, 5  ;;  %v6884_v30 = vrot.slane %v6882_v51, 4  ;;  %v6887_v1 = vrot.slane %v6885_v42, 5  ;;  %v6895_v35 = vshrl.u32 %v24552_v7, 16 }
 0x6da   :  { %v6856_v50 = vsel %vm24320_vm10, %v6851_v54, %v6855_v10  ;;  %v6865_v11 = vrot.slane %v6864_v31, 4  ;;  %v6874_v58 = vor.u32 %v6873_v3, %v6869_v57  ;;  %v6893_v46 = vrot.slane %v6891_v32, 5  ;;  %v24579_v54 = vld [vmem:[#allocation2 + $0x178] sm:$0xf]  ;;  %v24584_v3 = vld [vmem:[#allocation2 + $0x17c] sm:$0x1] }
 0x6db   :  { %v16160_v17 = vcombine.low %v6846_v20, %v6856_v50  ;;  %v6888_v26 = vor.u32 %v6887_v1, %v6884_v30  ;;  %v6897_v56 = vrot.slane %v6895_v35, 4  ;;  %v6901_v19 = vshll.u32 %v6225_v52, 16 }
 0x6dc   :  { %v6906_v62 = vshrl.u32 %v24555_v63, 16  ;;  %v6870_v25 = vsel %vm24320_vm10, %v6865_v11, %v6869_v57  ;;  %v6875_v10 = vrot.slane %v6874_v58, 4  ;;  %v6909_v61 = vshll.u32 %v24555_v63, 16  ;;  %v24592_v58 = vld [vmem:[#allocation2 + $0x180] sm:$0xf] }
 0x6dd   :  { %18336 = vmatmul.mubr.bf16.gmra.mrb[48].mxu1 %v16160_v17  ;;  %v6915_v60 = vshll.u32 %v24565_v47, 16  ;;  %v6889_v34 = vrot.slane %v6888_v26, 4  ;;  %v6898_v24 = vor.u32 %v6897_v56, %v6893_v46  ;;  %v6903_v16 = vrot.slane %v6901_v19, 5 }
 0x6de   :  { %v6908_v59 = vrot.slane %v6906_v62, 4  ;;  %v6880_v48 = vsel %vm24320_vm10, %v6875_v10, %v6879_v18  ;;  %v6911_v27 = vrot.slane %v6909_v61, 5  ;;  %v6919_v20 = vshrl.u32 %v24565_v47, 16  ;;  %v24594_v62 = vld [vmem:[#allocation2 + $0x184] sm:$0xf] }
 0x6df   :  { %v6917_v52 = vrot.slane %v6915_v60, 5  ;;  %v16161_v57 = vcombine.low %v6870_v25, %v6880_v48  ;;  %v6894_v51 = vsel %vm24320_vm10, %v6889_v34, %v6893_v46  ;;  %v6899_v42 = vrot.slane %v6898_v24, 4 }
 0x6e0   :  { %v6925_v31 = vshll.u32 %v24567_v28, 16  ;;  %v6912_v32 = vor.u32 %v6911_v27, %v6908_v59  ;;  %v6921_v50 = vrot.slane %v6919_v20, 4  ;;  %v6930_v30 = vshrl.u32 %v24574_v5, 16 }
 0x6e1   :  { %v6933_v18 = vshll.u32 %v24574_v5, 16  ;;  %18339 = vmatprep.mubr.bf16.mxu1 %v16161_v57  ;;  %v6904_v1 = vsel %vm24320_vm10, %v6899_v42, %v6903_v16  ;;  %v6939_v17 = vshll.u32 %v24579_v54, 16  ;;  %v6943_v11 = vshrl.u32 %v24579_v54, 16  ;;  %v24601_v57 = vld [vmem:[#allocation2 + $0x188] sm:$0x1] }
 0x6e2   :  { %v6927_v35 = vrot.slane %v6925_v31, 5  ;;  %v16162_v46 = vcombine.low %v6894_v51, %v6904_v1  ;;  %v6913_v26 = vrot.slane %v6912_v32, 4  ;;  %v6922_v56 = vor.u32 %v6921_v50, %v6917_v52  ;;  %v24604_v42 = vld [vmem:[#allocation2 + $0x18c] sm:$0xf] }
 0x6e3   :  { %v6932_v19 = vrot.slane %v6930_v30, 4  ;;  %v6935_v25 = vrot.slane %v6933_v18, 5  ;;  %v6941_v10 = vrot.slane %v6939_v17, 5  ;;  %v6945_v61 = vrot.slane %v6943_v11, 4  ;;  %v24609_v30 = vld [vmem:[#allocation2 + $0x190] sm:$0xf] }
 0x6e4   :  { %v6949_v60 = vshll.u32 %v24584_v3, 16  ;;  %v6918_v34 = vsel %vm24320_vm10, %v6913_v26, %v6917_v52  ;;  %v6923_v24 = vrot.slane %v6922_v56, 4  ;;  %v6954_v16 = vshrl.u32 %v24592_v58, 16 }
 0x6e5   :  { %18340 = vmatmul.mubr.bf16.gmra.mrb[52].mxu1 %v16162_v46  ;;  %v6957_v59 = vshll.u32 %v24592_v58, 16  ;;  %v6936_v48 = vor.u32 %v6935_v25, %v6932_v19  ;;  %v6946_v27 = vor.u32 %v6945_v61, %v6941_v10  ;;  %v6963_v51 = vshll.u32 %v24594_v62, 16 }
 0x6e6   :  { %v6951_v20 = vrot.slane %v6949_v60, 5  ;;  %v6928_v31 = vsel %vm24320_vm10, %v6923_v24, %v6927_v35  ;;  %v6956_v32 = vrot.slane %v6954_v16, 4  ;;  %v6967_v52 = vshrl.u32 %v24594_v62, 16 }
 0x6e7   :  { %v6959_v50 = vrot.slane %v6957_v59, 5  ;;  %v16163_v18 = vcombine.low %v6918_v34, %v6928_v31  ;;  %v6937_v1 = vrot.slane %v6936_v48, 4  ;;  %v6947_v17 = vrot.slane %v6946_v27, 4  ;;  %v24619_v59 = vld [vmem:[#allocation2 + $0x194] sm:$0x1] }
 0x6e8   :  { %v6965_v11 = vrot.slane %v6963_v51, 5  ;;  %v6969_v26 = vrot.slane %v6967_v52, 4  ;;  %v6973_v56 = vshll.u32 %v24601_v57, 16  ;;  %v6978_v19 = vshrl.u32 %v24604_v42, 16 }
 0x6e9   :  { %v6960_v46 = vor.u32 %v6959_v50, %v6956_v32  ;;  %18343 = vmatprep.mubr.bf16.mxu1 %v16163_v18  ;;  %v6942_v35 = vsel %vm24320_vm10, %v6937_v1, %v6941_v10  ;;  %v6952_v25 = vsel %vm24320_vm10, %v6947_v17, %v6951_v20  ;;  %v6981_v61 = vshll.u32 %v24604_v42, 16 }
 0x6ea   :  { %v6987_v60 = vshll.u32 %v24609_v30, 16  ;;  %v16164_v34 = vcombine.low %v6942_v35, %v6952_v25  ;;  %v6970_v16 = vor.u32 %v6969_v26, %v6965_v11  ;;  %v6980_v48 = vrot.slane %v6978_v19, 4 }
 0x6eb   :  { %v6961_v24 = vrot.slane %v6960_v46, 4  ;;  %v6983_v27 = vrot.slane %v6981_v61, 5  ;;  %v6991_v31 = vshrl.u32 %v24609_v30, 16  ;;  %v6975_v20 = vrot.slane %v6973_v56, 5  ;;  %v20264_v56 = vld [vmem:[#allocation2] sm:$0xf] }
 0x6ec   :  { %v6989_v51 = vrot.slane %v6987_v60, 5  ;;  %v6971_v32 = vrot.slane %v6970_v16, 4  ;;  %v6997_v18 = vshll.u32 %v24619_v59, 16  ;;  %v24631_v61 = vld [vmem:[#allocation2 + $0x4] sm:$0xf] }
 0x6ed   :  { %18344 = vmatmul.mubr.bf16.gmra.mrb[56].mxu1 %v16164_v34  ;;  %v6966_v10 = vsel %vm24320_vm10, %v6961_v24, %v6965_v11  ;;  %v6984_v50 = vor.u32 %v6983_v27, %v6980_v48  ;;  %v6993_v52 = vrot.slane %v6991_v31, 4  ;;  %v16175_v60 = vcombine.low %v20264_v56, %v24631_v61  ;;  %v20266_v24 = vld [vmem:[#allocation2 + $0xc] sm:$0xf]  ;;  %v24634_v16 = vld [vmem:[#allocation2 + $0x10] sm:$0xf] }
 0x6ee   :  { %v6976_v1 = vsel %vm24320_vm10, %v6971_v32, %v6975_v20  ;;  %v6999_v25 = vrot.slane %v6997_v18, 5  ;;  %v16176_v48 = vcombine.low %v20266_v24, %v24634_v16  ;;  %v20114_v27 = vld [vmem:[%s27576_s4 + $0x88] sm:$0xff]   ;;  %v24640_v31 = vld [vmem:[#allocation2 + $0x1c] sm:$0xf]  ;;  %v20270_v32 = vld [vmem:[%s27576_s4 + $0x80] sm:$0xff]  }
 0x6ef   :  { %v16165_v17 = vcombine.low %v6966_v10, %v6976_v1  ;;  %v6985_v46 = vrot.slane %v6984_v50, 4  ;;  %v6994_v26 = vor.u32 %v6993_v52, %v6989_v51  ;;  %v20119_v20 = vld [vmem:[%s27576_s4 + $0x90] sm:$0xff]   ;;  %v20271_v50 = vld [vmem:[#allocation2 + $0x24] sm:$0xf]  ;;  %v24649_v52 = vld [vmem:[#allocation2 + $0x28] sm:$0xf] }
 0x6f0   :  { %v16178_v18 = vcombine.low %v20271_v50, %v24649_v52  ;;  %v20124_v1 = vld [vmem:[%s27576_s4 + $0x98] sm:$0xff]   ;;  %v20134_v56 = vld [vmem:[%s27576_s4 + $0xa8] sm:$0xff]   ;;  %v24679_v50 = vld [vmem:[#allocation2 + $0x64] sm:$0xf] }
 0x6f1   :  { %18347 = vmatprep.mubr.bf16.mxu1 %v16165_v17  ;;  %v6990_v19 = vsel %vm24320_vm10, %v6985_v46, %v6989_v51  ;;  %v6995_v35 = vrot.slane %v6994_v26, 4  ;;  %v20268_v51 = vld [vmem:[#allocation2 + $0x18] sm:$0xf]  ;;  %v20273_v17 = vld [vmem:[#allocation2 + $0x30] sm:$0xf] }
 0x6f2   :  { %v16177_v10 = vcombine.low %v20268_v51, %v24640_v31  ;;  %v24655_v46 = vld [vmem:[#allocation2 + $0x34] sm:$0xf]  ;;  %v24673_v51 = vld [vmem:[#allocation2 + $0x58] sm:$0xf] }
 0x6f3   :  { %v7000_v11 = vsel %vm24320_vm10, %v6995_v35, %v6999_v25  ;;  %v16179_v26 = vcombine.low %v20273_v17, %v24655_v46  ;;  %v20275_v35 = vld [vmem:[#allocation2 + $0x3c] sm:$0xf]  ;;  %v24661_v25 = vld [vmem:[#allocation2 + $0x40] sm:$0xf]  ;;  %v20283_v17 = vld [vmem:[#allocation2 + $0x6c] sm:$0xf] }
 0x6f4   :  { %v16166_v34 = vcombine.low %v6990_v19, %v7000_v11  ;;  %v20129_v19 = vld [vmem:[%s27576_s4 + $0xa0] sm:$0xff]   ;;  %v16180_v11 = vcombine.low %v20275_v35, %v24661_v25  ;;  %v24691_v35 = vld [vmem:[#allocation2 + $0x7c] sm:$0xf] }
 0x6f6   :  { %18348 = vmatmul.mubr.bf16.gmra.mrb[60].mxu1 %v16166_v34  ;;  %v24667_v34 = vld [vmem:[#allocation2 + $0x4c] sm:$0xf] }
 0x6f7   :  { %18367 = vmatprep.mubr.bf16.mxu1 %v16175_v60  ;;  %v20277_v60 = vld [vmem:[#allocation2 + $0x48] sm:$0xf] }
 0x6f8   :  { %v16181_v24 = vcombine.low %v20277_v60, %v24667_v34  ;;  %v20287_v60 = vld [vmem:[#allocation2 + $0x84] sm:$0xf] }
 0x6fe   :  { %18368 = vmatmul.mubr.bf16.vlgmr.msra.gmra.mrb[0].mxu1 %v16176_v48  ;;  %v20139_v48 = vld [vmem:[%s27576_s4 + $0xb0] sm:$0xff]  }
 0x6ff   :  { %18371 = vmatprep.mubr.bf16.mxu1 %v16177_v10  ;;  %18432 = vmatpush3.bf16.msra.mxu1 %v20270_v32  ;;  %v20144_v32 = vld [vmem:[%s27576_s4 + $0xb8] sm:$0xff]  }
 0x700   :  { %18433 = vmatprep.subr.bf16.mxu1 %v20114_v27 }
 0x703   :  { %18434 = vmatpush3.bf16.msra.mxu1 %v20114_v27  ;;  %v20279_v27 = vld [vmem:[#allocation2 + $0x54] sm:$0xf] }
 0x704   :  { %18435 = vmatprep.subr.bf16.mxu1 %v20119_v20  ;;  %v16182_v10 = vcombine.low %v20279_v27, %v24673_v51  ;;  %v24697_v27 = vld [vmem:[#allocation2 + $0x94] sm:$0xf] }
 0x706   :  { %18372 = vmatmul.mubr.bf16.gmra.mrb[4].mxu1 %v16178_v18 }
 0x707   :  { %18375 = vmatprep.mubr.bf16.mxu1 %v16179_v26  ;;  %18436 = vmatpush3.bf16.msra.mxu1 %v20119_v20  ;;  %v20281_v20 = vld [vmem:[#allocation2 + $0x60] sm:$0xf]  ;;  %v24687_v26 = vld [vmem:[#allocation2 + $0x70] sm:$0xf] }
 0x708   :  { %18437 = vmatprep.subr.bf16.mxu1 %v20124_v1  ;;  %v16183_v18 = vcombine.low %v20281_v20, %v24679_v50  ;;  %v20291_v20 = vld [vmem:[#allocation2 + $0x9c] sm:$0xf] }
 0x70b   :  { %18438 = vmatpush3.bf16.msra.mxu1 %v20124_v1  ;;  %v24685_v1 = vld [vmem:[%s27576_s4 + $0xc0] sm:$0xff]  }
 0x70c   :  { %18439 = vmatprep.subr.bf16.mxu1 %v20129_v19 }
 0x70e   :  { %18376 = vmatmul.mubr.bf16.gmra.mrb[8].mxu1 %v16180_v11  ;;  %v20286_v11 = vld [vmem:[#allocation2 + $0x78] sm:$0xf] }
 0x70f   :  { %18379 = vmatprep.mubr.bf16.mxu1 %v16181_v24  ;;  %18440 = vmatpush3.bf16.msra.mxu1 %v20129_v19  ;;  %v16184_v19 = vcombine.low %v20283_v17, %v24687_v26  ;;  %v24694_v24 = vld [vmem:[#allocation2 + $0x88] sm:$0xf] }
 0x710   :  { %18441 = vmatprep.subr.bf16.mxu1 %v20134_v56 }
 0x713   :  { %18442 = vmatpush3.bf16.msra.mxu1 %v20134_v56  ;;  %v16185_v56 = vcombine.low %v20286_v11, %v24691_v35  ;;  %v20293_v11 = vld [vmem:[#allocation2 + $0xa8] sm:$0xf] }
 0x714   :  { %18443 = vmatprep.subr.bf16.mxu1 %v20139_v48 }
 0x716   :  { %18380 = vmatmul.mubr.bf16.gmra.mrb[12].mxu1 %v16182_v10  ;;  %v20290_v10 = vld [vmem:[#allocation2 + $0x90] sm:$0xf] }
 0x717   :  { %18383 = vmatprep.mubr.bf16.mxu1 %v16183_v18  ;;  %18444 = vmatpush3.bf16.msra.mxu1 %v20139_v48  ;;  %v16186_v48 = vcombine.low %v20287_v60, %v24694_v24  ;;  %v24700_v18 = vld [vmem:[#allocation2 + $0xa0] sm:$0xf]  ;;  %v16190_v60 = vcombine.low %v24404_v55, %v24409_v8  ;;  %v16196_v55 = vcombine.low %v24476_v12, %v24481_v15 }
 0x718   :  { %18445 = vmatprep.subr.bf16.mxu1 %v20144_v32  ;;  %v16188_v17 = vcombine.low %v20291_v20, %v24700_v18  ;;  %v16197_v8 = vcombine.low %v24491_v41, %v24493_v14  ;;  %v16204_v12 = vcombine.low %v24574_v5, %v24579_v54  ;;  %v16205_v14 = vcombine.low %v24592_v58, %v24594_v62  ;;  %v8014_v5 = vld [vmem:[#allocation2 + $0x18] sm:$0xe] }
 0x71b   :  { %18446 = vmatpush3.bf16.msra.mxu1 %v20144_v32  ;;  %v16187_v32 = vcombine.low %v20290_v10, %v24697_v27  ;;  %v16193_v10 = vcombine.low %v24440_v44, %v24445_v6  ;;  %v16202_v44 = vcombine.low %v24546_v36, %v24552_v7  ;;  %v16203_v6 = vcombine.low %v24555_v63, %v24565_v47  ;;  %v8013_v36 = vld [vmem:[#allocation2 + $0xc] sm:$0xe] }
 0x71c   :  { %18511 = vmatprep.subr.bf16.mxu1 %v24685_v1 }
 0x71e   :  { %18384 = vmatmul.mubr.bf16.gmra.mrb[16].mxu1 %v16184_v19  ;;  %v16189_v19 = vcombine.low %v20293_v11, %v24399_v13  ;;  %v16194_v13 = vcombine.low %v24450_v33, %v24452_v37  ;;  %v8113_v33 = vrot.slane %v24631_v61, 5  ;;  %v8012_v37 = vld [vmem:[#allocation2] sm:$0xe]  ;;  %v20295_v61 = vld [vmem:[#allocation2 + $0x14] sm:$0x1]  ;;  %v16217_v11 = vrot.slane %v8014_v5, 9 }
 0x71f   :  { %18387 = vmatprep.mubr.bf16.mxu1 %v16185_v56  ;;  %v16191_v56 = vcombine.low %v24411_v2, %v24420_v53  ;;  %v16198_v2 = vcombine.low %v24500_v9, %v24505_v4  ;;  %v16199_v53 = vcombine.low %v24514_v45, %v24516_v38  ;;  %v16215_v15 = vrot.slane %v8012_v37, 9  ;;  %v20149_v37 = vld [vmem:[%s27576_s4 + $0xd0] sm:$0xff]  }
 0x720   :  { %v8115_v41 = vrot.slane %v8113_v33, 4  ;;  %v8120_v38 = vrot.slane %v24634_v16, 5  ;;  %v8123_v20 = vrot.slane %v20295_v61, 5  ;;  %v20300_v5 = vld [vmem:[#allocation2 + $0x50] sm:$0x1]  ;;  %v20151_v61 = vld [vmem:[%s27576_s4 + $0xe0] sm:$0xff]  }
 0x721   :  { %v8114_v4 = vsel %vm24737_vm13, %v16215_v15, %v8113_v33 }
 0x722   :  { %v8122_v63 = vrot.slane %v8120_v38, 4 }
 0x724   :  { %v8124_v16 = vsel %vm24737_vm13, %v8122_v63, %v8123_v20 }
 0x726   :  { %18388 = vmatmul.mubr.bf16.gmra.mrb[20].mxu1 %v16186_v48  ;;  %v16192_v48 = vcombine.low %v24428_v21, %v24433_v29  ;;  %v16200_v21 = vcombine.low %v24524_v22, %v24529_v49  ;;  %v16201_v29 = vcombine.low %v24535_v0, %v24541_v40  ;;  %v8127_v22 = vrot.slane %v24640_v31, 5 }
 0x727   :  { %18391 = vmatprep.mubr.bf16.mxu1 %v16187_v32  ;;  %v16195_v32 = vcombine.low %v24459_v39, %v24465_v43  ;;  %v20294_v39 = vld [vmem:[#allocation2 + $0x8] sm:$0x1]  ;;  %v16206_v0 = vcombine.low %v24604_v42, %v24609_v30  ;;  %v8134_v31 = vrot.slane %v24649_v52, 5  ;;  %v8016_v52 = vld [vmem:[#allocation2 + $0x30] sm:$0xe] }
 0x728   :  { %v8116_v43 = vrot.slane %v20294_v39, 5  ;;  %v8129_v58 = vrot.slane %v8127_v22, 4 }
 0x72a   :  { %v8117_v45 = vsel %vm24737_vm13, %v8115_v41, %v8116_v43  ;;  %v8148_v43 = vrot.slane %v24661_v25, 5 }
 0x72b   :  { %v16263_v49 = vcombine.low %v8114_v4, %v8117_v45  ;;  %v8017_v4 = vld [vmem:[#allocation2 + $0x3c] sm:$0xe] }
 0x72c   :  { %v20150_v45 = vld [vmem:[%s27576_s4 + $0xd8] sm:$0xff]  }
 0x72e   :  { %18392 = vmatmul.mubr.bf16.gmra.mrb[24].mxu1 %v16188_v17  ;;  %v16216_v17 = vrot.slane %v8013_v36, 9 }
 0x72f   :  { %18395 = vmatprep.mubr.bf16.mxu1 %v16189_v19  ;;  %v20296_v19 = vld [vmem:[#allocation2 + $0x20] sm:$0x1] }
 0x736   :  { %18396 = vmatmul.mubr.bf16.gmra.mrb[28].mxu1 %v16190_v60  ;;  %v8141_v60 = vrot.slane %v24655_v46, 5 }
 0x737   :  { %18399 = vmatprep.mubr.bf16.mxu1 %v16191_v56  ;;  %v8130_v56 = vrot.slane %v20296_v19, 5  ;;  %v8169_v19 = vrot.slane %v24679_v50, 5 }
 0x739   :  { %v8131_v42 = vsel %vm24737_vm13, %v8129_v58, %v8130_v56  ;;  %v8158_v58 = vrot.slane %v20300_v5, 5 }
 0x73e   :  { %18400 = vmatmul.mubr.bf16.gmra.mrb[32].mxu1 %v16192_v48  ;;  %v8121_v48 = vsel %vm24737_vm13, %v16216_v17, %v8120_v38  ;;  %v8150_v38 = vrot.slane %v8148_v43, 4  ;;  %v8162_v17 = vrot.slane %v24673_v51, 5 }
 0x73f   :  { %18403 = vmatprep.mubr.bf16.mxu1 %v16193_v10  ;;  %v16264_v10 = vcombine.low %v8121_v48, %v8124_v16 }
 0x740   :  { %v8164_v48 = vrot.slane %v8162_v17, 4 }
 0x746   :  { %18404 = vmatmul.mubr.bf16.gmra.mrb[36].mxu1 %v16194_v13  ;;  %v8128_v13 = vsel %vm24737_vm13, %v16217_v11, %v8127_v22  ;;  %v8018_v22 = vld [vmem:[#allocation2 + $0x48] sm:$0xe] }
 0x747   :  { %18407 = vmatprep.mubr.bf16.mxu1 %v16195_v32  ;;  %v8015_v32 = vld [vmem:[#allocation2 + $0x24] sm:$0xe]  ;;  %v16221_v63 = vrot.slane %v8018_v22, 9 }
 0x748   :  { %v16218_v46 = vrot.slane %v8015_v32, 9  ;;  %v20301_v32 = vld [vmem:[#allocation2 + $0x5c] sm:$0x1] }
 0x74a   :  { %v8135_v15 = vsel %vm24737_vm13, %v16218_v46, %v8134_v31 }
 0x74e   :  { %18408 = vmatmul.mubr.bf16.gmra.mrb[40].mxu1 %v16196_v55  ;;  %v20148_v55 = vld [vmem:[%s27576_s4 + $0xc8] sm:$0xff]  }
 0x74f   :  { %18411 = vmatprep.mubr.bf16.mxu1 %v16197_v8  ;;  %v16265_v8 = vcombine.low %v8128_v13, %v8131_v42  ;;  %v8019_v42 = vld [vmem:[#allocation2 + $0x54] sm:$0xe]  ;;  %v8171_v13 = vrot.slane %v8169_v19, 4 }
 0x750   :  { %v16222_v50 = vrot.slane %v8019_v42, 9 }
 0x756   :  { %18412 = vmatmul.mubr.bf16.gmra.mrb[44].mxu1 %v16198_v2  ;;  %v8136_v2 = vrot.slane %v8134_v31, 4 }
 0x757   :  { %18415 = vmatprep.mubr.bf16.mxu1 %v16199_v53  ;;  %v8143_v53 = vrot.slane %v8141_v60, 4 }
 0x75e   :  { %18416 = vmatmul.mubr.bf16.gmra.mrb[48].mxu1 %v16200_v21  ;;  %v20297_v21 = vld [vmem:[#allocation2 + $0x2c] sm:$0x1] }
 0x75f   :  { %18419 = vmatprep.mubr.bf16.mxu1 %v16201_v29  ;;  %v8137_v29 = vrot.slane %v20297_v21, 5  ;;  %v8176_v21 = vrot.slane %v24687_v26, 5 }
 0x761   :  { %v8138_v39 = vsel %vm24737_vm13, %v8136_v2, %v8137_v29  ;;  %v20302_v2 = vld [vmem:[#allocation2 + $0x68] sm:$0x1] }
 0x762   :  { %v16266_v41 = vcombine.low %v8135_v15, %v8138_v39  ;;  %v8021_v39 = vld [vmem:[#allocation2 + $0x6c] sm:$0xe] }
 0x766   :  { %18420 = vmatmul.mubr.bf16.gmra.mrb[52].mxu1 %v16202_v44  ;;  %v16219_v44 = vrot.slane %v8016_v52, 9  ;;  %v8172_v52 = vrot.slane %v20302_v2, 5 }
 0x767   :  { %18423 = vmatprep.mubr.bf16.mxu1 %v16203_v6  ;;  %v20298_v6 = vld [vmem:[#allocation2 + $0x38] sm:$0x1] }
 0x768   :  { %v8144_v33 = vrot.slane %v20298_v6, 5  ;;  %v8173_v29 = vsel %vm24737_vm13, %v8171_v13, %v8172_v52  ;;  %v8163_v6 = vsel %vm24737_vm13, %v16222_v50, %v8162_v17  ;;  %v8024_v17 = vld [vmem:[#allocation2 + $0x90] sm:$0xe] }
 0x76e   :  { %18424 = vmatmul.mubr.bf16.gmra.mrb[56].mxu1 %v16204_v12  ;;  %v8145_v12 = vsel %vm24737_vm13, %v8143_v53, %v8144_v33  ;;  %v20153_v53 = vld [vmem:[%s27576_s4 + $0xf0] sm:$0xff]  }
 0x76f   :  { %18427 = vmatprep.mubr.bf16.mxu1 %v16205_v14  ;;  %v8142_v14 = vsel %vm24737_vm13, %v16219_v44, %v8141_v60  ;;  %v20152_v60 = vld [vmem:[%s27576_s4 + $0xe8] sm:$0xff]   ;;  %v8183_v44 = vrot.slane %v24691_v35, 5  ;;  %v16224_v35 = vrot.slane %v8021_v39, 9 }
 0x770   :  { %v16267_v25 = vcombine.low %v8142_v14, %v8145_v12  ;;  %v8178_v12 = vrot.slane %v8176_v21, 4 }
 0x771   :  { %v8185_v15 = vrot.slane %v8183_v44, 4 }
 0x776   :  { %18428 = vmatmul.mubr.bf16.gmra.mrb[60].mxu1 %v16206_v0  ;;  %v20299_v0 = vld [vmem:[#allocation2 + $0x44] sm:$0x1] }
 0x777   :  { %18447 = vmatprep.mubr.bf16.mxu1 %v16263_v49  ;;  %v8151_v36 = vrot.slane %v20299_v0, 5  ;;  %v8197_v0 = vrot.slane %v24697_v27, 5 }
 0x779   :  { %v8152_v20 = vsel %vm24737_vm13, %v8150_v38, %v8151_v36  ;;  %v24814_v38 = vld [vmem:[%s27576_s4 + $0x100] sm:$0xff]   ;;  %v8177_v36 = vsel %vm24737_vm13, %v16224_v35, %v8176_v21 }
 0x77e   :  { %18448 = vmatmul.mubr.bf16.vlgmr.msra.gmra.mrb[0].mxu1 %v16264_v10  ;;  %v8020_v10 = vld [vmem:[#allocation2 + $0x60] sm:$0xe] }
 0x77f   :  { %18451 = vmatprep.mubr.bf16.mxu1 %v16265_v8  ;;  %18512 = vmatpush3.bf16.msra.mxu1 %v24685_v1  ;;  %v8155_v1 = vrot.slane %v24667_v34, 5  ;;  %v16220_v34 = vrot.slane %v8017_v4, 9  ;;  %v16223_v8 = vrot.slane %v8020_v10, 9 }
 0x780   :  { %18513 = vmatprep.subr.bf16.mxu1 %v20148_v55 }
 0x781   :  { %v8157_v49 = vrot.slane %v8155_v1, 4  ;;  %v8149_v56 = vsel %vm24737_vm13, %v16220_v34, %v8148_v43  ;;  %v8156_v31 = vsel %vm24737_vm13, %v16221_v63, %v8155_v1  ;;  %v20154_v43 = vld [vmem:[%s27576_s4 + $0xf8] sm:$0xff]  }
 0x782   :  { %v16268_v16 = vcombine.low %v8149_v56, %v8152_v20  ;;  %v8022_v1 = vld [vmem:[#allocation2 + $0x78] sm:$0xe]  ;;  %v16227_v56 = vrot.slane %v8024_v17, 9 }
 0x783   :  { %18514 = vmatpush3.bf16.msra.mxu1 %v20148_v55  ;;  %v8159_v11 = vsel %vm24737_vm13, %v8157_v49, %v8158_v58  ;;  %v8165_v55 = vrot.slane %v20301_v32, 5  ;;  %v16225_v4 = vrot.slane %v8022_v1, 9  ;;  %v8190_v49 = vrot.slane %v24694_v24, 5  ;;  %v8023_v58 = vld [vmem:[#allocation2 + $0x84] sm:$0xe] }
 0x784   :  { %18515 = vmatprep.subr.bf16.mxu1 %v20149_v37  ;;  %v16269_v51 = vcombine.low %v8156_v31, %v8159_v11  ;;  %v8199_v24 = vrot.slane %v8197_v0, 4  ;;  %v16226_v11 = vrot.slane %v8023_v58, 9  ;;  %v8198_v32 = vsel %vm24737_vm13, %v16227_v56, %v8197_v0 }
 0x785   :  { %v8166_v46 = vsel %vm24737_vm13, %v8164_v48, %v8165_v55  ;;  %v8184_v5 = vsel %vm24737_vm13, %v16225_v4, %v8183_v44  ;;  %v8192_v20 = vrot.slane %v8190_v49, 4  ;;  %v20307_v48 = vld [vmem:[#allocation2 + $0xac] sm:$0xf]  ;;  %v8025_v55 = vld [vmem:[#allocation2 + $0x9c] sm:$0xe] }
 0x786   :  { %18452 = vmatmul.mubr.bf16.gmra.mrb[4].mxu1 %v16266_v41  ;;  %v16270_v33 = vcombine.low %v8163_v6, %v8166_v46  ;;  %v20303_v41 = vld [vmem:[#allocation2 + $0x74] sm:$0x1]  ;;  %v8211_v10 = vrot.slane %v20307_v48, 5  ;;  %v8191_v13 = vsel %vm24737_vm13, %v16226_v11, %v8190_v49  ;;  %v20308_v46 = vld [vmem:[#allocation2 + $0xa4] sm:$0x1] }
 0x787   :  { %18455 = vmatprep.mubr.bf16.mxu1 %v16267_v25  ;;  %18516 = vmatpush3.bf16.msra.mxu1 %v20149_v37  ;;  %v8170_v37 = vsel %vm24737_vm13, %v16223_v8, %v8169_v19  ;;  %v8179_v14 = vrot.slane %v20303_v41, 5  ;;  %v20305_v19 = vld [vmem:[#allocation2 + $0x8c] sm:$0x1]  ;;  %v8026_v8 = vld [vmem:[#allocation2 + $0xa8] sm:$0xe]  ;;  %v8207_v21 = vrot.slane %v20308_v46, 5 }
 0x788   :  { %18517 = vmatprep.subr.bf16.mxu1 %v20150_v45  ;;  %v16271_v26 = vcombine.low %v8170_v37, %v8173_v29  ;;  %v8193_v27 = vrot.slane %v20305_v19, 5  ;;  %v16229_v29 = vrot.slane %v8026_v8, 9  ;;  %v20309_v44 = vld [vmem:[#allocation2 + $0xb0] sm:$0x1]  ;;  %v20316_v48 = vld [vmem:[#allocation2 + $0xec] sm:$0x1] }
 0x789   :  { %v8180_v22 = vsel %vm24737_vm13, %v8178_v12, %v8179_v14  ;;  %v8214_v6 = vrot.slane %v20309_v44, 5  ;;  %v8028_v12 = vld [vmem:[#allocation2 + $0xd8] sm:$0xe]  ;;  %v8027_v14 = vld [vmem:[#allocation2 + $0xb4] sm:$0xe] }
 0x78a   :  { %v16272_v63 = vcombine.low %v8177_v36, %v8180_v22  ;;  %v8194_v42 = vsel %vm24737_vm13, %v8192_v20, %v8193_v27  ;;  %v8212_v35 = vsel %vm24737_vm13, %v16229_v29, %v8211_v10  ;;  %v16231_v4 = vrot.slane %v8028_v12, 9  ;;  %v20313_v36 = vld [vmem:[#allocation2 + $0xbc] sm:$0x1]  ;;  %v20314_v20 = vld [vmem:[#allocation2 + $0xe8] sm:$0xf] }
 0x78b   :  { %18518 = vmatpush3.bf16.msra.mxu1 %v20150_v45  ;;  %v20304_v45 = vld [vmem:[#allocation2 + $0x80] sm:$0x1]  ;;  %v16274_v50 = vcombine.low %v8191_v13, %v8194_v42  ;;  %v16230_v0 = vrot.slane %v8027_v14, 9  ;;  %v8232_v17 = vrot.slane %v20314_v20, 5  ;;  %v8030_v42 = vld [vmem:[#allocation2 + $0xf0] sm:$0xe] }
 0x78c   :  { %18519 = vmatprep.subr.bf16.mxu1 %v20151_v61  ;;  %v8186_v25 = vrot.slane %v20304_v45, 5  ;;  %v16233_v13 = vrot.slane %v8030_v42, 9  ;;  %v20318_v8 = vld [vmem:[#allocation2 + $0x100] sm:$0xf]  ;;  %v8031_v44 = vld [vmem:[#allocation2 + $0xfc] sm:$0xe] }
 0x78d   :  { %v20322_v14 = vld [vmem:[#allocation2 + $0x118] sm:$0xf] }
 0x78e   :  { %18456 = vmatmul.mubr.bf16.gmra.mrb[8].mxu1 %v16268_v16  ;;  %v8187_v34 = vsel %vm24737_vm13, %v8185_v15, %v8186_v25  ;;  %v20306_v16 = vld [vmem:[#allocation2 + $0x98] sm:$0x1]  ;;  %v20312_v25 = vld [vmem:[#allocation2 + $0xe0] sm:$0x1] }
 0x78f   :  { %18459 = vmatprep.mubr.bf16.mxu1 %v16269_v51  ;;  %18520 = vmatpush3.bf16.msra.mxu1 %v20151_v61  ;;  %v16273_v61 = vcombine.low %v8184_v5, %v8187_v34  ;;  %v8200_v31 = vrot.slane %v20306_v16, 5  ;;  %v8228_v22 = vrot.slane %v20312_v25, 5  ;;  %v8029_v16 = vld [vmem:[#allocation2 + $0xe4] sm:$0xe] }
 0x790   :  { %18521 = vmatprep.subr.bf16.mxu1 %v20152_v60  ;;  %v20323_v25 = vld [vmem:[#allocation2 + $0x124] sm:$0xf] }
 0x791   :  { %v8201_v51 = vsel %vm24737_vm13, %v8199_v24, %v8200_v31  ;;  %v20315_v24 = vld [vmem:[#allocation2 + $0xf4] sm:$0xf]  ;;  %v8234_v31 = vrot.slane %v8232_v17, 4 }
 0x792   :  { %v16275_v2 = vcombine.low %v8198_v32, %v8201_v51  ;;  %v8239_v11 = vrot.slane %v20315_v24, 5  ;;  %v16232_v51 = vrot.slane %v8029_v16, 9  ;;  %v20326_v16 = vld [vmem:[#allocation2 + $0x130] sm:$0xf] }
 0x793   :  { %18522 = vmatpush3.bf16.msra.mxu1 %v20152_v60  ;;  %v8204_v60 = vrot.slane %v24700_v18, 5  ;;  %v16228_v18 = vrot.slane %v8025_v55, 9 }
 0x794   :  { %18523 = vmatprep.subr.bf16.mxu1 %v20153_v53  ;;  %v8233_v46 = vsel %vm24737_vm13, %v16232_v51, %v8232_v17  ;;  %v8240_v29 = vsel %vm24737_vm13, %v16233_v13, %v8239_v11  ;;  %v20324_v17 = vld [vmem:[#allocation2 + $0x11c] sm:$0x1] }
 0x795   :  { %v8206_v52 = vrot.slane %v8204_v60, 4  ;;  %v8205_v15 = vsel %vm24737_vm13, %v16228_v18, %v8204_v60  ;;  %v8241_v60 = vrot.slane %v8239_v11, 4  ;;  %v8263_v24 = vrot.slane %v20324_v17, 5 }
 0x796   :  { %18460 = vmatmul.mubr.bf16.gmra.mrb[12].mxu1 %v16270_v33  ;;  %v20310_v33 = vld [vmem:[#allocation2 + $0xdc] sm:$0xf] }
 0x797   :  { %18463 = vmatprep.mubr.bf16.mxu1 %v16271_v26  ;;  %18524 = vmatpush3.bf16.msra.mxu1 %v20153_v53  ;;  %v8213_v53 = vrot.slane %v8211_v10, 4  ;;  %v8225_v37 = vrot.slane %v20310_v33, 5  ;;  %v8208_v39 = vsel %vm24737_vm13, %v8206_v52, %v8207_v21  ;;  %v8235_v10 = vrot.slane %v20316_v48, 5 }
 0x798   :  { %18525 = vmatprep.subr.bf16.mxu1 %v20154_v43  ;;  %v16276_v41 = vcombine.low %v8205_v15, %v8208_v39  ;;  %v20321_v15 = vld [vmem:[#allocation2 + $0x110] sm:$0x1] }
 0x799   :  { %v8215_v1 = vsel %vm24737_vm13, %v8213_v53, %v8214_v6  ;;  %v8227_v45 = vrot.slane %v8225_v37, 4  ;;  %v8226_v5 = vsel %vm24737_vm13, %v16231_v4, %v8225_v37  ;;  %v8236_v55 = vsel %vm24737_vm13, %v8234_v31, %v8235_v10  ;;  %v20319_v53 = vld [vmem:[#allocation2 + $0x10c] sm:$0xf]  ;;  %v8032_v37 = vld [vmem:[#allocation2 + $0x108] sm:$0xe] }
 0x79a   :  { %v16277_v49 = vcombine.low %v8212_v35, %v8215_v1  ;;  %v8253_v18 = vrot.slane %v20319_v53, 5  ;;  %v16280_v21 = vcombine.low %v8233_v46, %v8236_v55  ;;  %v16235_v1 = vrot.slane %v8032_v37, 9  ;;  %v20328_v53 = vld [vmem:[#allocation2 + $0x134] sm:$0x1] }
 0x79b   :  { %18526 = vmatpush3.bf16.msra.mxu1 %v20154_v43  ;;  %v20311_v43 = vld [vmem:[#allocation2 + $0xb8] sm:$0xf]  ;;  %v8229_v58 = vsel %vm24737_vm13, %v8227_v45, %v8228_v22  ;;  %v8256_v35 = vrot.slane %v20321_v15, 5  ;;  %v8260_v4 = vrot.slane %v20322_v14, 5  ;;  %v8267_v22 = vrot.slane %v20323_v25, 5 }
 0x79c   :  { %18591 = vmatprep.subr.bf16.mxu1 %v24814_v38  ;;  %v8218_v26 = vrot.slane %v20311_v43, 5  ;;  %v16279_v27 = vcombine.low %v8226_v5, %v8229_v58  ;;  %v8255_v39 = vrot.slane %v8253_v18, 4  ;;  %v16234_v43 = vrot.slane %v8031_v44, 9  ;;  %v8034_v58 = vld [vmem:[#allocation2 + $0x120] sm:$0xe] }
 0x79d   :  { %v8262_v5 = vrot.slane %v8260_v4, 4  ;;  %v16237_v11 = vrot.slane %v8034_v58, 9  ;;  %v8274_v31 = vrot.slane %v20326_v16, 5 }
 0x79e   :  { %18464 = vmatmul.mubr.bf16.gmra.mrb[16].mxu1 %v16272_v63  ;;  %v8220_v34 = vrot.slane %v8218_v26, 4  ;;  %v8221_v63 = vrot.slane %v20313_v36, 5  ;;  %v8219_v19 = vsel %vm24737_vm13, %v16230_v0, %v8218_v26  ;;  %v20320_v26 = vld [vmem:[#allocation2 + $0x104] sm:$0x1]  ;;  %v8257_v45 = vsel %vm24737_vm13, %v8255_v39, %v8256_v35  ;;  %v8033_v36 = vld [vmem:[#allocation2 + $0x114] sm:$0xe] }
 0x79f   :  { %18467 = vmatprep.mubr.bf16.mxu1 %v16273_v61  ;;  %v8249_v12 = vrot.slane %v20320_v26, 5  ;;  %v8254_v0 = vsel %vm24737_vm13, %v16235_v1, %v8253_v18  ;;  %v16236_v20 = vrot.slane %v8033_v36, 9  ;;  %v8268_v13 = vsel %vm24737_vm13, %v16237_v11, %v8267_v22  ;;  %v8037_v1 = vld [vmem:[#allocation2 + $0x144] sm:$0xe]  ;;  %v8040_v11 = vld [vmem:[#allocation2 + $0x168] sm:$0xe] }
 0x7a0   :  { %v8222_v61 = vsel %vm24737_vm13, %v8220_v34, %v8221_v63  ;;  %v16283_v63 = vcombine.low %v8254_v0, %v8257_v45  ;;  %v8276_v55 = vrot.slane %v8274_v31, 4  ;;  %v8277_v18 = vrot.slane %v20328_v53, 5  ;;  %v20331_v45 = vld [vmem:[#allocation2 + $0x14c] sm:$0x1] }
 0x7a1   :  { %v16278_v56 = vcombine.low %v8219_v19, %v8222_v61  ;;  %v8269_v61 = vrot.slane %v8267_v22, 4  ;;  %v20325_v19 = vld [vmem:[#allocation2 + $0x128] sm:$0x1]  ;;  %v8261_v48 = vsel %vm24737_vm13, %v16236_v20, %v8260_v4  ;;  %v8295_v39 = vrot.slane %v24541_v40, 5  ;;  %v8039_v20 = vld [vmem:[#allocation2 + $0x15c] sm:$0xe] }
 0x7a2   :  { %v8278_v44 = vsel %vm24737_vm13, %v8276_v55, %v8277_v18  ;;  %v16240_v4 = vrot.slane %v8037_v1, 9  ;;  %v8291_v25 = vrot.slane %v20331_v45, 5  ;;  %v8302_v0 = vrot.slane %v24552_v7, 5  ;;  %v8043_v45 = vld [vmem:[#allocation2 + $0x18c] sm:$0xe] }
 0x7a3   :  { %v8297_v14 = vrot.slane %v8295_v39, 4  ;;  %v16242_v7 = vrot.slane %v8039_v20, 9  ;;  %v16243_v16 = vrot.slane %v8040_v11, 9  ;;  %v8333_v20 = vrot.slane %v24619_v59, 5 }
 0x7a6   :  { %18468 = vmatmul.mubr.bf16.gmra.mrb[20].mxu1 %v16274_v50  ;;  %v20317_v50 = vld [vmem:[#allocation2 + $0xf8] sm:$0x1] }
 0x7a7   :  { %18471 = vmatprep.mubr.bf16.mxu1 %v16275_v2  ;;  %v8242_v32 = vrot.slane %v20317_v50, 5  ;;  %v8246_v2 = vrot.slane %v20318_v8, 5  ;;  %v8035_v50 = vld [vmem:[#allocation2 + $0x12c] sm:$0xe]  ;;  %v8036_v8 = vld [vmem:[#allocation2 + $0x138] sm:$0xe] }
 0x7a8   :  { %v16239_v46 = vrot.slane %v8036_v8, 9  ;;  %v9643_v8 = vld [vmem:[#allocation2 + $0x184] sm:$0xf] }
 0x7a9   :  { %v8243_v52 = vsel %vm24737_vm13, %v8241_v60, %v8242_v32  ;;  %v8248_v33 = vrot.slane %v8246_v2, 4  ;;  %v20327_v60 = vld [vmem:[#allocation2 + $0x13c] sm:$0xf] }
 0x7aa   :  { %v16281_v6 = vcombine.low %v8240_v29, %v8243_v52  ;;  %v8281_v51 = vrot.slane %v20327_v60, 5  ;;  %v16238_v52 = vrot.slane %v8035_v50, 9 }
 0x7ae   :  { %18472 = vmatmul.mubr.bf16.gmra.mrb[24].mxu1 %v16276_v41  ;;  %v8250_v41 = vsel %vm24737_vm13, %v8248_v33, %v8249_v12  ;;  %v8282_v12 = vsel %vm24737_vm13, %v16239_v46, %v8281_v51  ;;  %v8330_v46 = vrot.slane %v24609_v30, 5  ;;  %v9647_v30 = vld [vmem:[#allocation2 + $0x194] sm:$0x1] }
 0x7af   :  { %18475 = vmatprep.mubr.bf16.mxu1 %v16277_v49  ;;  %v8247_v49 = vsel %vm24737_vm13, %v16234_v43, %v8246_v2  ;;  %v8283_v2 = vrot.slane %v8281_v51, 4  ;;  %v8275_v43 = vsel %vm24737_vm13, %v16238_v52, %v8274_v31  ;;  %v8316_v31 = vrot.slane %v24579_v54, 5  ;;  %v8041_v51 = vld [vmem:[#allocation2 + $0x174] sm:$0xe] }
 0x7b0   :  { %v16282_v34 = vcombine.low %v8247_v49, %v8250_v41  ;;  %v16286_v26 = vcombine.low %v8275_v43, %v8278_v44  ;;  %v8038_v41 = vld [vmem:[#allocation2 + $0x150] sm:$0xe]  ;;  %v20332_v49 = vld [vmem:[#allocation2 + $0x158] sm:$0x1]  ;;  %v16244_v54 = vrot.slane %v8041_v51, 9  ;;  %v8319_v52 = vrot.slane %v24584_v3, 5 }
 0x7b1   :  { %v16241_v22 = vrot.slane %v8038_v41, 9  ;;  %v8298_v40 = vrot.slane %v20332_v49, 5  ;;  %v9646_v44 = vld [vmem:[#allocation2 + $0x190] sm:$0xf]  ;;  %v9649_v43 = vld [vmem:[#allocation2 + $0x19c] sm:$0xf] }
 0x7b2   :  { %v10996_v3 = vld [vmem:[#allocation2 + $0x198] sm:$0xe]  ;;  %v9650_v41 = vld [vmem:[#allocation2 + $0x1a0] sm:$0x1]  ;;  %v20167_v51 = vld [vmem:[%s27576_s4 + $0x110] sm:$0xff]  }
 0x7b3   :  { %v8299_v36 = vsel %vm24737_vm13, %v8297_v14, %v8298_v40  ;;  %v16446_v49 = vrot.slane %v10996_v3, 9  ;;  %v11312_v40 = vrot.slane %v9649_v43, 5  ;;  %v20180_v43 = vld [vmem:[#allocation2 + $0x114] sm:$0xff]   ;;  %v20181_v3 = vld [vmem:[#allocation2 + $0x120] sm:$0xff]  }
 0x7b6   :  { %18476 = vmatmul.mubr.bf16.gmra.mrb[28].mxu1 %v16278_v56  ;;  %v8264_v56 = vsel %vm24737_vm13, %v8262_v5, %v8263_v24  ;;  %v8304_v24 = vrot.slane %v8302_v0, 4 }
 0x7b7   :  { %18479 = vmatprep.mubr.bf16.mxu1 %v16279_v27  ;;  %v8270_v27 = vrot.slane %v20325_v19, 5  ;;  %v16284_v10 = vcombine.low %v8261_v48, %v8264_v56  ;;  %v8323_v48 = vrot.slane %v24594_v62, 5  ;;  %v8326_v62 = vrot.slane %v24601_v57, 5 }
 0x7b9   :  { %v8271_v42 = vsel %vm24737_vm13, %v8269_v61, %v8270_v27  ;;  %v8296_v61 = vsel %vm24737_vm13, %v16241_v22, %v8295_v39  ;;  %v20333_v27 = vld [vmem:[#allocation2 + $0x164] sm:$0x1]  ;;  %v8325_v18 = vrot.slane %v8323_v48, 4  ;;  %v8317_v39 = vsel %vm24737_vm13, %v16244_v54, %v8316_v31 }
 0x7ba   :  { %v16285_v32 = vcombine.low %v8268_v13, %v8271_v42  ;;  %v16289_v17 = vcombine.low %v8296_v61, %v8299_v36  ;;  %v8305_v56 = vrot.slane %v20333_v27, 5  ;;  %v8042_v13 = vld [vmem:[#allocation2 + $0x180] sm:$0xe]  ;;  %v16246_v61 = vrot.slane %v8043_v45, 9 }
 0x7bb   :  { %v16245_v53 = vrot.slane %v8042_v13, 9  ;;  %v8327_v57 = vsel %vm24737_vm13, %v8325_v18, %v8326_v62  ;;  %v20160_v13 = vld [vmem:[#allocation2 + $0x3c] sm:$0xff]   ;;  %v20168_v18 = vld [vmem:[#allocation2 + $0x84] sm:$0xff]   ;;  %v20169_v62 = vld [vmem:[#allocation2 + $0x90] sm:$0xff]  }
 0x7bc   :  { %v8306_v42 = vsel %vm24737_vm13, %v8304_v24, %v8305_v56  ;;  %v8331_v56 = vsel %vm24737_vm13, %v16246_v61, %v8330_v46  ;;  %v20164_v54 = vld [vmem:[#allocation2 + $0x60] sm:$0xff]   ;;  %v9564_v61 = vld [vmem:[#allocation2 + $0x30] sm:$0xf] }
 0x7be   :  { %18480 = vmatmul.mubr.bf16.gmra.mrb[32].mxu1 %v16280_v21  ;;  %v20329_v21 = vld [vmem:[#allocation2 + $0x140] sm:$0x1] }
 0x7bf   :  { %18483 = vmatprep.mubr.bf16.mxu1 %v16281_v6  ;;  %v8284_v29 = vrot.slane %v20329_v21, 5  ;;  %v20330_v6 = vld [vmem:[#allocation2 + $0x148] sm:$0xf] }
 0x7c0   :  { %v8288_v33 = vrot.slane %v20330_v6, 5  ;;  %v9644_v21 = vld [vmem:[#allocation2 + $0x188] sm:$0x1] }
 0x7c1   :  { %v8285_v37 = vsel %vm24737_vm13, %v8283_v2, %v8284_v29  ;;  %v10994_v2 = vld [vmem:[#allocation2 + $0x180] sm:$0xe]  ;;  %v11301_v1 = vrot.slane %v9644_v21, 5  ;;  %v20171_v21 = vld [vmem:[#allocation2 + $0xa8] sm:$0xff]  }
 0x7c2   :  { %v16287_v15 = vcombine.low %v8282_v12, %v8285_v37  ;;  %v8290_v35 = vrot.slane %v8288_v33, 4  ;;  %v8289_v5 = vsel %vm24737_vm13, %v16240_v4, %v8288_v33  ;;  %v16444_v6 = vrot.slane %v10994_v2, 9  ;;  %v10995_v37 = vld [vmem:[#allocation2 + $0x18c] sm:$0xe] }
 0x7c3   :  { %v11298_v33 = vrot.slane %v9643_v8, 5  ;;  %v16445_v14 = vrot.slane %v10995_v37, 9  ;;  %v11305_v4 = vrot.slane %v9646_v44, 5  ;;  %v20192_v8 = vld [vmem:[%s27576_s4 + $0x138] sm:$0xff]   ;;  %v20165_v2 = vld [vmem:[#allocation2 + $0x6c] sm:$0xff]   ;;  %v20174_v44 = vld [vmem:[#allocation2 + $0xc0] sm:$0xff]  }
 0x7c4   :  { %v20178_v37 = vld [vmem:[#allocation2 + $0xfc] sm:$0xff]  }
 0x7c5   :  { %v11300_v12 = vrot.slane %v11298_v33, 4  ;;  %v11307_v36 = vrot.slane %v11305_v4, 4 }
 0x7c6   :  { %18484 = vmatmul.mubr.bf16.gmra.mrb[36].mxu1 %v16282_v34  ;;  %v8292_v34 = vsel %vm24737_vm13, %v8290_v35, %v8291_v25  ;;  %v8332_v35 = vrot.slane %v8330_v46, 4  ;;  %v24919_v25 = vsel %vm24737_vm13, %v16444_v6, %v11298_v33  ;;  %v20170_v46 = vld [vmem:[#allocation2 + $0x9c] sm:$0xff]   ;;  %v20175_v6 = vld [vmem:[#allocation2 + $0xe4] sm:$0xff]   ;;  %v20176_v33 = vld [vmem:[#allocation2 + $0xf0] sm:$0xff]  }
 0x7c7   :  { %18487 = vmatprep.mubr.bf16.mxu1 %v16283_v63  ;;  %v8309_v63 = vrot.slane %v24565_v47, 5  ;;  %v16288_v58 = vcombine.low %v8289_v5, %v8292_v34  ;;  %v8312_v47 = vrot.slane %v24567_v28, 5  ;;  %v8318_v28 = vrot.slane %v8316_v31, 4  ;;  %v20156_v31 = vld [vmem:[#allocation2 + $0x18] sm:$0xff]  }
 0x7c8   :  { %v24923_v22 = vsel %vm24737_vm13, %v11300_v12, %v11301_v1  ;;  %v11314_v5 = vrot.slane %v11312_v40, 4  ;;  %v8334_v59 = vsel %vm24737_vm13, %v8332_v35, %v8333_v20  ;;  %v9558_v12 = vld [vmem:[#allocation2 + $0x18] sm:$0xf]  ;;  %v20185_v35 = vld [vmem:[#allocation2 + $0x144] sm:$0xff]  }
 0x7c9   :  { %v8311_v19 = vrot.slane %v8309_v63, 4  ;;  %v8320_v29 = vsel %vm24737_vm13, %v8318_v28, %v8319_v52  ;;  %28013 = vst [vmem:[#allocation27_spill] sm:$0xff] %v24923_v22  ;;  %v20163_v28 = vld [vmem:[#allocation2 + $0x54] sm:$0xff]   ;;  %v24977_v52 = vld [vmem:[%s27576_s4 + $0x140] sm:$0xff]  }
 0x7ca   :  { %v20184_v1 = vld [vmem:[#allocation2 + $0x138] sm:$0xff]  }
 0x7cb   :  { %v8313_v60 = vsel %vm24737_vm13, %v8311_v19, %v8312_v47  ;;  %v24940_v19 = vsel %vm24737_vm13, %v16446_v49, %v11312_v40  ;;  %v20155_v47 = vld [vmem:[#allocation2 + $0xc] sm:$0xff]   ;;  %v9676_v49 = vshrl.u32 %v9558_v12, 16  ;;  %v9679_v40 = vshll.u32 %v9558_v12, 16 }
 0x7cc   :  { %28016 = vst [vmem:[#allocation13_spill] sm:$0xff] %v24940_v19 }
 0x7ce   :  { %18488 = vmatmul.mubr.bf16.gmra.mrb[40].mxu1 %v16284_v10  ;;  %v8303_v10 = vsel %vm24737_vm13, %v16242_v7, %v8302_v0 }
 0x7cf   :  { %18491 = vmatprep.mubr.bf16.mxu1 %v16285_v32  ;;  %v16290_v50 = vcombine.low %v8303_v10, %v8306_v42  ;;  %v8310_v32 = vsel %vm24737_vm13, %v16243_v16, %v8309_v63  ;;  %v11308_v63 = vrot.slane %v9647_v30, 5  ;;  %v16294_v16 = vcombine.low %v8331_v56, %v8334_v59  ;;  %v20162_v42 = vld [vmem:[%s27576_s4 + $0x108] sm:$0xff]   ;;  %v20172_v10 = vld [vmem:[%s27576_s4 + $0x118] sm:$0xff]   ;;  %v9556_v30 = vld [vmem:[#allocation2 + $0x10] sm:$0xf] }
 0x7d0   :  { %v16291_v55 = vcombine.low %v8310_v32, %v8313_v60  ;;  %v20158_v60 = vld [vmem:[#allocation2 + $0x24] sm:$0xff]   ;;  %v9665_v45 = vshrl.u32 %v9556_v30, 16 }
 0x7d1   :  { %v24934_v24 = vsel %vm24737_vm13, %v11307_v36, %v11308_v63  ;;  %v20182_v32 = vld [vmem:[%s27576_s4 + $0x128] sm:$0xff]   ;;  %v9561_v63 = vld [vmem:[#allocation2 + $0x24] sm:$0xf] }
 0x7d2   :  { %28015 = vst [vmem:[#allocation34_spill] sm:$0xff] %v24934_v24  ;;  %v25470_v24 = vld [vmem:[#allocation2 + $0x170] sm:$0x1] }
 0x7d6   :  { %18492 = vmatmul.mubr.bf16.gmra.mrb[44].mxu1 %v16286_v26  ;;  %v8324_v26 = vsel %vm24737_vm13, %v16245_v53, %v8323_v48  ;;  %v20159_v48 = vld [vmem:[#allocation2 + $0x30] sm:$0xff]   ;;  %v20166_v53 = vld [vmem:[#allocation2 + $0x78] sm:$0xff]  }
 0x7d7   :  { %18495 = vmatprep.mubr.bf16.mxu1 %v16287_v15  ;;  %v16292_v15 = vcombine.low %v8317_v39, %v8320_v29  ;;  %v16293_v34 = vcombine.low %v8324_v26, %v8327_v57  ;;  %v20173_v29 = vld [vmem:[#allocation2 + $0xb4] sm:$0xff]   ;;  %v20179_v39 = vld [vmem:[#allocation2 + $0x108] sm:$0xff]  }
 0x7d8   :  { %v20183_v26 = vld [vmem:[#allocation2 + $0x12c] sm:$0xff]  }
 0x7d9   :  { %v9555_v57 = vld [vmem:[#allocation2 + $0xc] sm:$0xf] }
 0x7de   :  { %18496 = vmatmul.mubr.bf16.gmra.mrb[48].mxu1 %v16288_v58  ;;  %v11315_v58 = vrot.slane %v9650_v41, 5  ;;  %v9652_v41 = vshrl.u32 %v9555_v57, 16 }
 0x7df   :  { %18499 = vmatprep.mubr.bf16.mxu1 %v16289_v17  ;;  %v24930_v17 = vsel %vm24737_vm13, %v16445_v14, %v11305_v4  ;;  %v9655_v14 = vshll.u32 %v9555_v57, 16  ;;  %v9661_v4 = vshll.u32 %v9556_v30, 16 }
 0x7e0   :  { %28014 = vst [vmem:[#allocation14_spill] sm:$0xff] %v24930_v17  ;;  %v24944_v7 = vsel %vm24737_vm13, %v11314_v5, %v11315_v58  ;;  %v9557_v5 = vld [vmem:[#allocation2 + $0x14] sm:$0x1]  ;;  %v9562_v58 = vld [vmem:[#allocation2 + $0x28] sm:$0xf]  ;;  %v9654_v20 = vrot.slane %v9652_v41, 4 }
 0x7e1   :  { %28017 = vst [vmem:[#allocation16_spill] sm:$0xff] %v24944_v7  ;;  %v9657_v59 = vrot.slane %v9655_v14, 5  ;;  %v24980_v56 = vrot.slane %v9661_v4, 5 }
 0x7e6   :  { %18500 = vmatmul.mubr.bf16.gmra.mrb[52].mxu1 %v16290_v50  ;;  %v20161_v50 = vld [vmem:[#allocation2 + $0x48] sm:$0xff]  }
 0x7e7   :  { %18503 = vmatprep.mubr.bf16.mxu1 %v16291_v55  ;;  %v20187_v55 = vld [vmem:[%s27576_s4 + $0x130] sm:$0xff]  }
 0x7ee   :  { %18504 = vmatmul.mubr.bf16.gmra.mrb[56].mxu1 %v16292_v15  ;;  %v9559_v15 = vld [vmem:[#allocation2 + $0x1c] sm:$0xf] }
 0x7ef   :  { %18507 = vmatprep.mubr.bf16.mxu1 %v16293_v34  ;;  %v9685_v34 = vshll.u32 %v9559_v15, 16  ;;  %v9689_v36 = vshrl.u32 %v9559_v15, 16 }
 0x7f6   :  { %18508 = vmatmul.mubr.bf16.gmra.mrb[60].mxu1 %v16294_v16  ;;  %v9667_v16 = vrot.slane %v9665_v45, 4 }
 0x7f7   :  { %18527 = vmatprep.mubr.bf16.mxu1 %v20155_v47  ;;  %v9565_v47 = vld [vmem:[#allocation2 + $0x34] sm:$0xf] }
 0x7fe   :  { %18528 = vmatmul.mubr.bf16.vlgmr.msra.gmra.mrb[0].mxu1 %v20156_v31  ;;  %v9678_v31 = vrot.slane %v9676_v49, 4  ;;  %v9563_v49 = vld [vmem:[#allocation2 + $0x2c] sm:$0x1] }
 0x7ff   :  { %18531 = vmatprep.mubr.bf16.mxu1 %v20158_v60  ;;  %18592 = vmatpush3.bf16.msra.mxu1 %v24814_v38  ;;  %v20177_v38 = vld [vmem:[%s27576_s4 + $0x120] sm:$0xff]   ;;  %v9700_v60 = vshrl.u32 %v9561_v63, 16 }
 0x800   :  { %18593 = vmatprep.subr.bf16.mxu1 %v20162_v42 }
 0x803   :  { %18594 = vmatpush3.bf16.msra.mxu1 %v20162_v42  ;;  %v9681_v42 = vrot.slane %v9679_v40, 5 }
 0x804   :  { %18595 = vmatprep.subr.bf16.mxu1 %v20167_v51 }
 0x806   :  { %18532 = vmatmul.mubr.bf16.gmra.mrb[4].mxu1 %v20159_v48  ;;  %v9567_v48 = vld [vmem:[#allocation2 + $0x3c] sm:$0xf] }
 0x807   :  { %18535 = vmatprep.mubr.bf16.mxu1 %v20160_v13  ;;  %18596 = vmatpush3.bf16.msra.mxu1 %v20167_v51  ;;  %v9703_v51 = vshll.u32 %v9561_v63, 16  ;;  %v24982_v13 = vrot.slane %v9685_v34, 5 }
 0x808   :  { %18597 = vmatprep.subr.bf16.mxu1 %v20172_v10 }
 0x80b   :  { %18598 = vmatpush3.bf16.msra.mxu1 %v20172_v10  ;;  %v9560_v10 = vld [vmem:[#allocation2 + $0x20] sm:$0x1] }
 0x80c   :  { %18599 = vmatprep.subr.bf16.mxu1 %v20177_v38 }
 0x80e   :  { %18536 = vmatmul.mubr.bf16.gmra.mrb[8].mxu1 %v20161_v50  ;;  %v9709_v50 = vshll.u32 %v9562_v58, 16 }
 0x80f   :  { %18539 = vmatprep.mubr.bf16.mxu1 %v20163_v28  ;;  %18600 = vmatpush3.bf16.msra.mxu1 %v20177_v38  ;;  %v9691_v38 = vrot.slane %v9689_v36, 4  ;;  %v20186_v28 = vld [vmem:[#allocation2 + $0x150] sm:$0xff]  }
 0x810   :  { %18601 = vmatprep.subr.bf16.mxu1 %v20182_v32 }
 0x813   :  { %18602 = vmatpush3.bf16.msra.mxu1 %v20182_v32  ;;  %v9713_v32 = vshrl.u32 %v9562_v58, 16  ;;  %v20189_v58 = vld [vmem:[#allocation2 + $0x168] sm:$0xff]  }
 0x814   :  { %18603 = vmatprep.subr.bf16.mxu1 %v20187_v55 }
 0x816   :  { %18540 = vmatmul.mubr.bf16.gmra.mrb[12].mxu1 %v20164_v54  ;;  %v9727_v54 = vshll.u32 %v9564_v61, 16 }
 0x817   :  { %18543 = vmatprep.mubr.bf16.mxu1 %v20165_v2  ;;  %18604 = vmatpush3.bf16.msra.mxu1 %v20187_v55  ;;  %v9724_v55 = vshrl.u32 %v9564_v61, 16  ;;  %v9737_v2 = vshrl.u32 %v9565_v47, 16 }
 0x818   :  { %18605 = vmatprep.subr.bf16.mxu1 %v20192_v8  ;;  %v9729_v30 = vrot.slane %v9727_v54, 5 }
 0x819   :  { %v9726_v57 = vrot.slane %v9724_v55, 4 }
 0x81b   :  { %18606 = vmatpush3.bf16.msra.mxu1 %v20192_v8  ;;  %v9733_v8 = vshll.u32 %v9565_v47, 16  ;;  %v9569_v47 = vld [vmem:[#allocation2 + $0x44] sm:$0x1] }
 0x81c   :  { %18671 = vmatprep.subr.bf16.mxu1 %v24977_v52 }
 0x81d   :  { %v24988_v12 = vrot.slane %v9733_v8, 5 }
 0x81e   :  { %18544 = vmatmul.mubr.bf16.gmra.mrb[16].mxu1 %v20166_v53  ;;  %v20188_v53 = vld [vmem:[#allocation2 + $0x15c] sm:$0xff]  }
 0x81f   :  { %18547 = vmatprep.mubr.bf16.mxu1 %v20168_v18  ;;  %v9658_v18 = vor.u32 %v9657_v59, %v9654_v20  ;;  %v9730_v59 = vor.u32 %v9729_v30, %v9726_v57 }
 0x821   :  { %v9659_v4 = vrot.slane %v9658_v18, 4  ;;  %v9571_v18 = vld [vmem:[#allocation2 + $0x4c] sm:$0xf] }
 0x826   :  { %18548 = vmatmul.mubr.bf16.gmra.mrb[20].mxu1 %v20169_v62  ;;  %v9671_v62 = vshll.u32 %v9557_v5, 16  ;;  %v9566_v5 = vld [vmem:[#allocation2 + $0x38] sm:$0x1] }
 0x827   :  { %18551 = vmatprep.mubr.bf16.mxu1 %v20170_v46  ;;  %v9748_v46 = vshrl.u32 %v9567_v48, 16 }
 0x828   :  { %v9673_v61 = vrot.slane %v9671_v62, 5 }
 0x829   :  { %v9750_v15 = vrot.slane %v9748_v46, 4 }
 0x82e   :  { %18552 = vmatmul.mubr.bf16.gmra.mrb[24].mxu1 %v20171_v21  ;;  %v9751_v21 = vshll.u32 %v9567_v48, 16 }
 0x82f   :  { %18555 = vmatprep.mubr.bf16.mxu1 %v20173_v29  ;;  %v9668_v29 = vor.u32 %v9667_v16, %v24980_v56 }
 0x831   :  { %v9669_v45 = vrot.slane %v9668_v29, 4 }
 0x836   :  { %18556 = vmatmul.mubr.bf16.gmra.mrb[28].mxu1 %v20174_v44  ;;  %v9695_v44 = vshll.u32 %v9560_v10, 16  ;;  %v9570_v10 = vld [vmem:[#allocation2 + $0x48] sm:$0xf] }
 0x837   :  { %18559 = vmatprep.mubr.bf16.mxu1 %v20175_v6  ;;  %v9702_v6 = vrot.slane %v9700_v60, 4  ;;  %v9772_v62 = vshrl.u32 %v9570_v10, 16  ;;  %v9775_v46 = vshll.u32 %v9570_v10, 16 }
 0x838   :  { %v9697_v20 = vrot.slane %v9695_v44, 5 }
 0x83e   :  { %18560 = vmatmul.mubr.bf16.gmra.mrb[32].mxu1 %v20176_v33  ;;  %v9705_v33 = vrot.slane %v9703_v51, 5 }
 0x83f   :  { %18563 = vmatprep.mubr.bf16.mxu1 %v20178_v37  ;;  %v9568_v37 = vld [vmem:[#allocation2 + $0x40] sm:$0xf] }
 0x840   :  { %v9757_v41 = vshll.u32 %v9568_v37, 16  ;;  %v9761_v14 = vshrl.u32 %v9568_v37, 16  ;;  %v9706_v40 = vor.u32 %v9705_v33, %v9702_v6 }
 0x842   :  { %v24992_v51 = vrot.slane %v9757_v41, 5  ;;  %v9763_v48 = vrot.slane %v9761_v14, 4  ;;  %v9572_v14 = vld [vmem:[#allocation2 + $0x50] sm:$0x1] }
 0x843   :  { %v9791_v10 = vshll.u32 %v9572_v14, 16 }
 0x844   :  { %v9764_v44 = vor.u32 %v9763_v48, %v24992_v51 }
 0x846   :  { %18564 = vmatmul.mubr.bf16.gmra.mrb[36].mxu1 %v20179_v39  ;;  %v9682_v39 = vor.u32 %v9681_v42, %v9678_v31  ;;  %v20190_v31 = vld [vmem:[#allocation2 + $0x174] sm:$0xff]   ;;  %v9719_v42 = vshll.u32 %v9563_v49, 16  ;;  %v9577_v49 = vld [vmem:[#allocation2 + $0x64] sm:$0xf] }
 0x847   :  { %18567 = vmatprep.mubr.bf16.mxu1 %v20180_v43  ;;  %v9692_v43 = vor.u32 %v9691_v38, %v24982_v13  ;;  %v9664_v38 = vsel %vm24320_vm10, %v9659_v4, %v24980_v56  ;;  %v9774_v4 = vrot.slane %v9772_v62, 4 }
 0x848   :  { %v9683_v34 = vrot.slane %v9682_v39, 4  ;;  %v9573_v39 = vld [vmem:[#allocation2 + $0x54] sm:$0xf] }
 0x849   :  { %v9693_v36 = vrot.slane %v9692_v43, 4  ;;  %v9574_v43 = vld [vmem:[#allocation2 + $0x58] sm:$0xf] }
 0x84a   :  { %v9688_v55 = vsel %vm24320_vm10, %v9683_v34, %v24982_v13 }
 0x84b   :  { %v9698_v54 = vsel %vm24320_vm10, %v9693_v36, %v9697_v20  ;;  %v9765_v36 = vrot.slane %v9764_v44, 4  ;;  %v9575_v44 = vld [vmem:[#allocation2 + $0x5c] sm:$0x1] }
 0x84c   :  { %v25017_v13 = vcombine.low %v9688_v55, %v9698_v54  ;;  %v9582_v54 = vld [vmem:[#allocation2 + $0x78] sm:$0xf] }
 0x84e   :  { %18568 = vmatmul.mubr.bf16.gmra.mrb[40].mxu1 %v20181_v3  ;;  %v24986_v3 = vrot.slane %v9709_v50, 5  ;;  %v9674_v50 = vsel %vm24320_vm10, %v9669_v45, %v9673_v61  ;;  %v9777_v45 = vrot.slane %v9775_v46, 5  ;;  %v9809_v61 = vshrl.u32 %v9574_v43, 16 }
 0x84f   :  { %18571 = vmatprep.mubr.bf16.mxu1 %v20183_v26  ;;  %v9715_v26 = vrot.slane %v9713_v32, 4  ;;  %v24999_v32 = vrot.slane %v9706_v40, 4  ;;  %v25015_v6 = vcombine.low %v9664_v38, %v9674_v50  ;;  %v20193_v40 = vld [vmem:[#allocation2 + $0x18c] sm:$0xff]  }
 0x850   :  { %v9778_v48 = vor.u32 %v9777_v45, %v9774_v4 }
 0x851   :  { %v9716_v63 = vor.u32 %v9715_v26, %v24986_v3  ;;  %v9712_v33 = vsel %vm24320_vm10, %v24999_v32, %v24986_v3  ;;  %v20191_v26 = vld [vmem:[#allocation2 + $0x180] sm:$0xff]  }
 0x852   :  { %v25053_v45 = vrot.slane %v9778_v48, 4 }
 0x853   :  { %v25006_v8 = vrot.slane %v9716_v63, 4  ;;  %v9796_v63 = vshrl.u32 %v9573_v39, 16 }
 0x855   :  { %v9798_v50 = vrot.slane %v9796_v63, 4 }
 0x856   :  { %18572 = vmatmul.mubr.bf16.gmra.mrb[44].mxu1 %v20184_v1  ;;  %v9739_v1 = vrot.slane %v9737_v2, 4  ;;  %v9767_v2 = vshll.u32 %v9569_v47, 16 }
 0x857   :  { %18575 = vmatprep.mubr.bf16.mxu1 %v20185_v35  ;;  %v9753_v35 = vrot.slane %v9751_v21, 5  ;;  %v9721_v21 = vrot.slane %v9719_v42, 5  ;;  %v9829_v42 = vshll.u32 %v9577_v49, 16 }
 0x858   :  { %v9740_v16 = vor.u32 %v9739_v1, %v24988_v12  ;;  %v25026_v30 = vrot.slane %v9767_v2, 5  ;;  %v9781_v1 = vshll.u32 %v9571_v18, 16  ;;  %v9811_v2 = vrot.slane %v9809_v61, 4 }
 0x859   :  { %v9754_v60 = vor.u32 %v9753_v35, %v9750_v15  ;;  %v9722_v57 = vsel %vm24320_vm10, %v25006_v8, %v9721_v21  ;;  %v9785_v15 = vshrl.u32 %v9571_v18, 16  ;;  %v9576_v35 = vld [vmem:[#allocation2 + $0x60] sm:$0xf]  ;;  %v20194_v18 = vld [vmem:[#allocation2 + $0x198] sm:$0xff]   ;;  %v25047_v21 = vrot.slane %v9829_v42, 5 }
 0x85a   :  { %v25010_v56 = vrot.slane %v9740_v16, 4  ;;  %v9820_v20 = vshrl.u32 %v9576_v35, 16  ;;  %v9580_v16 = vld [vmem:[#allocation2 + $0x70] sm:$0xf]  ;;  %v25039_v47 = vrot.slane %v9781_v1, 5  ;;  %v9770_v62 = vsel %vm24320_vm10, %v9765_v36, %v25026_v30 }
 0x85b   :  { %v25012_v29 = vrot.slane %v9754_v60, 4  ;;  %v9833_v60 = vshrl.u32 %v9577_v49, 16  ;;  %v9857_v55 = vshrl.u32 %v9580_v16, 16  ;;  %v16377_v1 = vcombine.low %v9712_v33, %v9722_v57  ;;  %v9578_v49 = vld [vmem:[#allocation2 + $0x68] sm:$0x1] }
 0x85c   :  { %v9583_v36 = vld [vmem:[#allocation2 + $0x7c] sm:$0xf]  ;;  %v9793_v33 = vrot.slane %v9791_v10, 5  ;;  %v9815_v57 = vshll.u32 %v9575_v44, 16  ;;  %v9784_v10 = vsel %vm24320_vm10, %v25053_v45, %v25039_v47 }
 0x85d   :  { %v9760_v34 = vsel %vm24320_vm10, %v25012_v29, %v24992_v51  ;;  %v9835_v29 = vrot.slane %v9833_v60, 4  ;;  %v9859_v14 = vrot.slane %v9857_v55, 4  ;;  %v9881_v42 = vshrl.u32 %v9583_v36, 16 }
 0x85e   :  { %18576 = vmatmul.mubr.bf16.gmra.mrb[48].mxu1 %v20186_v28  ;;  %v9743_v28 = vshll.u32 %v9566_v5, 16  ;;  %v9799_v5 = vshll.u32 %v9573_v39, 16  ;;  %v25057_v63 = vcombine.low %v9760_v34, %v9770_v62 }
 0x85f   :  { %18579 = vmatprep.mubr.bf16.mxu1 %v20188_v53  ;;  %v25008_v53 = vrot.slane %v9730_v59, 4  ;;  %v9823_v59 = vshll.u32 %v9576_v35, 16 }
 0x860   :  { %v9745_v37 = vrot.slane %v9743_v28, 5  ;;  %v9801_v32 = vrot.slane %v9799_v5, 5  ;;  %v9853_v28 = vshll.u32 %v9580_v16, 16 }
 0x861   :  { %v9736_v41 = vsel %vm24320_vm10, %v25008_v53, %v24988_v12  ;;  %v9805_v12 = vshll.u32 %v9574_v43, 16  ;;  %v9822_v53 = vrot.slane %v9820_v20, 4  ;;  %v9868_v43 = vshrl.u32 %v9582_v54, 16  ;;  %v9585_v20 = vld [vmem:[#allocation2 + $0x84] sm:$0xf] }
 0x862   :  { %v9746_v3 = vsel %vm24320_vm10, %v25010_v56, %v9745_v37  ;;  %v9825_v56 = vrot.slane %v9823_v59, 5  ;;  %v25049_v35 = vrot.slane %v9853_v28, 5  ;;  %v9817_v28 = vrot.slane %v9815_v57, 5 }
 0x863   :  { %v25041_v8 = vrot.slane %v9805_v12, 5  ;;  %v25051_v4 = vcombine.low %v9736_v41, %v9746_v3  ;;  %v9836_v12 = vor.u32 %v9835_v29, %v25047_v21  ;;  %v9870_v41 = vrot.slane %v9868_v43, 4  ;;  %v9587_v43 = vld [vmem:[#allocation2 + $0x8c] sm:$0x1] }
 0x864   :  { %v9860_v16 = vor.u32 %v9859_v14, %v25049_v35 }
 0x865   :  { %v9812_v30 = vor.u32 %v9811_v2, %v25041_v8  ;;  %v9837_v55 = vrot.slane %v9836_v12, 4 }
 0x866   :  { %18580 = vmatmul.mubr.bf16.gmra.mrb[52].mxu1 %v20189_v58  ;;  %v9579_v58 = vld [vmem:[#allocation2 + $0x6c] sm:$0xf] }
 0x867   :  { %18583 = vmatprep.mubr.bf16.mxu1 %v20190_v31  ;;  %v9787_v31 = vrot.slane %v9785_v15, 4  ;;  %v9844_v38 = vshrl.u32 %v9579_v58, 16  ;;  %v9847_v51 = vshll.u32 %v9579_v58, 16  ;;  %v9802_v15 = vor.u32 %v9801_v32, %v9798_v50  ;;  %v9581_v58 = vld [vmem:[#allocation2 + $0x74] sm:$0x1]  ;;  %v20196_v32 = vld [vmem:[%s27576_s4 + $0x148] sm:$0xff]  }
 0x868   :  { %v9813_v60 = vrot.slane %v9812_v30, 4  ;;  %v9863_v34 = vshll.u32 %v9581_v58, 16  ;;  %v9895_v50 = vshll.u32 %v9585_v20, 16  ;;  %v9589_v30 = vld [vmem:[#allocation2 + $0x94] sm:$0xf]  ;;  %v9911_v58 = vshll.u32 %v9587_v43, 16 }
 0x869   :  { %v9788_v46 = vor.u32 %v9787_v31, %v25039_v47  ;;  %v9846_v37 = vrot.slane %v9844_v38, 4  ;;  %v9849_v39 = vrot.slane %v9847_v51, 5  ;;  %v9803_v59 = vrot.slane %v9802_v15, 4  ;;  %v9584_v47 = vld [vmem:[#allocation2 + $0x80] sm:$0x1] }
 0x86a   :  { %v9877_v31 = vshll.u32 %v9583_v36, 16  ;;  %v9892_v51 = vshrl.u32 %v9585_v20, 16  ;;  %v9818_v29 = vsel %vm24320_vm10, %v9813_v60, %v9817_v28  ;;  %v9897_v15 = vrot.slane %v9895_v50, 5  ;;  %v9595_v28 = vld [vmem:[#allocation2 + $0xac] sm:$0xf] }
 0x86b   :  { %v9789_v5 = vrot.slane %v9788_v46, 4  ;;  %v9850_v61 = vor.u32 %v9849_v39, %v9846_v37  ;;  %v9883_v46 = vrot.slane %v9881_v42, 4  ;;  %v9865_v39 = vrot.slane %v9863_v34, 5  ;;  %v9594_v34 = vld [vmem:[#allocation2 + $0xa8] sm:$0xf] }
 0x86c   :  { %v25073_v62 = vrot.slane %v9877_v31, 5  ;;  %v9925_v12 = vshll.u32 %v9589_v30, 16  ;;  %v9977_v43 = vshrl.u32 %v9595_v28, 16 }
 0x86d   :  { %v9794_v38 = vsel %vm24320_vm10, %v9789_v5, %v9793_v33 }
 0x86e   :  { %18584 = vmatmul.mubr.bf16.gmra.mrb[56].mxu1 %v20191_v26  ;;  %v9871_v26 = vshll.u32 %v9582_v54, 16  ;;  %v9851_v54 = vrot.slane %v9850_v61, 4  ;;  %v9884_v36 = vor.u32 %v9883_v46, %v25073_v62  ;;  %v25095_v57 = vcombine.low %v9784_v10, %v9794_v38  ;;  %v20198_v10 = vld [vmem:[%s27576_s4 + $0x158] sm:$0xff]  }
 0x86f   :  { %18587 = vmatprep.mubr.bf16.mxu1 %v20193_v40  ;;  %v9826_v40 = vor.u32 %v9825_v56, %v9822_v53  ;;  %v9586_v53 = vld [vmem:[#allocation2 + $0x88] sm:$0xf]  ;;  %v9808_v56 = vsel %vm24320_vm10, %v9803_v59, %v25041_v8  ;;  %v9894_v8 = vrot.slane %v9892_v51, 4  ;;  %v9929_v61 = vshrl.u32 %v9589_v30, 16 }
 0x870   :  { %v9873_v3 = vrot.slane %v9871_v26, 5  ;;  %v9588_v26 = vld [vmem:[#allocation2 + $0x90] sm:$0xf]  ;;  %v9901_v14 = vshll.u32 %v9586_v53, 16  ;;  %v9905_v45 = vshrl.u32 %v9586_v53, 16  ;;  %v25114_v38 = vrot.slane %v9884_v36, 4 }
 0x871   :  { %v9827_v48 = vrot.slane %v9826_v40, 4  ;;  %v9887_v40 = vshll.u32 %v9584_v47, 16  ;;  %v9916_v5 = vshrl.u32 %v9588_v26, 16  ;;  %v9919_v33 = vshll.u32 %v9588_v26, 16  ;;  %v20199_v26 = vld [vmem:[%s27576_s4 + $0x160] sm:$0xff]  }
 0x872   :  { %v9874_v2 = vor.u32 %v9873_v3, %v9870_v41  ;;  %v25097_v41 = vcombine.low %v9808_v56, %v9818_v29  ;;  %v9898_v3 = vor.u32 %v9897_v15, %v9894_v8  ;;  %v25099_v20 = vrot.slane %v9901_v14, 5  ;;  %v9597_v56 = vld [vmem:[#allocation2 + $0xb4] sm:$0xf] }
 0x873   :  { %v9832_v44 = vsel %vm24320_vm10, %v9827_v48, %v25047_v21  ;;  %v9856_v21 = vsel %vm24320_vm10, %v9851_v54, %v25049_v35  ;;  %v9591_v35 = vld [vmem:[#allocation2 + $0x9c] sm:$0xf]  ;;  %v9907_v59 = vrot.slane %v9905_v45, 4  ;;  %v25109_v60 = vrot.slane %v9887_v40, 5  ;;  %v9590_v48 = vld [vmem:[#allocation2 + $0x98] sm:$0x1] }
 0x874   :  { %v9918_v51 = vrot.slane %v9916_v5, 4  ;;  %v9921_v50 = vrot.slane %v9919_v33, 5  ;;  %v25119_v54 = vrot.slane %v9925_v12, 5  ;;  %v9943_v53 = vshll.u32 %v9591_v35, 16  ;;  %v9600_v40 = vld [vmem:[#allocation2 + $0xc0] sm:$0xf] }
 0x875   :  { %v9908_v47 = vor.u32 %v9907_v59, %v25099_v20  ;;  %v9935_v15 = vshll.u32 %v9590_v48, 16 }
 0x876   :  { %18588 = vmatmul.mubr.bf16.gmra.mrb[60].mxu1 %v20194_v18  ;;  %v9861_v18 = vrot.slane %v9860_v16, 4  ;;  %v9922_v8 = vor.u32 %v9921_v50, %v9918_v51  ;;  %v9945_v30 = vrot.slane %v9943_v53, 5  ;;  %v9596_v50 = vld [vmem:[#allocation2 + $0xb0] sm:$0x1] }
 0x877   :  { %18607 = vmatprep.mubr.bf16.mxu1 %v25015_v6  ;;  %v9839_v6 = vshll.u32 %v9578_v49, 16  ;;  %v25087_v49 = vrot.slane %v9874_v2, 4  ;;  %v9931_v2 = vrot.slane %v9929_v61, 4  ;;  %v25140_v59 = vrot.slane %v9908_v47, 4 }
 0x878   :  { %v25142_v48 = vrot.slane %v9922_v8, 4 }
 0x879   :  { %v9841_v37 = vrot.slane %v9839_v6, 5  ;;  %v9880_v42 = vsel %vm24320_vm10, %v25087_v49, %v25073_v62  ;;  %v9592_v6 = vld [vmem:[#allocation2 + $0xa0] sm:$0xf]  ;;  %v9932_v45 = vor.u32 %v9931_v2, %v25119_v54  ;;  %v25150_v2 = vrot.slane %v9935_v15, 5 }
 0x87a   :  { %v9949_v46 = vshll.u32 %v9592_v6, 16  ;;  %v9953_v29 = vshrl.u32 %v9592_v6, 16  ;;  %v10012_v6 = vshrl.u32 %v9600_v40, 16 }
 0x87c   :  { %v9955_v36 = vrot.slane %v9953_v29, 4  ;;  %v10014_v8 = vrot.slane %v10012_v6, 4 }
 0x87e   :  { %18608 = vmatmul.mubr.bf16.vlgmr.msra.gmra.mrb[0].mxu1 %v25017_v13  ;;  %v9842_v13 = vsel %vm24320_vm10, %v9837_v55, %v9841_v37  ;;  %v25117_v55 = vrot.slane %v9911_v58, 5  ;;  %v9964_v37 = vshrl.u32 %v9594_v34, 16 }
 0x87f   :  { %18611 = vmatprep.mubr.bf16.mxu1 %v16377_v1  ;;  %18672 = vmatpush3.bf16.msra.mxu1 %v24977_v52  ;;  %v20197_v52 = vld [vmem:[%s27576_s4 + $0x150] sm:$0xff]   ;;  %v9866_v1 = vsel %vm24320_vm10, %v9861_v18, %v9865_v39  ;;  %v25101_v16 = vcombine.low %v9832_v44, %v9842_v13  ;;  %v25122_v18 = vrot.slane %v9898_v3, 4  ;;  %v9598_v44 = vld [vmem:[#allocation2 + $0xb8] sm:$0xf]  ;;  %v9967_v39 = vshll.u32 %v9594_v34, 16  ;;  %v20200_v3 = vld [vmem:[%s27576_s4 + $0x168] sm:$0xff]  }
 0x880   :  { %18673 = vmatprep.subr.bf16.mxu1 %v20196_v32  ;;  %v25103_v31 = vcombine.low %v9856_v21, %v9866_v1  ;;  %v9988_v13 = vshrl.u32 %v9597_v56, 16  ;;  %v9991_v21 = vshll.u32 %v9597_v56, 16  ;;  %v25133_v1 = vrot.slane %v9949_v46, 5  ;;  %v9599_v56 = vld [vmem:[#allocation2 + $0xbc] sm:$0x1] }
 0x881   :  { %v9997_v5 = vshll.u32 %v9598_v44, 16  ;;  %v10001_v33 = vshrl.u32 %v9598_v44, 16  ;;  %v9966_v58 = vrot.slane %v9964_v37, 4  ;;  %v9969_v12 = vrot.slane %v9967_v39, 5  ;;  %v9601_v39 = vld [vmem:[#allocation2 + $0xc4] sm:$0xf] }
 0x882   :  { %v10015_v34 = vshll.u32 %v9600_v40, 16  ;;  %v9956_v29 = vor.u32 %v9955_v36, %v25133_v1  ;;  %v10021_v36 = vshll.u32 %v9601_v39, 16 }
 0x883   :  { %18674 = vmatpush3.bf16.msra.mxu1 %v20196_v32  ;;  %v9940_v32 = vshrl.u32 %v9591_v35, 16  ;;  %v9979_v35 = vrot.slane %v9977_v43, 4  ;;  %v25152_v47 = vrot.slane %v9997_v5, 5  ;;  %v10003_v46 = vrot.slane %v10001_v33, 4 }
 0x884   :  { %18675 = vmatprep.subr.bf16.mxu1 %v20197_v52  ;;  %v9970_v44 = vor.u32 %v9969_v12, %v9966_v58  ;;  %v9928_v43 = vsel %vm24320_vm10, %v25142_v48, %v25119_v54  ;;  %v10017_v15 = vrot.slane %v10015_v34, 5  ;;  %v10025_v5 = vshrl.u32 %v9601_v39, 16  ;;  %v9604_v12 = vld [vmem:[#allocation2 + $0xe8] sm:$0xf] }
 0x885   :  { %v9942_v14 = vrot.slane %v9940_v32, 4  ;;  %v9990_v32 = vrot.slane %v9988_v13, 4  ;;  %v10007_v13 = vshll.u32 %v9599_v56, 16  ;;  %v9957_v33 = vrot.slane %v9956_v29, 4  ;;  %v12620_v29 = vld [vmem:[#allocation2 + $0x178] sm:$0xf] }
 0x886   :  { %18612 = vmatmul.mubr.bf16.gmra.mrb[4].mxu1 %v25051_v4  ;;  %v9973_v4 = vshll.u32 %v9595_v28, 16  ;;  %v9993_v28 = vrot.slane %v9991_v21, 5  ;;  %v9603_v21 = vld [vmem:[#allocation2 + $0xe4] sm:$0xf]  ;;  %v9971_v54 = vrot.slane %v9970_v44, 4  ;;  %v10045_v56 = vshll.u32 %v9604_v12, 16 }
 0x887   :  { %18615 = vmatprep.mubr.bf16.mxu1 %v25057_v63  ;;  %18676 = vmatpush3.bf16.msra.mxu1 %v20197_v52  ;;  %v9890_v63 = vsel %vm24320_vm10, %v25114_v38, %v25109_v60  ;;  %v9593_v52 = vld [vmem:[#allocation2 + $0xa4] sm:$0x1]  ;;  %v9946_v51 = vor.u32 %v9945_v30, %v9942_v14  ;;  %v10036_v6 = vshrl.u32 %v9603_v21, 16  ;;  %v10039_v34 = vshll.u32 %v9603_v21, 16  ;;  %v13975_v44 = vld [vmem:[#allocation2 + $0x174] sm:$0xe] }
 0x888   :  { %18677 = vmatprep.subr.bf16.mxu1 %v20198_v10  ;;  %v25135_v61 = vrot.slane %v9973_v4, 5  ;;  %v9959_v53 = vshll.u32 %v9593_v52, 16  ;;  %v9914_v4 = vsel %vm24320_vm10, %v25140_v59, %v25117_v55  ;;  %v9994_v30 = vor.u32 %v9993_v28, %v9990_v32  ;;  %v9607_v38 = vld [vmem:[#allocation2 + $0xf4] sm:$0xf] }
 0x889   :  { %v9947_v14 = vrot.slane %v9946_v51, 4  ;;  %v10004_v52 = vor.u32 %v10003_v46, %v25152_v47  ;;  %v10018_v59 = vor.u32 %v10017_v15, %v10014_v8  ;;  %v25180_v32 = vrot.slane %v10007_v13, 5  ;;  %v13976_v13 = vld [vmem:[#allocation2 + $0x180] sm:$0xe] }
 0x88a   :  { %v9980_v37 = vor.u32 %v9979_v35, %v25135_v61  ;;  %v9961_v40 = vrot.slane %v9959_v53, 5  ;;  %v20202_v35 = vld [vmem:[%s27576_s4 + $0x178] sm:$0xff]   ;;  %v25187_v53 = vrot.slane %v10025_v5, 4  ;;  %v16384_v8 = vcombine.low %v9880_v42, %v9890_v63  ;;  %v13977_v42 = vld [vmem:[#allocation2 + $0x18c] sm:$0xe] }
 0x88b   :  { %18678 = vmatpush3.bf16.msra.mxu1 %v20198_v10  ;;  %v9904_v10 = vsel %vm24320_vm10, %v25122_v18, %v25099_v20  ;;  %v25183_v28 = vrot.slane %v10004_v52, 4  ;;  %v16642_v62 = vrot.slane %v13975_v44, 9  ;;  %v14267_v49 = vrot.slane %v12620_v29, 5 }
 0x88c   :  { %18679 = vmatprep.subr.bf16.mxu1 %v20199_v26  ;;  %v9981_v58 = vrot.slane %v9980_v37, 4  ;;  %v25201_v37 = vrot.slane %v10018_v59, 4  ;;  %v16385_v15 = vcombine.low %v9904_v10, %v9914_v4  ;;  %v25232_v63 = vrot.slane %v10045_v56, 5  ;;  %v12624_v10 = vld [vmem:[#allocation2 + $0x188] sm:$0x1] }
 0x88d   :  { %v12627_v4 = vld [vmem:[#allocation2 + $0x194] sm:$0x1]  ;;  %v16643_v5 = vrot.slane %v13976_v13, 9  ;;  %v13978_v59 = vld [vmem:[#allocation2 + $0x198] sm:$0xe]  ;;  %v10073_v44 = vshrl.u32 %v9607_v38, 16 }
 0x88e   :  { %18616 = vmatmul.mubr.bf16.gmra.mrb[8].mxu1 %v25095_v57  ;;  %v9933_v57 = vrot.slane %v9932_v45, 4  ;;  %v9983_v45 = vshll.u32 %v9596_v50, 16  ;;  %v25178_v50 = vrot.slane %v9994_v30, 4  ;;  %v12623_v30 = vld [vmem:[#allocation2 + $0x184] sm:$0xf]  ;;  %v14284_v56 = vrot.slane %v12627_v4, 5 }
 0x88f   :  { %18619 = vmatprep.mubr.bf16.mxu1 %v25097_v41  ;;  %18680 = vmatpush3.bf16.msra.mxu1 %v20199_v26  ;;  %v20201_v41 = vld [vmem:[%s27576_s4 + $0x170] sm:$0xff]   ;;  %v9602_v26 = vld [vmem:[#allocation2 + $0xc8] sm:$0x1]  ;;  %v25286_v4 = vld [vmem:[#allocation2 + $0x100] sm:$0xf] }
 0x890   :  { %18681 = vmatprep.subr.bf16.mxu1 %v20200_v3  ;;  %v9938_v55 = vsel %vm24320_vm10, %v9933_v57, %v25150_v2  ;;  %v10031_v48 = vshll.u32 %v9602_v26, 16  ;;  %v9985_v51 = vrot.slane %v9983_v45, 5  ;;  %v25185_v2 = vrot.slane %v10021_v36, 5  ;;  %v12621_v45 = vld [vmem:[#allocation2 + $0x17c] sm:$0x1] }
 0x891   :  { %v10049_v57 = vshrl.u32 %v9604_v12, 16  ;;  %v25207_v26 = vrot.slane %v10039_v34, 5  ;;  %v14270_v36 = vrot.slane %v12621_v45, 5  ;;  %v16644_v12 = vrot.slane %v13977_v42, 9 }
 0x892   :  { %v9986_v46 = vsel %vm24320_vm10, %v9981_v58, %v9985_v51  ;;  %v25203_v39 = vrot.slane %v10031_v48, 5  ;;  %v12629_v58 = vld [vmem:[#allocation2 + $0x19c] sm:$0xf]  ;;  %v25247_v48 = vsel %vm24737_vm13, %v16642_v62, %v14267_v49  ;;  %v10069_v51 = vshll.u32 %v9607_v38, 16 }
 0x893   :  { %18682 = vmatpush3.bf16.msra.mxu1 %v20200_v3  ;;  %v9952_v3 = vsel %vm24320_vm10, %v9947_v14, %v25133_v1  ;;  %v9976_v1 = vsel %vm24320_vm10, %v9971_v54, %v25135_v61  ;;  %v25209_v61 = vld [vmem:[#allocation2 + $0xf0] sm:$0xf]  ;;  %v25226_v14 = vcombine.low %v9928_v43, %v9938_v55  ;;  %v25234_v52 = vrot.slane %v10049_v57, 4  ;;  %28018 = vst [vmem:[#allocation18_spill] sm:$0xff] %v25247_v48 }
 0x894   :  { %18683 = vmatprep.subr.bf16.mxu1 %v20201_v41  ;;  %v25230_v60 = vcombine.low %v9976_v1, %v9986_v46  ;;  %v10060_v20 = vshrl.u32 %v25209_v61, 16  ;;  %v10063_v18 = vshll.u32 %v25209_v61, 16  ;;  %v14269_v43 = vrot.slane %v14267_v49, 4 }
 0x895   :  { %v14274_v55 = vrot.slane %v12623_v30, 5  ;;  %v10028_v54 = vor.u32 %v25187_v53, %v25185_v2  ;;  %v16645_v57 = vrot.slane %v13978_v59, 9  ;;  %v14288_v29 = vrot.slane %v12629_v58, 5  ;;  %v9609_v30 = vld [vmem:[#allocation2 + $0xfc] sm:$0xf] }
 0x896   :  { %18620 = vmatmul.mubr.bf16.gmra.mrb[12].mxu1 %v25101_v16  ;;  %v9962_v16 = vsel %vm24320_vm10, %v9957_v33, %v9961_v40  ;;  %v12626_v40 = vld [vmem:[#allocation2 + $0x190] sm:$0xf]  ;;  %v10000_v33 = vsel %vm24320_vm10, %v25178_v50, %v25152_v47  ;;  %v12630_v47 = vld [vmem:[#allocation2 + $0x1a0] sm:$0x1]  ;;  %v10010_v45 = vsel %vm24320_vm10, %v25183_v28, %v25180_v32  ;;  %v10052_v49 = vor.u32 %v25234_v52, %v25232_v63  ;;  %v25290_v28 = vld [vmem:[#allocation2 + $0x10c] sm:$0xf] }
 0x897   :  { %18623 = vmatprep.mubr.bf16.mxu1 %v25103_v31  ;;  %18684 = vmatpush3.bf16.msra.mxu1 %v20201_v41  ;;  %v25199_v31 = vld [vmem:[%s27576_s4 + $0x180] sm:$0xff]   ;;  %v25205_v41 = vrot.slane %v10036_v6, 4  ;;  %v25228_v21 = vcombine.low %v9952_v3, %v9962_v16  ;;  %v25251_v6 = vsel %vm24737_vm13, %v14269_v43, %v14270_v36  ;;  %v14276_v34 = vrot.slane %v14274_v55, 4  ;;  %v25255_v16 = vld [vmem:[#allocation2 + $0xec] sm:$0x1] }
 0x898   :  { %18685 = vmatprep.subr.bf16.mxu1 %v20202_v35  ;;  %28019 = vst [vmem:[#allocation15_spill] sm:$0xff] %v25251_v6  ;;  %v14277_v3 = vrot.slane %v12624_v10, 5  ;;  %v25259_v1 = vsel %vm24737_vm13, %v16643_v5, %v14274_v55  ;;  %v14290_v38 = vrot.slane %v14288_v29, 4  ;;  %v10055_v42 = vshll.u32 %v25255_v16, 16  ;;  %v9612_v43 = vld [vmem:[#allocation2 + $0x108] sm:$0xf] }
 0x899   :  { %28020 = vst [vmem:[#allocation19_spill] sm:$0xff] %v25259_v1  ;;  %v10042_v62 = vor.u32 %v25207_v26, %v25205_v41  ;;  %v10062_v10 = vrot.slane %v10060_v20, 4  ;;  %v10065_v36 = vrot.slane %v10063_v18, 5  ;;  %v25288_v32 = vrot.slane %v10069_v51, 5 }
 0x89a   :  { %v25263_v46 = vsel %vm24737_vm13, %v14276_v34, %v14277_v3  ;;  %v25294_v5 = vsel %vm24737_vm13, %v16645_v57, %v14288_v29  ;;  %v10075_v26 = vrot.slane %v10073_v44, 4  ;;  %v10084_v52 = vshrl.u32 %v9609_v30, 16  ;;  %v25312_v29 = vld [vmem:[#allocation2 + $0xf8] sm:$0x1] }
 0x89b   :  { %18686 = vmatpush3.bf16.msra.mxu1 %v20202_v35  ;;  %v14281_v35 = vrot.slane %v12626_v40, 5  ;;  %28021 = vst [vmem:[#allocation20_spill] sm:$0xff] %v25263_v46  ;;  %v14291_v40 = vrot.slane %v12630_v47, 5  ;;  %28024 = vst [vmem:[#allocation32_spill] sm:$0xff] %v25294_v5  ;;  %v10087_v20 = vshll.u32 %v9609_v30, 16  ;;  %v10093_v55 = vshll.u32 %v25286_v4, 16 }
 0x89c   :  { %18751 = vmatprep.subr.bf16.mxu1 %v25199_v31  ;;  %v10097_v58 = vshrl.u32 %v25286_v4, 16  ;;  %v16389_v59 = vcombine.low %v10000_v33, %v10010_v45  ;;  %v10117_v34 = vshll.u32 %v25290_v28, 16  ;;  %v10121_v3 = vshrl.u32 %v25290_v28, 16 }
 0x89d   :  { %v14283_v53 = vrot.slane %v14281_v35, 4  ;;  %v25298_v41 = vsel %vm24737_vm13, %v14290_v38, %v14291_v40  ;;  %v10029_v51 = vrot.slane %v10028_v54, 4  ;;  %v10043_v47 = vrot.slane %v10042_v62, 4  ;;  %v25317_v40 = vld [vmem:[#allocation2 + $0x118] sm:$0xf] }
 0x89e   :  { %18624 = vmatmul.mubr.bf16.gmra.mrb[16].mxu1 %v16384_v8  ;;  %v25269_v8 = vsel %vm24737_vm13, %v16644_v12, %v14281_v35  ;;  %28025 = vst [vmem:[#allocation29_spill] sm:$0xff] %v25298_v41  ;;  %v10108_v12 = vshrl.u32 %v9612_v43, 16  ;;  %v10111_v35 = vshll.u32 %v9612_v43, 16  ;;  %v10053_v57 = vrot.slane %v10052_v49, 4  ;;  %v25319_v43 = vld [vmem:[#allocation2 + $0x104] sm:$0x1] }
 0x89f   :  { %18627 = vmatprep.mubr.bf16.mxu1 %v16385_v15  ;;  %28022 = vst [vmem:[#allocation22_spill] sm:$0xff] %v25269_v8  ;;  %v25273_v15 = vsel %vm24737_vm13, %v14283_v53, %v14284_v56  ;;  %v10057_v53 = vrot.slane %v10055_v42, 5  ;;  %v9615_v56 = vld [vmem:[#allocation2 + $0x114] sm:$0xf]  ;;  %v10076_v44 = vor.u32 %v10075_v26, %v25288_v32  ;;  %v10086_v33 = vrot.slane %v10084_v52, 4 }
 0x8a0   :  { %28023 = vst [vmem:[#allocation28_spill] sm:$0xff] %v25273_v15  ;;  %v10089_v45 = vrot.slane %v10087_v20, 5  ;;  %v25315_v30 = vrot.slane %v10093_v55, 5  ;;  %v10099_v38 = vrot.slane %v10097_v58, 4  ;;  %v25321_v54 = vrot.slane %v10117_v34, 5 }
 0x8a1   :  { %v10123_v62 = vrot.slane %v10121_v3, 4  ;;  %v10132_v42 = vshrl.u32 %v9615_v56, 16  ;;  %v10135_v49 = vshll.u32 %v9615_v56, 16  ;;  %v10079_v52 = vshll.u32 %v25312_v29, 16  ;;  %v25341_v34 = vld [vmem:[#allocation2 + $0x110] sm:$0x1] }
 0x8a2   :  { %v10058_v20 = vsel %vm24320_vm10, %v10053_v57, %v10057_v53  ;;  %v10090_v55 = vor.u32 %v10089_v45, %v10086_v33  ;;  %v10141_v58 = vshll.u32 %v25317_v40, 16  ;;  %v9618_v57 = vld [vmem:[#allocation2 + $0x120] sm:$0xf]  ;;  %v10127_v45 = vshll.u32 %v25341_v34, 16 }
 0x8a3   :  { %v10081_v56 = vrot.slane %v10079_v52, 5  ;;  %v10156_v52 = vshrl.u32 %v9618_v57, 16 }
 0x8a4   :  { %v10091_v33 = vrot.slane %v10090_v55, 4 }
 0x8a6   :  { %18628 = vmatmul.mubr.bf16.gmra.mrb[20].mxu1 %v25226_v14  ;;  %v10024_v14 = vsel %vm24320_vm10, %v25201_v37, %v25185_v2  ;;  %v10110_v2 = vrot.slane %v10108_v12, 4  ;;  %v10113_v37 = vrot.slane %v10111_v35, 5  ;;  %v10145_v12 = vshrl.u32 %v25317_v40, 16 }
 0x8a7   :  { %18631 = vmatprep.mubr.bf16.mxu1 %v25228_v21  ;;  %v10066_v21 = vor.u32 %v10065_v36, %v10062_v10  ;;  %v10034_v10 = vsel %vm24320_vm10, %v10029_v51, %v25203_v39  ;;  %v10048_v36 = vsel %vm24320_vm10, %v10043_v47, %v25232_v63  ;;  %v25337_v39 = vrot.slane %v10076_v44, 4  ;;  %v25348_v44 = vld [vmem:[#allocation2 + $0x124] sm:$0xf] }
 0x8a8   :  { %v10100_v35 = vor.u32 %v10099_v38, %v25315_v30  ;;  %v10103_v63 = vshll.u32 %v25319_v43, 16  ;;  %v10114_v3 = vor.u32 %v10113_v37, %v10110_v2  ;;  %v10134_v51 = vrot.slane %v10132_v42, 4  ;;  %v9621_v37 = vld [vmem:[#allocation2 + $0x12c] sm:$0xf] }
 0x8a9   :  { %v25329_v26 = vrot.slane %v10066_v21, 4  ;;  %v10137_v47 = vrot.slane %v10135_v49, 5  ;;  %v16390_v53 = vcombine.low %v10024_v14, %v10034_v10  ;;  %v16391_v21 = vcombine.low %v10048_v36, %v10058_v20  ;;  %v25356_v10 = vld [vmem:[#allocation2 + $0x130] sm:$0xf]  ;;  %v25358_v36 = vld [vmem:[#allocation2 + $0x11c] sm:$0x1] }
 0x8aa   :  { %v25351_v38 = vrot.slane %v10141_v58, 5  ;;  %v10147_v2 = vrot.slane %v10145_v12, 4  ;;  %v10082_v14 = vsel %vm24320_vm10, %v25337_v39, %v10081_v56  ;;  %v10105_v42 = vrot.slane %v10103_v63, 5 }
 0x8ab   :  { %v10115_v49 = vrot.slane %v10114_v3, 4  ;;  %v10159_v20 = vshll.u32 %v9618_v57, 16  ;;  %v10165_v55 = vshll.u32 %v25348_v44, 16  ;;  %v10169_v58 = vshrl.u32 %v25348_v44, 16 }
 0x8ac   :  { %v10180_v12 = vshrl.u32 %v9621_v37, 16  ;;  %v10183_v18 = vshll.u32 %v9621_v37, 16  ;;  %v10096_v39 = vsel %vm24320_vm10, %v10091_v33, %v25315_v30  ;;  %v10148_v63 = vor.u32 %v10147_v2, %v25351_v38  ;;  %v9624_v30 = vld [vmem:[#allocation2 + $0x138] sm:$0xf]  ;;  %v25378_v2 = vld [vmem:[#allocation2 + $0x13c] sm:$0xf] }
 0x8ad   :  { %v10189_v3 = vshll.u32 %v25356_v10, 16  ;;  %v10193_v56 = vshrl.u32 %v25356_v10, 16  ;;  %v25380_v37 = vrot.slane %v10165_v55, 5  ;;  %v10204_v50 = vshrl.u32 %v9624_v30, 16 }
 0x8ae   :  { %18632 = vmatmul.mubr.bf16.gmra.mrb[24].mxu1 %v25230_v60  ;;  %v10124_v60 = vor.u32 %v10123_v62, %v25321_v54  ;;  %v10101_v62 = vrot.slane %v10100_v35, 4  ;;  %v10129_v35 = vrot.slane %v10127_v45, 5  ;;  %v10158_v45 = vrot.slane %v10156_v52, 4 }
 0x8af   :  { %18635 = vmatprep.mubr.bf16.mxu1 %v16389_v59  ;;  %v10072_v59 = vsel %vm24320_vm10, %v25329_v26, %v25288_v32  ;;  %v10138_v26 = vor.u32 %v10137_v47, %v10134_v51  ;;  %v10120_v51 = vsel %vm24320_vm10, %v10115_v49, %v25321_v54  ;;  %v10151_v47 = vshll.u32 %v25358_v36, 16 }
 0x8b0   :  { %v10125_v32 = vrot.slane %v10124_v60, 4  ;;  %v10106_v60 = vsel %vm24320_vm10, %v10101_v62, %v10105_v42  ;;  %v10171_v62 = vrot.slane %v10169_v58, 4  ;;  %v10182_v42 = vrot.slane %v10180_v12, 4  ;;  %v9627_v12 = vld [vmem:[#allocation2 + $0x144] sm:$0xf] }
 0x8b1   :  { %v10139_v33 = vrot.slane %v10138_v26, 4  ;;  %v10185_v54 = vrot.slane %v10183_v18, 5  ;;  %v10149_v49 = vrot.slane %v10148_v63, 4  ;;  %v25383_v61 = vrot.slane %v10189_v3, 5  ;;  %v25388_v63 = vld [vmem:[#allocation2 + $0x148] sm:$0xf] }
 0x8b2   :  { %v10130_v57 = vsel %vm24320_vm10, %v10125_v32, %v10129_v35  ;;  %v10195_v27 = vrot.slane %v10193_v56, 4  ;;  %v10207_v11 = vshll.u32 %v9624_v30, 16  ;;  %v10213_v32 = vshll.u32 %v25378_v2, 16 }
 0x8b3   :  { %v10217_v26 = vshrl.u32 %v25378_v2, 16  ;;  %v16392_v52 = vcombine.low %v10072_v59, %v10082_v14  ;;  %v10153_v35 = vrot.slane %v10151_v47, 5  ;;  %v16394_v55 = vcombine.low %v10120_v51, %v10130_v57  ;;  %v25395_v59 = vld [vmem:[#allocation2 + $0x134] sm:$0x1] }
 0x8b4   :  { %v10172_v58 = vor.u32 %v10171_v62, %v25380_v37  ;;  %v10186_v18 = vor.u32 %v10185_v54, %v10182_v42  ;;  %v10144_v3 = vsel %vm24320_vm10, %v10139_v33, %v25351_v38  ;;  %v10206_v14 = vrot.slane %v10204_v50, 4 }
 0x8b5   :  { %v10154_v56 = vsel %vm24320_vm10, %v10149_v49, %v10153_v35  ;;  %v10209_v51 = vrot.slane %v10207_v11, 5  ;;  %v25398_v47 = vrot.slane %v10213_v32, 5  ;;  %v10219_v57 = vrot.slane %v10217_v26, 4 }
 0x8b6   :  { %18636 = vmatmul.mubr.bf16.gmra.mrb[28].mxu1 %v16390_v53  ;;  %v25373_v53 = vld [vmem:[#allocation2 + $0x128] sm:$0x1]  ;;  %v10228_v38 = vshrl.u32 %v9627_v12, 16  ;;  %v10231_v33 = vshll.u32 %v9627_v12, 16  ;;  %v10237_v62 = vshll.u32 %v25388_v63, 16  ;;  %v10173_v50 = vrot.slane %v10172_v58, 4 }
 0x8b7   :  { %18639 = vmatprep.mubr.bf16.mxu1 %v16391_v21  ;;  %v10161_v21 = vrot.slane %v10159_v20, 5  ;;  %v10175_v13 = vshll.u32 %v25373_v53, 16  ;;  %v16393_v20 = vcombine.low %v10096_v39, %v10106_v60  ;;  %v9630_v39 = vld [vmem:[#allocation2 + $0x150] sm:$0xf]  ;;  %v10196_v60 = vor.u32 %v10195_v27, %v25383_v61 }
 0x8b8   :  { %v10187_v54 = vrot.slane %v10186_v18, 4  ;;  %v10199_v49 = vshll.u32 %v25395_v59, 16  ;;  %v10252_v27 = vshrl.u32 %v9630_v39, 16  ;;  %v10255_v11 = vshll.u32 %v9630_v39, 16 }
 0x8b9   :  { %v10162_v0 = vor.u32 %v10161_v21, %v10158_v45  ;;  %v10177_v30 = vrot.slane %v10175_v13, 5  ;;  %v25400_v45 = vld [vmem:[#allocation2 + $0x154] sm:$0xf]  ;;  %v25402_v21 = vld [vmem:[#allocation2 + $0x140] sm:$0x1]  ;;  %v10241_v13 = vshrl.u32 %v25388_v63, 16  ;;  %v10220_v35 = vor.u32 %v10219_v57, %v25398_v47 }
 0x8ba   :  { %v10261_v32 = vshll.u32 %v25400_v45, 16  ;;  %v10265_v26 = vshrl.u32 %v25400_v45, 16  ;;  %v10223_v12 = vshll.u32 %v25402_v21, 16  ;;  %v10230_v41 = vrot.slane %v10228_v38, 4 }
 0x8bb   :  { %v10163_v42 = vrot.slane %v10162_v0, 4  ;;  %v10233_v5 = vrot.slane %v10231_v33, 5  ;;  %v25411_v15 = vrot.slane %v10237_v62, 5  ;;  %v10243_v0 = vrot.slane %v10241_v13, 4  ;;  %v25422_v62 = vld [vmem:[#allocation2 + $0x160] sm:$0xf] }
 0x8bc   :  { %v16395_v58 = vcombine.low %v10144_v3, %v10154_v56  ;;  %v10178_v39 = vsel %vm24320_vm10, %v10173_v50, %v10177_v30  ;;  %v10201_v8 = vrot.slane %v10199_v49, 5  ;;  %v10257_v57 = vrot.slane %v10255_v11, 5  ;;  %v25431_v49 = vld [vmem:[#allocation2 + $0x158] sm:$0x1] }
 0x8bd   :  { %v10168_v18 = vsel %vm24320_vm10, %v10163_v42, %v25380_v37  ;;  %v25420_v38 = vrot.slane %v10261_v32, 5  ;;  %v10267_v33 = vrot.slane %v10265_v26, 4  ;;  %v10192_v37 = vsel %vm24320_vm10, %v10187_v54, %v25383_v61 }
 0x8be   :  { %18640 = vmatmul.mubr.bf16.gmra.mrb[32].mxu1 %v16392_v52  ;;  %v10197_v52 = vrot.slane %v10196_v60, 4  ;;  %v25418_v60 = vld [vmem:[#allocation2 + $0x14c] sm:$0x1]  ;;  %v10221_v56 = vrot.slane %v10220_v35, 4  ;;  %v10225_v30 = vrot.slane %v10223_v12, 5  ;;  %v10234_v42 = vor.u32 %v10233_v5, %v10230_v41 }
 0x8bf   :  { %18643 = vmatprep.mubr.bf16.mxu1 %v16393_v20  ;;  %v10210_v20 = vor.u32 %v10209_v51, %v10206_v14  ;;  %v9633_v14 = vld [vmem:[#allocation2 + $0x15c] sm:$0xf]  ;;  %v10254_v51 = vrot.slane %v10252_v27, 4  ;;  %v10247_v50 = vshll.u32 %v25418_v60, 16  ;;  %v10285_v32 = vshll.u32 %v25422_v62, 16 }
 0x8c0   :  { %v10202_v13 = vsel %vm24320_vm10, %v10197_v52, %v10201_v8  ;;  %v10276_v27 = vshrl.u32 %v9633_v14, 16  ;;  %v10279_v11 = vshll.u32 %v9633_v14, 16  ;;  %v10289_v26 = vshrl.u32 %v25422_v62, 16  ;;  %v9636_v41 = vld [vmem:[#allocation2 + $0x168] sm:$0xf] }
 0x8c1   :  { %v10211_v3 = vrot.slane %v10210_v20, 4  ;;  %v10258_v61 = vor.u32 %v10257_v57, %v10254_v51  ;;  %v10268_v54 = vor.u32 %v10267_v33, %v25420_v38  ;;  %v16396_v20 = vcombine.low %v10168_v18, %v10178_v39  ;;  %v25441_v52 = vld [vmem:[#allocation2 + $0x16c] sm:$0xf]  ;;  %v9639_v51 = vld [vmem:[#allocation2 + $0x174] sm:$0xf] }
 0x8c2   :  { %v16397_v35 = vcombine.low %v10192_v37, %v10202_v13  ;;  %v10226_v5 = vsel %vm24320_vm10, %v10221_v56, %v10225_v30  ;;  %v10235_v12 = vrot.slane %v10234_v42, 4  ;;  %v10271_v14 = vshll.u32 %v25431_v49, 16  ;;  %v25446_v37 = vld [vmem:[#allocation2 + $0x178] sm:$0xf]  ;;  %v25448_v56 = vld [vmem:[#allocation2 + $0x164] sm:$0x1] }
 0x8c3   :  { %v10216_v8 = vsel %vm24320_vm10, %v10211_v3, %v25398_v47  ;;  %v10278_v57 = vrot.slane %v10276_v27, 4  ;;  %v10281_v33 = vrot.slane %v10279_v11, 5  ;;  %v25444_v18 = vrot.slane %v10285_v32, 5 }
 0x8c4   :  { %v10291_v39 = vrot.slane %v10289_v26, 4  ;;  %v10259_v47 = vrot.slane %v10258_v61, 4  ;;  %v10269_v3 = vrot.slane %v10268_v54, 4  ;;  %v10300_v30 = vshrl.u32 %v9636_v41, 16 }
 0x8c5   :  { %v10303_v13 = vshll.u32 %v9636_v41, 16  ;;  %v10309_v42 = vshll.u32 %v25441_v52, 16  ;;  %v10327_v27 = vshll.u32 %v9639_v51, 16  ;;  %v10240_v11 = vsel %vm24320_vm10, %v10235_v12, %v25411_v15 }
 0x8c6   :  { %18644 = vmatmul.mubr.bf16.gmra.mrb[36].mxu1 %v16394_v55  ;;  %v10244_v55 = vor.u32 %v10243_v0, %v25411_v15  ;;  %v10273_v32 = vrot.slane %v10271_v14, 5  ;;  %v10333_v26 = vshll.u32 %v25446_v37, 16  ;;  %v10337_v61 = vshrl.u32 %v25446_v37, 16 }
 0x8c7   :  { %18647 = vmatprep.mubr.bf16.mxu1 %v16395_v58  ;;  %v10249_v58 = vrot.slane %v10247_v50, 5  ;;  %v10324_v50 = vshrl.u32 %v9639_v51, 16  ;;  %v10295_v41 = vshll.u32 %v25448_v56, 16  ;;  %v10264_v51 = vsel %vm24320_vm10, %v10259_v47, %v25420_v38 }
 0x8c8   :  { %v10245_v0 = vrot.slane %v10244_v55, 4  ;;  %v10313_v55 = vshrl.u32 %v25441_v52, 16  ;;  %v10274_v15 = vsel %vm24320_vm10, %v10269_v3, %v10273_v32  ;;  %v10302_v12 = vrot.slane %v10300_v30, 4  ;;  %v25472_v3 = vld [vmem:[#allocation2 + $0x17c] sm:$0x1] }
 0x8c9   :  { %v10305_v14 = vrot.slane %v10303_v13, 5  ;;  %v25466_v46 = vrot.slane %v10309_v42, 5  ;;  %v10326_v6 = vrot.slane %v10324_v50, 4  ;;  %v10329_v48 = vrot.slane %v10327_v27, 5  ;;  %v20334_v27 = vld [vmem:[#allocation2 + $0x184] sm:$0xf] }
 0x8ca   :  { %v10250_v54 = vsel %vm24320_vm10, %v10245_v0, %v10249_v58  ;;  %v10315_v1 = vrot.slane %v10313_v55, 4  ;;  %v16398_v0 = vcombine.low %v10216_v8, %v10226_v5  ;;  %v25468_v58 = vrot.slane %v10333_v26, 5  ;;  %v9645_v5 = vld [vmem:[#allocation2 + $0x18c] sm:$0xf] }
 0x8cb   :  { %v16400_v38 = vcombine.low %v10264_v51, %v10274_v15  ;;  %v10297_v47 = vrot.slane %v10295_v41, 5  ;;  %v10306_v30 = vor.u32 %v10305_v14, %v10302_v12  ;;  %v10330_v42 = vor.u32 %v10329_v48, %v10326_v6 }
 0x8cc   :  { %v10316_v13 = vor.u32 %v10315_v1, %v25466_v46  ;;  %v10361_v32 = vshrl.u32 %v20334_v27, 16  ;;  %v10343_v1 = vshll.u32 %v25472_v3, 16  ;;  %v10372_v48 = vshrl.u32 %v9645_v5, 16 }
 0x8cd   :  { %v10375_v6 = vshll.u32 %v9645_v5, 16  ;;  %v10307_v51 = vrot.slane %v10306_v30, 4  ;;  %v10331_v12 = vrot.slane %v10330_v42, 4  ;;  %v9648_v5 = vld [vmem:[#allocation2 + $0x198] sm:$0xf] }
 0x8ce   :  { %18648 = vmatmul.mubr.bf16.gmra.mrb[40].mxu1 %v16396_v20  ;;  %v10282_v20 = vor.u32 %v10281_v33, %v10278_v57  ;;  %v10339_v57 = vrot.slane %v10337_v61, 4  ;;  %v9642_v33 = vld [vmem:[#allocation2 + $0x180] sm:$0xf]  ;;  %v10317_v15 = vrot.slane %v10316_v13, 4 }
 0x8cf   :  { %18651 = vmatprep.mubr.bf16.mxu1 %v16397_v35  ;;  %v10292_v35 = vor.u32 %v10291_v39, %v25444_v18  ;;  %v16399_v39 = vcombine.low %v10240_v11, %v10250_v54  ;;  %v10348_v8 = vshrl.u32 %v9642_v33, 16  ;;  %v10351_v50 = vshll.u32 %v9642_v33, 16 }
 0x8d0   :  { %v10283_v7 = vrot.slane %v10282_v20, 4  ;;  %v10340_v55 = vor.u32 %v10339_v57, %v25468_v58  ;;  %v10357_v11 = vshll.u32 %v20334_v27, 16  ;;  %v10319_v54 = vshll.u32 %v25470_v24, 16  ;;  %v20335_v20 = vld [vmem:[#allocation2 + $0x190] sm:$0xf] }
 0x8d1   :  { %v10293_v19 = vrot.slane %v10292_v35, 4  ;;  %v10381_v35 = vshll.u32 %v20335_v20, 16  ;;  %v10385_v41 = vshrl.u32 %v20335_v20, 16  ;;  %v10350_v14 = vrot.slane %v10348_v8, 4 }
 0x8d2   :  { %v10288_v26 = vsel %vm24320_vm10, %v10283_v7, %v25444_v18  ;;  %v10353_v57 = vrot.slane %v10351_v50, 5  ;;  %v10359_v33 = vrot.slane %v10357_v11, 5  ;;  %v10363_v7 = vrot.slane %v10361_v32, 4  ;;  %v20336_v32 = vld [vmem:[#allocation2 + $0x19c] sm:$0xf] }
 0x8d3   :  { %v10298_v61 = vsel %vm24320_vm10, %v10293_v19, %v10297_v47  ;;  %v10345_v19 = vrot.slane %v10343_v1, 5  ;;  %v10374_v47 = vrot.slane %v10372_v48, 4  ;;  %v10377_v27 = vrot.slane %v10375_v6, 5  ;;  %v20337_v48 = vld [vmem:[#allocation2 + $0x188] sm:$0x1] }
 0x8d4   :  { %v16401_v18 = vcombine.low %v10288_v26, %v10298_v61  ;;  %v10383_v17 = vrot.slane %v10381_v35, 5  ;;  %v10387_v22 = vrot.slane %v10385_v41, 4  ;;  %v10312_v30 = vsel %vm24320_vm10, %v10307_v51, %v25466_v46  ;;  %v20338_v51 = vld [vmem:[#allocation2 + $0x194] sm:$0x1] }
 0x8d5   :  { %v10336_v42 = vsel %vm24320_vm10, %v10331_v12, %v25468_v58  ;;  %v10354_v8 = vor.u32 %v10353_v57, %v10350_v14  ;;  %v10396_v50 = vshrl.u32 %v9648_v5, 16  ;;  %v10399_v11 = vshll.u32 %v9648_v5, 16 }
 0x8d6   :  { %18652 = vmatmul.mubr.bf16.gmra.mrb[44].mxu1 %v16398_v0  ;;  %v10341_v0 = vrot.slane %v10340_v55, 4  ;;  %v10364_v55 = vor.u32 %v10363_v7, %v10359_v33  ;;  %v10405_v26 = vshll.u32 %v20336_v32, 16  ;;  %v10409_v61 = vshrl.u32 %v20336_v32, 16 }
 0x8d7   :  { %18655 = vmatprep.mubr.bf16.mxu1 %v16399_v39  ;;  %v10321_v39 = vrot.slane %v10319_v54, 5  ;;  %v10378_v54 = vor.u32 %v10377_v27, %v10374_v47  ;;  %v10388_v1 = vor.u32 %v10387_v22, %v10383_v17  ;;  %v10367_v6 = vshll.u32 %v20337_v48, 16 }
 0x8d8   :  { %v10355_v35 = vrot.slane %v10354_v8, 4  ;;  %v10365_v41 = vrot.slane %v10364_v55, 4  ;;  %v10391_v58 = vshll.u32 %v20338_v51, 16  ;;  %v10401_v12 = vrot.slane %v10399_v11, 5 }
 0x8d9   :  { %v10322_v13 = vsel %vm24320_vm10, %v10317_v15, %v10321_v39  ;;  %v10398_v15 = vrot.slane %v10396_v50, 4  ;;  %v10411_v14 = vrot.slane %v10409_v61, 4  ;;  %v10379_v57 = vrot.slane %v10378_v54, 4 }
 0x8da   :  { %v16402_v46 = vcombine.low %v10312_v30, %v10322_v13  ;;  %v10389_v7 = vrot.slane %v10388_v1, 4  ;;  %v10393_v39 = vrot.slane %v10391_v58, 5  ;;  %v10360_v22 = vsel %vm24320_vm10, %v10355_v35, %v10359_v33  ;;  %v20339_v13 = vld [vmem:[#allocation2 + $0x10] sm:$0xf]  ;;  %v10965_v33 = vld [vmem:[#allocation2 + $0xc] sm:$0xe] }
 0x8db   :  { %v10402_v47 = vor.u32 %v10401_v12, %v10398_v15  ;;  %v10384_v5 = vsel %vm24320_vm10, %v10379_v57, %v10383_v17  ;;  %v16415_v54 = vrot.slane %v10965_v33, 9  ;;  %v20341_v1 = vld [vmem:[#allocation2 + $0x14] sm:$0x1]  ;;  %v10966_v12 = vld [vmem:[#allocation2 + $0x18] sm:$0xe]  ;;  %v20204_v33 = vld [vmem:[%s27576_s4 + $0x188] sm:$0xff]  }
 0x8dc   :  { %v10394_v30 = vsel %vm24320_vm10, %v10389_v7, %v10393_v39  ;;  %v10967_v7 = vld [vmem:[#allocation2 + $0x24] sm:$0xe]  ;;  %v20344_v39 = vld [vmem:[#allocation2 + $0x20] sm:$0x1] }
 0x8dd   :  { %v16405_v50 = vcombine.low %v10384_v5, %v10394_v30  ;;  %v10403_v11 = vrot.slane %v10402_v47, 4  ;;  %v20345_v47 = vld [vmem:[#allocation2 + $0x2c] sm:$0x1]  ;;  %v20346_v30 = vld [vmem:[#allocation2 + $0x34] sm:$0xf] }
 0x8de   :  { %18656 = vmatmul.mubr.bf16.gmra.mrb[48].mxu1 %v16400_v38  ;;  %v10346_v38 = vsel %vm24320_vm10, %v10341_v0, %v10345_v19  ;;  %v10407_v0 = vrot.slane %v10405_v26, 5 }
 0x8df   :  { %18659 = vmatprep.mubr.bf16.mxu1 %v16401_v18  ;;  %v16403_v20 = vcombine.low %v10336_v42, %v10346_v38  ;;  %v10369_v18 = vrot.slane %v10367_v6, 5  ;;  %v11095_v42 = vrot.slane %v20339_v13, 5  ;;  %v20340_v38 = vld [vmem:[#allocation2 + $0x1a0] sm:$0x1]  ;;  %v20342_v6 = vld [vmem:[#allocation2 + $0x1c] sm:$0xf] }
 0x8e0   :  { %v10412_v27 = vor.u32 %v10411_v14, %v10407_v0  ;;  %v10415_v8 = vshll.u32 %v20340_v38, 16  ;;  %v10408_v17 = vsel %vm24320_vm10, %v10403_v11, %v10407_v0  ;;  %v11116_v13 = vrot.slane %v20346_v30, 5  ;;  %v20347_v38 = vld [vmem:[#allocation2 + $0x40] sm:$0xf]  ;;  %v20352_v30 = vld [vmem:[#allocation2 + $0x50] sm:$0x1] }
 0x8e1   :  { %v10370_v19 = vsel %vm24320_vm10, %v10365_v41, %v10369_v18  ;;  %v11097_v26 = vrot.slane %v11095_v42, 4  ;;  %v20343_v41 = vld [vmem:[#allocation2 + $0x28] sm:$0xf]  ;;  %v11096_v15 = vsel %vm24737_vm13, %v16415_v54, %v11095_v42  ;;  %v16416_v18 = vrot.slane %v10966_v12, 9  ;;  %v10969_v54 = vld [vmem:[#allocation2 + $0x3c] sm:$0xe] }
 0x8e2   :  { %v16404_v55 = vcombine.low %v10360_v22, %v10370_v19  ;;  %v10413_v32 = vrot.slane %v10412_v27, 4  ;;  %v10417_v61 = vrot.slane %v10415_v8, 5  ;;  %v11109_v51 = vrot.slane %v20343_v41, 5  ;;  %v20205_v41 = vld [vmem:[%s27576_s4 + $0x190] sm:$0xff]  }
 0x8e3   :  { %v11105_v22 = vrot.slane %v20344_v39, 5  ;;  %v16417_v19 = vrot.slane %v10967_v7, 9  ;;  %v11112_v27 = vrot.slane %v20345_v47, 5  ;;  %v11123_v8 = vrot.slane %v20347_v38, 5  ;;  %v20206_v39 = vld [vmem:[%s27576_s4 + $0x198] sm:$0xff]  }
 0x8e4   :  { %v10418_v48 = vsel %vm24320_vm10, %v10413_v32, %v10417_v61  ;;  %v11111_v0 = vrot.slane %v11109_v51, 4  ;;  %v10968_v32 = vld [vmem:[#allocation2 + $0x30] sm:$0xe]  ;;  %v11118_v61 = vrot.slane %v11116_v13, 4  ;;  %v10971_v47 = vld [vmem:[#allocation2 + $0x54] sm:$0xe] }
 0x8e5   :  { %v16406_v58 = vcombine.low %v10408_v17, %v10418_v48  ;;  %v11110_v11 = vsel %vm24737_vm13, %v16417_v19, %v11109_v51  ;;  %v20348_v17 = vld [vmem:[#allocation2 + $0x38] sm:$0x1]  ;;  %v20353_v38 = vld [vmem:[#allocation2 + $0x5c] sm:$0x1] }
 0x8e6   :  { %18660 = vmatmul.mubr.bf16.gmra.mrb[52].mxu1 %v16402_v46  ;;  %v11098_v46 = vrot.slane %v20341_v1, 5  ;;  %v11113_v42 = vsel %vm24737_vm13, %v11111_v0, %v11112_v27  ;;  %v11125_v1 = vrot.slane %v11123_v8, 4  ;;  %v11119_v48 = vrot.slane %v20348_v17, 5  ;;  %v10972_v17 = vld [vmem:[#allocation2 + $0x60] sm:$0xe] }
 0x8e7   :  { %18663 = vmatprep.mubr.bf16.mxu1 %v16403_v20  ;;  %v11102_v20 = vrot.slane %v20342_v6, 5  ;;  %v16419_v6 = vrot.slane %v10969_v54, 9 }
 0x8e8   :  { %v11099_v35 = vsel %vm24737_vm13, %v11097_v26, %v11098_v46  ;;  %v16465_v26 = vcombine.low %v11110_v11, %v11113_v42  ;;  %v16418_v46 = vrot.slane %v10968_v32, 9  ;;  %v11120_v51 = vsel %vm24737_vm13, %v11118_v61, %v11119_v48  ;;  %v20354_v11 = vld [vmem:[#allocation2 + $0x64] sm:$0xf]  ;;  %v20208_v48 = vld [vmem:[%s27576_s4 + $0x1a8] sm:$0xff]  }
 0x8e9   :  { %v16463_v14 = vcombine.low %v11096_v15, %v11099_v35  ;;  %v11104_v57 = vrot.slane %v11102_v20, 4  ;;  %v11124_v0 = vsel %vm24737_vm13, %v16419_v6, %v11123_v8  ;;  %v16421_v42 = vrot.slane %v10971_v47, 9  ;;  %v20207_v8 = vld [vmem:[%s27576_s4 + $0x1a0] sm:$0xff]  }
 0x8ea   :  { %v11144_v32 = vrot.slane %v20354_v11, 5  ;;  %v20360_v11 = vld [vmem:[#allocation2 + $0x80] sm:$0x1] }
 0x8eb   :  { %v11106_v5 = vsel %vm24737_vm13, %v11104_v57, %v11105_v22  ;;  %v11117_v57 = vsel %vm24737_vm13, %v16418_v46, %v11116_v13  ;;  %v11133_v13 = vrot.slane %v20352_v30, 5  ;;  %v10974_v30 = vld [vmem:[#allocation2 + $0x78] sm:$0xe] }
 0x8ec   :  { %v16466_v7 = vcombine.low %v11117_v57, %v11120_v51  ;;  %v16422_v51 = vrot.slane %v10972_v17, 9 }
 0x8ee   :  { %18664 = vmatmul.mubr.bf16.gmra.mrb[56].mxu1 %v16404_v55  ;;  %v11103_v55 = vsel %vm24737_vm13, %v16416_v18, %v11102_v20  ;;  %v20349_v20 = vld [vmem:[#allocation2 + $0x44] sm:$0x1]  ;;  %v10970_v18 = vld [vmem:[#allocation2 + $0x48] sm:$0xe]  ;;  %v11145_v47 = vsel %vm24737_vm13, %v16422_v51, %v11144_v32 }
 0x8ef   :  { %18667 = vmatprep.mubr.bf16.mxu1 %v16405_v50  ;;  %v16464_v50 = vcombine.low %v11103_v55, %v11106_v5  ;;  %v11126_v35 = vrot.slane %v20349_v20, 5  ;;  %v16420_v5 = vrot.slane %v10970_v18, 9  ;;  %v11140_v55 = vrot.slane %v20353_v38, 5 }
 0x8f0   :  { %v11146_v20 = vrot.slane %v11144_v32, 4  ;;  %v11161_v32 = vrot.slane %v20360_v11, 5 }
 0x8f1   :  { %v11127_v12 = vsel %vm24737_vm13, %v11125_v1, %v11126_v35  ;;  %v10973_v35 = vld [vmem:[#allocation2 + $0x6c] sm:$0xe] }
 0x8f2   :  { %v16467_v22 = vcombine.low %v11124_v0, %v11127_v12  ;;  %v16423_v12 = vrot.slane %v10973_v35, 9  ;;  %v20358_v0 = vld [vmem:[#allocation2 + $0x7c] sm:$0xf] }
 0x8f3   :  { %v11158_v18 = vrot.slane %v20358_v0, 5 }
 0x8f5   :  { %v11160_v38 = vrot.slane %v11158_v18, 4 }
 0x8f6   :  { %18668 = vmatmul.mubr.bf16.gmra.mrb[60].mxu1 %v16406_v58  ;;  %v20350_v58 = vld [vmem:[#allocation2 + $0x4c] sm:$0xf] }
 0x8f7   :  { %18687 = vmatprep.mubr.bf16.mxu1 %v16463_v14  ;;  %v11130_v15 = vrot.slane %v20350_v58, 5  ;;  %v20356_v58 = vld [vmem:[#allocation2 + $0x68] sm:$0x1] }
 0x8f9   :  { %v11132_v19 = vrot.slane %v11130_v15, 4  ;;  %v11131_v54 = vsel %vm24737_vm13, %v16420_v5, %v11130_v15  ;;  %v11147_v15 = vrot.slane %v20356_v58, 5  ;;  %v10976_v58 = vld [vmem:[#allocation2 + $0x90] sm:$0xe] }
 0x8fe   :  { %18688 = vmatmul.mubr.bf16.vlgmr.msra.gmra.mrb[0].mxu1 %v16464_v50  ;;  %v11134_v50 = vsel %vm24737_vm13, %v11132_v19, %v11133_v13  ;;  %v20210_v13 = vld [vmem:[%s27576_s4 + $0x1b8] sm:$0xff]  }
 0x8ff   :  { %18691 = vmatprep.mubr.bf16.mxu1 %v16465_v26  ;;  %18752 = vmatpush3.bf16.msra.mxu1 %v25199_v31  ;;  %v20351_v31 = vld [vmem:[#allocation2 + $0x58] sm:$0xf]  ;;  %v20355_v26 = vld [vmem:[#allocation2 + $0x70] sm:$0xf]  ;;  %v16468_v1 = vcombine.low %v11131_v54, %v11134_v50  ;;  %v16424_v50 = vrot.slane %v10974_v30, 9 }
 0x900   :  { %18753 = vmatprep.subr.bf16.mxu1 %v20204_v33  ;;  %v11137_v14 = vrot.slane %v20351_v31, 5  ;;  %v11151_v61 = vrot.slane %v20355_v26, 5  ;;  %v20357_v31 = vld [vmem:[#allocation2 + $0x74] sm:$0x1]  ;;  %v20361_v26 = vld [vmem:[#allocation2 + $0x8c] sm:$0x1] }
 0x901   :  { %v11154_v57 = vrot.slane %v20357_v31, 5  ;;  %v11168_v54 = vrot.slane %v20361_v26, 5  ;;  %v11159_v35 = vsel %vm24737_vm13, %v16424_v50, %v11158_v18  ;;  %v10977_v31 = vld [vmem:[#allocation2 + $0x9c] sm:$0xe]  ;;  %v20367_v30 = vld [vmem:[#allocation2 + $0xb8] sm:$0xf] }
 0x902   :  { %v11139_v27 = vrot.slane %v11137_v14, 4  ;;  %v11138_v46 = vsel %vm24737_vm13, %v16421_v42, %v11137_v14  ;;  %v20209_v14 = vld [vmem:[%s27576_s4 + $0x1b0] sm:$0xff]   ;;  %v11152_v5 = vsel %vm24737_vm13, %v16423_v12, %v11151_v61 }
 0x903   :  { %18754 = vmatpush3.bf16.msra.mxu1 %v20204_v33 }
 0x904   :  { %18755 = vmatprep.subr.bf16.mxu1 %v20205_v41  ;;  %v11141_v33 = vsel %vm24737_vm13, %v11139_v27, %v11140_v55  ;;  %v10975_v55 = vld [vmem:[#allocation2 + $0x84] sm:$0xe] }
 0x905   :  { %v16469_v6 = vcombine.low %v11138_v46, %v11141_v33  ;;  %v16425_v33 = vrot.slane %v10975_v55, 9  ;;  %v20362_v46 = vld [vmem:[#allocation2 + $0x94] sm:$0xf] }
 0x906   :  { %18692 = vmatmul.mubr.bf16.gmra.mrb[4].mxu1 %v16466_v7  ;;  %v11148_v7 = vsel %vm24737_vm13, %v11146_v20, %v11147_v15  ;;  %v11172_v17 = vrot.slane %v20362_v46, 5 }
 0x907   :  { %18695 = vmatprep.mubr.bf16.mxu1 %v16467_v22  ;;  %18756 = vmatpush3.bf16.msra.mxu1 %v20205_v41  ;;  %v11153_v41 = vrot.slane %v11151_v61, 4  ;;  %v20359_v22 = vld [vmem:[#allocation2 + $0x88] sm:$0xf]  ;;  %v16470_v27 = vcombine.low %v11145_v47, %v11148_v7  ;;  %v25566_v61 = vld [vmem:[%s27576_s4 + $0x1c0] sm:$0xff]   ;;  %v20364_v7 = vld [vmem:[#allocation2 + $0x98] sm:$0x1] }
 0x908   :  { %18757 = vmatprep.subr.bf16.mxu1 %v20206_v39  ;;  %v11165_v19 = vrot.slane %v20359_v22, 5  ;;  %v11174_v12 = vrot.slane %v11172_v17, 4  ;;  %v11175_v0 = vrot.slane %v20364_v7, 5  ;;  %v20365_v22 = vld [vmem:[#allocation2 + $0xa4] sm:$0x1] }
 0x909   :  { %v11182_v18 = vrot.slane %v20365_v22, 5 }
 0x90a   :  { %v11166_v51 = vsel %vm24737_vm13, %v16425_v33, %v11165_v19  ;;  %v11176_v47 = vsel %vm24737_vm13, %v11174_v12, %v11175_v0  ;;  %v10981_v0 = vld [vmem:[#allocation2 + $0xe4] sm:$0xe] }
 0x90b   :  { %18758 = vmatpush3.bf16.msra.mxu1 %v20206_v39  ;;  %v11155_v39 = vsel %vm24737_vm13, %v11153_v41, %v11154_v57 }
 0x90c   :  { %18759 = vmatprep.subr.bf16.mxu1 %v20207_v8  ;;  %v16471_v42 = vcombine.low %v11152_v5, %v11155_v39  ;;  %v16427_v39 = vrot.slane %v10977_v31, 9 }
 0x90e   :  { %18696 = vmatmul.mubr.bf16.gmra.mrb[8].mxu1 %v16468_v1  ;;  %v11162_v1 = vsel %vm24737_vm13, %v11160_v38, %v11161_v32  ;;  %v10979_v32 = vld [vmem:[#allocation2 + $0xb4] sm:$0xe] }
 0x90f   :  { %18699 = vmatprep.mubr.bf16.mxu1 %v16469_v6  ;;  %18760 = vmatpush3.bf16.msra.mxu1 %v20207_v8  ;;  %v11167_v8 = vrot.slane %v11165_v19, 4  ;;  %v20363_v6 = vld [vmem:[#allocation2 + $0xa0] sm:$0xf]  ;;  %v16472_v41 = vcombine.low %v11159_v35, %v11162_v1  ;;  %v16429_v46 = vrot.slane %v10979_v32, 9  ;;  %v20370_v35 = vld [vmem:[#allocation2 + $0xc4] sm:$0xf] }
 0x910   :  { %18761 = vmatprep.subr.bf16.mxu1 %v20208_v48  ;;  %v11179_v20 = vrot.slane %v20363_v6, 5 }
 0x912   :  { %v11181_v57 = vrot.slane %v11179_v20, 4  ;;  %v11180_v55 = vsel %vm24737_vm13, %v16427_v39, %v11179_v20 }
 0x913   :  { %18762 = vmatpush3.bf16.msra.mxu1 %v20208_v48  ;;  %v11169_v48 = vsel %vm24737_vm13, %v11167_v8, %v11168_v54  ;;  %v10978_v8 = vld [vmem:[#allocation2 + $0xa8] sm:$0xe]  ;;  %v20368_v54 = vld [vmem:[#allocation2 + $0xb0] sm:$0x1] }
 0x914   :  { %18763 = vmatprep.subr.bf16.mxu1 %v20209_v14  ;;  %v16473_v15 = vcombine.low %v11166_v51, %v11169_v48  ;;  %v11183_v5 = vsel %vm24737_vm13, %v11181_v57, %v11182_v18  ;;  %v16428_v26 = vrot.slane %v10978_v8, 9  ;;  %v11189_v1 = vrot.slane %v20368_v54, 5  ;;  %v20369_v48 = vld [vmem:[#allocation2 + $0xbc] sm:$0x1]  ;;  %v20371_v51 = vld [vmem:[#allocation2 + $0xe8] sm:$0xf] }
 0x915   :  { %v16475_v50 = vcombine.low %v11180_v55, %v11183_v5  ;;  %v11196_v6 = vrot.slane %v20369_v48, 5  ;;  %v10980_v57 = vld [vmem:[#allocation2 + $0xc0] sm:$0xe]  ;;  %v20372_v18 = vld [vmem:[#allocation2 + $0xc8] sm:$0x1]  ;;  %v11210_v5 = vrot.slane %v25255_v16, 5 }
 0x916   :  { %18700 = vmatmul.mubr.bf16.gmra.mrb[12].mxu1 %v16470_v27  ;;  %v20366_v27 = vld [vmem:[#allocation2 + $0xac] sm:$0xf]  ;;  %v16430_v22 = vrot.slane %v10980_v57, 9 }
 0x917   :  { %18703 = vmatprep.mubr.bf16.mxu1 %v16471_v42  ;;  %18764 = vmatpush3.bf16.msra.mxu1 %v20209_v14  ;;  %v16426_v14 = vrot.slane %v10976_v58, 9  ;;  %v11186_v19 = vrot.slane %v20366_v27, 5  ;;  %v11207_v58 = vrot.slane %v20371_v51, 5  ;;  %v16431_v27 = vrot.slane %v10981_v0, 9  ;;  %v10984_v51 = vld [vmem:[#allocation2 + $0x108] sm:$0xe] }
 0x918   :  { %18765 = vmatprep.subr.bf16.mxu1 %v20210_v13 }
 0x919   :  { %v11173_v42 = vsel %vm24737_vm13, %v16426_v14, %v11172_v17  ;;  %v11188_v11 = vrot.slane %v11186_v19, 4  ;;  %v11209_v39 = vrot.slane %v11207_v58, 4 }
 0x91a   :  { %v16474_v38 = vcombine.low %v11173_v42, %v11176_v47  ;;  %v11203_v47 = vrot.slane %v20372_v18, 5 }
 0x91b   :  { %18766 = vmatpush3.bf16.msra.mxu1 %v20210_v13  ;;  %v11193_v13 = vrot.slane %v20367_v30, 5  ;;  %v11190_v17 = vsel %vm24737_vm13, %v11188_v11, %v11189_v1  ;;  %v20373_v30 = vld [vmem:[#allocation2 + $0xf4] sm:$0xf]  ;;  %v10982_v11 = vld [vmem:[#allocation2 + $0xf0] sm:$0xe]  ;;  %v11217_v1 = vrot.slane %v25312_v29, 5 }
 0x91c   :  { %18831 = vmatprep.subr.bf16.mxu1 %v25566_v61  ;;  %v11214_v42 = vrot.slane %v20373_v30, 5  ;;  %v16432_v54 = vrot.slane %v10982_v11, 9  ;;  %v11245_v30 = vrot.slane %v25373_v53, 5 }
 0x91d   :  { %v11195_v33 = vrot.slane %v11193_v13, 4  ;;  %v11194_v31 = vsel %vm24737_vm13, %v16429_v46, %v11193_v13  ;;  %v11211_v13 = vsel %vm24737_vm13, %v11209_v39, %v11210_v5  ;;  %v11249_v39 = vrot.slane %v25356_v10, 5  ;;  %v10987_v5 = vld [vmem:[#allocation2 + $0x12c] sm:$0xe] }
 0x91e   :  { %18704 = vmatmul.mubr.bf16.gmra.mrb[16].mxu1 %v16472_v41  ;;  %v11200_v41 = vrot.slane %v20370_v35, 5  ;;  %v11216_v16 = vrot.slane %v11214_v42, 4  ;;  %v11235_v35 = vrot.slane %v25317_v40, 5  ;;  %v11238_v40 = vrot.slane %v25358_v36, 5 }
 0x91f   :  { %18707 = vmatprep.mubr.bf16.mxu1 %v16473_v15  ;;  %v11197_v20 = vsel %vm24737_vm13, %v11195_v33, %v11196_v6  ;;  %v11187_v15 = vsel %vm24737_vm13, %v16428_v26, %v11186_v19  ;;  %v10983_v33 = vld [vmem:[#allocation2 + $0xfc] sm:$0xe]  ;;  %v11228_v6 = vrot.slane %v25290_v28, 5  ;;  %v16434_v28 = vrot.slane %v10984_v51, 9 }
 0x920   :  { %v16476_v12 = vcombine.low %v11187_v15, %v11190_v17  ;;  %v16477_v14 = vcombine.low %v11194_v31, %v11197_v20  ;;  %v11202_v7 = vrot.slane %v11200_v41, 4  ;;  %v11201_v55 = vsel %vm24737_vm13, %v16430_v22, %v11200_v41  ;;  %v10985_v15 = vld [vmem:[#allocation2 + $0x114] sm:$0xe] }
 0x921   :  { %v16433_v46 = vrot.slane %v10983_v33, 9  ;;  %v11218_v48 = vsel %vm24737_vm13, %v11216_v16, %v11217_v1  ;;  %v11215_v41 = vsel %vm24737_vm13, %v16432_v54, %v11214_v42  ;;  %v11231_v31 = vrot.slane %v25341_v34, 5  ;;  %v10989_v33 = vld [vmem:[#allocation2 + $0x144] sm:$0xe] }
 0x922   :  { %v11204_v19 = vsel %vm24737_vm13, %v11202_v7, %v11203_v47  ;;  %v16480_v20 = vcombine.low %v11215_v41, %v11218_v48  ;;  %v16435_v57 = vrot.slane %v10985_v15, 9  ;;  %v11242_v7 = vrot.slane %v25348_v44, 5  ;;  %v10986_v47 = vld [vmem:[#allocation2 + $0x120] sm:$0xe]  ;;  %v10990_v41 = vld [vmem:[#allocation2 + $0x150] sm:$0xe] }
 0x923   :  { %v16478_v8 = vcombine.low %v11201_v55, %v11204_v19  ;;  %v11229_v22 = vsel %vm24737_vm13, %v16434_v28, %v11228_v6  ;;  %v11251_v19 = vrot.slane %v11249_v39, 4  ;;  %v16436_v44 = vrot.slane %v10986_v47, 9 }
 0x924   :  { %v11236_v34 = vsel %vm24737_vm13, %v16435_v57, %v11235_v35  ;;  %v11244_v36 = vrot.slane %v11242_v7, 4  ;;  %v16437_v42 = vrot.slane %v10987_v5, 9  ;;  %v11252_v10 = vrot.slane %v25395_v59, 5 }
 0x925   :  { %v11259_v54 = vrot.slane %v25402_v21, 5  ;;  %v16439_v1 = vrot.slane %v10989_v33, 9  ;;  %v20238_v33 = vld [vmem:[%s27576_s4 + $0x1e8] sm:$0xff]  }
 0x926   :  { %18708 = vmatmul.mubr.bf16.gmra.mrb[20].mxu1 %v16474_v38  ;;  %v11221_v38 = vrot.slane %v25286_v4, 5  ;;  %v11224_v4 = vrot.slane %v25319_v43, 5  ;;  %v11230_v43 = vrot.slane %v11228_v6, 4  ;;  %v11253_v55 = vsel %vm24737_vm13, %v11251_v19, %v11252_v10  ;;  %v20211_v10 = vld [vmem:[#allocation2 + $0x18] sm:$0xff]  }
 0x927   :  { %18711 = vmatprep.mubr.bf16.mxu1 %v16475_v50  ;;  %v11208_v50 = vsel %vm24737_vm13, %v16431_v27, %v11207_v58  ;;  %v11250_v53 = vsel %vm24737_vm13, %v16437_v42, %v11249_v39  ;;  %v11277_v6 = vrot.slane %v25422_v62, 5  ;;  %v11280_v62 = vrot.slane %v25448_v56, 5 }
 0x928   :  { %v16479_v32 = vcombine.low %v11208_v50, %v11211_v13  ;;  %v11223_v26 = vrot.slane %v11221_v38, 4  ;;  %v11222_v29 = vsel %vm24737_vm13, %v16433_v46, %v11221_v38  ;;  %v11246_v13 = vsel %vm24737_vm13, %v11244_v36, %v11245_v30  ;;  %v28029_v30 = vld [vmem:[#allocation34_spill] sm:$0xff] }
 0x929   :  { %v11256_v38 = vrot.slane %v25378_v2, 5  ;;  %v11243_v50 = vsel %vm24737_vm13, %v16436_v44, %v11242_v7  ;;  %v16485_v16 = vcombine.low %v11250_v53, %v11253_v55  ;;  %v11279_v51 = vrot.slane %v11277_v6, 4  ;;  %v20215_v53 = vld [vmem:[#allocation2 + $0x3c] sm:$0xff]  }
 0x92a   :  { %v11225_v17 = vsel %vm24737_vm13, %v11223_v26, %v11224_v4  ;;  %v16484_v11 = vcombine.low %v11243_v50, %v11246_v13  ;;  %v11270_v4 = vrot.slane %v25400_v45, 5  ;;  %v16440_v45 = vrot.slane %v10990_v41, 9  ;;  %v28031_v13 = vld [vmem:[#allocation13_spill] sm:$0xff] }
 0x92b   :  { %v16481_v58 = vcombine.low %v11222_v29, %v11225_v17  ;;  %v11258_v59 = vrot.slane %v11256_v38, 4  ;;  %v10991_v29 = vld [vmem:[#allocation2 + $0x15c] sm:$0xe]  ;;  %v11281_v28 = vsel %vm24737_vm13, %v11279_v51, %v11280_v62  ;;  %v20218_v50 = vld [vmem:[%s27576_s4 + $0x1c8] sm:$0xff]   ;;  %v20235_v51 = vld [vmem:[#allocation2 + $0x114] sm:$0xff]  }
 0x92c   :  { %v11271_v57 = vsel %vm24737_vm13, %v16440_v45, %v11270_v4  ;;  %v20230_v41 = vld [vmem:[#allocation2 + $0xcc] sm:$0xff]   ;;  %v20236_v45 = vld [vmem:[#allocation2 + $0x120] sm:$0xff]  }
 0x92d   :  { %v11260_v46 = vsel %vm24737_vm13, %v11258_v59, %v11259_v54  ;;  %v20217_v59 = vld [vmem:[#allocation2 + $0x54] sm:$0xff]   ;;  %v20220_v54 = vld [vmem:[#allocation2 + $0x6c] sm:$0xff]   ;;  %v20240_v62 = vld [vmem:[#allocation2 + $0x144] sm:$0xff]  }
 0x92e   :  { %18712 = vmatmul.mubr.bf16.gmra.mrb[24].mxu1 %v16476_v12  ;;  %v11237_v12 = vrot.slane %v11235_v35, 4 }
 0x92f   :  { %18715 = vmatprep.mubr.bf16.mxu1 %v16477_v14  ;;  %v11232_v14 = vsel %vm24737_vm13, %v11230_v43, %v11231_v31  ;;  %v16441_v43 = vrot.slane %v10991_v29, 9  ;;  %v11291_v31 = vrot.slane %v25446_v37, 5  ;;  %v11294_v37 = vrot.slane %v25472_v3, 5  ;;  %v28028_v3 = vld [vmem:[#allocation14_spill] sm:$0xff]  ;;  %v20234_v29 = vld [vmem:[#allocation2 + $0x108] sm:$0xff]  }
 0x930   :  { %v11239_v0 = vsel %vm24737_vm13, %v11237_v12, %v11238_v40  ;;  %v16482_v18 = vcombine.low %v11229_v22, %v11232_v14  ;;  %v11284_v12 = vrot.slane %v25441_v52, 5  ;;  %v10992_v14 = vld [vmem:[#allocation2 + $0x168] sm:$0xe]  ;;  %v11287_v22 = vrot.slane %v25470_v24, 5  ;;  %v28026_v24 = vld [vmem:[#allocation27_spill] sm:$0xff] }
 0x931   :  { %v16483_v27 = vcombine.low %v11236_v34, %v11239_v0  ;;  %v10993_v0 = vld [vmem:[#allocation2 + $0x174] sm:$0xe]  ;;  %v11293_v39 = vrot.slane %v11291_v31, 4  ;;  %v16442_v52 = vrot.slane %v10992_v14, 9  ;;  %v28027_v44 = vcombine.low %v24919_v25, %v28026_v24 }
 0x932   :  { %v11286_v56 = vrot.slane %v11284_v12, 4  ;;  %v28030_v42 = vcombine.low %v28028_v3, %v28029_v30  ;;  %v20223_v25 = vld [vmem:[%s27576_s4 + $0x1d0] sm:$0xff]  }
 0x933   :  { %v11295_v47 = vsel %vm24737_vm13, %v11293_v39, %v11294_v37  ;;  %v20242_v37 = vld [vmem:[#allocation2 + $0x15c] sm:$0xff]  }
 0x934   :  { %v11288_v34 = vsel %vm24737_vm13, %v11286_v56, %v11287_v22 }
 0x936   :  { %18716 = vmatmul.mubr.bf16.gmra.mrb[28].mxu1 %v16478_v8  ;;  %v11263_v8 = vrot.slane %v25388_v63, 5  ;;  %v11266_v63 = vrot.slane %v25418_v60, 5  ;;  %v11272_v60 = vrot.slane %v11270_v4, 4  ;;  %v20222_v4 = vld [vmem:[#allocation2 + $0x84] sm:$0xff]  }
 0x937   :  { %18719 = vmatprep.mubr.bf16.mxu1 %v16479_v32  ;;  %v10988_v32 = vld [vmem:[#allocation2 + $0x138] sm:$0xe] }
 0x938   :  { %v11265_v26 = vrot.slane %v11263_v8, 4  ;;  %v16438_v2 = vrot.slane %v10988_v32, 9  ;;  %v11264_v21 = vsel %vm24737_vm13, %v16439_v1, %v11263_v8  ;;  %v20212_v8 = vld [vmem:[#allocation2 + $0x24] sm:$0xff]   ;;  %v20228_v32 = vld [vmem:[%s27576_s4 + $0x1d8] sm:$0xff]  }
 0x939   :  { %v20248_v1 = vld [vmem:[%s27576_s4 + $0x1f8] sm:$0xff]  }
 0x93a   :  { %v11267_v48 = vsel %vm24737_vm13, %v11265_v26, %v11266_v63  ;;  %v11257_v17 = vsel %vm24737_vm13, %v16438_v2, %v11256_v38  ;;  %v28032_v38 = vld [vmem:[#allocation16_spill] sm:$0xff]  ;;  %v20243_v2 = vld [vmem:[%s27576_s4 + $0x1f0] sm:$0xff]   ;;  %v20221_v63 = vld [vmem:[#allocation2 + $0x78] sm:$0xff]  }
 0x93b   :  { %v16486_v35 = vcombine.low %v11257_v17, %v11260_v46  ;;  %v28033_v55 = vcombine.low %v28031_v13, %v28032_v38  ;;  %v20219_v26 = vld [vmem:[#allocation2 + $0x60] sm:$0xff]   ;;  %v20226_v17 = vld [vmem:[#allocation2 + $0xa8] sm:$0xff]  }
 0x93c   :  { %v25707_v46 = vld [vmem:[%s27576_s4 + $0x200] sm:$0xff]  }
 0x93e   :  { %18720 = vmatmul.mubr.bf16.gmra.mrb[32].mxu1 %v16480_v20  ;;  %v16487_v20 = vcombine.low %v11264_v21, %v11267_v48  ;;  %v20224_v48 = vld [vmem:[#allocation2 + $0x90] sm:$0xff]   ;;  %v20229_v21 = vld [vmem:[#allocation2 + $0xc0] sm:$0xff]  }
 0x93f   :  { %18723 = vmatprep.mubr.bf16.mxu1 %v16481_v58  ;;  %v11273_v58 = vrot.slane %v25431_v49, 5  ;;  %v11278_v49 = vsel %vm24737_vm13, %v16441_v43, %v11277_v6  ;;  %v20225_v6 = vld [vmem:[#allocation2 + $0x9c] sm:$0xff]  }
 0x940   :  { %v16489_v7 = vcombine.low %v11278_v49, %v11281_v28  ;;  %v20239_v43 = vld [vmem:[#allocation2 + $0x138] sm:$0xff]  }
 0x941   :  { %v11274_v15 = vsel %vm24737_vm13, %v11272_v60, %v11273_v58  ;;  %v20232_v60 = vld [vmem:[#allocation2 + $0xfc] sm:$0xff]   ;;  %v20237_v58 = vld [vmem:[#allocation2 + $0x12c] sm:$0xff]  }
 0x942   :  { %v16488_v40 = vcombine.low %v11271_v57, %v11274_v15  ;;  %v20241_v15 = vld [vmem:[#allocation2 + $0x150] sm:$0xff]   ;;  %v12539_v28 = vld [vmem:[#allocation2 + $0x1c] sm:$0xf]  ;;  %v12542_v57 = vld [vmem:[#allocation2 + $0x28] sm:$0xf] }
 0x943   :  { %v12648_v56 = vshrl.u32 %v12539_v28, 16  ;;  %v12668_v22 = vshll.u32 %v12542_v57, 16 }
 0x945   :  { %v12650_v3 = vrot.slane %v12648_v56, 4 }
 0x946   :  { %18724 = vmatmul.mubr.bf16.gmra.mrb[36].mxu1 %v16482_v18  ;;  %v16443_v18 = vrot.slane %v10993_v0, 9  ;;  %v12545_v0 = vld [vmem:[#allocation2 + $0x34] sm:$0xf] }
 0x947   :  { %18727 = vmatprep.mubr.bf16.mxu1 %v16483_v27  ;;  %v11285_v27 = vsel %vm24737_vm13, %v16442_v52, %v11284_v12  ;;  %v12538_v12 = vld [vmem:[#allocation2 + $0x18] sm:$0xf] }
 0x948   :  { %v16490_v36 = vcombine.low %v11285_v27, %v11288_v34  ;;  %v11292_v5 = vsel %vm24737_vm13, %v16443_v18, %v11291_v31  ;;  %v12541_v31 = vld [vmem:[#allocation2 + $0x24] sm:$0xf]  ;;  %v12635_v49 = vshrl.u32 %v12538_v12, 16  ;;  %v12638_v14 = vshll.u32 %v12538_v12, 16  ;;  %v20244_v27 = vld [vmem:[#allocation2 + $0x168] sm:$0xff]  }
 0x949   :  { %v16491_v19 = vcombine.low %v11292_v5, %v11295_v47  ;;  %v12659_v39 = vshrl.u32 %v12541_v31, 16  ;;  %v12662_v52 = vshll.u32 %v12541_v31, 16  ;;  %v12672_v18 = vshrl.u32 %v12542_v57, 16  ;;  %v12551_v57 = vld [vmem:[#allocation2 + $0x4c] sm:$0xf] }
 0x94a   :  { %v12696_v5 = vshrl.u32 %v12545_v0, 16  ;;  %v12640_v24 = vrot.slane %v12638_v14, 5 }
 0x94b   :  { %v12661_v30 = vrot.slane %v12659_v39, 4  ;;  %v12674_v13 = vrot.slane %v12672_v18, 4  ;;  %v12553_v18 = vld [vmem:[#allocation2 + $0x54] sm:$0xf] }
 0x94e   :  { %18728 = vmatmul.mubr.bf16.gmra.mrb[40].mxu1 %v16484_v11  ;;  %v20214_v11 = vld [vmem:[#allocation2 + $0x30] sm:$0xff]  }
 0x94f   :  { %18731 = vmatprep.mubr.bf16.mxu1 %v16485_v16  ;;  %v20216_v16 = vld [vmem:[#allocation2 + $0x48] sm:$0xff]  }
 0x956   :  { %18732 = vmatmul.mubr.bf16.gmra.mrb[44].mxu1 %v16486_v35  ;;  %v20227_v35 = vld [vmem:[#allocation2 + $0xb4] sm:$0xff]  }
 0x957   :  { %18735 = vmatprep.mubr.bf16.mxu1 %v16487_v20  ;;  %v20231_v20 = vld [vmem:[#allocation2 + $0xf0] sm:$0xff]  }
 0x95e   :  { %18736 = vmatmul.mubr.bf16.gmra.mrb[48].mxu1 %v16488_v40  ;;  %v12544_v40 = vld [vmem:[#allocation2 + $0x30] sm:$0xf] }
 0x95f   :  { %18739 = vmatprep.mubr.bf16.mxu1 %v16489_v7  ;;  %v12644_v7 = vshll.u32 %v12539_v28, 16  ;;  %v12683_v34 = vshrl.u32 %v12544_v40, 16  ;;  %v12686_v47 = vshll.u32 %v12544_v40, 16 }
 0x961   :  { %v12685_v38 = vrot.slane %v12683_v34, 4 }
 0x966   :  { %18740 = vmatmul.mubr.bf16.gmra.mrb[52].mxu1 %v16490_v36  ;;  %v12692_v36 = vshll.u32 %v12545_v0, 16 }
 0x967   :  { %18743 = vmatprep.mubr.bf16.mxu1 %v16491_v19  ;;  %v12637_v19 = vrot.slane %v12635_v49, 4 }
 0x96e   :  { %18744 = vmatmul.mubr.bf16.gmra.mrb[56].mxu1 %v28027_v44  ;;  %v25710_v44 = vrot.slane %v12644_v7, 5 }
 0x96f   :  { %18747 = vmatprep.mubr.bf16.mxu1 %v28030_v42  ;;  %v12664_v42 = vrot.slane %v12662_v52, 5 }
 0x976   :  { %18748 = vmatmul.mubr.bf16.gmra.mrb[60].mxu1 %v28033_v55  ;;  %v12688_v55 = vrot.slane %v12686_v47, 5 }
 0x977   :  { %18767 = vmatprep.mubr.bf16.mxu1 %v20211_v10  ;;  %v25712_v10 = vrot.slane %v12668_v22, 5 }
 0x97e   :  { %18768 = vmatmul.mubr.bf16.vlgmr.msra.gmra.mrb[0].mxu1 %v20212_v8  ;;  %v12540_v8 = vld [vmem:[#allocation2 + $0x20] sm:$0x1] }
 0x97f   :  { %18771 = vmatprep.mubr.bf16.mxu1 %v20214_v11  ;;  %18832 = vmatpush3.bf16.msra.mxu1 %v25566_v61  ;;  %v20233_v61 = vld [vmem:[%s27576_s4 + $0x1e0] sm:$0xff]   ;;  %v12698_v11 = vrot.slane %v12696_v5, 4  ;;  %v12554_v5 = vld [vmem:[#allocation2 + $0x58] sm:$0xf] }
 0x980   :  { %18833 = vmatprep.subr.bf16.mxu1 %v20218_v50 }
 0x983   :  { %18834 = vmatpush3.bf16.msra.mxu1 %v20218_v50  ;;  %v25714_v50 = vrot.slane %v12692_v36, 5  ;;  %v12740_v36 = vshll.u32 %v12551_v57, 16 }
 0x984   :  { %18835 = vmatprep.subr.bf16.mxu1 %v20223_v25 }
 0x986   :  { %18772 = vmatmul.mubr.bf16.gmra.mrb[4].mxu1 %v20215_v53  ;;  %v12641_v53 = vor.u32 %v12640_v24, %v12637_v19  ;;  %v20249_v19 = vld [vmem:[#allocation2 + $0x198] sm:$0xff]  }
 0x987   :  { %18775 = vmatprep.mubr.bf16.mxu1 %v20216_v16  ;;  %18836 = vmatpush3.bf16.msra.mxu1 %v20223_v25  ;;  %v12547_v25 = vld [vmem:[#allocation2 + $0x3c] sm:$0xf]  ;;  %v12651_v16 = vor.u32 %v12650_v3, %v25710_v44 }
 0x988   :  { %18837 = vmatprep.subr.bf16.mxu1 %v20228_v32 }
 0x98b   :  { %18838 = vmatpush3.bf16.msra.mxu1 %v20228_v32  ;;  %v12543_v32 = vld [vmem:[#allocation2 + $0x2c] sm:$0x1] }
 0x98c   :  { %18839 = vmatprep.subr.bf16.mxu1 %v20233_v61 }
 0x98e   :  { %18776 = vmatmul.mubr.bf16.gmra.mrb[8].mxu1 %v20217_v59  ;;  %v12675_v59 = vor.u32 %v12674_v13, %v25712_v10  ;;  %v12758_v13 = vshll.u32 %v12553_v18, 16 }
 0x98f   :  { %18779 = vmatprep.mubr.bf16.mxu1 %v20219_v26  ;;  %18840 = vmatpush3.bf16.msra.mxu1 %v20233_v61  ;;  %v12665_v61 = vor.u32 %v12664_v42, %v12661_v30  ;;  %v20245_v26 = vld [vmem:[#allocation2 + $0x174] sm:$0xff]   ;;  %v12744_v30 = vshrl.u32 %v12551_v57, 16 }
 0x990   :  { %18841 = vmatprep.subr.bf16.mxu1 %v20238_v33 }
 0x993   :  { %18842 = vmatpush3.bf16.msra.mxu1 %v20238_v33  ;;  %v12548_v33 = vld [vmem:[#allocation2 + $0x40] sm:$0xf] }
 0x994   :  { %18843 = vmatprep.subr.bf16.mxu1 %v20243_v2 }
 0x996   :  { %18780 = vmatmul.mubr.bf16.gmra.mrb[12].mxu1 %v20220_v54  ;;  %v12546_v54 = vld [vmem:[#allocation2 + $0x38] sm:$0x1] }
 0x997   :  { %18783 = vmatprep.mubr.bf16.mxu1 %v20221_v63  ;;  %18844 = vmatpush3.bf16.msra.mxu1 %v20243_v2  ;;  %v12654_v2 = vshll.u32 %v12540_v8, 16  ;;  %v12707_v63 = vshrl.u32 %v12547_v25, 16  ;;  %v12764_v8 = vshll.u32 %v12554_v5, 16 }
 0x998   :  { %18845 = vmatprep.subr.bf16.mxu1 %v20248_v1 }
 0x99b   :  { %18846 = vmatpush3.bf16.msra.mxu1 %v20248_v1  ;;  %v12689_v1 = vor.u32 %v12688_v55, %v12685_v38  ;;  %v12552_v55 = vld [vmem:[#allocation2 + $0x50] sm:$0x1] }
 0x99c   :  { %18911 = vmatprep.subr.bf16.mxu1 %v25707_v46 }
 0x99e   :  { %18784 = vmatmul.mubr.bf16.gmra.mrb[16].mxu1 %v20222_v4  ;;  %v12710_v4 = vshll.u32 %v12547_v25, 16 }
 0x99f   :  { %18787 = vmatprep.mubr.bf16.mxu1 %v20224_v48  ;;  %v20246_v48 = vld [vmem:[#allocation2 + $0x180] sm:$0xff]  }
 0x9a0   :  { %v12712_v12 = vrot.slane %v12710_v4, 5 }
 0x9a6   :  { %18788 = vmatmul.mubr.bf16.gmra.mrb[20].mxu1 %v20225_v6  ;;  %v12678_v6 = vshll.u32 %v12543_v32, 16  ;;  %v12555_v32 = vld [vmem:[#allocation2 + $0x5c] sm:$0x1] }
 0x9a7   :  { %18791 = vmatprep.mubr.bf16.mxu1 %v20226_v17  ;;  %v12699_v17 = vor.u32 %v12698_v11, %v25714_v50 }
 0x9a8   :  { %v12680_v28 = vrot.slane %v12678_v6, 5 }
 0x9a9   :  { %v12700_v31 = vrot.slane %v12699_v17, 4  ;;  %v12750_v17 = vshll.u32 %v12552_v55, 16 }
 0x9ae   :  { %18792 = vmatmul.mubr.bf16.gmra.mrb[24].mxu1 %v20227_v35  ;;  %v12642_v35 = vrot.slane %v12641_v53, 4 }
 0x9af   :  { %18795 = vmatprep.mubr.bf16.mxu1 %v20229_v21  ;;  %v12716_v21 = vshll.u32 %v12548_v33, 16 }
 0x9b0   :  { %v12647_v14 = vsel %vm24320_vm10, %v12642_v35, %v25710_v44  ;;  %v25749_v35 = vrot.slane %v12764_v8, 5 }
 0x9b1   :  { %v25722_v7 = vrot.slane %v12716_v21, 5 }
 0x9b6   :  { %18796 = vmatmul.mubr.bf16.gmra.mrb[28].mxu1 %v20230_v41  ;;  %v12720_v41 = vshrl.u32 %v12548_v33, 16 }
 0x9b7   :  { %18799 = vmatprep.mubr.bf16.mxu1 %v20231_v20  ;;  %v12550_v20 = vld [vmem:[#allocation2 + $0x48] sm:$0xf] }
 0x9b8   :  { %v12731_v40 = vshrl.u32 %v12550_v20, 16  ;;  %v12734_v49 = vshll.u32 %v12550_v20, 16  ;;  %v12722_v56 = vrot.slane %v12720_v41, 4  ;;  %v12560_v20 = vld [vmem:[#allocation2 + $0x70] sm:$0xf] }
 0x9b9   :  { %v12812_v57 = vshll.u32 %v12560_v20, 16 }
 0x9ba   :  { %v12733_v44 = vrot.slane %v12731_v40, 4  ;;  %v12736_v3 = vrot.slane %v12734_v49, 5  ;;  %v12723_v42 = vor.u32 %v12722_v56, %v25722_v7  ;;  %v12816_v40 = vshrl.u32 %v12560_v20, 16  ;;  %v12563_v49 = vld [vmem:[#allocation2 + $0x7c] sm:$0xf] }
 0x9bc   :  { %v12737_v33 = vor.u32 %v12736_v3, %v12733_v44  ;;  %v12818_v44 = vrot.slane %v12816_v40, 4  ;;  %v12565_v3 = vld [vmem:[#allocation2 + $0x84] sm:$0xf] }
 0x9be   :  { %18800 = vmatmul.mubr.bf16.gmra.mrb[32].mxu1 %v20232_v60  ;;  %v12652_v60 = vrot.slane %v12651_v16, 4  ;;  %v12768_v16 = vshrl.u32 %v12554_v5, 16 }
 0x9bf   :  { %18803 = vmatprep.mubr.bf16.mxu1 %v20234_v29  ;;  %v12666_v29 = vrot.slane %v12665_v61, 4  ;;  %v12557_v61 = vld [vmem:[#allocation2 + $0x64] sm:$0xf] }
 0x9c0   :  { %v12788_v41 = vshll.u32 %v12557_v61, 16 }
 0x9c1   :  { %v12671_v39 = vsel %vm24320_vm10, %v12666_v29, %v25712_v10  ;;  %v12755_v10 = vshrl.u32 %v12553_v18, 16  ;;  %v12792_v29 = vshrl.u32 %v12557_v61, 16  ;;  %v12561_v61 = vld [vmem:[#allocation2 + $0x74] sm:$0x1] }
 0x9c2   :  { %v25758_v56 = vrot.slane %v12788_v41, 5 }
 0x9c3   :  { %v12757_v4 = vrot.slane %v12755_v10, 4 }
 0x9c6   :  { %18804 = vmatmul.mubr.bf16.gmra.mrb[36].mxu1 %v20235_v51  ;;  %v12676_v51 = vrot.slane %v12675_v59, 4 }
 0x9c7   :  { %18807 = vmatprep.mubr.bf16.mxu1 %v20236_v45  ;;  %v12702_v45 = vshll.u32 %v12546_v54, 16  ;;  %v12559_v54 = vld [vmem:[#allocation2 + $0x6c] sm:$0xf] }
 0x9c8   :  { %v12681_v52 = vsel %vm24320_vm10, %v12676_v51, %v12680_v28  ;;  %v12803_v51 = vshrl.u32 %v12559_v54, 16 }
 0x9c9   :  { %v12704_v22 = vrot.slane %v12702_v45, 5  ;;  %v25737_v11 = vcombine.low %v12671_v39, %v12681_v52  ;;  %v12806_v45 = vshll.u32 %v12559_v54, 16  ;;  %v12851_v54 = vshrl.u32 %v12565_v3, 16 }
 0x9ca   :  { %v12805_v18 = vrot.slane %v12803_v51, 4 }
 0x9cb   :  { %v12705_v24 = vsel %vm24320_vm10, %v12700_v31, %v12704_v22  ;;  %v12794_v22 = vrot.slane %v12792_v29, 4  ;;  %v12822_v29 = vshll.u32 %v12561_v61, 16 }
 0x9ce   :  { %18808 = vmatmul.mubr.bf16.gmra.mrb[40].mxu1 %v20237_v58  ;;  %v12656_v58 = vrot.slane %v12654_v2, 5  ;;  %v12746_v2 = vrot.slane %v12744_v30, 4 }
 0x9cf   :  { %18811 = vmatprep.mubr.bf16.mxu1 %v20239_v43  ;;  %v12690_v43 = vrot.slane %v12689_v1, 4  ;;  %v20250_v1 = vld [vmem:[#allocation2 + $0x1a4] sm:$0xff]  }
 0x9d0   :  { %v12657_v0 = vsel %vm24320_vm10, %v12652_v60, %v12656_v58  ;;  %v12770_v60 = vrot.slane %v12768_v16, 4  ;;  %v12562_v58 = vld [vmem:[#allocation2 + $0x78] sm:$0xf]  ;;  %v12566_v16 = vld [vmem:[#allocation2 + $0x88] sm:$0xf] }
 0x9d1   :  { %v12695_v34 = vsel %vm24320_vm10, %v12690_v43, %v25714_v50  ;;  %v16575_v38 = vcombine.low %v12647_v14, %v12657_v0  ;;  %v12556_v50 = vld [vmem:[#allocation2 + $0x60] sm:$0xf]  ;;  %v12827_v0 = vshrl.u32 %v12562_v58, 16  ;;  %v12830_v39 = vshll.u32 %v12562_v58, 16 }
 0x9d2   :  { %v25739_v25 = vcombine.low %v12695_v34, %v12705_v24  ;;  %v12779_v6 = vshrl.u32 %v12556_v50, 16  ;;  %v12782_v21 = vshll.u32 %v12556_v50, 16  ;;  %v12771_v52 = vor.u32 %v12770_v60, %v25749_v35  ;;  %v20252_v50 = vld [vmem:[%s27576_s4 + $0x208] sm:$0xff]  }
 0x9d3   :  { %v25765_v24 = vrot.slane %v12812_v57, 5  ;;  %v12860_v41 = vshll.u32 %v12566_v16, 16 }
 0x9d4   :  { %v12781_v31 = vrot.slane %v12779_v6, 4  ;;  %v12784_v14 = vrot.slane %v12782_v21, 5  ;;  %v12772_v55 = vrot.slane %v12771_v52, 4  ;;  %v12564_v6 = vld [vmem:[#allocation2 + $0x80] sm:$0x1]  ;;  %v20254_v52 = vld [vmem:[%s27576_s4 + $0x218] sm:$0xff]  }
 0x9d5   :  { %v12846_v51 = vshll.u32 %v12564_v6, 16  ;;  %v25807_v40 = vrot.slane %v12860_v41, 5 }
 0x9d6   :  { %18812 = vmatmul.mubr.bf16.gmra.mrb[44].mxu1 %v20240_v62  ;;  %v12549_v62 = vld [vmem:[#allocation2 + $0x44] sm:$0x1]  ;;  %v12785_v10 = vor.u32 %v12784_v14, %v12781_v31  ;;  %v12568_v14 = vld [vmem:[#allocation2 + $0x90] sm:$0xf] }
 0x9d7   :  { %18815 = vmatprep.mubr.bf16.mxu1 %v20241_v15  ;;  %v12709_v15 = vrot.slane %v12707_v63, 4  ;;  %v25747_v63 = vrot.slane %v12723_v42, 4  ;;  %v12558_v42 = vld [vmem:[#allocation2 + $0x68] sm:$0x1] }
 0x9d9   :  { %v12713_v47 = vor.u32 %v12712_v12, %v12709_v15  ;;  %v12774_v12 = vshll.u32 %v12555_v32, 16 }
 0x9db   :  { %v25743_v59 = vrot.slane %v12713_v47, 4  ;;  %v12752_v47 = vrot.slane %v12750_v17, 5  ;;  %v12776_v8 = vrot.slane %v12774_v12, 5  ;;  %v25786_v17 = vrot.slane %v12785_v10, 4 }
 0x9dd   :  { %v12719_v43 = vsel %vm24320_vm10, %v25743_v59, %v25722_v7  ;;  %v12777_v20 = vsel %vm24320_vm10, %v12772_v55, %v12776_v8  ;;  %v12824_v59 = vrot.slane %v12822_v29, 5 }
 0x9de   :  { %18816 = vmatmul.mubr.bf16.gmra.mrb[48].mxu1 %v20242_v37  ;;  %v20247_v37 = vld [vmem:[#allocation2 + $0x18c] sm:$0xff]  }
 0x9df   :  { %18819 = vmatprep.mubr.bf16.mxu1 %v20244_v27  ;;  %v12726_v27 = vshll.u32 %v12549_v62, 16  ;;  %v25755_v62 = vrot.slane %v12737_v33, 4 }
 0x9e1   :  { %v25741_v53 = vrot.slane %v12726_v27, 5  ;;  %v12836_v27 = vshll.u32 %v12563_v49, 16 }
 0x9e3   :  { %v12729_v34 = vsel %vm24320_vm10, %v25747_v63, %v25741_v53  ;;  %v12795_v53 = vor.u32 %v12794_v22, %v25758_v56  ;;  %v25775_v33 = vrot.slane %v12836_v27, 5 }
 0x9e5   :  { %v25790_v60 = vrot.slane %v12795_v53, 4  ;;  %v20255_v53 = vld [vmem:[%s27576_s4 + $0x220] sm:$0xff]  }
 0x9e6   :  { %18820 = vmatmul.mubr.bf16.gmra.mrb[52].mxu1 %v20245_v26  ;;  %v25745_v26 = vrot.slane %v12740_v36, 5  ;;  %v12840_v36 = vshrl.u32 %v12563_v49, 16 }
 0x9e7   :  { %18823 = vmatprep.mubr.bf16.mxu1 %v20246_v48  ;;  %v12760_v48 = vrot.slane %v12758_v13, 5  ;;  %v12829_v13 = vrot.slane %v12827_v0, 4 }
 0x9e8   :  { %v12747_v15 = vor.u32 %v12746_v2, %v25745_v26  ;;  %v12743_v30 = vsel %vm24320_vm10, %v25755_v62, %v25745_v26  ;;  %v12842_v2 = vrot.slane %v12840_v36, 4  ;;  %v12854_v26 = vshll.u32 %v12565_v3, 16 }
 0x9e9   :  { %v12761_v28 = vor.u32 %v12760_v48, %v12757_v4  ;;  %v12798_v4 = vshll.u32 %v12558_v42, 16  ;;  %v12819_v48 = vor.u32 %v12818_v44, %v25765_v24  ;;  %v16578_v62 = vcombine.low %v12719_v43, %v12729_v34  ;;  %v12569_v43 = vld [vmem:[#allocation2 + $0x94] sm:$0xf]  ;;  %v12574_v44 = vld [vmem:[#allocation2 + $0xa8] sm:$0xf] }
 0x9ea   :  { %v12748_v5 = vrot.slane %v12747_v15, 4  ;;  %v12856_v58 = vrot.slane %v12854_v26, 5  ;;  %v12884_v42 = vshll.u32 %v12569_v43, 16  ;;  %v12888_v10 = vshrl.u32 %v12569_v43, 16  ;;  %v20257_v43 = vld [vmem:[%s27576_s4 + $0x230] sm:$0xff]  }
 0x9eb   :  { %v12800_v15 = vrot.slane %v12798_v4, 5  ;;  %v12820_v12 = vrot.slane %v12819_v48, 4  ;;  %v12923_v61 = vshrl.u32 %v12574_v44, 16 }
 0x9ec   :  { %v25840_v4 = vrot.slane %v12884_v42, 5  ;;  %v12890_v48 = vrot.slane %v12888_v10, 4 }
 0x9ed   :  { %v12801_v7 = vsel %vm24320_vm10, %v25790_v60, %v12800_v15  ;;  %v12825_v27 = vsel %vm24320_vm10, %v12820_v12, %v12824_v59  ;;  %v12925_v29 = vrot.slane %v12923_v61, 4  ;;  %v12578_v15 = vld [vmem:[#allocation2 + $0xb8] sm:$0xf]  ;;  %v12576_v59 = vld [vmem:[#allocation2 + $0xb0] sm:$0x1] }
 0x9ee   :  { %18824 = vmatmul.mubr.bf16.gmra.mrb[56].mxu1 %v20247_v37  ;;  %v12808_v37 = vrot.slane %v12806_v45, 5  ;;  %v12853_v45 = vrot.slane %v12851_v54, 4  ;;  %v12579_v61 = vld [vmem:[#allocation2 + $0xbc] sm:$0x1] }
 0x9ef   :  { %18827 = vmatprep.mubr.bf16.mxu1 %v20249_v19  ;;  %v12762_v19 = vrot.slane %v12761_v28, 4  ;;  %v25803_v28 = vld [vmem:[#allocation2 + $0x8c] sm:$0x1] }
 0x9f0   :  { %v12809_v32 = vor.u32 %v12808_v37, %v12805_v18  ;;  %v12848_v37 = vrot.slane %v12846_v51, 5  ;;  %v12857_v34 = vor.u32 %v12856_v58, %v12853_v45  ;;  %v12870_v36 = vshll.u32 %v25803_v28, 16 }
 0x9f1   :  { %v12767_v63 = vsel %vm24320_vm10, %v12762_v19, %v25749_v35  ;;  %v12878_v19 = vshll.u32 %v12568_v14, 16 }
 0x9f2   :  { %v25792_v35 = vrot.slane %v12809_v32, 4  ;;  %v16580_v0 = vcombine.low %v12767_v63, %v12777_v20  ;;  %v20256_v20 = vld [vmem:[%s27576_s4 + $0x228] sm:$0xff]   ;;  %v25847_v45 = vrot.slane %v12870_v36, 5 }
 0x9f3   :  { %v12880_v54 = vrot.slane %v12878_v19, 5 }
 0x9f4   :  { %v12815_v22 = vsel %vm24320_vm10, %v25792_v35, %v25765_v24 }
 0x9f5   :  { %v16582_v35 = vcombine.low %v12815_v22, %v12825_v27 }
 0x9f6   :  { %18828 = vmatmul.mubr.bf16.gmra.mrb[60].mxu1 %v20250_v1  ;;  %v12753_v1 = vsel %vm24320_vm10, %v12748_v5, %v12752_v47  ;;  %v12572_v47 = vld [vmem:[#allocation2 + $0xa0] sm:$0xf]  ;;  %v12875_v5 = vshrl.u32 %v12568_v14, 16 }
 0x9f7   :  { %18847 = vmatprep.mubr.bf16.mxu1 %v16575_v38  ;;  %v12832_v38 = vrot.slane %v12830_v39, 5  ;;  %v16579_v31 = vcombine.low %v12743_v30, %v12753_v1  ;;  %v12791_v39 = vsel %vm24320_vm10, %v25786_v17, %v25758_v56  ;;  %v12571_v56 = vld [vmem:[#allocation2 + $0x9c] sm:$0xf]  ;;  %v12570_v30 = vld [vmem:[#allocation2 + $0x98] sm:$0x1]  ;;  %v12908_v8 = vshll.u32 %v12572_v47, 16 }
 0x9f8   :  { %v12902_v55 = vshll.u32 %v12571_v56, 16  ;;  %v12894_v6 = vshll.u32 %v12570_v30, 16  ;;  %v16581_v60 = vcombine.low %v12791_v39, %v12801_v7 }
 0x9f9   :  { %v12833_v21 = vor.u32 %v12832_v38, %v12829_v13  ;;  %v12575_v13 = vld [vmem:[#allocation2 + $0xac] sm:$0xf]  ;;  %v12899_v38 = vshrl.u32 %v12571_v56, 16  ;;  %v25842_v41 = vrot.slane %v12908_v8, 5 }
 0x9fa   :  { %v12932_v26 = vshll.u32 %v12575_v13, 16  ;;  %v12936_v1 = vshrl.u32 %v12575_v13, 16  ;;  %v25860_v14 = vrot.slane %v12894_v6, 5  ;;  %v20258_v13 = vld [vmem:[%s27576_s4 + $0x238] sm:$0xff]  }
 0x9fb   :  { %v25805_v57 = vrot.slane %v12833_v21, 4  ;;  %v12901_v17 = vrot.slane %v12899_v38, 4  ;;  %v12904_v21 = vrot.slane %v12902_v55, 5 }
 0x9fc   :  { %v25849_v58 = vrot.slane %v12932_v26, 5 }
 0x9fd   :  { %v12839_v24 = vsel %vm24320_vm10, %v25805_v57, %v25775_v33  ;;  %v12580_v57 = vld [vmem:[#allocation2 + $0xc0] sm:$0xf]  ;;  %v12905_v39 = vor.u32 %v12904_v21, %v12901_v17  ;;  %v12587_v21 = vld [vmem:[#allocation2 + $0xf4] sm:$0xf] }
 0x9fe   :  { %18848 = vmatmul.mubr.bf16.vlgmr.msra.gmra.mrb[0].mxu1 %v25737_v11  ;;  %v12864_v11 = vshrl.u32 %v12566_v16, 16  ;;  %v25836_v16 = vrot.slane %v12857_v34, 4  ;;  %v12581_v34 = vld [vmem:[#allocation2 + $0xc4] sm:$0xf]  ;;  %v12971_v27 = vshrl.u32 %v12580_v57, 16  ;;  %v12974_v36 = vshll.u32 %v12580_v57, 16 }
 0x9ff   :  { %18851 = vmatprep.mubr.bf16.mxu1 %v25739_v25  ;;  %18912 = vmatpush3.bf16.msra.mxu1 %v25707_v46  ;;  %v20253_v25 = vld [vmem:[%s27576_s4 + $0x210] sm:$0xff]   ;;  %v12843_v46 = vor.u32 %v12842_v2, %v25775_v33  ;;  %v12926_v33 = vshll.u32 %v12574_v44, 16  ;;  %v12877_v2 = vrot.slane %v12875_v5, 4  ;;  %v12980_v42 = vshll.u32 %v12581_v34, 16 }
 0xa00   :  { %18913 = vmatprep.subr.bf16.mxu1 %v20252_v50  ;;  %v12866_v49 = vrot.slane %v12864_v11, 4  ;;  %v12863_v12 = vsel %vm24320_vm10, %v25836_v16, %v25807_v40  ;;  %v12984_v10 = vshrl.u32 %v12581_v34, 16  ;;  %v25899_v57 = vld [vmem:[#allocation2 + $0xd0] sm:$0xf] }
 0xa01   :  { %v12844_v18 = vrot.slane %v12843_v46, 4  ;;  %v12577_v46 = vld [vmem:[#allocation2 + $0xb4] sm:$0xf]  ;;  %v12881_v28 = vor.u32 %v12880_v54, %v12877_v2  ;;  %v12973_v2 = vrot.slane %v12971_v27, 4  ;;  %v12976_v54 = vrot.slane %v12974_v36, 5 }
 0xa02   :  { %v12867_v3 = vor.u32 %v12866_v49, %v25807_v40  ;;  %v12947_v22 = vshrl.u32 %v12577_v46, 16  ;;  %v25878_v6 = vrot.slane %v12980_v42, 5  ;;  %v12986_v17 = vrot.slane %v12984_v10, 4 }
 0xa03   :  { %18914 = vmatpush3.bf16.msra.mxu1 %v20252_v50  ;;  %v12912_v50 = vshrl.u32 %v12572_v47, 16  ;;  %v12849_v32 = vsel %vm24320_vm10, %v12844_v18, %v12848_v37  ;;  %v12950_v18 = vshll.u32 %v12577_v46, 16  ;;  %v12956_v37 = vshll.u32 %v12578_v15, 16 }
 0xa04   :  { %18915 = vmatprep.subr.bf16.mxu1 %v20253_v25  ;;  %v25838_v63 = vrot.slane %v12867_v3, 4  ;;  %v16583_v51 = vcombine.low %v12839_v24, %v12849_v32  ;;  %v12960_v47 = vshrl.u32 %v12578_v15, 16  ;;  %v12882_v5 = vrot.slane %v12881_v28, 4 }
 0xa05   :  { %v12914_v11 = vrot.slane %v12912_v50, 4  ;;  %v12942_v24 = vshll.u32 %v12576_v59, 16  ;;  %v12906_v3 = vrot.slane %v12905_v39, 4  ;;  %v12949_v55 = vrot.slane %v12947_v22, 4  ;;  %v25902_v22 = vld [vmem:[#allocation2 + $0x100] sm:$0xf] }
 0xa06   :  { %18852 = vmatmul.mubr.bf16.gmra.mrb[4].mxu1 %v16578_v62  ;;  %v12938_v62 = vrot.slane %v12936_v1, 4  ;;  %v12873_v49 = vsel %vm24320_vm10, %v25838_v63, %v25847_v45  ;;  %v12952_v8 = vrot.slane %v12950_v18, 5  ;;  %v25870_v50 = vrot.slane %v12956_v37, 5 }
 0xa07   :  { %18855 = vmatprep.mubr.bf16.mxu1 %v16579_v31  ;;  %18916 = vmatpush3.bf16.msra.mxu1 %v20253_v25  ;;  %v12928_v25 = vrot.slane %v12926_v33, 5  ;;  %v12891_v31 = vor.u32 %v12890_v48, %v25840_v4  ;;  %v12915_v7 = vor.u32 %v12914_v11, %v25842_v41  ;;  %v12962_v33 = vrot.slane %v12960_v47, 4 }
 0xa08   :  { %18917 = vmatprep.subr.bf16.mxu1 %v20254_v52  ;;  %v12939_v56 = vor.u32 %v12938_v62, %v25849_v58  ;;  %v12887_v26 = vsel %vm24320_vm10, %v12882_v5, %v25840_v4  ;;  %v12944_v48 = vrot.slane %v12942_v24, 5  ;;  %v12953_v46 = vor.u32 %v12952_v8, %v12949_v55  ;;  %v25896_v62 = vld [vmem:[#allocation2 + $0xc8] sm:$0x1]  ;;  %v25920_v55 = vld [vmem:[#allocation2 + $0x104] sm:$0x1] }
 0xa09   :  { %v12892_v19 = vrot.slane %v12891_v31, 4  ;;  %v12916_v30 = vrot.slane %v12915_v7, 4  ;;  %v12977_v45 = vor.u32 %v12976_v54, %v12973_v2  ;;  %v13028_v15 = vshll.u32 %v12587_v21, 16  ;;  %v12583_v31 = vld [vmem:[#allocation2 + $0xcc] sm:$0xf] }
 0xa0a   :  { %v12940_v32 = vrot.slane %v12939_v56, 4  ;;  %v12954_v40 = vrot.slane %v12953_v46, 4  ;;  %v12995_v18 = vshrl.u32 %v12583_v31, 16  ;;  %v12998_v37 = vshll.u32 %v12583_v31, 16  ;;  %v12592_v8 = vld [vmem:[#allocation2 + $0x108] sm:$0xf] }
 0xa0b   :  { %18918 = vmatpush3.bf16.msra.mxu1 %v20254_v52  ;;  %v12929_v52 = vor.u32 %v12928_v25, %v12925_v29  ;;  %v12897_v1 = vsel %vm24320_vm10, %v12892_v19, %v25860_v14  ;;  %v12966_v29 = vshll.u32 %v12579_v61, 16  ;;  %v13004_v34 = vshll.u32 %v25899_v57, 16  ;;  %v25908_v19 = vld [vmem:[#allocation2 + $0xf8] sm:$0x1]  ;;  %v25924_v2 = vld [vmem:[#allocation2 + $0x10c] sm:$0xf] }
 0xa0c   :  { %18919 = vmatprep.subr.bf16.mxu1 %v20255_v53  ;;  %v12945_v25 = vsel %vm24320_vm10, %v12940_v32, %v12944_v48  ;;  %v16585_v28 = vcombine.low %v12887_v26, %v12897_v1  ;;  %v13008_v56 = vshrl.u32 %v25899_v57, 16  ;;  %v25906_v36 = vrot.slane %v13028_v15, 5  ;;  %v25928_v54 = vld [vmem:[#allocation2 + $0xd4] sm:$0x1] }
 0xa0d   :  { %v12930_v38 = vrot.slane %v12929_v52, 4  ;;  %v12968_v59 = vrot.slane %v12966_v29, 5  ;;  %v12589_v52 = vld [vmem:[#allocation2 + $0xfc] sm:$0xf]  ;;  %v12959_v42 = vsel %vm24320_vm10, %v12954_v40, %v25870_v50  ;;  %v13000_v32 = vrot.slane %v12998_v37, 5 }
 0xa0e   :  { %18856 = vmatmul.mubr.bf16.gmra.mrb[8].mxu1 %v16580_v0  ;;  %v12573_v0 = vld [vmem:[#allocation2 + $0xa4] sm:$0x1]  ;;  %v13043_v5 = vshrl.u32 %v12589_v52, 16  ;;  %v13046_v24 = vshll.u32 %v12589_v52, 16  ;;  %v25922_v61 = vrot.slane %v13004_v34, 5  ;;  %v13038_v1 = vshll.u32 %v25908_v19, 16 }
 0xa0f   :  { %18859 = vmatprep.mubr.bf16.mxu1 %v16581_v60  ;;  %18920 = vmatpush3.bf16.msra.mxu1 %v20255_v53  ;;  %v12918_v44 = vshll.u32 %v12573_v0, 16  ;;  %v12586_v53 = vld [vmem:[#allocation2 + $0xf0] sm:$0xf]  ;;  %v12911_v60 = vsel %vm24320_vm10, %v12906_v3, %v25842_v41  ;;  %v16584_v41 = vcombine.low %v12863_v12, %v12873_v49  ;;  %v12978_v12 = vrot.slane %v12977_v45, 4  ;;  %v12595_v15 = vld [vmem:[#allocation2 + $0x114] sm:$0xf] }
 0xa10   :  { %18921 = vmatprep.subr.bf16.mxu1 %v20256_v20  ;;  %v13019_v11 = vshrl.u32 %v12586_v53, 16  ;;  %v12990_v49 = vshll.u32 %v25896_v62, 16  ;;  %v13052_v3 = vshll.u32 %v25902_v22, 16  ;;  %v13080_v46 = vshrl.u32 %v25924_v2, 16  ;;  %v25952_v40 = vld [vmem:[#allocation2 + $0x124] sm:$0xf] }
 0xa11   :  { %v12920_v63 = vrot.slane %v12918_v44, 5  ;;  %v13091_v34 = vshrl.u32 %v12595_v15, 16 }
 0xa12   :  { %v13021_v14 = vrot.slane %v13019_v11, 4  ;;  %v13062_v11 = vshll.u32 %v25920_v55, 16  ;;  %v13082_v37 = vrot.slane %v13080_v46, 4 }
 0xa13   :  { %18922 = vmatpush3.bf16.msra.mxu1 %v20256_v20  ;;  %v13022_v20 = vshll.u32 %v12586_v53, 16  ;;  %v12921_v4 = vsel %vm24320_vm10, %v12916_v30, %v12920_v63  ;;  %v13056_v30 = vshrl.u32 %v25902_v22, 16  ;;  %v12997_v53 = vrot.slane %v12995_v18, 4  ;;  %v25954_v18 = vld [vmem:[#allocation2 + $0x110] sm:$0x1] }
 0xa14   :  { %18923 = vmatprep.subr.bf16.mxu1 %v20257_v43  ;;  %v16586_v39 = vcombine.low %v12911_v60, %v12921_v4  ;;  %v13045_v63 = vrot.slane %v13043_v5, 4  ;;  %v13070_v60 = vshll.u32 %v12592_v8, 16  ;;  %v13076_v4 = vshll.u32 %v25924_v2, 16 }
 0xa15   :  { %v13024_v0 = vrot.slane %v13022_v20, 5  ;;  %v13067_v20 = vshrl.u32 %v12592_v8, 16 }
 0xa16   :  { %18860 = vmatmul.mubr.bf16.gmra.mrb[12].mxu1 %v16582_v35  ;;  %v12935_v35 = vsel %vm24320_vm10, %v12930_v38, %v25849_v58  ;;  %v12987_v58 = vor.u32 %v12986_v17, %v25878_v6  ;;  %v12992_v38 = vrot.slane %v12990_v49, 5  ;;  %v25934_v17 = vrot.slane %v13052_v3, 5 }
 0xa17   :  { %18863 = vmatprep.mubr.bf16.mxu1 %v16583_v51  ;;  %18924 = vmatpush3.bf16.msra.mxu1 %v20257_v43  ;;  %v12963_v51 = vor.u32 %v12962_v33, %v25870_v50  ;;  %v16587_v7 = vcombine.low %v12935_v35, %v12945_v25  ;;  %v13032_v43 = vshrl.u32 %v12587_v21, 16  ;;  %v13025_v27 = vor.u32 %v13024_v0, %v13021_v14  ;;  %v25946_v0 = vld [vmem:[#allocation2 + $0x118] sm:$0xf] }
 0xa18   :  { %18925 = vmatprep.subr.bf16.mxu1 %v20258_v13  ;;  %v12988_v47 = vrot.slane %v12987_v58, 4  ;;  %v13010_v33 = vrot.slane %v13008_v56, 4  ;;  %v13058_v21 = vrot.slane %v13056_v30, 4  ;;  %v13001_v35 = vor.u32 %v13000_v32, %v12997_v53  ;;  %v25973_v32 = vld [vmem:[#allocation2 + $0x11c] sm:$0x1] }
 0xa19   :  { %v12964_v16 = vrot.slane %v12963_v51, 4  ;;  %v13034_v44 = vrot.slane %v13032_v43, 4  ;;  %v25930_v26 = vrot.slane %v13025_v27, 4  ;;  %v13014_v25 = vshll.u32 %v25928_v54, 16 }
 0xa1a   :  { %v12993_v50 = vsel %vm24320_vm10, %v12988_v47, %v12992_v38  ;;  %v13011_v29 = vor.u32 %v13010_v33, %v25922_v61  ;;  %v13059_v14 = vor.u32 %v13058_v21, %v25934_v17  ;;  %v13072_v43 = vrot.slane %v13070_v60, 5 }
 0xa1b   :  { %18926 = vmatpush3.bf16.msra.mxu1 %v20258_v13  ;;  %v12969_v10 = vsel %vm24320_vm10, %v12964_v16, %v12968_v59  ;;  %v12983_v13 = vsel %vm24320_vm10, %v12978_v12, %v25878_v6  ;;  %v13035_v48 = vor.u32 %v13034_v44, %v25906_v36  ;;  %v13048_v6 = vrot.slane %v13046_v24, 5 }
 0xa1c   :  { %v16588_v51 = vcombine.low %v12959_v42, %v12969_v10  ;;  %v16589_v45 = vcombine.low %v12983_v13, %v12993_v50  ;;  %v13069_v59 = vrot.slane %v13067_v20, 4  ;;  %v25950_v52 = vrot.slane %v13076_v4, 5 }
 0xa1d   :  { %v13036_v58 = vrot.slane %v13035_v48, 4  ;;  %v13049_v31 = vor.u32 %v13048_v6, %v13045_v63  ;;  %v13002_v16 = vrot.slane %v13001_v35, 4  ;;  %v13012_v12 = vrot.slane %v13011_v29, 4  ;;  %v12601_v63 = vld [vmem:[#allocation2 + $0x12c] sm:$0xf] }
 0xa1e   :  { %18864 = vmatmul.mubr.bf16.gmra.mrb[16].mxu1 %v16584_v41  ;;  %v13040_v41 = vrot.slane %v13038_v1, 5  ;;  %v13016_v49 = vrot.slane %v13014_v25, 5  ;;  %v13094_v56 = vshll.u32 %v12595_v15, 16  ;;  %v13100_v47 = vshll.u32 %v25946_v0, 16  ;;  %v12604_v29 = vld [vmem:[#allocation2 + $0x138] sm:$0xf] }
 0xa1f   :  { %18867 = vmatprep.mubr.bf16.mxu1 %v16585_v28  ;;  %v13031_v28 = vsel %vm24320_vm10, %v25930_v26, %v25906_v36  ;;  %v13104_v27 = vshrl.u32 %v25946_v0, 16  ;;  %v13124_v44 = vshll.u32 %v25952_v40, 16  ;;  %v13128_v24 = vshrl.u32 %v25952_v40, 16  ;;  %v25992_v15 = vld [vmem:[#allocation2 + $0x128] sm:$0x1] }
 0xa20   :  { %v13041_v3 = vsel %vm24320_vm10, %v13036_v58, %v13040_v41  ;;  %v25962_v30 = vrot.slane %v13049_v31, 4  ;;  %v25964_v42 = vrot.slane %v13059_v14, 4  ;;  %v13086_v10 = vshll.u32 %v25954_v18, 16  ;;  %v25990_v41 = vld [vmem:[#allocation2 + $0x13c] sm:$0xf] }
 0xa21   :  { %v13007_v13 = vsel %vm24320_vm10, %v13002_v16, %v25922_v61  ;;  %v13017_v38 = vsel %vm24320_vm10, %v13012_v12, %v13016_v49  ;;  %v13073_v8 = vor.u32 %v13072_v43, %v13069_v59  ;;  %v13083_v53 = vor.u32 %v13082_v37, %v25950_v52  ;;  %v25979_v61 = vld [vmem:[#allocation2 + $0x130] sm:$0xf] }
 0xa22   :  { %v13093_v33 = vrot.slane %v13091_v34, 4  ;;  %v13096_v50 = vrot.slane %v13094_v56, 5  ;;  %v25975_v26 = vrot.slane %v13100_v47, 5  ;;  %v13106_v1 = vrot.slane %v13104_v27, 4  ;;  %v12607_v27 = vld [vmem:[#allocation2 + $0x144] sm:$0xf] }
 0xa23   :  { %v25977_v21 = vrot.slane %v13124_v44, 5  ;;  %v16590_v20 = vcombine.low %v13007_v13, %v13017_v38  ;;  %v16591_v60 = vcombine.low %v13031_v28, %v13041_v3  ;;  %v13055_v4 = vsel %vm24320_vm10, %v25962_v30, %v25934_v17  ;;  %v26008_v3 = vld [vmem:[#allocation2 + $0x148] sm:$0xf] }
 0xa24   :  { %v13074_v25 = vrot.slane %v13073_v8, 4  ;;  %v13084_v46 = vrot.slane %v13083_v53, 4  ;;  %v13139_v28 = vshrl.u32 %v12601_v63, 16  ;;  %v13142_v58 = vshll.u32 %v12601_v63, 16 }
 0xa25   :  { %v13148_v31 = vshll.u32 %v25979_v61, 16  ;;  %v13152_v17 = vshrl.u32 %v25979_v61, 16  ;;  %v13097_v14 = vor.u32 %v13096_v50, %v13093_v33  ;;  %v13163_v43 = vshrl.u32 %v12604_v29, 16  ;;  %v26012_v33 = vld [vmem:[#allocation2 + $0x134] sm:$0x1] }
 0xa26   :  { %18868 = vmatmul.mubr.bf16.gmra.mrb[20].mxu1 %v16586_v39  ;;  %v12598_v39 = vld [vmem:[#allocation2 + $0x120] sm:$0xf]  ;;  %v13166_v16 = vshll.u32 %v12604_v29, 16  ;;  %v13172_v12 = vshll.u32 %v25990_v41, 16  ;;  %v13176_v49 = vshrl.u32 %v25990_v41, 16  ;;  %v13079_v37 = vsel %vm24320_vm10, %v13074_v25, %v25950_v52 }
 0xa27   :  { %18871 = vmatprep.mubr.bf16.mxu1 %v16587_v7  ;;  %v25948_v7 = vrot.slane %v13062_v11, 5  ;;  %v13115_v36 = vshrl.u32 %v12598_v39, 16  ;;  %v13118_v5 = vshll.u32 %v12598_v39, 16  ;;  %v13130_v11 = vrot.slane %v13128_v24, 4 }
 0xa28   :  { %v13107_v39 = vor.u32 %v13106_v1, %v25975_v26  ;;  %v13134_v47 = vshll.u32 %v25992_v15, 16  ;;  %v26006_v44 = vrot.slane %v13148_v31, 5  ;;  %v13154_v24 = vrot.slane %v13152_v17, 4  ;;  %v12610_v31 = vld [vmem:[#allocation2 + $0x150] sm:$0xf] }
 0xa29   :  { %v13117_v48 = vrot.slane %v13115_v36, 4  ;;  %v13120_v6 = vrot.slane %v13118_v5, 5  ;;  %v13065_v35 = vsel %vm24320_vm10, %v25964_v42, %v25948_v7  ;;  %v13131_v59 = vor.u32 %v13130_v11, %v25977_v21 }
 0xa2a   :  { %v13141_v36 = vrot.slane %v13139_v28, 4  ;;  %v13144_v5 = vrot.slane %v13142_v58, 5  ;;  %v13098_v30 = vrot.slane %v13097_v14, 4  ;;  %v13108_v42 = vrot.slane %v13107_v39, 4 }
 0xa2b   :  { %v13121_v7 = vor.u32 %v13120_v6, %v13117_v48  ;;  %v13132_v13 = vrot.slane %v13131_v59, 4  ;;  %v13165_v38 = vrot.slane %v13163_v43, 4  ;;  %v13168_v52 = vrot.slane %v13166_v16, 5  ;;  %v26036_v16 = vld [vmem:[#allocation2 + $0x14c] sm:$0x1] }
 0xa2c   :  { %v26010_v8 = vrot.slane %v13172_v12, 5  ;;  %v13178_v53 = vrot.slane %v13176_v49, 4  ;;  %v13187_v50 = vshrl.u32 %v12607_v27, 16  ;;  %v13190_v1 = vshll.u32 %v12607_v27, 16 }
 0xa2d   :  { %v13196_v63 = vshll.u32 %v26008_v3, 16  ;;  %v13200_v48 = vshrl.u32 %v26008_v3, 16  ;;  %v16592_v6 = vcombine.low %v13055_v4, %v13065_v35  ;;  %v13136_v11 = vrot.slane %v13134_v47, 5 }
 0xa2e   :  { %18872 = vmatmul.mubr.bf16.gmra.mrb[24].mxu1 %v16588_v51  ;;  %v13088_v51 = vrot.slane %v13086_v10, 5  ;;  %v13122_v10 = vrot.slane %v13121_v7, 4  ;;  %v13103_v25 = vsel %vm24320_vm10, %v13098_v30, %v25975_v26  ;;  %v13158_v35 = vshll.u32 %v26012_v33, 16  ;;  %v26031_v26 = vld [vmem:[#allocation2 + $0x154] sm:$0xf] }
 0xa2f   :  { %18875 = vmatprep.mubr.bf16.mxu1 %v16589_v45  ;;  %v13110_v45 = vshll.u32 %v25973_v32, 16  ;;  %v13137_v4 = vsel %vm24320_vm10, %v13132_v13, %v13136_v11  ;;  %v13169_v28 = vor.u32 %v13168_v52, %v13165_v38  ;;  %v13179_v58 = vor.u32 %v13178_v53, %v26010_v8  ;;  %v26051_v11 = vld [vmem:[#allocation2 + $0x16c] sm:$0xf] }
 0xa30   :  { %v13089_v34 = vsel %vm24320_vm10, %v13084_v46, %v13088_v51  ;;  %v13127_v51 = vsel %vm24320_vm10, %v13122_v10, %v25977_v21  ;;  %v13189_v17 = vrot.slane %v13187_v50, 4  ;;  %v13192_v14 = vrot.slane %v13190_v1, 5  ;;  %v26041_v10 = vld [vmem:[#allocation2 + $0x160] sm:$0xf]  ;;  %v12616_v50 = vld [vmem:[#allocation2 + $0x168] sm:$0xf] }
 0xa31   :  { %v13112_v56 = vrot.slane %v13110_v45, 5  ;;  %v16593_v29 = vcombine.low %v13079_v37, %v13089_v34  ;;  %v26025_v45 = vld [vmem:[#allocation2 + $0x140] sm:$0x1]  ;;  %v26033_v39 = vrot.slane %v13196_v63, 5  ;;  %v13202_v21 = vrot.slane %v13200_v48, 4 }
 0xa32   :  { %v13182_v43 = vshll.u32 %v26025_v45, 16  ;;  %v13211_v12 = vshrl.u32 %v12610_v31, 16  ;;  %v13214_v49 = vshll.u32 %v12610_v31, 16  ;;  %v13220_v37 = vshll.u32 %v26031_v26, 16 }
 0xa33   :  { %v13113_v46 = vsel %vm24320_vm10, %v13108_v42, %v13112_v56  ;;  %v16595_v56 = vcombine.low %v13127_v51, %v13137_v4  ;;  %v13160_v47 = vrot.slane %v13158_v35, 5  ;;  %v13224_v27 = vshrl.u32 %v26031_v26, 16 }
 0xa34   :  { %v16594_v34 = vcombine.low %v13103_v25, %v13113_v46  ;;  %v13193_v30 = vor.u32 %v13192_v14, %v13189_v17  ;;  %v13203_v42 = vor.u32 %v13202_v21, %v26033_v39  ;;  %v13184_v52 = vrot.slane %v13182_v43, 5 }
 0xa35   :  { %v13206_v53 = vshll.u32 %v26036_v16, 16  ;;  %v13213_v1 = vrot.slane %v13211_v12, 4  ;;  %v13216_v63 = vrot.slane %v13214_v49, 5  ;;  %v26049_v48 = vrot.slane %v13220_v37, 5 }
 0xa36   :  { %18876 = vmatmul.mubr.bf16.gmra.mrb[28].mxu1 %v16590_v20  ;;  %v13145_v20 = vor.u32 %v13144_v5, %v13141_v36  ;;  %v12613_v36 = vld [vmem:[#allocation2 + $0x15c] sm:$0xf]  ;;  %v13170_v5 = vrot.slane %v13169_v28, 4  ;;  %v13248_v25 = vshrl.u32 %v26041_v10, 16  ;;  %v13194_v4 = vrot.slane %v13193_v30, 4 }
 0xa37   :  { %18879 = vmatprep.mubr.bf16.mxu1 %v16591_v60  ;;  %v13155_v60 = vor.u32 %v13154_v24, %v26006_v44  ;;  %v13180_v24 = vrot.slane %v13179_v58, 4  ;;  %v13204_v35 = vrot.slane %v13203_v42, 4  ;;  %v13259_v28 = vshrl.u32 %v12616_v50, 16 }
 0xa38   :  { %v13146_v7 = vrot.slane %v13145_v20, 4  ;;  %v26053_v20 = vld [vmem:[#allocation2 + $0x158] sm:$0x1]  ;;  %v13175_v46 = vsel %vm24320_vm10, %v13170_v5, %v26010_v8  ;;  %v13262_v58 = vshll.u32 %v12616_v50, 16  ;;  %v13268_v31 = vshll.u32 %v26051_v11, 16 }
 0xa39   :  { %v13156_v59 = vrot.slane %v13155_v60, 4  ;;  %v13226_v60 = vrot.slane %v13224_v27, 4  ;;  %v13185_v51 = vsel %vm24320_vm10, %v13180_v24, %v13184_v52  ;;  %v13272_v17 = vshrl.u32 %v26051_v11, 16  ;;  %v12619_v24 = vld [vmem:[#allocation2 + $0x174] sm:$0xf] }
 0xa3a   :  { %v13151_v13 = vsel %vm24320_vm10, %v13146_v7, %v26006_v44  ;;  %v13244_v44 = vshll.u32 %v26041_v10, 16  ;;  %v13208_v14 = vrot.slane %v13206_v53, 5  ;;  %v13217_v21 = vor.u32 %v13216_v63, %v13213_v1  ;;  %v12622_v53 = vld [vmem:[#allocation2 + $0x180] sm:$0xf]  ;;  %v26078_v63 = vld [vmem:[#allocation2 + $0x170] sm:$0x1] }
 0xa3b   :  { %v13161_v38 = vsel %vm24320_vm10, %v13156_v59, %v13160_v47  ;;  %v13230_v7 = vshll.u32 %v26053_v20, 16  ;;  %v13227_v43 = vor.u32 %v13226_v60, %v26049_v48  ;;  %v13250_v49 = vrot.slane %v13248_v25, 4 }
 0xa3c   :  { %v26066_v8 = vrot.slane %v13244_v44, 5  ;;  %v16596_v37 = vcombine.low %v13151_v13, %v13161_v38  ;;  %v13261_v47 = vrot.slane %v13259_v28, 4  ;;  %v13264_v27 = vrot.slane %v13262_v58, 5  ;;  %v26075_v38 = vld [vmem:[#allocation2 + $0x164] sm:$0x1] }
 0xa3d   :  { %v13274_v5 = vrot.slane %v13272_v17, 4  ;;  %v16597_v30 = vcombine.low %v13175_v46, %v13185_v51  ;;  %v13218_v42 = vrot.slane %v13217_v21, 4  ;;  %v13232_v52 = vrot.slane %v13230_v7, 5 }
 0xa3e   :  { %18880 = vmatmul.mubr.bf16.gmra.mrb[32].mxu1 %v16592_v6  ;;  %v13235_v6 = vshrl.u32 %v12613_v36, 16  ;;  %v13228_v13 = vrot.slane %v13227_v43, 4  ;;  %v13286_v60 = vshll.u32 %v12619_v24, 16  ;;  %v13265_v46 = vor.u32 %v13264_v27, %v13261_v47 }
 0xa3f   :  { %18883 = vmatprep.mubr.bf16.mxu1 %v16593_v29  ;;  %v13238_v29 = vshll.u32 %v12613_v36, 16  ;;  %v26073_v36 = vrot.slane %v13268_v31, 5  ;;  %v13223_v28 = vsel %vm24320_vm10, %v13218_v42, %v26049_v48  ;;  %v13254_v58 = vshll.u32 %v26075_v38, 16  ;;  %v20375_v31 = vld [vmem:[#allocation2 + $0x184] sm:$0xf] }
 0xa40   :  { %v13237_v59 = vrot.slane %v13235_v6, 4  ;;  %v13283_v6 = vshrl.u32 %v12619_v24, 16  ;;  %v13316_v17 = vshll.u32 %v20375_v31, 16  ;;  %v13233_v21 = vsel %vm24320_vm10, %v13228_v13, %v13232_v52 }
 0xa41   :  { %v13240_v12 = vrot.slane %v13238_v29, 5  ;;  %v20374_v29 = vld [vmem:[#allocation2 + $0x178] sm:$0xf]  ;;  %v13275_v51 = vor.u32 %v13274_v5, %v26073_v36  ;;  %v13278_v43 = vshll.u32 %v26078_v63, 16  ;;  %v16599_v5 = vcombine.low %v13223_v28, %v13233_v21 }
 0xa42   :  { %v13292_v44 = vshll.u32 %v20374_v29, 16  ;;  %v13296_v25 = vshrl.u32 %v20374_v29, 16  ;;  %v13256_v24 = vrot.slane %v13254_v58, 5 }
 0xa43   :  { %v13241_v1 = vor.u32 %v13240_v12, %v13237_v59  ;;  %v13285_v12 = vrot.slane %v13283_v6, 4  ;;  %v13276_v47 = vrot.slane %v13275_v51, 4  ;;  %v13280_v13 = vrot.slane %v13278_v43, 5 }
 0xa45   :  { %v13242_v7 = vrot.slane %v13241_v1, 4 }
 0xa46   :  { %18884 = vmatmul.mubr.bf16.gmra.mrb[36].mxu1 %v16594_v34  ;;  %v13199_v34 = vsel %vm24320_vm10, %v13194_v4, %v26033_v39  ;;  %v13251_v39 = vor.u32 %v13250_v49, %v26066_v8  ;;  %v13307_v4 = vshrl.u32 %v12622_v53, 16  ;;  %v13288_v49 = vrot.slane %v13286_v60, 5  ;;  %v20376_v60 = vld [vmem:[#allocation2 + $0x17c] sm:$0x1] }
 0xa47   :  { %18887 = vmatprep.mubr.bf16.mxu1 %v16595_v56  ;;  %v13209_v56 = vsel %vm24320_vm10, %v13204_v35, %v13208_v14  ;;  %v13310_v35 = vshll.u32 %v12622_v53, 16  ;;  %v13320_v14 = vshrl.u32 %v20375_v31, 16  ;;  %v12625_v53 = vld [vmem:[#allocation2 + $0x18c] sm:$0xf]  ;;  %v13247_v52 = vsel %vm24320_vm10, %v13242_v7, %v26066_v8 }
 0xa48   :  { %v16598_v50 = vcombine.low %v13199_v34, %v13209_v56  ;;  %v13252_v59 = vrot.slane %v13251_v39, 4  ;;  %v13298_v34 = vrot.slane %v13296_v25, 4  ;;  %v13266_v56 = vrot.slane %v13265_v46, 4 }
 0xa49   :  { %v13309_v48 = vrot.slane %v13307_v4, 4  ;;  %v13312_v27 = vrot.slane %v13310_v35, 5  ;;  %v13322_v42 = vrot.slane %v13320_v14, 4  ;;  %v13289_v39 = vor.u32 %v13288_v49, %v13285_v12  ;;  %v20377_v35 = vld [vmem:[#allocation2 + $0x190] sm:$0xf] }
 0xa4a   :  { %v13257_v1 = vsel %vm24320_vm10, %v13252_v59, %v13256_v24  ;;  %v13302_v29 = vshll.u32 %v20376_v60, 16  ;;  %v13271_v25 = vsel %vm24320_vm10, %v13266_v56, %v26073_v36  ;;  %v13331_v8 = vshrl.u32 %v12625_v53, 16  ;;  %v20378_v14 = vld [vmem:[#allocation2 + $0x19c] sm:$0xf]  ;;  %v20379_v36 = vld [vmem:[#allocation2 + $0x188] sm:$0x1] }
 0xa4b   :  { %v13313_v46 = vor.u32 %v13312_v27, %v13309_v48  ;;  %v13334_v4 = vshll.u32 %v12625_v53, 16  ;;  %v13340_v28 = vshll.u32 %v20377_v35, 16  ;;  %v13344_v58 = vshrl.u32 %v20377_v35, 16  ;;  %v12631_v27 = vld [vmem:[#allocation2 + $0x1a4] sm:$0xf] }
 0xa4c   :  { %v13364_v21 = vshll.u32 %v20378_v14, 16  ;;  %v13368_v7 = vshrl.u32 %v20378_v14, 16  ;;  %v13290_v59 = vrot.slane %v13289_v39, 4  ;;  %v13304_v12 = vrot.slane %v13302_v29, 5 }
 0xa4d   :  { %v13326_v49 = vshll.u32 %v20379_v36, 16  ;;  %v13333_v48 = vrot.slane %v13331_v8, 4  ;;  %v13342_v53 = vrot.slane %v13340_v28, 5  ;;  %v13382_v29 = vshll.u32 %v12631_v27, 16 }
 0xa4e   :  { %18888 = vmatmul.mubr.bf16.gmra.mrb[40].mxu1 %v16596_v37  ;;  %v26088_v37 = vrot.slane %v13292_v44, 5  ;;  %v12628_v44 = vld [vmem:[#allocation2 + $0x198] sm:$0xf]  ;;  %v13366_v35 = vrot.slane %v13364_v21, 5  ;;  %v13370_v39 = vrot.slane %v13368_v7, 4 }
 0xa4f   :  { %18891 = vmatprep.mubr.bf16.mxu1 %v16597_v30  ;;  %v26090_v30 = vrot.slane %v13316_v17, 5  ;;  %v13355_v31 = vshrl.u32 %v12628_v44, 16  ;;  %v13358_v17 = vshll.u32 %v12628_v44, 16  ;;  %v13384_v7 = vrot.slane %v13382_v29, 5 }
 0xa50   :  { %v13299_v6 = vor.u32 %v13298_v34, %v26088_v37  ;;  %v16600_v34 = vcombine.low %v13247_v52, %v13257_v1  ;;  %v13371_v14 = vor.u32 %v13370_v39, %v13366_v35 }
 0xa51   :  { %v13323_v51 = vor.u32 %v13322_v42, %v26090_v30  ;;  %v13336_v42 = vrot.slane %v13334_v4, 5  ;;  %v13357_v60 = vrot.slane %v13355_v31, 4  ;;  %v13360_v44 = vrot.slane %v13358_v17, 5 }
 0xa52   :  { %v13300_v43 = vrot.slane %v13299_v6, 4  ;;  %v13379_v6 = vshrl.u32 %v12631_v27, 16 }
 0xa53   :  { %v13324_v24 = vrot.slane %v13323_v51, 4  ;;  %v13337_v51 = vor.u32 %v13336_v42, %v13333_v48  ;;  %v13361_v17 = vor.u32 %v13360_v44, %v13357_v60  ;;  %v13372_v48 = vrot.slane %v13371_v14, 4  ;;  %v20384_v14 = vld [vmem:[#allocation2 + $0x28] sm:$0xf] }
 0xa54   :  { %v13381_v21 = vrot.slane %v13379_v6, 4 }
 0xa56   :  { %18892 = vmatmul.mubr.bf16.gmra.mrb[44].mxu1 %v16598_v50  ;;  %v13281_v50 = vsel %vm24320_vm10, %v13276_v47, %v13280_v13  ;;  %v13314_v47 = vrot.slane %v13313_v46, 4  ;;  %v13346_v13 = vrot.slane %v13344_v58, 4  ;;  %v13305_v46 = vsel %vm24320_vm10, %v13300_v43, %v13304_v12  ;;  %v20380_v58 = vld [vmem:[#allocation2 + $0x194] sm:$0x1]  ;;  %v26118_v12 = vld [vmem:[#allocation2 + $0x1ac] sm:$0x1] }
 0xa57   :  { %18895 = vmatprep.mubr.bf16.mxu1 %v16599_v5  ;;  %v16601_v56 = vcombine.low %v13271_v25, %v13281_v50  ;;  %v26104_v5 = vld [vmem:[#allocation2 + $0x1a8] sm:$0xf]  ;;  %v13295_v25 = vsel %vm24320_vm10, %v13290_v59, %v26088_v37  ;;  %v13328_v50 = vrot.slane %v13326_v49, 5  ;;  %v13350_v31 = vshll.u32 %v20380_v58, 16  ;;  %v20381_v49 = vld [vmem:[#allocation2 + $0x1a0] sm:$0x1] }
 0xa58   :  { %v13388_v52 = vshll.u32 %v26104_v5, 16  ;;  %v13392_v1 = vshrl.u32 %v26104_v5, 16  ;;  %v13319_v8 = vsel %vm24320_vm10, %v13314_v47, %v26090_v30  ;;  %v13347_v4 = vor.u32 %v13346_v13, %v13342_v53 }
 0xa59   :  { %v13329_v28 = vsel %vm24320_vm10, %v13324_v24, %v13328_v50  ;;  %v16602_v36 = vcombine.low %v13295_v25, %v13305_v46  ;;  %v13374_v43 = vshll.u32 %v20381_v49, 16  ;;  %v13338_v30 = vrot.slane %v13337_v51, 4 }
 0xa5a   :  { %v13390_v37 = vrot.slane %v13388_v52, 5  ;;  %v13394_v59 = vrot.slane %v13392_v1, 4  ;;  %v13362_v47 = vrot.slane %v13361_v17, 4  ;;  %v13352_v27 = vrot.slane %v13350_v31, 5  ;;  %v20382_v52 = vld [vmem:[#allocation2 + $0x1c] sm:$0xf] }
 0xa5b   :  { %v13385_v24 = vor.u32 %v13384_v7, %v13381_v21  ;;  %v13398_v13 = vshll.u32 %v26118_v12, 16  ;;  %v13376_v60 = vrot.slane %v13374_v43, 5  ;;  %v13343_v44 = vsel %vm24320_vm10, %v13338_v30, %v13342_v53  ;;  %v20383_v31 = vld [vmem:[#allocation2 + $0x20] sm:$0x1] }
 0xa5c   :  { %v13395_v42 = vor.u32 %v13394_v59, %v13390_v37  ;;  %v13367_v6 = vsel %vm24320_vm10, %v13362_v47, %v13366_v35  ;;  %v14078_v1 = vrot.slane %v20382_v52, 5  ;;  %v14081_v17 = vrot.slane %v20383_v31, 5 }
 0xa5d   :  { %v13377_v29 = vsel %vm24320_vm10, %v13372_v48, %v13376_v60  ;;  %v13386_v25 = vrot.slane %v13385_v24, 4  ;;  %v13400_v46 = vrot.slane %v13398_v13, 5  ;;  %v14085_v21 = vrot.slane %v20384_v14, 5  ;;  %v20386_v48 = vld [vmem:[#allocation2 + $0x2c] sm:$0x1] }
 0xa5e   :  { %18896 = vmatmul.mubr.bf16.gmra.mrb[48].mxu1 %v16600_v34  ;;  %v16603_v34 = vcombine.low %v13319_v8, %v13329_v28  ;;  %v13396_v50 = vrot.slane %v13395_v42, 4  ;;  %v16605_v51 = vcombine.low %v13367_v6, %v13377_v29  ;;  %v14080_v28 = vrot.slane %v14078_v1, 4  ;;  %v20387_v42 = vld [vmem:[#allocation2 + $0x38] sm:$0x1]  ;;  %v20389_v29 = vld [vmem:[#allocation2 + $0x4c] sm:$0xf] }
 0xa5f   :  { %18899 = vmatprep.mubr.bf16.mxu1 %v16601_v56  ;;  %v13348_v56 = vrot.slane %v13347_v4, 4  ;;  %v13948_v4 = vld [vmem:[#allocation2 + $0x18] sm:$0xe]  ;;  %v13391_v53 = vsel %vm24320_vm10, %v13386_v25, %v13390_v37  ;;  %v14087_v37 = vrot.slane %v14085_v21, 4  ;;  %v14095_v13 = vrot.slane %v20387_v42, 5 }
 0xa60   :  { %v13401_v35 = vsel %vm24320_vm10, %v13396_v50, %v13400_v46  ;;  %v16615_v58 = vrot.slane %v13948_v4, 9  ;;  %v14082_v59 = vsel %vm24737_vm13, %v14080_v28, %v14081_v17  ;;  %v14106_v52 = vrot.slane %v20389_v29, 5  ;;  %v13951_v46 = vld [vmem:[#allocation2 + $0x3c] sm:$0xe]  ;;  %v13952_v4 = vld [vmem:[#allocation2 + $0x48] sm:$0xe] }
 0xa61   :  { %v13353_v39 = vsel %vm24320_vm10, %v13348_v56, %v13352_v27  ;;  %v16606_v7 = vcombine.low %v13391_v53, %v13401_v35  ;;  %v13950_v56 = vld [vmem:[#allocation2 + $0x30] sm:$0xe]  ;;  %v14088_v27 = vrot.slane %v20386_v48, 5  ;;  %v16618_v53 = vrot.slane %v13951_v46, 9  ;;  %v20390_v35 = vld [vmem:[#allocation2 + $0x44] sm:$0x1] }
 0xa62   :  { %v16604_v8 = vcombine.low %v13343_v44, %v13353_v39  ;;  %v14079_v43 = vsel %vm24737_vm13, %v16615_v58, %v14078_v1  ;;  %v16617_v24 = vrot.slane %v13950_v56, 9  ;;  %v20388_v44 = vld [vmem:[#allocation2 + $0x40] sm:$0xf]  ;;  %v14108_v28 = vrot.slane %v14106_v52, 4  ;;  %v20391_v17 = vld [vmem:[#allocation2 + $0x50] sm:$0x1] }
 0xa63   :  { %v16663_v30 = vcombine.low %v14079_v43, %v14082_v59  ;;  %v14089_v60 = vsel %vm24737_vm13, %v14087_v37, %v14088_v27  ;;  %v14099_v39 = vrot.slane %v20388_v44, 5  ;;  %v14102_v58 = vrot.slane %v20390_v35, 5  ;;  %v13953_v56 = vld [vmem:[#allocation2 + $0x54] sm:$0xe]  ;;  %v13954_v48 = vld [vmem:[#allocation2 + $0x60] sm:$0xe] }
 0xa64   :  { %v16619_v31 = vrot.slane %v13952_v4, 9  ;;  %v14109_v14 = vrot.slane %v20391_v17, 5  ;;  %v20394_v42 = vld [vmem:[#allocation2 + $0x5c] sm:$0x1]  ;;  %v20395_v44 = vld [vmem:[#allocation2 + $0x68] sm:$0x1] }
 0xa65   :  { %v20396_v29 = vld [vmem:[#allocation2 + $0x70] sm:$0xf]  ;;  %v13955_v4 = vld [vmem:[#allocation2 + $0x6c] sm:$0xe]  ;;  %v13956_v35 = vld [vmem:[#allocation2 + $0x78] sm:$0xe] }
 0xa66   :  { %18900 = vmatmul.mubr.bf16.gmra.mrb[52].mxu1 %v16602_v36  ;;  %v20385_v36 = vld [vmem:[#allocation2 + $0x34] sm:$0xf]  ;;  %v14107_v37 = vsel %vm24737_vm13, %v16619_v31, %v14106_v52  ;;  %v16622_v31 = vrot.slane %v13955_v4, 9 }
 0xa67   :  { %18903 = vmatprep.mubr.bf16.mxu1 %v16603_v34  ;;  %v14092_v49 = vrot.slane %v20385_v36, 5  ;;  %v13949_v34 = vld [vmem:[#allocation2 + $0x24] sm:$0xe]  ;;  %v14110_v36 = vsel %vm24737_vm13, %v14108_v28, %v14109_v14  ;;  %v20398_v17 = vld [vmem:[#allocation2 + $0x74] sm:$0x1] }
 0xa68   :  { %v16616_v47 = vrot.slane %v13949_v34, 9  ;;  %v14100_v34 = vsel %vm24737_vm13, %v16618_v53, %v14099_v39  ;;  %v14130_v14 = vrot.slane %v20398_v17, 5  ;;  %v13960_v17 = vld [vmem:[#allocation2 + $0xa8] sm:$0xe] }
 0xa69   :  { %v14094_v23 = vrot.slane %v14092_v49, 4  ;;  %v14093_v50 = vsel %vm24737_vm13, %v16617_v24, %v14092_v49  ;;  %v20393_v49 = vld [vmem:[#allocation2 + $0x64] sm:$0xf]  ;;  %v16620_v24 = vrot.slane %v13953_v56, 9 }
 0xa6a   :  { %v14086_v1 = vsel %vm24737_vm13, %v16616_v47, %v14085_v21  ;;  %v14120_v43 = vrot.slane %v20393_v49, 5  ;;  %v20400_v49 = vld [vmem:[#allocation2 + $0x88] sm:$0xf] }
 0xa6b   :  { %v14096_v6 = vsel %vm24737_vm13, %v14094_v23, %v14095_v13  ;;  %v16664_v25 = vcombine.low %v14086_v1, %v14089_v60  ;;  %v16667_v23 = vcombine.low %v14107_v37, %v14110_v36  ;;  %v14116_v13 = vrot.slane %v20394_v42, 5  ;;  %v13958_v42 = vld [vmem:[#allocation2 + $0x90] sm:$0xe] }
 0xa6c   :  { %v14122_v27 = vrot.slane %v14120_v43, 4  ;;  %v16621_v60 = vrot.slane %v13954_v48, 9  ;;  %v14127_v1 = vrot.slane %v20396_v29, 5  ;;  %v13957_v48 = vld [vmem:[#allocation2 + $0x84] sm:$0xe] }
 0xa6d   :  { %v20403_v29 = vld [vmem:[#allocation2 + $0x98] sm:$0x1] }
 0xa6e   :  { %18904 = vmatmul.mubr.bf16.gmra.mrb[56].mxu1 %v16604_v8  ;;  %v16665_v8 = vcombine.low %v14093_v50, %v14096_v6  ;;  %v14123_v6 = vrot.slane %v20395_v44, 5  ;;  %v14129_v53 = vrot.slane %v14127_v1, 4  ;;  %v14128_v56 = vsel %vm24737_vm13, %v16622_v31, %v14127_v1  ;;  %v20402_v44 = vld [vmem:[#allocation2 + $0x8c] sm:$0x1] }
 0xa6f   :  { %18907 = vmatprep.mubr.bf16.mxu1 %v16605_v51  ;;  %v14101_v51 = vrot.slane %v14099_v39, 4 }
 0xa70   :  { %v14124_v52 = vsel %vm24737_vm13, %v14122_v27, %v14123_v6  ;;  %v14144_v6 = vrot.slane %v20402_v44, 5  ;;  %v13962_v44 = vld [vmem:[#allocation2 + $0xc0] sm:$0xe] }
 0xa71   :  { %v14103_v21 = vsel %vm24737_vm13, %v14101_v51, %v14102_v58  ;;  %v14121_v51 = vsel %vm24737_vm13, %v16621_v60, %v14120_v43  ;;  %v16624_v60 = vrot.slane %v13957_v48, 9 }
 0xa72   :  { %v16669_v28 = vcombine.low %v14121_v51, %v14124_v52  ;;  %v14151_v52 = vrot.slane %v20403_v29, 5  ;;  %v20410_v29 = vld [vmem:[#allocation2 + $0xbc] sm:$0x1] }
 0xa76   :  { %18908 = vmatmul.mubr.bf16.gmra.mrb[60].mxu1 %v16606_v7  ;;  %v20392_v7 = vld [vmem:[#allocation2 + $0x58] sm:$0xf] }
 0xa77   :  { %18927 = vmatprep.mubr.bf16.mxu1 %v16663_v30  ;;  %v14113_v59 = vrot.slane %v20392_v7, 5  ;;  %v16666_v30 = vcombine.low %v14100_v34, %v14103_v21  ;;  %v16623_v21 = vrot.slane %v13956_v35, 9  ;;  %v20399_v7 = vld [vmem:[#allocation2 + $0x80] sm:$0x1]  ;;  %v14141_v34 = vrot.slane %v20400_v49, 5 }
 0xa78   :  { %v14137_v36 = vrot.slane %v20399_v7, 5  ;;  %v13959_v35 = vld [vmem:[#allocation2 + $0x9c] sm:$0xe]  ;;  %v20406_v7 = vld [vmem:[#allocation2 + $0xa4] sm:$0x1] }
 0xa79   :  { %v14115_v47 = vrot.slane %v14113_v59, 4  ;;  %v14114_v46 = vsel %vm24737_vm13, %v16620_v24, %v14113_v59  ;;  %v14131_v59 = vsel %vm24737_vm13, %v14129_v53, %v14130_v14  ;;  %v14143_v24 = vrot.slane %v14141_v34, 4  ;;  %v20407_v49 = vld [vmem:[#allocation2 + $0xb0] sm:$0x1] }
 0xa7a   :  { %v14142_v4 = vsel %vm24737_vm13, %v16624_v60, %v14141_v34 }
 0xa7b   :  { %v14117_v39 = vsel %vm24737_vm13, %v14115_v47, %v14116_v13  ;;  %v14145_v1 = vsel %vm24737_vm13, %v14143_v24, %v14144_v6 }
 0xa7e   :  { %18928 = vmatmul.mubr.bf16.vlgmr.msra.gmra.mrb[0].mxu1 %v16664_v25  ;;  %v20397_v25 = vld [vmem:[#allocation2 + $0x7c] sm:$0xf] }
 0xa7f   :  { %18931 = vmatprep.mubr.bf16.mxu1 %v16665_v8  ;;  %v14134_v50 = vrot.slane %v20397_v25, 5  ;;  %v16668_v8 = vcombine.low %v14114_v46, %v14117_v39  ;;  %v16625_v39 = vrot.slane %v13958_v42, 9  ;;  %v20404_v25 = vld [vmem:[#allocation2 + $0xa0] sm:$0xf]  ;;  %v13961_v42 = vld [vmem:[#allocation2 + $0xb4] sm:$0xe] }
 0xa80   :  { %v14155_v46 = vrot.slane %v20404_v25, 5  ;;  %v16629_v25 = vrot.slane %v13962_v44, 9  ;;  %v14218_v44 = vrot.slane %v25952_v40, 5  ;;  %v14221_v40 = vrot.slane %v25992_v15, 5 }
 0xa81   :  { %v14136_v58 = vrot.slane %v14134_v50, 4  ;;  %v14135_v47 = vsel %vm24737_vm13, %v16623_v21, %v14134_v50  ;;  %v16626_v21 = vrot.slane %v13959_v35, 9 }
 0xa82   :  { %v14157_v31 = vrot.slane %v14155_v46, 4 }
 0xa83   :  { %v14138_v43 = vsel %vm24737_vm13, %v14136_v58, %v14137_v36  ;;  %v14158_v36 = vrot.slane %v20406_v7, 5  ;;  %v14156_v48 = vsel %vm24737_vm13, %v16626_v21, %v14155_v46  ;;  %v13963_v46 = vld [vmem:[#allocation2 + $0xcc] sm:$0xe] }
 0xa84   :  { %v16671_v27 = vcombine.low %v14135_v47, %v14138_v43  ;;  %v14165_v43 = vrot.slane %v20407_v49, 5  ;;  %v16630_v35 = vrot.slane %v13963_v46, 9  ;;  %v14193_v49 = vrot.slane %v25908_v19, 5 }
 0xa85   :  { %v14159_v34 = vsel %vm24737_vm13, %v14157_v31, %v14158_v36  ;;  %v14186_v31 = vrot.slane %v25928_v54, 5  ;;  %v14197_v54 = vrot.slane %v25902_v22, 5  ;;  %v14200_v19 = vrot.slane %v25920_v55, 5 }
 0xa86   :  { %18932 = vmatmul.mubr.bf16.gmra.mrb[4].mxu1 %v16666_v30  ;;  %v20401_v30 = vld [vmem:[#allocation2 + $0x94] sm:$0xf] }
 0xa87   :  { %18935 = vmatprep.mubr.bf16.mxu1 %v16667_v23  ;;  %v14148_v37 = vrot.slane %v20401_v30, 5  ;;  %v16670_v23 = vcombine.low %v14128_v56, %v14131_v59  ;;  %v16627_v59 = vrot.slane %v13960_v17, 9  ;;  %v20408_v30 = vld [vmem:[#allocation2 + $0xb8] sm:$0xf] }
 0xa88   :  { %v14169_v56 = vrot.slane %v20408_v30, 5  ;;  %v14204_v30 = vrot.slane %v25924_v2, 5  ;;  %v14211_v2 = vrot.slane %v25946_v0, 5 }
 0xa89   :  { %v14150_v13 = vrot.slane %v14148_v37, 4  ;;  %v14149_v53 = vsel %vm24737_vm13, %v16625_v39, %v14148_v37  ;;  %v16628_v39 = vrot.slane %v13961_v42, 9  ;;  %v14207_v42 = vrot.slane %v25954_v18, 5 }
 0xa8a   :  { %v14171_v60 = vrot.slane %v14169_v56, 4  ;;  %v14213_v18 = vrot.slane %v14211_v2, 4 }
 0xa8b   :  { %v14152_v50 = vsel %vm24737_vm13, %v14150_v13, %v14151_v52  ;;  %v14172_v52 = vrot.slane %v20410_v29, 5  ;;  %v13967_v29 = vld [vmem:[#allocation2 + $0x114] sm:$0xe] }
 0xa8c   :  { %v16673_v58 = vcombine.low %v14149_v53, %v14152_v50  ;;  %v14179_v50 = vrot.slane %v25896_v62, 5  ;;  %v14170_v53 = vsel %vm24737_vm13, %v16628_v39, %v14169_v56  ;;  %v16634_v0 = vrot.slane %v13967_v29, 9 }
 0xa8e   :  { %18936 = vmatmul.mubr.bf16.gmra.mrb[8].mxu1 %v16668_v8  ;;  %v20405_v8 = vld [vmem:[#allocation2 + $0xac] sm:$0xf] }
 0xa8f   :  { %18939 = vmatprep.mubr.bf16.mxu1 %v16669_v28  ;;  %v14162_v51 = vrot.slane %v20405_v8, 5  ;;  %v16672_v28 = vcombine.low %v14142_v4, %v14145_v1  ;;  %v14183_v1 = vrot.slane %v25899_v57, 5  ;;  %v14173_v8 = vsel %vm24737_vm13, %v14171_v60, %v14172_v52  ;;  %v20411_v4 = vld [vmem:[#allocation2 + $0xf4] sm:$0xf] }
 0xa90   :  { %v16676_v57 = vcombine.low %v14170_v53, %v14173_v8  ;;  %v14212_v53 = vsel %vm24737_vm13, %v16634_v0, %v14211_v2  ;;  %v13974_v2 = vld [vmem:[#allocation2 + $0x168] sm:$0xe] }
 0xa91   :  { %v14164_v14 = vrot.slane %v14162_v51, 4  ;;  %v14163_v24 = vsel %vm24737_vm13, %v16627_v59, %v14162_v51  ;;  %v14184_v7 = vsel %vm24737_vm13, %v16630_v35, %v14183_v1 }
 0xa93   :  { %v14166_v37 = vsel %vm24737_vm13, %v14164_v14, %v14165_v43  ;;  %v13964_v14 = vld [vmem:[#allocation2 + $0xf0] sm:$0xe] }
 0xa94   :  { %v16675_v13 = vcombine.low %v14163_v24, %v14166_v37  ;;  %v16631_v59 = vrot.slane %v13964_v14, 9  ;;  %v13965_v37 = vld [vmem:[#allocation2 + $0xfc] sm:$0xe] }
 0xa95   :  { %v16632_v24 = vrot.slane %v13965_v37, 9  ;;  %v14242_v37 = vrot.slane %v26036_v16, 5 }
 0xa96   :  { %18940 = vmatmul.mubr.bf16.gmra.mrb[12].mxu1 %v16670_v23  ;;  %v20409_v23 = vld [vmem:[#allocation2 + $0xc4] sm:$0xf] }
 0xa97   :  { %18943 = vmatprep.mubr.bf16.mxu1 %v16671_v27  ;;  %v14176_v47 = vrot.slane %v20409_v23, 5  ;;  %v16674_v27 = vcombine.low %v14156_v48, %v14159_v34  ;;  %v13966_v48 = vld [vmem:[#allocation2 + $0x108] sm:$0xe] }
 0xa98   :  { %v16633_v22 = vrot.slane %v13966_v48, 9  ;;  %v14253_v48 = vrot.slane %v26041_v10, 5 }
 0xa99   :  { %v14178_v6 = vrot.slane %v14176_v47, 4  ;;  %v14177_v62 = vsel %vm24737_vm13, %v16629_v25, %v14176_v47  ;;  %v14199_v47 = vrot.slane %v14197_v54, 4  ;;  %v14220_v25 = vrot.slane %v14218_v44, 4 }
 0xa9a   :  { %v14205_v55 = vsel %vm24737_vm13, %v16633_v22, %v14204_v30 }
 0xa9b   :  { %v14180_v51 = vsel %vm24737_vm13, %v14178_v6, %v14179_v50  ;;  %v14198_v6 = vsel %vm24737_vm13, %v16632_v24, %v14197_v54  ;;  %v14214_v50 = vrot.slane %v25973_v32, 5  ;;  %v14260_v24 = vrot.slane %v26051_v11, 5 }
 0xa9c   :  { %v16677_v17 = vcombine.low %v14177_v62, %v14180_v51  ;;  %v14225_v51 = vrot.slane %v25979_v61, 5  ;;  %v14263_v11 = vrot.slane %v26078_v63, 5  ;;  %v28037_v63 = vld [vmem:[#allocation19_spill] sm:$0xff] }
 0xa9d   :  { %v14215_v8 = vsel %vm24737_vm13, %v14213_v18, %v14214_v50  ;;  %v28038_v50 = vld [vmem:[#allocation20_spill] sm:$0xff] }
 0xa9e   :  { %18944 = vmatmul.mubr.bf16.gmra.mrb[16].mxu1 %v16672_v28  ;;  %v14190_v28 = vrot.slane %v20411_v4, 5  ;;  %v14222_v4 = vsel %vm24737_vm13, %v14220_v25, %v14221_v40  ;;  %v16682_v35 = vcombine.low %v14212_v53, %v14215_v8  ;;  %v14227_v15 = vrot.slane %v14225_v51, 4  ;;  %v28035_v25 = vld [vmem:[#allocation15_spill] sm:$0xff]  ;;  %v13979_v8 = vld [vmem:[#allocation2 + $0x1a4] sm:$0xe]  ;;  %v28040_v53 = vld [vmem:[#allocation22_spill] sm:$0xff] }
 0xa9f   :  { %18947 = vmatprep.mubr.bf16.mxu1 %v16673_v58  ;;  %v14185_v58 = vrot.slane %v14183_v1, 4  ;;  %v13968_v1 = vld [vmem:[#allocation2 + $0x120] sm:$0xe]  ;;  %v14295_v40 = vrot.slane %v26104_v5, 5 }
 0xaa0   :  { %v14192_v21 = vrot.slane %v14190_v28, 4  ;;  %v14191_v56 = vsel %vm24737_vm13, %v16631_v59, %v14190_v28  ;;  %v16635_v46 = vrot.slane %v13968_v1, 9  ;;  %v14232_v28 = vrot.slane %v25990_v41, 5 }
 0xaa1   :  { %v14187_v36 = vsel %vm24737_vm13, %v14185_v58, %v14186_v31  ;;  %v13969_v58 = vld [vmem:[#allocation2 + $0x12c] sm:$0xe]  ;;  %v14235_v41 = vrot.slane %v26025_v45, 5  ;;  %v14246_v59 = vrot.slane %v26031_v26, 5  ;;  %v14249_v26 = vrot.slane %v26053_v20, 5 }
 0xaa2   :  { %v16678_v43 = vcombine.low %v14184_v7, %v14187_v36  ;;  %v14194_v34 = vsel %vm24737_vm13, %v14192_v21, %v14193_v49  ;;  %v14219_v32 = vsel %vm24737_vm13, %v16635_v46, %v14218_v44  ;;  %v14234_v62 = vrot.slane %v14232_v28, 4 }
 0xaa3   :  { %v16679_v23 = vcombine.low %v14191_v56, %v14194_v34  ;;  %v16683_v31 = vcombine.low %v14219_v32, %v14222_v4  ;;  %v16636_v61 = vrot.slane %v13969_v58, 9  ;;  %v14239_v7 = vrot.slane %v26008_v3, 5  ;;  %v28043_v58 = vld [vmem:[#allocation32_spill] sm:$0xff] }
 0xaa4   :  { %v14236_v36 = vsel %vm24737_vm13, %v14234_v62, %v14235_v41  ;;  %v14248_v56 = vrot.slane %v14246_v59, 4  ;;  %v14255_v20 = vrot.slane %v14253_v48, 4  ;;  %v14256_v44 = vrot.slane %v26075_v38, 5  ;;  %v28034_v38 = vld [vmem:[#allocation18_spill] sm:$0xff] }
 0xaa5   :  { %v14226_v49 = vsel %vm24737_vm13, %v16636_v61, %v14225_v51  ;;  %v14241_v45 = vrot.slane %v14239_v7, 4  ;;  %v28036_v0 = vcombine.low %v28034_v38, %v28035_v25  ;;  %v28039_v46 = vcombine.low %v28037_v63, %v28038_v50 }
 0xaa6   :  { %18948 = vmatmul.mubr.bf16.gmra.mrb[20].mxu1 %v16674_v27  ;;  %v14206_v27 = vrot.slane %v14204_v30, 4  ;;  %v13972_v30 = vld [vmem:[#allocation2 + $0x150] sm:$0xe]  ;;  %v16646_v51 = vrot.slane %v13979_v8, 9  ;;  %v14297_v4 = vrot.slane %v14295_v40, 4 }
 0xaa7   :  { %18951 = vmatprep.mubr.bf16.mxu1 %v16675_v13  ;;  %v14201_v13 = vsel %vm24737_vm13, %v14199_v47, %v14200_v19  ;;  %v14243_v47 = vsel %vm24737_vm13, %v14241_v45, %v14242_v37 }
 0xaa8   :  { %v14208_v60 = vsel %vm24737_vm13, %v14206_v27, %v14207_v42  ;;  %v16680_v39 = vcombine.low %v14198_v6, %v14201_v13  ;;  %v14250_v27 = vsel %vm24737_vm13, %v14248_v56, %v14249_v26  ;;  %v13973_v42 = vld [vmem:[#allocation2 + $0x15c] sm:$0xe]  ;;  %v16641_v6 = vrot.slane %v13974_v2, 9 }
 0xaa9   :  { %v16681_v52 = vcombine.low %v14205_v55, %v14208_v60  ;;  %v14262_v60 = vrot.slane %v14260_v24, 4  ;;  %v16640_v10 = vrot.slane %v13973_v42, 9 }
 0xaaa   :  { %v14261_v18 = vsel %vm24737_vm13, %v16641_v6, %v14260_v24 }
 0xaab   :  { %v14264_v55 = vsel %vm24737_vm13, %v14262_v60, %v14263_v11  ;;  %v14254_v29 = vsel %vm24737_vm13, %v16640_v10, %v14253_v48 }
 0xaac   :  { %v16689_v1 = vcombine.low %v14261_v18, %v14264_v55 }
 0xaae   :  { %18952 = vmatmul.mubr.bf16.gmra.mrb[24].mxu1 %v16676_v57  ;;  %v13970_v57 = vld [vmem:[#allocation2 + $0x138] sm:$0xe] }
 0xaaf   :  { %18955 = vmatprep.mubr.bf16.mxu1 %v16677_v17  ;;  %v14228_v17 = vrot.slane %v26012_v33, 5  ;;  %v16637_v14 = vrot.slane %v13970_v57, 9  ;;  %v14296_v57 = vsel %vm24737_vm13, %v16646_v51, %v14295_v40 }
 0xab1   :  { %v14229_v21 = vsel %vm24737_vm13, %v14227_v15, %v14228_v17  ;;  %v14233_v33 = vsel %vm24737_vm13, %v16637_v14, %v14232_v28  ;;  %v14298_v28 = vrot.slane %v26118_v12, 5 }
 0xab2   :  { %v16684_v54 = vcombine.low %v14226_v49, %v14229_v21  ;;  %v16685_v34 = vcombine.low %v14233_v33, %v14236_v36 }
 0xab3   :  { %v14299_v62 = vsel %vm24737_vm13, %v14297_v4, %v14298_v28 }
 0xab4   :  { %v16694_v5 = vcombine.low %v14296_v57, %v14299_v62 }
 0xab6   :  { %18956 = vmatmul.mubr.bf16.gmra.mrb[28].mxu1 %v16678_v43  ;;  %v13971_v43 = vld [vmem:[#allocation2 + $0x144] sm:$0xe] }
 0xab7   :  { %18959 = vmatprep.mubr.bf16.mxu1 %v16679_v23  ;;  %v16638_v3 = vrot.slane %v13971_v43, 9  ;;  %v16639_v23 = vrot.slane %v13972_v30, 9 }
 0xab9   :  { %v14240_v19 = vsel %vm24737_vm13, %v16638_v3, %v14239_v7  ;;  %v14247_v16 = vsel %vm24737_vm13, %v16639_v23, %v14246_v59 }
 0xaba   :  { %v16686_v22 = vcombine.low %v14240_v19, %v14243_v47  ;;  %v16687_v13 = vcombine.low %v14247_v16, %v14250_v27 }
 0xabe   :  { %18960 = vmatmul.mubr.bf16.gmra.mrb[32].mxu1 %v16680_v39  ;;  %v14257_v39 = vsel %vm24737_vm13, %v14255_v20, %v14256_v44 }
 0xabf   :  { %18963 = vmatprep.mubr.bf16.mxu1 %v16681_v52  ;;  %v16688_v52 = vcombine.low %v14254_v29, %v14257_v39 }
 0xac6   :  { %18964 = vmatmul.mubr.bf16.gmra.mrb[36].mxu1 %v16682_v35  ;;  %v28041_v35 = vld [vmem:[#allocation28_spill] sm:$0xff] }
 0xac7   :  { %18967 = vmatprep.mubr.bf16.mxu1 %v16683_v31  ;;  %v28042_v32 = vcombine.low %v28040_v53, %v28041_v35  ;;  %v28044_v31 = vld [vmem:[#allocation29_spill] sm:$0xff] }
 0xac8   :  { %v28045_v15 = vcombine.low %v28043_v58, %v28044_v31 }
 0xace   :  { %18968 = vmatmul.mubr.bf16.gmra.mrb[40].mxu1 %v16684_v54 }
 0xacf   :  { %18971 = vmatprep.mubr.bf16.mxu1 %v16685_v34 }
 0xad6   :  { %18972 = vmatmul.mubr.bf16.gmra.mrb[44].mxu1 %v16686_v22 }
 0xad7   :  { %18975 = vmatprep.mubr.bf16.mxu1 %v16687_v13 }
 0xade   :  { %18976 = vmatmul.mubr.bf16.gmra.mrb[48].mxu1 %v16688_v52 }
 0xadf   :  { %18979 = vmatprep.mubr.bf16.mxu1 %v16689_v1 }
 0xae6   :  { %18980 = vmatmul.mubr.bf16.gmra.mrb[52].mxu1 %v28036_v0 }
 0xae7   :  { %18983 = vmatprep.mubr.bf16.mxu1 %v28039_v46 }
 0xaee   :  { %18984 = vmatmul.mubr.bf16.gmra.mrb[56].mxu1 %v28042_v32 }
 0xaef   :  { %18987 = vmatprep.mubr.bf16.mxu1 %v28045_v15 }
 0xaf6   :  { %18988 = vmatmul.mubr.bf16.gmra.mrb[60].mxu1 %v16694_v5 }
 0xb51   :  { %v26283_v61 = vpop.f32.mrb[0].mxu1 }
 0xb52   :  { %v26285_v17 = vpop.f32.mrb[1].mxu1  ;;  %v14920_v7 = vmul.f32 %v26283_v61, %v26283_v61 }
 0xb53   :  { %v26287_v12 = vpop.f32.mrb[2].mxu1  ;;  %v14918_v41 = vmul.f32 %v26285_v17, %v26285_v17 }
 0xb54   :  { %v26289_v14 = vpop.f32.mrb[3].mxu1  ;;  %v14921_v49 = vmul.f32 %v26287_v12, %v26287_v12 }
 0xb55   :  { %v14848_v21 = vadd.f32 %v26289_v14, %v26285_v17  ;;  %v14919_v9 = vmul.f32 %v26289_v14, %v26289_v14 }
 0xb57   :  { %v14849_v36 = vadd.f32 %v26283_v61, %v14848_v21  ;;  %v14982_v59 = vadd.f32 %v14919_v9, %v14918_v41 }
 0xb59   :  { %v14983_v54 = vadd.f32 %v14982_v59, %v14920_v7  ;;  %v26302_v33 = vpop.f32.mrb[4].mxu1  ;;  %v14850_v43 = vadd.f32 %v26287_v12, %v14849_v36 }
 0xb5a   :  { %v26305_v34 = vpop.f32.mrb[5].mxu1  ;;  %v14924_v48 = vmul.f32 %v26302_v33, %v26302_v33 }
 0xb5b   :  { %v14851_v45 = vadd.f32 %v14850_v43, %v26305_v34  ;;  %v14922_v30 = vmul.f32 %v26305_v34, %v26305_v34  ;;  %v14984_v56 = vadd.f32 %v14983_v54, %v14921_v49  ;;  %v26310_v3 = vpop.f32.mrb[6].mxu1 }
 0xb5c   :  { %v26312_v37 = vpop.f32.mrb[7].mxu1  ;;  %v14925_v19 = vmul.f32 %v26310_v3, %v26310_v3 }
 0xb5d   :  { %v14985_v23 = vadd.f32 %v14984_v56, %v14922_v30  ;;  %v14852_v26 = vadd.f32 %v14851_v45, %v26312_v37  ;;  %v14923_v47 = vmul.f32 %v26312_v37, %v26312_v37 }
 0xb5f   :  { %v14853_v27 = vadd.f32 %v26302_v33, %v14852_v26  ;;  %v14986_v24 = vadd.f32 %v14985_v23, %v14923_v47 }
 0xb61   :  { %v14987_v22 = vadd.f32 %v14986_v24, %v14924_v48  ;;  %v26322_v16 = vpop.f32.mrb[8].mxu1  ;;  %v14854_v42 = vadd.f32 %v26310_v3, %v14853_v27 }
 0xb62   :  { %v26325_v13 = vpop.f32.mrb[9].mxu1  ;;  %v14928_v55 = vmul.f32 %v26322_v16, %v26322_v16 }
 0xb63   :  { %v14855_v20 = vadd.f32 %v14854_v42, %v26325_v13  ;;  %v14926_v2 = vmul.f32 %v26325_v13, %v26325_v13  ;;  %v14988_v60 = vadd.f32 %v14987_v22, %v14925_v19  ;;  %v26330_v10 = vpop.f32.mrb[10].mxu1 }
 0xb64   :  { %v26332_v44 = vpop.f32.mrb[11].mxu1  ;;  %v14929_v18 = vmul.f32 %v26330_v10, %v26330_v10 }
 0xb65   :  { %v14989_v6 = vadd.f32 %v14988_v60, %v14926_v2  ;;  %v14856_v11 = vadd.f32 %v14855_v20, %v26332_v44  ;;  %v14927_v39 = vmul.f32 %v26332_v44, %v26332_v44 }
 0xb67   :  { %v14857_v29 = vadd.f32 %v26322_v16, %v14856_v11  ;;  %v14990_v52 = vadd.f32 %v14989_v6, %v14927_v39 }
 0xb69   :  { %v14991_v1 = vadd.f32 %v14990_v52, %v14928_v55  ;;  %v26342_v38 = vpop.f32.mrb[12].mxu1  ;;  %v14858_v25 = vadd.f32 %v26330_v10, %v14857_v29 }
 0xb6a   :  { %v26345_v0 = vpop.f32.mrb[13].mxu1  ;;  %v14932_v53 = vmul.f32 %v26342_v38, %v26342_v38 }
 0xb6b   :  { %v14859_v63 = vadd.f32 %v14858_v25, %v26345_v0  ;;  %v14930_v50 = vmul.f32 %v26345_v0, %v26345_v0  ;;  %v14992_v46 = vadd.f32 %v14991_v1, %v14929_v18  ;;  %v26350_v40 = vpop.f32.mrb[14].mxu1 }
 0xb6c   :  { %v26352_v8 = vpop.f32.mrb[15].mxu1  ;;  %v14933_v58 = vmul.f32 %v26350_v40, %v26350_v40 }
 0xb6d   :  { %v14993_v51 = vadd.f32 %v14992_v46, %v14930_v50  ;;  %v14860_v4 = vadd.f32 %v14859_v63, %v26352_v8  ;;  %v14931_v28 = vmul.f32 %v26352_v8, %v26352_v8 }
 0xb6f   :  { %v14861_v35 = vadd.f32 %v26342_v38, %v14860_v4  ;;  %v14994_v32 = vadd.f32 %v14993_v51, %v14931_v28 }
 0xb71   :  { %v14995_v31 = vadd.f32 %v14994_v32, %v14932_v53  ;;  %v26362_v15 = vpop.f32.mrb[16].mxu1  ;;  %v14862_v57 = vadd.f32 %v26350_v40, %v14861_v35 }
 0xb72   :  { %v26365_v62 = vpop.f32.mrb[17].mxu1  ;;  %v14936_v54 = vmul.f32 %v26362_v15, %v26362_v15 }
 0xb73   :  { %v14863_v5 = vadd.f32 %v14862_v57, %v26365_v62  ;;  %v14934_v41 = vmul.f32 %v26365_v62, %v26365_v62  ;;  %v14996_v21 = vadd.f32 %v14995_v31, %v14933_v58  ;;  %v26370_v9 = vpop.f32.mrb[18].mxu1 }
 0xb74   :  { %v26372_v7 = vpop.f32.mrb[19].mxu1  ;;  %v14937_v30 = vmul.f32 %v26370_v9, %v26370_v9 }
 0xb75   :  { %v14997_v36 = vadd.f32 %v14996_v21, %v14934_v41  ;;  %v14864_v59 = vadd.f32 %v14863_v5, %v26372_v7  ;;  %v14935_v49 = vmul.f32 %v26372_v7, %v26372_v7 }
 0xb77   :  { %v14865_v43 = vadd.f32 %v26362_v15, %v14864_v59  ;;  %v14998_v45 = vadd.f32 %v14997_v36, %v14935_v49 }
 0xb79   :  { %v14999_v56 = vadd.f32 %v14998_v45, %v14936_v54  ;;  %v26382_v23 = vpop.f32.mrb[20].mxu1  ;;  %v14866_v26 = vadd.f32 %v26370_v9, %v14865_v43 }
 0xb7a   :  { %v26385_v47 = vpop.f32.mrb[21].mxu1  ;;  %v14940_v60 = vmul.f32 %v26382_v23, %v26382_v23 }
 0xb7b   :  { %v14867_v48 = vadd.f32 %v14866_v26, %v26385_v47  ;;  %v14938_v27 = vmul.f32 %v26385_v47, %v26385_v47  ;;  %v15000_v24 = vadd.f32 %v14999_v56, %v14937_v30  ;;  %v26390_v19 = vpop.f32.mrb[22].mxu1 }
 0xb7c   :  { %v26392_v22 = vpop.f32.mrb[23].mxu1  ;;  %v14941_v39 = vmul.f32 %v26390_v19, %v26390_v19 }
 0xb7d   :  { %v15001_v42 = vadd.f32 %v15000_v24, %v14938_v27  ;;  %v14868_v20 = vadd.f32 %v14867_v48, %v26392_v22  ;;  %v14939_v2 = vmul.f32 %v26392_v22, %v26392_v22 }
 0xb7f   :  { %v14869_v6 = vadd.f32 %v26382_v23, %v14868_v20  ;;  %v15002_v11 = vadd.f32 %v15001_v42, %v14939_v2 }
 0xb81   :  { %v15003_v55 = vadd.f32 %v15002_v11, %v14940_v60  ;;  %v26402_v29 = vpop.f32.mrb[24].mxu1  ;;  %v14870_v52 = vadd.f32 %v26390_v19, %v14869_v6 }
 0xb82   :  { %v26405_v18 = vpop.f32.mrb[25].mxu1  ;;  %v14944_v53 = vmul.f32 %v26402_v29, %v26402_v29 }
 0xb83   :  { %v14871_v1 = vadd.f32 %v14870_v52, %v26405_v18  ;;  %v14942_v25 = vmul.f32 %v26405_v18, %v26405_v18  ;;  %v15004_v63 = vadd.f32 %v15003_v55, %v14941_v39  ;;  %v26410_v50 = vpop.f32.mrb[26].mxu1 }
 0xb84   :  { %v26412_v46 = vpop.f32.mrb[27].mxu1  ;;  %v14945_v58 = vmul.f32 %v26410_v50, %v26410_v50 }
 0xb85   :  { %v15005_v51 = vadd.f32 %v15004_v63, %v14942_v25  ;;  %v14872_v4 = vadd.f32 %v14871_v1, %v26412_v46  ;;  %v14943_v28 = vmul.f32 %v26412_v46, %v26412_v46 }
 0xb87   :  { %v14873_v35 = vadd.f32 %v26402_v29, %v14872_v4  ;;  %v15006_v32 = vadd.f32 %v15005_v51, %v14943_v28 }
 0xb89   :  { %v15007_v31 = vadd.f32 %v15006_v32, %v14944_v53  ;;  %v26422_v57 = vpop.f32.mrb[28].mxu1  ;;  %v14874_v5 = vadd.f32 %v26410_v50, %v14873_v35 }
 0xb8a   :  { %v26425_v41 = vpop.f32.mrb[29].mxu1  ;;  %v14948_v56 = vmul.f32 %v26422_v57, %v26422_v57 }
 0xb8b   :  { %v14875_v21 = vadd.f32 %v14874_v5, %v26425_v41  ;;  %v14946_v36 = vmul.f32 %v26425_v41, %v26425_v41  ;;  %v15008_v59 = vadd.f32 %v15007_v31, %v14945_v58  ;;  %v26430_v49 = vpop.f32.mrb[30].mxu1 }
 0xb8c   :  { %v26432_v54 = vpop.f32.mrb[31].mxu1  ;;  %v14949_v27 = vmul.f32 %v26430_v49, %v26430_v49 }
 0xb8d   :  { %v15009_v43 = vadd.f32 %v15008_v59, %v14946_v36  ;;  %v14876_v45 = vadd.f32 %v14875_v21, %v26432_v54  ;;  %v14947_v30 = vmul.f32 %v26432_v54, %v26432_v54 }
 0xb8f   :  { %v14877_v26 = vadd.f32 %v26422_v57, %v14876_v45  ;;  %v15010_v48 = vadd.f32 %v15009_v43, %v14947_v30 }
 0xb91   :  { %v15011_v24 = vadd.f32 %v15010_v48, %v14948_v56  ;;  %v26442_v42 = vpop.f32.mrb[32].mxu1  ;;  %v14878_v20 = vadd.f32 %v26430_v49, %v14877_v26 }
 0xb92   :  { %v26445_v2 = vpop.f32.mrb[33].mxu1  ;;  %v14952_v63 = vmul.f32 %v26442_v42, %v26442_v42 }
 0xb93   :  { %v14879_v60 = vadd.f32 %v14878_v20, %v26445_v2  ;;  %v14950_v6 = vmul.f32 %v26445_v2, %v26445_v2  ;;  %v15012_v11 = vadd.f32 %v15011_v24, %v14949_v27  ;;  %v26450_v39 = vpop.f32.mrb[34].mxu1 }
 0xb94   :  { %v26452_v55 = vpop.f32.mrb[35].mxu1  ;;  %v14953_v28 = vmul.f32 %v26450_v39, %v26450_v39 }
 0xb95   :  { %v15013_v52 = vadd.f32 %v15012_v11, %v14950_v6  ;;  %v14880_v1 = vadd.f32 %v14879_v60, %v26452_v55  ;;  %v14951_v25 = vmul.f32 %v26452_v55, %v26452_v55 }
 0xb97   :  { %v14881_v51 = vadd.f32 %v26442_v42, %v14880_v1  ;;  %v15014_v4 = vadd.f32 %v15013_v52, %v14951_v25 }
 0xb99   :  { %v15015_v53 = vadd.f32 %v15014_v4, %v14952_v63  ;;  %v26462_v35 = vpop.f32.mrb[36].mxu1  ;;  %v14882_v32 = vadd.f32 %v26450_v39, %v14881_v51 }
 0xb9a   :  { %28046 = vst [vmem:[#allocation6_spill] sm:$0xff] %v26462_v35  ;;  %v26465_v58 = vpop.f32.mrb[37].mxu1  ;;  %v14956_v56 = vmul.f32 %v26462_v35, %v26462_v35 }
 0xb9b   :  { %v14883_v31 = vadd.f32 %v14882_v32, %v26465_v58  ;;  %v14954_v5 = vmul.f32 %v26465_v58, %v26465_v58  ;;  %v15016_v21 = vadd.f32 %v15015_v53, %v14953_v28  ;;  %v26470_v36 = vpop.f32.mrb[38].mxu1 }
 0xb9c   :  { %28047 = vst [vmem:[#allocation8_spill] sm:$0xff] %v26470_v36  ;;  %v26472_v59 = vpop.f32.mrb[39].mxu1  ;;  %v14957_v27 = vmul.f32 %v26470_v36, %v26470_v36 }
 0xb9d   :  { %v15017_v43 = vadd.f32 %v15016_v21, %v14954_v5  ;;  %v14884_v45 = vadd.f32 %v14883_v31, %v26472_v59  ;;  %v14955_v30 = vmul.f32 %v26472_v59, %v26472_v59 }
 0xb9f   :  { %v14885_v26 = vadd.f32 %v26462_v35, %v14884_v45  ;;  %v15018_v48 = vadd.f32 %v15017_v43, %v14955_v30 }
 0xba1   :  { %v15019_v24 = vadd.f32 %v15018_v48, %v14956_v56  ;;  %v26482_v20 = vpop.f32.mrb[40].mxu1  ;;  %v14886_v60 = vadd.f32 %v26470_v36, %v14885_v26 }
 0xba2   :  { %28048 = vst [vmem:[#allocation7_spill] sm:$0xff] %v26482_v20  ;;  %v26485_v6 = vpop.f32.mrb[41].mxu1  ;;  %v14960_v53 = vmul.f32 %v26482_v20, %v26482_v20 }
 0xba3   :  { %28049 = vst [vmem:[#allocation10_spill] sm:$0xff] %v26485_v6  ;;  %v14887_v11 = vadd.f32 %v14886_v60, %v26485_v6  ;;  %v14958_v52 = vmul.f32 %v26485_v6, %v26485_v6  ;;  %v15020_v1 = vadd.f32 %v15019_v24, %v14957_v27  ;;  %v26490_v25 = vpop.f32.mrb[42].mxu1 }
 0xba4   :  { %28050 = vst [vmem:[#allocation36_spill] sm:$0xff] %v26490_v25  ;;  %v26492_v63 = vpop.f32.mrb[43].mxu1  ;;  %v14961_v5 = vmul.f32 %v26490_v25, %v26490_v25 }
 0xba5   :  { %28051 = vst [vmem:[#allocation35_spill] sm:$0xff] %v26492_v63  ;;  %v15021_v51 = vadd.f32 %v15020_v1, %v14958_v52  ;;  %v14888_v4 = vadd.f32 %v14887_v11, %v26492_v63  ;;  %v14959_v28 = vmul.f32 %v26492_v63, %v26492_v63 }
 0xba7   :  { %v14889_v32 = vadd.f32 %v26482_v20, %v14888_v4  ;;  %v15022_v31 = vadd.f32 %v15021_v51, %v14959_v28 }
 0xba9   :  { %v15023_v21 = vadd.f32 %v15022_v31, %v14960_v53  ;;  %v26502_v43 = vpop.f32.mrb[44].mxu1  ;;  %v14890_v45 = vadd.f32 %v26490_v25, %v14889_v32 }
 0xbaa   :  { %28052 = vst [vmem:[#allocation38_spill] sm:$0xff] %v26502_v43  ;;  %v26505_v30 = vpop.f32.mrb[45].mxu1  ;;  %v14964_v1 = vmul.f32 %v26502_v43, %v26502_v43 }
 0xbab   :  { %28053 = vst [vmem:[#allocation37_spill] sm:$0xff] %v26505_v30  ;;  %v14891_v56 = vadd.f32 %v14890_v45, %v26505_v30  ;;  %v14962_v26 = vmul.f32 %v26505_v30, %v26505_v30  ;;  %v15024_v48 = vadd.f32 %v15023_v21, %v14961_v5  ;;  %v26510_v27 = vpop.f32.mrb[46].mxu1 }
 0xbac   :  { %28054 = vst [vmem:[#allocation40_spill] sm:$0xff] %v26510_v27  ;;  %v26512_v24 = vpop.f32.mrb[47].mxu1  ;;  %v14965_v28 = vmul.f32 %v26510_v27, %v26510_v27 }
 0xbad   :  { %28055 = vst [vmem:[#allocation39_spill] sm:$0xff] %v26512_v24  ;;  %v15025_v60 = vadd.f32 %v15024_v48, %v14962_v26  ;;  %v14892_v11 = vadd.f32 %v14891_v56, %v26512_v24  ;;  %v14963_v52 = vmul.f32 %v26512_v24, %v26512_v24 }
 0xbaf   :  { %v14893_v51 = vadd.f32 %v26502_v43, %v14892_v11  ;;  %v15026_v4 = vadd.f32 %v15025_v60, %v14963_v52 }
 0xbb1   :  { %v15027_v53 = vadd.f32 %v15026_v4, %v14964_v1  ;;  %v26522_v32 = vpop.f32.mrb[48].mxu1  ;;  %v14894_v31 = vadd.f32 %v26510_v27, %v14893_v51 }
 0xbb2   :  { %28056 = vst [vmem:[#allocation9_spill] sm:$0xff] %v26522_v32  ;;  %v26525_v5 = vpop.f32.mrb[49].mxu1  ;;  %v14968_v1 = vmul.f32 %v26522_v32, %v26522_v32 }
 0xbb3   :  { %28057 = vst [vmem:[#allocation12_spill] sm:$0xff] %v26525_v5  ;;  %v14895_v21 = vadd.f32 %v14894_v31, %v26525_v5  ;;  %v14966_v45 = vmul.f32 %v26525_v5, %v26525_v5  ;;  %v15028_v56 = vadd.f32 %v15027_v53, %v14965_v28  ;;  %v26530_v26 = vpop.f32.mrb[50].mxu1 }
 0xbb4   :  { %28058 = vst [vmem:[#allocation17_spill] sm:$0xff] %v26530_v26  ;;  %v26532_v48 = vpop.f32.mrb[51].mxu1  ;;  %v14969_v31 = vmul.f32 %v26530_v26, %v26530_v26 }
 0xbb5   :  { %28059 = vst [vmem:[#allocation11_spill] sm:$0xff] %v26532_v48  ;;  %v15029_v60 = vadd.f32 %v15028_v56, %v14966_v45  ;;  %v14896_v11 = vadd.f32 %v14895_v21, %v26532_v48  ;;  %v14967_v52 = vmul.f32 %v26532_v48, %v26532_v48 }
 0xbb7   :  { %v14897_v51 = vadd.f32 %v26522_v32, %v14896_v11  ;;  %v15030_v4 = vadd.f32 %v15029_v60, %v14967_v52 }
 0xbb9   :  { %v15031_v28 = vadd.f32 %v15030_v4, %v14968_v1  ;;  %v26542_v53 = vpop.f32.mrb[52].mxu1  ;;  %v14898_v5 = vadd.f32 %v26530_v26, %v14897_v51 }
 0xbba   :  { %28060 = vst [vmem:[#allocation21_spill] sm:$0xff] %v26542_v53  ;;  %v26545_v45 = vpop.f32.mrb[53].mxu1  ;;  %v14972_v51 = vmul.f32 %v26542_v53, %v26542_v53 }
 0xbbb   :  { %28061 = vst [vmem:[#allocation24_spill] sm:$0xff] %v26545_v45  ;;  %v14899_v21 = vadd.f32 %v14898_v5, %v26545_v45  ;;  %v14970_v56 = vmul.f32 %v26545_v45, %v26545_v45  ;;  %v15032_v48 = vadd.f32 %v15031_v28, %v14969_v31  ;;  %v26550_v27 = vpop.f32.mrb[54].mxu1 }
 0xbbc   :  { %28062 = vst [vmem:[#allocation25_spill] sm:$0xff] %v26550_v27  ;;  %v26552_v11 = vpop.f32.mrb[55].mxu1  ;;  %v14973_v45 = vmul.f32 %v26550_v27, %v26550_v27 }
 0xbbd   :  { %28063 = vst [vmem:[#allocation23_spill] sm:$0xff] %v26552_v11  ;;  %v15033_v60 = vadd.f32 %v15032_v48, %v14970_v56  ;;  %v14900_v52 = vadd.f32 %v14899_v21, %v26552_v11  ;;  %v14971_v1 = vmul.f32 %v26552_v11, %v26552_v11 }
 0xbbf   :  { %v14901_v4 = vadd.f32 %v26542_v53, %v14900_v52  ;;  %v15034_v5 = vadd.f32 %v15033_v60, %v14971_v1 }
 0xbc1   :  { %v15035_v31 = vadd.f32 %v15034_v5, %v14972_v51  ;;  %v26562_v28 = vpop.f32.mrb[56].mxu1  ;;  %v14902_v26 = vadd.f32 %v26550_v27, %v14901_v4 }
 0xbc2   :  { %28064 = vst [vmem:[#allocation31_spill] sm:$0xff] %v26562_v28  ;;  %v26565_v48 = vpop.f32.mrb[57].mxu1  ;;  %v14976_v4 = vmul.f32 %v26562_v28, %v26562_v28 }
 0xbc3   :  { %28065 = vst [vmem:[#allocation33_spill] sm:$0xff] %v26565_v48  ;;  %v14903_v21 = vadd.f32 %v14902_v26, %v26565_v48  ;;  %v14974_v56 = vmul.f32 %v26565_v48, %v26565_v48  ;;  %v15036_v11 = vadd.f32 %v15035_v31, %v14973_v45  ;;  %v26570_v32 = vpop.f32.mrb[58].mxu1 }
 0xbc4   :  { %28066 = vst [vmem:[#allocation26_spill] sm:$0xff] %v26570_v32  ;;  %v26572_v52 = vpop.f32.mrb[59].mxu1  ;;  %v14977_v48 = vmul.f32 %v26570_v32, %v26570_v32 }
 0xbc5   :  { %28067 = vst [vmem:[#allocation27_spill] sm:$0xff] %v26572_v52  ;;  %v15037_v60 = vadd.f32 %v15036_v11, %v14974_v56  ;;  %v14904_v1 = vadd.f32 %v14903_v21, %v26572_v52  ;;  %v14975_v51 = vmul.f32 %v26572_v52, %v26572_v52 }
 0xbc7   :  { %v14905_v5 = vadd.f32 %v26562_v28, %v14904_v1  ;;  %v15038_v26 = vadd.f32 %v15037_v60, %v14975_v51 }
 0xbc9   :  { %v15039_v45 = vadd.f32 %v15038_v26, %v14976_v4  ;;  %v26582_v31 = vpop.f32.mrb[60].mxu1  ;;  %v14906_v27 = vadd.f32 %v26570_v32, %v14905_v5 }
 0xbca   :  { %28068 = vst [vmem:[#allocation14_spill] sm:$0xff] %v26582_v31  ;;  %v26585_v11 = vpop.f32.mrb[61].mxu1  ;;  %v14980_v4 = vmul.f32 %v26582_v31, %v26582_v31 }
 0xbcb   :  { %28069 = vst [vmem:[#allocation34_spill] sm:$0xff] %v26585_v11  ;;  %v14907_v21 = vadd.f32 %v14906_v27, %v26585_v11  ;;  %v14978_v56 = vmul.f32 %v26585_v11, %v26585_v11  ;;  %v15040_v52 = vadd.f32 %v15039_v45, %v14977_v48  ;;  %v26590_v53 = vpop.f32.mrb[62].mxu1 }
 0xbcc   :  { %v14770_v1 = vpop.f32.mrb[63].mxu1  ;;  %v14981_v32 = vmul.f32 %v26590_v53, %v26590_v53 }
 0xbcd   :  { %v15041_v60 = vadd.f32 %v15040_v52, %v14978_v56  ;;  %v14908_v51 = vadd.f32 %v14907_v21, %v14770_v1  ;;  %v14979_v28 = vmul.f32 %v14770_v1, %v14770_v1 }
 0xbcf   :  { %v14909_v26 = vadd.f32 %v26582_v31, %v14908_v51  ;;  %v15042_v5 = vadd.f32 %v15041_v60, %v14979_v28 }
 0xbd1   :  { %v14910_v27 = vadd.f32 %v26590_v53, %v14909_v26  ;;  %v15043_v43 = vadd.f32 %v15042_v5, %v14980_v4 }
 0xbd3   :  { %v14911_v11 = vrot.slane %v14910_v27, 4  ;;  %v15044_v48 = vadd.f32 %v15043_v43, %v14981_v32  ;;  %v14846_v43 = vld [vmem:[%s27577_s5] sm:$0x1] }
 0xbd5   :  { %v14912_v45 = vadd.f32 %v14911_v11, %v14910_v27  ;;  %v15045_v24 = vrot.slane %v15044_v48, 4 }
 0xbd7   :  { %v14913_v30 = vrot.slane %v14912_v45, 2  ;;  %v15046_v52 = vadd.f32 %v15045_v24, %v15044_v48 }
 0xbd9   :  { %v14914_v21 = vadd.f32 %v14913_v30, %v14912_v45  ;;  %v15047_v56 = vrot.slane %v15046_v52, 2  ;;  %v14847_v30 = vld [vmem:[%s27578_s6] sm:$0x1] }
 0xbdb   :  { %v14915_v25 = vrot.slane %v14914_v21, 1  ;;  %v15048_v20 = vadd.f32 %v15047_v56, %v15046_v52  ;;  %v28073_v56 = vld [vmem:[#allocation10_spill] sm:$0xff] }
 0xbdd   :  { %v14916_v63 = vadd.f32 %v14915_v25, %v14914_v21  ;;  %v15049_v6 = vrot.slane %v15048_v20, 1  ;;  %v28070_v25 = vld [vmem:[#allocation30_spill] sm:$0xff]  ;;  %v28072_v21 = vld [vmem:[#allocation8_spill] sm:$0xff] }
 0xbdf   :  { %v14917_v51 = vmul.f32 0.001953125, %v14916_v63  ;;  %v15050_v28 = vadd.f32 %v15049_v6, %v15048_v20 }
 0xbe1   :  { %v15051_v60 = vmul.f32 0.001953125, %v15050_v28  ;;  %v15052_v31 = vmul.f32 %v14917_v51, %v14917_v51  ;;  %v28075_v28 = vld [vmem:[#allocation7_spill] sm:$0xff] }
 0xbe3   :  { %v15053_v36 = vsub.f32 %v15051_v60, %v15052_v31  ;;  %v28076_v60 = vld [vmem:[#allocation36_spill] sm:$0xff] }
 0xbe5   :  { %v15054_v35 = vadd.f32 1e-05, %v15053_v36 }
 0xbe7   :  { %20261 = vrsqrt.f32 %v15054_v35 }
 0xbf1   :  { %v20262_v32 = vpop.eup %20261 }
 0xbf2   :  { %v15056_v11 = vmul.f32 %v20262_v32, %v14846_v43  ;;  %v28077_v32 = vld [vmem:[#allocation37_spill] sm:$0xff] }
 0xbf4   :  { %v15057_v24 = vmul.f32 %v15056_v11, %v14917_v51  ;;  %v26605_v4 = vrot.slane %v15056_v11, %v28070_v25  ;;  %v28074_v51 = vld [vmem:[#allocation35_spill] sm:$0xff] }
 0xbf6   :  { %v15058_v20 = vsub.f32 %v14847_v30, %v15057_v24  ;;  %v15126_v6 = vmul.f32 %v26605_v4, %v14770_v1  ;;  %v26610_v35 = vmul.f32 %v26605_v4, %v26285_v17  ;;  %v26614_v36 = vmul.f32 %v26605_v4, %v26289_v14  ;;  %v28078_v30 = vld [vmem:[#allocation39_spill] sm:$0xff] }
 0xbf7   :  { %v26618_v63 = vmul.f32 %v26283_v61, %v26605_v4  ;;  %v26622_v31 = vmul.f32 %v26287_v12, %v26605_v4  ;;  %v26626_v26 = vmul.f32 %v26605_v4, %v26305_v34  ;;  %v26630_v17 = vmul.f32 %v26605_v4, %v26312_v37  ;;  %v16764_v34 = vld [vmem:[%s27572_s0 + $0x321] sm:$0xff] }
 0xbf8   :  { %v26633_v1 = vrot.slane %v15058_v20, %v28070_v25  ;;  %v26637_v14 = vmul.f32 %v26302_v33, %v26605_v4  ;;  %v26641_v61 = vmul.f32 %v26310_v3, %v26605_v4  ;;  %v26645_v12 = vmul.f32 %v26605_v4, %v26325_v13  ;;  %v28079_v25 = vld [vmem:[#allocation38_spill] sm:$0xff] }
 0xbf9   :  { %v26652_v37 = vmul.f32 %v26605_v4, %v26332_v44  ;;  %v26656_v33 = vmul.f32 %v26322_v16, %v26605_v4  ;;  %v26660_v3 = vmul.f32 %v26330_v10, %v26605_v4  ;;  %v26664_v13 = vmul.f32 %v26605_v4, %v26345_v0 }
 0xbfa   :  { %v15196_v5 = vadd.f32 %v26633_v1, %v15126_v6  ;;  %v26669_v27 = vmul.f32 %v26605_v4, %v26352_v8  ;;  %v26673_v44 = vmul.f32 %v26342_v38, %v26605_v4  ;;  %v26677_v16 = vmul.f32 %v26350_v40, %v26605_v4  ;;  %v28080_v6 = vld [vmem:[#allocation40_spill] sm:$0xff] }
 0xbfb   :  { %v26681_v10 = vmul.f32 %v26605_v4, %v26365_v62  ;;  %v26685_v0 = vmul.f32 %v26605_v4, %v26372_v7  ;;  %v26689_v8 = vmul.f32 %v26362_v15, %v26605_v4  ;;  %v26693_v38 = vmul.f32 %v26370_v9, %v26605_v4 }
 0xbfc   :  { %v15324_v48 = vadd.f32 %v16764_v34, %v15196_v5  ;;  %v26697_v40 = vmul.f32 %v26605_v4, %v26385_v47  ;;  %v26701_v62 = vmul.f32 %v26605_v4, %v26392_v22  ;;  %v26705_v7 = vmul.f32 %v26382_v23, %v26605_v4  ;;  %v28081_v5 = vld [vmem:[#allocation12_spill] sm:$0xff] }
 0xbfd   :  { %v26709_v15 = vmul.f32 %v26390_v19, %v26605_v4  ;;  %v26713_v9 = vmul.f32 %v26605_v4, %v26405_v18  ;;  %v26717_v47 = vmul.f32 %v26605_v4, %v26412_v46  ;;  %v26721_v22 = vmul.f32 %v26402_v29, %v26605_v4 }
 0xbfe   :  { %v15388_v45 = vmax.f32 %v15324_v48, 0.0  ;;  %v26725_v23 = vmul.f32 %v26410_v50, %v26605_v4  ;;  %v26729_v19 = vmul.f32 %v26605_v4, %v26425_v41  ;;  %v26733_v18 = vmul.f32 %v26605_v4, %v26432_v54 }
 0xbff   :  { %v26737_v46 = vmul.f32 %v26422_v57, %v26605_v4  ;;  %v26741_v29 = vmul.f32 %v26430_v49, %v26605_v4  ;;  %v26745_v50 = vmul.f32 %v26605_v4, %v26445_v2  ;;  %v26749_v41 = vmul.f32 %v26605_v4, %v26452_v55  ;;  %v28071_v55 = vld [vmem:[#allocation6_spill] sm:$0xff] }
 0xc00   :  { %15452 = vst [vmem:[#allocation3 + $0x1e8] sm:$0xff] %v15388_v45  ;;  %v26753_v54 = vmul.f32 %v26442_v42, %v26605_v4  ;;  %v26757_v57 = vmul.f32 %v26450_v39, %v26605_v4  ;;  %v26761_v49 = vmul.f32 %v26605_v4, %v26465_v58  ;;  %v26765_v2 = vmul.f32 %v26605_v4, %v26472_v59  ;;  %v28082_v45 = vld [vmem:[#allocation11_spill] sm:$0xff] }
 0xc01   :  { %v26769_v52 = vmul.f32 %v28071_v55, %v26605_v4  ;;  %v26773_v42 = vmul.f32 %v28072_v21, %v26605_v4  ;;  %v26777_v39 = vmul.f32 %v26605_v4, %v28073_v56  ;;  %v26781_v58 = vmul.f32 %v26605_v4, %v28074_v51  ;;  %v28083_v21 = vld [vmem:[#allocation9_spill] sm:$0xff] }
 0xc02   :  { %v26785_v59 = vmul.f32 %v28075_v28, %v26605_v4  ;;  %v26789_v43 = vmul.f32 %v28076_v60, %v26605_v4  ;;  %v26793_v11 = vmul.f32 %v26605_v4, %v28077_v32  ;;  %v26797_v24 = vmul.f32 %v26605_v4, %v28078_v30  ;;  %v28085_v51 = vld [vmem:[#allocation17_spill] sm:$0xff]  ;;  %v28087_v60 = vld [vmem:[#allocation24_spill] sm:$0xff]  ;;  %v28089_v30 = vld [vmem:[#allocation23_spill] sm:$0xff] }
 0xc03   :  { %v26801_v20 = vmul.f32 %v28079_v25, %v26605_v4  ;;  %v26805_v34 = vmul.f32 %v28080_v6, %v26605_v4  ;;  %v26809_v48 = vmul.f32 %v26605_v4, %v28081_v5  ;;  %v26813_v55 = vmul.f32 %v26605_v4, %v28082_v45  ;;  %v28091_v6 = vld [vmem:[#allocation21_spill] sm:$0xff] }
 0xc04   :  { %v26817_v56 = vmul.f32 %v28083_v21, %v26605_v4  ;;  %v26821_v28 = vmul.f32 %v28085_v51, %v26605_v4  ;;  %v26825_v32 = vmul.f32 %v26605_v4, %v28087_v60  ;;  %v26829_v25 = vmul.f32 %v26605_v4, %v28089_v30  ;;  %v28093_v45 = vld [vmem:[#allocation25_spill] sm:$0xff] }
 0xc05   :  { %v26833_v5 = vmul.f32 %v28091_v6, %v26605_v4  ;;  %v26837_v21 = vmul.f32 %v28093_v45, %v26605_v4 }
 0xc06   :  { %28084 = vst [vmem:[#allocation13_spill] sm:$0xff] %v26817_v56  ;;  %28086 = vst [vmem:[#allocation16_spill] sm:$0xff] %v26821_v28  ;;  %v28095_v56 = vld [vmem:[#allocation33_spill] sm:$0xff]  ;;  %v28096_v28 = vld [vmem:[#allocation27_spill] sm:$0xff] }
 0xc07   :  { %28088 = vst [vmem:[#allocation18_spill] sm:$0xff] %v26825_v32  ;;  %28090 = vst [vmem:[#allocation15_spill] sm:$0xff] %v26829_v25  ;;  %v26841_v51 = vmul.f32 %v26605_v4, %v28095_v56  ;;  %v26845_v60 = vmul.f32 %v26605_v4, %v28096_v28  ;;  %v28097_v32 = vld [vmem:[#allocation31_spill] sm:$0xff]  ;;  %v28098_v25 = vld [vmem:[#allocation26_spill] sm:$0xff]  ;;  %v26865_v28 = vmul.f32 %v26590_v53, %v26605_v4 }
 0xc08   :  { %28092 = vst [vmem:[#allocation19_spill] sm:$0xff] %v26833_v5  ;;  %28094 = vst [vmem:[#allocation20_spill] sm:$0xff] %v26837_v21  ;;  %v26849_v30 = vmul.f32 %v28097_v32, %v26605_v4  ;;  %v26853_v6 = vmul.f32 %v28098_v25, %v26605_v4  ;;  %v28099_v5 = vld [vmem:[#allocation34_spill] sm:$0xff]  ;;  %v26869_v32 = vadd.f32 %v26633_v1, %v26610_v35 }
 0xc09   :  { %v26857_v45 = vmul.f32 %v26605_v4, %v28099_v5  ;;  %v28100_v21 = vld [vmem:[#allocation14_spill] sm:$0xff]  ;;  %v26873_v25 = vadd.f32 %v26633_v1, %v26614_v36  ;;  %v26877_v5 = vadd.f32 %v26633_v1, %v26618_v63  ;;  %v26885_v53 = vadd.f32 %v26633_v1, %v26626_v26 }
 0xc0a   :  { %v26861_v56 = vmul.f32 %v28100_v21, %v26605_v4  ;;  %v26881_v21 = vadd.f32 %v26633_v1, %v26622_v31  ;;  %v26889_v4 = vadd.f32 %v26633_v1, %v26630_v17  ;;  %v26893_v35 = vadd.f32 %v26633_v1, %v26637_v14 }
 0xc0b   :  { %v26897_v36 = vadd.f32 %v26633_v1, %v26641_v61  ;;  %v26901_v63 = vadd.f32 %v26633_v1, %v26645_v12  ;;  %v26905_v31 = vadd.f32 %v26633_v1, %v26652_v37  ;;  %v26909_v26 = vadd.f32 %v26633_v1, %v26656_v33 }
 0xc0c   :  { %v26913_v17 = vadd.f32 %v26633_v1, %v26660_v3  ;;  %v26917_v14 = vadd.f32 %v26633_v1, %v26664_v13  ;;  %v26921_v61 = vadd.f32 %v26633_v1, %v26669_v27  ;;  %v26925_v12 = vadd.f32 %v26633_v1, %v26673_v44 }
 0xc0d   :  { %v26929_v37 = vadd.f32 %v26633_v1, %v26677_v16  ;;  %v26933_v33 = vadd.f32 %v26633_v1, %v26681_v10  ;;  %v26937_v3 = vadd.f32 %v26633_v1, %v26685_v0  ;;  %v26941_v13 = vadd.f32 %v26633_v1, %v26689_v8 }
 0xc0e   :  { %v26945_v27 = vadd.f32 %v26633_v1, %v26693_v38  ;;  %v26949_v44 = vadd.f32 %v26633_v1, %v26697_v40  ;;  %v26953_v16 = vadd.f32 %v26633_v1, %v26701_v62  ;;  %v26957_v10 = vadd.f32 %v26633_v1, %v26705_v7 }
 0xc0f   :  { %v26961_v0 = vadd.f32 %v26633_v1, %v26709_v15  ;;  %v26965_v8 = vadd.f32 %v26633_v1, %v26713_v9  ;;  %v26969_v38 = vadd.f32 %v26633_v1, %v26717_v47  ;;  %v26973_v40 = vadd.f32 %v26633_v1, %v26721_v22 }
 0xc10   :  { %v26977_v62 = vadd.f32 %v26633_v1, %v26725_v23  ;;  %v26981_v7 = vadd.f32 %v26633_v1, %v26729_v19  ;;  %v26985_v15 = vadd.f32 %v26633_v1, %v26733_v18  ;;  %v26989_v9 = vadd.f32 %v26633_v1, %v26737_v46 }
 0xc11   :  { %v26993_v47 = vadd.f32 %v26633_v1, %v26741_v29  ;;  %v26997_v22 = vadd.f32 %v26633_v1, %v26745_v50  ;;  %v27001_v23 = vadd.f32 %v26633_v1, %v26749_v41  ;;  %v27005_v19 = vadd.f32 %v26633_v1, %v26753_v54 }
 0xc12   :  { %v27009_v18 = vadd.f32 %v26633_v1, %v26757_v57  ;;  %v27013_v46 = vadd.f32 %v26633_v1, %v26761_v49  ;;  %v27017_v29 = vadd.f32 %v26633_v1, %v26765_v2  ;;  %v27021_v50 = vadd.f32 %v26633_v1, %v26769_v52  ;;  %v16705_v2 = vld [vmem:[%s27572_s0 + $0x31] sm:$0xff]  ;;  %v16703_v52 = vld [vmem:[%s27572_s0 + $0x19] sm:$0xff] }
 0xc13   :  { %28101 = vst [vmem:[#allocation22_spill] sm:$0xff] %v27005_v19  ;;  %v27025_v41 = vadd.f32 %v26633_v1, %v26773_v42  ;;  %v27029_v54 = vadd.f32 %v26633_v1, %v26777_v39  ;;  %v27033_v57 = vadd.f32 %v26633_v1, %v26781_v58  ;;  %v27037_v49 = vadd.f32 %v26633_v1, %v26785_v59  ;;  %v16706_v42 = vld [vmem:[%s27572_s0 + $0x39] sm:$0xff]  ;;  %v16704_v39 = vld [vmem:[%s27572_s0 + $0x21] sm:$0xff]  ;;  %v16721_v19 = vld [vmem:[%s27572_s0 + $0xf1] sm:$0xff] }
 0xc14   :  { %28102 = vst [vmem:[#allocation28_spill] sm:$0xff] %v27009_v18  ;;  %28103 = vst [vmem:[#allocation32_spill] sm:$0xff] %v27013_v46  ;;  %v27053_v58 = vadd.f32 %v26633_v1, %v26789_v43  ;;  %v27057_v59 = vadd.f32 %v26633_v1, %v26793_v11  ;;  %v16707_v43 = vld [vmem:[%s27572_s0 + $0x49] sm:$0xff]  ;;  %v16717_v18 = vld [vmem:[%s27572_s0 + $0xc1] sm:$0xff] }
 0xc15   :  { %28104 = vst [vmem:[#allocation29_spill] sm:$0xff] %v27017_v29  ;;  %28105 = vst [vmem:[#allocation30_spill] sm:$0xff] %v27021_v50  ;;  %v16710_v11 = vld [vmem:[%s27572_s0 + $0x69] sm:$0xff]  ;;  %v28125_v29 = vld [vmem:[#allocation19_spill] sm:$0xff] }
 0xc16   :  { %28106 = vst [vmem:[#allocation6_spill] sm:$0xff] %v27025_v41  ;;  %28107 = vst [vmem:[#allocation8_spill] sm:$0xff] %v27029_v54  ;;  %v16709_v54 = vld [vmem:[%s27572_s0 + $0x61] sm:$0xff]  ;;  %v16713_v41 = vld [vmem:[%s27572_s0 + $0x91] sm:$0xff]  ;;  %v27121_v46 = vadd.f32 %v26633_v1, %v28125_v29 }
 0xc17   :  { %28108 = vst [vmem:[#allocation10_spill] sm:$0xff] %v27033_v57  ;;  %28109 = vst [vmem:[#allocation35_spill] sm:$0xff] %v27037_v49  ;;  %v27061_v49 = vadd.f32 %v26633_v1, %v26797_v24  ;;  %v27065_v57 = vadd.f32 %v26633_v1, %v26801_v20  ;;  %v16708_v24 = vld [vmem:[%s27572_s0 + $0x51] sm:$0xff]  ;;  %v27081_v20 = vadd.f32 %v26633_v1, %v26805_v34  ;;  %v16711_v34 = vld [vmem:[%s27572_s0 + $0x79] sm:$0xff] }
 0xc18   :  { %28110 = vst [vmem:[#allocation7_spill] sm:$0xff] %v27053_v58  ;;  %28111 = vst [vmem:[#allocation36_spill] sm:$0xff] %v27057_v59  ;;  %v28117_v59 = vld [vmem:[#allocation13_spill] sm:$0xff] }
 0xc19   :  { %28112 = vst [vmem:[#allocation37_spill] sm:$0xff] %v27061_v49  ;;  %28113 = vst [vmem:[#allocation39_spill] sm:$0xff] %v27065_v57  ;;  %v27085_v57 = vadd.f32 %v26633_v1, %v26809_v48  ;;  %v27089_v49 = vadd.f32 %v26633_v1, %v26813_v55  ;;  %v27093_v58 = vadd.f32 %v26633_v1, %v28117_v59  ;;  %v16714_v48 = vld [vmem:[%s27572_s0 + $0x99] sm:$0xff]  ;;  %v16712_v55 = vld [vmem:[%s27572_s0 + $0x81] sm:$0xff] }
 0xc1a   :  { %28114 = vst [vmem:[#allocation38_spill] sm:$0xff] %v27081_v20  ;;  %v28123_v20 = vld [vmem:[#allocation15_spill] sm:$0xff]  ;;  %28126 = vst [vmem:[#allocation23_spill] sm:$0xff] %v27121_v46  ;;  %v27141_v46 = vadd.f32 %v26633_v1, %v26841_v51 }
 0xc1b   :  { %28115 = vst [vmem:[#allocation40_spill] sm:$0xff] %v27085_v57  ;;  %28116 = vst [vmem:[#allocation12_spill] sm:$0xff] %v27089_v49  ;;  %v28119_v49 = vld [vmem:[#allocation16_spill] sm:$0xff]  ;;  %v27117_v50 = vadd.f32 %v26633_v1, %v28123_v20  ;;  %v16716_v20 = vld [vmem:[%s27572_s0 + $0xb1] sm:$0xff] }
 0xc1c   :  { %28118 = vst [vmem:[#allocation11_spill] sm:$0xff] %v27093_v58  ;;  %v27109_v59 = vadd.f32 %v26633_v1, %v28119_v49  ;;  %v28121_v58 = vld [vmem:[#allocation18_spill] sm:$0xff]  ;;  %28129 = vst [vmem:[#allocation25_spill] sm:$0xff] %v27141_v46  ;;  %v16722_v51 = vld [vmem:[%s27572_s0 + $0xf9] sm:$0xff]  ;;  %v27177_v46 = vadd.f32 %v26633_v1, %v26865_v28  ;;  %v27198_v28 = vadd.f32 %v16705_v2, %v26877_v5 }
 0xc1d   :  { %v27113_v57 = vadd.f32 %v26633_v1, %v28121_v58  ;;  %28124 = vst [vmem:[#allocation24_spill] sm:$0xff] %v27117_v50  ;;  %v16715_v49 = vld [vmem:[%s27572_s0 + $0xa9] sm:$0xff]  ;;  %v28127_v50 = vld [vmem:[#allocation20_spill] sm:$0xff]  ;;  %v27216_v5 = vadd.f32 %v16707_v43, %v26885_v53  ;;  %v27222_v2 = vadd.f32 %v16709_v54, %v26893_v35  ;;  %v27240_v35 = vadd.f32 %v16711_v34, %v26901_v63 }
 0xc1e   :  { %28120 = vst [vmem:[#allocation9_spill] sm:$0xff] %v27109_v59  ;;  %v16718_v58 = vld [vmem:[%s27572_s0 + $0xc9] sm:$0xff]  ;;  %v27137_v29 = vadd.f32 %v26633_v1, %v28127_v50  ;;  %v27149_v59 = vadd.f32 %v26633_v1, %v26849_v30  ;;  %v16719_v50 = vld [vmem:[%s27572_s0 + $0xd9] sm:$0xff]  ;;  %v27165_v30 = vadd.f32 %v26633_v1, %v26853_v6  ;;  %28135 = vst [vmem:[#allocation14_spill] sm:$0xff] %v27177_v46 }
 0xc1f   :  { %28122 = vst [vmem:[#allocation17_spill] sm:$0xff] %v27113_v57  ;;  %v27145_v57 = vadd.f32 %v26633_v1, %v26845_v60  ;;  %v16720_v60 = vld [vmem:[%s27572_s0 + $0xe1] sm:$0xff]  ;;  %v16723_v6 = vld [vmem:[%s27572_s0 + $0x109] sm:$0xff]  ;;  %v27201_v46 = vadd.f32 %v16706_v42, %v26881_v21  ;;  %v27219_v21 = vadd.f32 %v16708_v24, %v26889_v4  ;;  %v16732_v4 = vld [vmem:[%s27572_s0 + $0x171] sm:$0xff]  ;;  %v27246_v54 = vadd.f32 %v16713_v41, %v26909_v26 }
 0xc20   :  { %28128 = vst [vmem:[#allocation21_spill] sm:$0xff] %v27137_v29  ;;  %28131 = vst [vmem:[#allocation27_spill] sm:$0xff] %v27149_v59  ;;  %v27169_v59 = vadd.f32 %v26633_v1, %v26857_v45  ;;  %v16725_v29 = vld [vmem:[%s27572_s0 + $0x121] sm:$0xff]  ;;  %v16726_v45 = vld [vmem:[%s27572_s0 + $0x129] sm:$0xff]  ;;  %v27249_v43 = vadd.f32 %v16714_v48, %v26913_v17  ;;  %v27264_v26 = vadd.f32 %v16715_v49, %v26917_v14 }
 0xc21   :  { %28130 = vst [vmem:[#allocation33_spill] sm:$0xff] %v27145_v57  ;;  %28132 = vst [vmem:[#allocation31_spill] sm:$0xff] %v27165_v30  ;;  %v27173_v57 = vadd.f32 %v26633_v1, %v26861_v56  ;;  %v16724_v56 = vld [vmem:[%s27572_s0 + $0x111] sm:$0xff]  ;;  %v27195_v1 = vadd.f32 %v16704_v39, %v26873_v25  ;;  %v16727_v30 = vld [vmem:[%s27572_s0 + $0x139] sm:$0xff]  ;;  %v27267_v17 = vadd.f32 %v16716_v20, %v26921_v61 }
 0xc22   :  { %28133 = vst [vmem:[#allocation26_spill] sm:$0xff] %v27169_v59  ;;  %v16729_v59 = vld [vmem:[%s27572_s0 + $0x151] sm:$0xff]  ;;  %v16728_v25 = vld [vmem:[%s27572_s0 + $0x141] sm:$0xff]  ;;  %v16731_v39 = vld [vmem:[%s27572_s0 + $0x169] sm:$0xff]  ;;  %v27270_v41 = vadd.f32 %v16717_v18, %v26925_v12  ;;  %v27273_v34 = vadd.f32 %v16718_v58, %v26929_v37  ;;  %v27285_v61 = vadd.f32 %v16719_v50, %v26933_v33  ;;  %v27288_v12 = vadd.f32 %v16720_v60, %v26937_v3 }
 0xc23   :  { %28134 = vst [vmem:[#allocation34_spill] sm:$0xff] %v27173_v57  ;;  %v27192_v57 = vadd.f32 %v16703_v52, %v26869_v32  ;;  %v16730_v32 = vld [vmem:[%s27572_s0 + $0x159] sm:$0xff]  ;;  %v27225_v52 = vadd.f32 %v16710_v11, %v26897_v36  ;;  %v16733_v42 = vld [vmem:[%s27572_s0 + $0x181] sm:$0xff]  ;;  %v16734_v53 = vld [vmem:[%s27572_s0 + $0x189] sm:$0xff]  ;;  %v27243_v36 = vadd.f32 %v16712_v55, %v26905_v31  ;;  %v27291_v37 = vadd.f32 %v16721_v19, %v26941_v13 }
 0xc24   :  { %v16737_v11 = vld [vmem:[%s27572_s0 + $0x1e1] sm:$0xff]  ;;  %v16735_v24 = vld [vmem:[%s27572_s0 + $0x1c9] sm:$0xff]  ;;  %v16736_v31 = vld [vmem:[%s27572_s0 + $0x1d1] sm:$0xff]  ;;  %v27294_v18 = vadd.f32 %v16722_v51, %v26945_v27  ;;  %v27306_v3 = vadd.f32 %v16723_v6, %v26949_v44  ;;  %v27309_v13 = vadd.f32 %v16724_v56, %v26953_v16  ;;  %v27312_v27 = vadd.f32 %v16725_v29, %v26957_v10 }
 0xc25   :  { %v16738_v63 = vld [vmem:[%s27572_s0 + $0x1e9] sm:$0xff]  ;;  %v16741_v48 = vld [vmem:[%s27572_s0 + $0x211] sm:$0xff]  ;;  %v16739_v55 = vld [vmem:[%s27572_s0 + $0x1f9] sm:$0xff]  ;;  %v27315_v19 = vadd.f32 %v16726_v45, %v26961_v0  ;;  %v27327_v16 = vadd.f32 %v16727_v30, %v26965_v8  ;;  %v27330_v10 = vadd.f32 %v16728_v25, %v26969_v38  ;;  %v27333_v0 = vadd.f32 %v16729_v59, %v26973_v40 }
 0xc26   :  { %v16742_v14 = vld [vmem:[%s27572_s0 + $0x219] sm:$0xff]  ;;  %v16740_v49 = vld [vmem:[%s27572_s0 + $0x201] sm:$0xff]  ;;  %v16743_v33 = vld [vmem:[%s27572_s0 + $0x229] sm:$0xff]  ;;  %v27336_v29 = vadd.f32 %v16730_v32, %v26977_v62  ;;  %v27348_v38 = vadd.f32 %v16731_v39, %v26981_v7  ;;  %v27351_v40 = vadd.f32 %v16732_v4, %v26985_v15  ;;  %v27354_v62 = vadd.f32 %v16733_v42, %v26989_v9 }
 0xc27   :  { %v16745_v58 = vld [vmem:[%s27572_s0 + $0x241] sm:$0xff]  ;;  %v16746_v20 = vld [vmem:[%s27572_s0 + $0x249] sm:$0xff]  ;;  %v16744_v50 = vld [vmem:[%s27572_s0 + $0x231] sm:$0xff]  ;;  %v27357_v59 = vadd.f32 %v16734_v53, %v26993_v47  ;;  %v27369_v15 = vadd.f32 %v16735_v24, %v26997_v22  ;;  %v27372_v9 = vadd.f32 %v16736_v31, %v27001_v23 }
 0xc28   :  { %v16749_v44 = vld [vmem:[%s27572_s0 + $0x271] sm:$0xff]  ;;  %v16747_v51 = vld [vmem:[%s27572_s0 + $0x259] sm:$0xff]  ;;  %v16748_v8 = vld [vmem:[%s27572_s0 + $0x261] sm:$0xff] }
 0xc29   :  { %v16750_v60 = vld [vmem:[%s27572_s0 + $0x279] sm:$0xff]  ;;  %v16753_v30 = vld [vmem:[%s27572_s0 + $0x2a1] sm:$0xff]  ;;  %v16751_v6 = vld [vmem:[%s27572_s0 + $0x289] sm:$0xff] }
 0xc2a   :  { %v16754_v7 = vld [vmem:[%s27572_s0 + $0x2a9] sm:$0xff]  ;;  %v28137_v56 = vld [vmem:[#allocation28_spill] sm:$0xff]  ;;  %v16752_v25 = vld [vmem:[%s27572_s0 + $0x291] sm:$0xff] }
 0xc2b   :  { %v28136_v47 = vld [vmem:[#allocation22_spill] sm:$0xff]  ;;  %v27378_v32 = vadd.f32 %v16738_v63, %v28137_v56  ;;  %v16755_v22 = vld [vmem:[%s27572_s0 + $0x2b9] sm:$0xff]  ;;  %v28141_v53 = vld [vmem:[#allocation29_spill] sm:$0xff] }
 0xc2c   :  { %v27375_v45 = vadd.f32 %v16737_v11, %v28136_v47  ;;  %v16757_v42 = vld [vmem:[%s27572_s0 + $0x2d1] sm:$0xff]  ;;  %v28139_v23 = vld [vmem:[#allocation32_spill] sm:$0xff]  ;;  %v27393_v4 = vadd.f32 %v16740_v49, %v28141_v53 }
 0xc2d   :  { %28138 = vst [vmem:[#allocation13_spill] sm:$0xff] %v27378_v32  ;;  %v27390_v39 = vadd.f32 %v16739_v55, %v28139_v23  ;;  %v28143_v11 = vld [vmem:[#allocation30_spill] sm:$0xff]  ;;  %v16758_v47 = vld [vmem:[%s27572_s0 + $0x2d9] sm:$0xff]  ;;  %v16756_v56 = vld [vmem:[%s27572_s0 + $0x2c1] sm:$0xff] }
 0xc2e   :  { %28142 = vst [vmem:[#allocation18_spill] sm:$0xff] %v27393_v4  ;;  %v27396_v24 = vadd.f32 %v16741_v48, %v28143_v11  ;;  %v28145_v63 = vld [vmem:[#allocation6_spill] sm:$0xff]  ;;  %v16761_v55 = vld [vmem:[%s27572_s0 + $0x301] sm:$0xff] }
 0xc2f   :  { %28140 = vst [vmem:[#allocation16_spill] sm:$0xff] %v27390_v39  ;;  %v27399_v31 = vadd.f32 %v16742_v14, %v28145_v63  ;;  %v28147_v49 = vld [vmem:[#allocation8_spill] sm:$0xff]  ;;  %v28149_v48 = vld [vmem:[#allocation10_spill] sm:$0xff]  ;;  %v28151_v14 = vld [vmem:[#allocation35_spill] sm:$0xff] }
 0xc30   :  { %28144 = vst [vmem:[#allocation15_spill] sm:$0xff] %v27396_v24  ;;  %v27411_v23 = vadd.f32 %v16743_v33, %v28147_v49  ;;  %v27414_v53 = vadd.f32 %v16744_v50, %v28149_v48  ;;  %v27417_v11 = vadd.f32 %v16745_v58, %v28151_v14  ;;  %v28153_v63 = vld [vmem:[#allocation7_spill] sm:$0xff]  ;;  %v16759_v24 = vld [vmem:[%s27572_s0 + $0x2e9] sm:$0xff]  ;;  %v28155_v50 = vld [vmem:[#allocation36_spill] sm:$0xff] }
 0xc31   :  { %28146 = vst [vmem:[#allocation19_spill] sm:$0xff] %v27399_v31  ;;  %v27420_v31 = vadd.f32 %v16746_v20, %v28153_v63  ;;  %v16762_v4 = vld [vmem:[%s27572_s0 + $0x309] sm:$0xff]  ;;  %v16760_v33 = vld [vmem:[%s27572_s0 + $0x2f1] sm:$0xff]  ;;  %v27432_v49 = vadd.f32 %v16747_v51, %v28155_v50  ;;  %v16766_v51 = vld [vmem:[%s27572_s0 + $0x339] sm:$0xff] }
 0xc32   :  { %28148 = vst [vmem:[#allocation20_spill] sm:$0xff] %v27411_v23  ;;  %28150 = vst [vmem:[#allocation22_spill] sm:$0xff] %v27414_v53  ;;  %v28157_v58 = vld [vmem:[#allocation37_spill] sm:$0xff]  ;;  %v28159_v20 = vld [vmem:[#allocation39_spill] sm:$0xff] }
 0xc33   :  { %28152 = vst [vmem:[#allocation28_spill] sm:$0xff] %v27417_v11  ;;  %28154 = vst [vmem:[#allocation32_spill] sm:$0xff] %v27420_v31  ;;  %v27435_v48 = vadd.f32 %v16748_v8, %v28157_v58  ;;  %v27438_v14 = vadd.f32 %v16749_v44, %v28159_v20  ;;  %v28161_v63 = vld [vmem:[#allocation38_spill] sm:$0xff]  ;;  %v16763_v53 = vld [vmem:[%s27572_s0 + $0x319] sm:$0xff] }
 0xc34   :  { %28156 = vst [vmem:[#allocation29_spill] sm:$0xff] %v27432_v49  ;;  %v27441_v31 = vadd.f32 %v16750_v60, %v28161_v63  ;;  %v16765_v11 = vld [vmem:[%s27572_s0 + $0x331] sm:$0xff]  ;;  %v28163_v8 = vld [vmem:[#allocation40_spill] sm:$0xff]  ;;  %v28166_v63 = vld [vmem:[#allocation9_spill] sm:$0xff]  ;;  %s20437_s0 = smov [#allocation3]  }
 0xc35   :  { %28158 = vst [vmem:[#allocation30_spill] sm:$0xff] %v27435_v48  ;;  %28160 = vst [vmem:[#allocation6_spill] sm:$0xff] %v27438_v14  ;;  %v27453_v50 = vadd.f32 %v16751_v6, %v28163_v8  ;;  %v28164_v44 = vld [vmem:[#allocation12_spill] sm:$0xff]  ;;  %v28165_v60 = vld [vmem:[#allocation11_spill] sm:$0xff]  ;;  %s15460_s25 = sshll.u32 %s20437_s0, 4  ;;  %s15461_s25 = int_to_ptr.vmem [resolvable:$true] %s15460_s25 }
 0xc36   :  { %28162 = vst [vmem:[#allocation8_spill] sm:$0xff] %v27441_v31  ;;  %v27456_v58 = vadd.f32 %v16752_v25, %v28164_v44  ;;  %v27459_v20 = vadd.f32 %v16753_v30, %v28165_v60  ;;  %v27462_v31 = vadd.f32 %v16754_v7, %v28166_v63  ;;  %v28167_v14 = vld [vmem:[#allocation17_spill] sm:$0xff]  ;;  %v28168_v49 = vld [vmem:[#allocation24_spill] sm:$0xff]  ;;  %v28169_v39 = vld [vmem:[#allocation23_spill] sm:$0xff]  ;;  %s20412_s26 = scalar_lea.vmem %s15461_s25, 8192  ;;  %p20417_p1 = scmp.lt.s32.totalorder %s15461_s25, %s15461_s25 }
 0xc37   :  { %v27465_v48 = vadd.f32 %v16755_v22, %v28167_v14  ;;  %v27468_v23 = vadd.f32 %v16756_v56, %v28168_v49  ;;  %v27471_v32 = vadd.f32 %v16757_v42, %v28169_v39  ;;  %v28170_v6 = vld [vmem:[#allocation21_spill] sm:$0xff]  ;;  %v28173_v7 = vld [vmem:[#allocation27_spill] sm:$0xff]  ;;  %v28175_v56 = vld [vmem:[#allocation26_spill] sm:$0xff]  ;;  %p20413_p0 = scmp.ne.s32.totalorder %s15461_s25, %s20412_s26  ;;  %p20418_p2 = scmp.lt.s32.totalorder %s20412_s26, %s20412_s26 }
 0xc38   :  { %v27474_v8 = vadd.f32 %v16758_v47, %v28170_v6  ;;  %v28171_v25 = vld [vmem:[#allocation25_spill] sm:$0xff]  ;;  %v27483_v63 = vadd.f32 %v16761_v55, %v28173_v7  ;;  %v28174_v22 = vld [vmem:[#allocation31_spill] sm:$0xff]  ;;  %v27489_v49 = vadd.f32 %v16763_v53, %v28175_v56  ;;  %v28176_v42 = vld [vmem:[#allocation34_spill] sm:$0xff]  ;;  %v15330_v55 = vmax.f32 %v27201_v46, 0.0 }
 0xc39   :  { %v27477_v44 = vadd.f32 %v16759_v24, %v28171_v25  ;;  %v28172_v30 = vld [vmem:[#allocation33_spill] sm:$0xff]  ;;  %v27486_v14 = vadd.f32 %v16762_v4, %v28174_v22  ;;  %v27492_v39 = vadd.f32 %v16765_v11, %v28176_v42  ;;  %v28177_v47 = vld [vmem:[#allocation14_spill] sm:$0xff]  ;;  %v15327_v24 = vmax.f32 %v27192_v57, 0.0  ;;  %v28182_v22 = vld [vmem:[#allocation19_spill] sm:$0xff]  ;;  %p20419_p3 = por %p20418_p2, %p20417_p1 }
 0xc3a   :  { %v27480_v60 = vadd.f32 %v16760_v33, %v28172_v30  ;;  %v27495_v6 = vadd.f32 %v16766_v51, %v28177_v47  ;;  %v15328_v33 = vmax.f32 %v27195_v1, 0.0  ;;  %v15329_v25 = vmax.f32 %v27198_v28, 0.0  ;;  %15394 = vst [vmem:[#allocation3 + $0x18] sm:$0xff] %v15330_v55  ;;  %v28183_v42 = vld [vmem:[#allocation20_spill] sm:$0xff] }
 0xc3b   :  { %v15331_v4 = vmax.f32 %v27216_v5, 0.0  ;;  %v15332_v30 = vmax.f32 %v27219_v21, 0.0  ;;  %v15333_v53 = vmax.f32 %v27222_v2, 0.0  ;;  %v15334_v11 = vmax.f32 %v27225_v52, 0.0  ;;  %15391 = vst [vmem:[#allocation3] sm:$0xff] %v15327_v24  ;;  %v28185_v24 = vld [vmem:[#allocation28_spill] sm:$0xff]  ;;  %p20420_p4 = pnand %p20419_p3, %p20413_p0 }
 0xc3c   :  { %v15335_v7 = vmax.f32 %v27240_v35, 0.0  ;;  %v15336_v51 = vmax.f32 %v27243_v36, 0.0  ;;  %v15337_v57 = vmax.f32 %v27246_v54, 0.0  ;;  %v15338_v1 = vmax.f32 %v27249_v43, 0.0  ;;  %15392 = vst [vmem:[#allocation3 + $0x8] sm:$0xff] %v15328_v33  ;;  %15393 = vst [vmem:[#allocation3 + $0x10] sm:$0xff] %v15329_v25 }
 0xc3d   :  { %v15339_v28 = vmax.f32 %v27264_v26, 0.0  ;;  %15395 = vst [vmem:[#allocation3 + $0x20] sm:$0xff] %v15331_v4  ;;  %v15340_v46 = vmax.f32 %v27267_v17, 0.0  ;;  %v15341_v5 = vmax.f32 %v27270_v41, 0.0  ;;  %v15342_v21 = vmax.f32 %v27273_v34, 0.0  ;;  %15396 = vst [vmem:[#allocation3 + $0x28] sm:$0xff] %v15332_v30 }
 0xc3e   :  { %v15343_v2 = vmax.f32 %v27285_v61, 0.0  ;;  %15397 = vst [vmem:[#allocation3 + $0x30] sm:$0xff] %v15333_v53  ;;  %15398 = vst [vmem:[#allocation3 + $0x38] sm:$0xff] %v15334_v11  ;;  %v15344_v52 = vmax.f32 %v27288_v12, 0.0  ;;  %v15345_v35 = vmax.f32 %v27291_v37, 0.0  ;;  %v15346_v36 = vmax.f32 %v27294_v18, 0.0 }
 0xc3f   :  { %15399 = vst [vmem:[#allocation3 + $0x40] sm:$0xff] %v15335_v7  ;;  %v15347_v54 = vmax.f32 %v27306_v3, 0.0  ;;  %15400 = vst [vmem:[#allocation3 + $0x48] sm:$0xff] %v15336_v51  ;;  %v15348_v43 = vmax.f32 %v27309_v13, 0.0  ;;  %v15349_v26 = vmax.f32 %v27312_v27, 0.0  ;;  %v15350_v17 = vmax.f32 %v27315_v19, 0.0 }
 0xc40   :  { %15401 = vst [vmem:[#allocation3 + $0x50] sm:$0xff] %v15337_v57  ;;  %15402 = vst [vmem:[#allocation3 + $0x58] sm:$0xff] %v15338_v1  ;;  %v15351_v41 = vmax.f32 %v27327_v16, 0.0  ;;  %v15352_v34 = vmax.f32 %v27330_v10, 0.0  ;;  %v15353_v61 = vmax.f32 %v27333_v0, 0.0  ;;  %v15354_v12 = vmax.f32 %v27336_v29, 0.0 }
 0xc41   :  { %15403 = vst [vmem:[#allocation3 + $0x60] sm:$0xff] %v15339_v28  ;;  %15404 = vst [vmem:[#allocation3 + $0x68] sm:$0xff] %v15340_v46  ;;  %v15355_v37 = vmax.f32 %v27348_v38, 0.0  ;;  %v15356_v18 = vmax.f32 %v27351_v40, 0.0  ;;  %v15357_v3 = vmax.f32 %v27354_v62, 0.0  ;;  %v15358_v13 = vmax.f32 %v27357_v59, 0.0 }
 0xc42   :  { %15405 = vst [vmem:[#allocation3 + $0x70] sm:$0xff] %v15341_v5  ;;  %15406 = vst [vmem:[#allocation3 + $0x78] sm:$0xff] %v15342_v21  ;;  %v15359_v27 = vmax.f32 %v27369_v15, 0.0  ;;  %v15360_v19 = vmax.f32 %v27372_v9, 0.0  ;;  %v15361_v16 = vmax.f32 %v27375_v45, 0.0  ;;  %v28178_v10 = vld [vmem:[#allocation13_spill] sm:$0xff] }
 0xc43   :  { %15407 = vst [vmem:[#allocation3 + $0x80] sm:$0xff] %v15343_v2  ;;  %15408 = vst [vmem:[#allocation3 + $0x88] sm:$0xff] %v15344_v52  ;;  %v15362_v0 = vmax.f32 %v28178_v10, 0.0  ;;  %v28179_v29 = vld [vmem:[#allocation16_spill] sm:$0xff]  ;;  %v28180_v40 = vld [vmem:[#allocation18_spill] sm:$0xff]  ;;  %v15366_v56 = vmax.f32 %v28182_v22, 0.0 }
 0xc44   :  { %15409 = vst [vmem:[#allocation3 + $0x90] sm:$0xff] %v15345_v35  ;;  %15410 = vst [vmem:[#allocation3 + $0x98] sm:$0xff] %v15346_v36  ;;  %v15363_v38 = vmax.f32 %v28179_v29, 0.0  ;;  %v15364_v62 = vmax.f32 %v28180_v40, 0.0  ;;  %v28181_v59 = vld [vmem:[#allocation15_spill] sm:$0xff]  ;;  %v15367_v47 = vmax.f32 %v28183_v42, 0.0 }
 0xc45   :  { %15411 = vst [vmem:[#allocation3 + $0xa0] sm:$0xff] %v15347_v54  ;;  %15412 = vst [vmem:[#allocation3 + $0xa8] sm:$0xff] %v15348_v43  ;;  %v15365_v15 = vmax.f32 %v28181_v59, 0.0  ;;  %v28184_v9 = vld [vmem:[#allocation22_spill] sm:$0xff]  ;;  %v15369_v33 = vmax.f32 %v28185_v24, 0.0  ;;  %v28186_v25 = vld [vmem:[#allocation32_spill] sm:$0xff] }
 0xc46   :  { %15413 = vst [vmem:[#allocation3 + $0xb0] sm:$0xff] %v15349_v26  ;;  %15414 = vst [vmem:[#allocation3 + $0xb8] sm:$0xff] %v15350_v17  ;;  %v15368_v45 = vmax.f32 %v28184_v9, 0.0  ;;  %v15370_v55 = vmax.f32 %v28186_v25, 0.0  ;;  %v28187_v4 = vld [vmem:[#allocation29_spill] sm:$0xff]  ;;  %v28188_v53 = vld [vmem:[#allocation30_spill] sm:$0xff] }
 0xc47   :  { %15415 = vst [vmem:[#allocation3 + $0xc0] sm:$0xff] %v15351_v41  ;;  %15416 = vst [vmem:[#allocation3 + $0xc8] sm:$0xff] %v15352_v34  ;;  %v15371_v30 = vmax.f32 %v28187_v4, 0.0  ;;  %v15372_v11 = vmax.f32 %v28188_v53, 0.0  ;;  %v28189_v7 = vld [vmem:[#allocation6_spill] sm:$0xff]  ;;  %v28190_v57 = vld [vmem:[#allocation8_spill] sm:$0xff] }
 0xc48   :  { %15417 = vst [vmem:[#allocation3 + $0xd0] sm:$0xff] %v15353_v61  ;;  %15418 = vst [vmem:[#allocation3 + $0xd8] sm:$0xff] %v15354_v12  ;;  %v15373_v51 = vmax.f32 %v28189_v7, 0.0  ;;  %v15374_v1 = vmax.f32 %v28190_v57, 0.0  ;;  %v15375_v28 = vmax.f32 %v27453_v50, 0.0  ;;  %v15376_v46 = vmax.f32 %v27456_v58, 0.0 }
 0xc49   :  { %15419 = vst [vmem:[#allocation3 + $0xe0] sm:$0xff] %v15355_v37  ;;  %15420 = vst [vmem:[#allocation3 + $0xe8] sm:$0xff] %v15356_v18  ;;  %v15377_v5 = vmax.f32 %v27459_v20, 0.0  ;;  %v15378_v21 = vmax.f32 %v27462_v31, 0.0  ;;  %v15379_v2 = vmax.f32 %v27465_v48, 0.0  ;;  %v15380_v50 = vmax.f32 %v27468_v23, 0.0 }
 0xc4a   :  { %15421 = vst [vmem:[#allocation3 + $0xf0] sm:$0xff] %v15357_v3  ;;  %15422 = vst [vmem:[#allocation3 + $0xf8] sm:$0xff] %v15358_v13  ;;  %v15381_v52 = vmax.f32 %v27471_v32, 0.0  ;;  %v15382_v35 = vmax.f32 %v27474_v8, 0.0  ;;  %v15383_v58 = vmax.f32 %v27477_v44, 0.0  ;;  %v15384_v31 = vmax.f32 %v27480_v60, 0.0 }
 0xc4b   :  { %15423 = vst [vmem:[#allocation3 + $0x100] sm:$0xff] %v15359_v27  ;;  %15424 = vst [vmem:[#allocation3 + $0x108] sm:$0xff] %v15360_v19  ;;  %v15385_v48 = vmax.f32 %v27483_v63, 0.0  ;;  %v15386_v20 = vmax.f32 %v27486_v14, 0.0  ;;  %v15387_v36 = vmax.f32 %v27489_v49, 0.0  ;;  %v15389_v32 = vmax.f32 %v27492_v39, 0.0 }
 0xc4c   :  { %15425 = vst [vmem:[#allocation3 + $0x110] sm:$0xff] %v15361_v16  ;;  %15426 = vst [vmem:[#allocation3 + $0x118] sm:$0xff] %v15362_v0  ;;  %v15390_v23 = vmax.f32 %v27495_v6, 0.0 }
 0xc4d   :  { %15427 = vst [vmem:[#allocation3 + $0x120] sm:$0xff] %v15363_v38  ;;  %15428 = vst [vmem:[#allocation3 + $0x128] sm:$0xff] %v15364_v62 }
 0xc4e   :  { %15429 = vst [vmem:[#allocation3 + $0x130] sm:$0xff] %v15365_v15  ;;  %15430 = vst [vmem:[#allocation3 + $0x138] sm:$0xff] %v15366_v56 }
 0xc4f   :  { %15431 = vst [vmem:[#allocation3 + $0x140] sm:$0xff] %v15367_v47  ;;  %15432 = vst [vmem:[#allocation3 + $0x148] sm:$0xff] %v15368_v45 }
 0xc50   :  { %15433 = vst [vmem:[#allocation3 + $0x150] sm:$0xff] %v15369_v33  ;;  %15434 = vst [vmem:[#allocation3 + $0x158] sm:$0xff] %v15370_v55 }
 0xc51   :  { %15435 = vst [vmem:[#allocation3 + $0x160] sm:$0xff] %v15371_v30  ;;  %15436 = vst [vmem:[#allocation3 + $0x168] sm:$0xff] %v15372_v11 }
 0xc52   :  { %15437 = vst [vmem:[#allocation3 + $0x170] sm:$0xff] %v15373_v51  ;;  %15438 = vst [vmem:[#allocation3 + $0x178] sm:$0xff] %v15374_v1 }
 0xc53   :  { %15439 = vst [vmem:[#allocation3 + $0x180] sm:$0xff] %v15375_v28  ;;  %15440 = vst [vmem:[#allocation3 + $0x188] sm:$0xff] %v15376_v46 }
 0xc54   :  { %15441 = vst [vmem:[#allocation3 + $0x190] sm:$0xff] %v15377_v5  ;;  %15442 = vst [vmem:[#allocation3 + $0x198] sm:$0xff] %v15378_v21 }
 0xc55   :  { %15443 = vst [vmem:[#allocation3 + $0x1a0] sm:$0xff] %v15379_v2  ;;  %15444 = vst [vmem:[#allocation3 + $0x1a8] sm:$0xff] %v15380_v50 }
 0xc56   :  { %15445 = vst [vmem:[#allocation3 + $0x1b0] sm:$0xff] %v15381_v52  ;;  %15446 = vst [vmem:[#allocation3 + $0x1b8] sm:$0xff] %v15382_v35 }
 0xc57   :  { %15447 = vst [vmem:[#allocation3 + $0x1c0] sm:$0xff] %v15383_v58  ;;  %15448 = vst [vmem:[#allocation3 + $0x1c8] sm:$0xff] %v15384_v31 }
 0xc58   :  { %15449 = vst [vmem:[#allocation3 + $0x1d0] sm:$0xff] %v15385_v48  ;;  %15450 = vst [vmem:[#allocation3 + $0x1d8] sm:$0xff] %v15386_v20 }
 0xc59   :  { %15451 = vst [vmem:[#allocation3 + $0x1e0] sm:$0xff] %v15387_v36  ;;  %15453 = vst [vmem:[#allocation3 + $0x1f0] sm:$0xff] %v15389_v32 }
 0xc5a   :  { %15454 = vst [vmem:[#allocation3 + $0x1f8] sm:$0xff] %v15390_v23 }
 0xc5b   :  { %20423 = shalt.err (!%p20420_p4)
}
 0xc5c   :  { %s20424_s29 = scalar_lea.hbm %s27579_s7, 8192 }
 0xc5d   :  { %p20425_p5 = scmp.ne.s32.totalorder %s27579_s7, %s20424_s29  ;;  %p20428_p6 = scmp.lt.u32.totalorder %s20424_s29, %s27579_s7 }
 0xc5f   :  { %p20430_p7 = pnand %p20428_p6, %p20425_p5 }
 0xc61   :  { %20433 = shalt.err (!%p20430_p7)
}
 0xc62   :  { %s20438_s1 = smov 128   ;;  %s20439_s11 = smov 8  }
 0xc63   :  { %15466 = dma.vmem_to_hbm [thread:$0]  %s15461_s25, 8192, %s27579_s7, [#allocation4], %s20438_s1, %s20438_s1, %s20439_s11  }
 0xc64   :  { %20434 = dma.done.wait [#allocation4], 8192  }
 0xc65   :  { %20435 = vsyncadd [#allocation4], 4294959104 }
 0xc66   :  { %15470 = vsyncpa [#allocation4], 1 }

</bundles_post_ra>
